<compile_context>
chip_gen: v5e
topology: v5e:2x2
jax: 0.10.0
libtpu: 0.0.40
codegen_flags: <defaults>
</compile_context>

<pallas_src>
import jax
import jax.numpy as jnp
from jax.experimental import pallas as pl
from jax.experimental.pallas import tpu as pltpu


def _vmem_limit_bytes(frac=0.65, fallback=64 * 1024 * 1024):
    """Generation-aware scoped-VMEM budget (~40 MiB on v7x, ~80 MiB on v5e/v6e)."""
    try:
        cap = int(pltpu.get_tpu_info().vmem_capacity_bytes)
    except Exception:  # pragma: no cover - conservative fallback
        cap = fallback
    return int(cap * frac)


# -----------------------------------------------------------------------------
# Fused kernel: conv3x3 + ReLU -> conv3x3 -> Gram-Schmidt, one batch per step
# -----------------------------------------------------------------------------
def _pc_wrapper_kernel(w1_ref, b1_ref, w2_ref, b2_ref, mag_ref, mask_ref, o_ref):
    """Blocks (one batch element per grid step, T on the lane axis):

      mag_ref, mask_ref : VMEM (1, F, T)    un-padded inputs
      w1_ref            : SMEM (3*3*2*Ch,)  flat [kh, kw, cin, ch]
      b1_ref            : SMEM (Ch,)
      w2_ref            : SMEM (3*3*Ch*Co,) flat [kh, kw, ch, co]
      b2_ref            : SMEM (Co,)
      o_ref             : VMEM (1, Co, F, T)  Gram-Schmidt residuals
    """
    _, Co, F, T = o_ref.shape
    Ch = b1_ref.shape[0]

    mag = mag_ref[0]                       # (F, T)
    msk = mask_ref[0]
    xm = mag * msk                         # masked-spectrogram input channel

    # Boundary-validity masks for the in-register 3x3 "same" zero halo.
    row = jax.lax.broadcasted_iota(jnp.int32, (F, T), 0)
    col = jax.lax.broadcasted_iota(jnp.int32, (F, T), 1)
    row_ok = {-1: row >= 1, 1: row < F - 1}
    col_ok = {-1: col >= 1, 1: col < T - 1}

    def shift_rows(x, dh):                 # y[f,t] = x[f+dh,t], zero outside
        if dh == 0:
            return x
        y = pltpu.roll(x, shift=(-dh) % F, axis=0)   # XLU sublane rotate
        return jnp.where(row_ok[dh], y, 0.0)

    def shift_cols(x, dw):                 # y[f,t] = x[f,t+dw], zero outside
        if dw == 0:
            return x
        y = pltpu.roll(x, shift=(-dw) % T, axis=1)   # XLU lane rotate
        return jnp.where(col_ok[dw], y, 0.0)

    # ---- conv1: [mag*mask, mask] -> Ch hidden channels, ReLU ----------------
    # Tap-major so only two shifted inputs are live at a time; the 2-channel
    # concat is never materialized (the conv is linear in its input channels).
    acc1 = [jnp.zeros((F, T), jnp.float32) for _ in range(Ch)]
    for kh in range(3):
        xm_r = shift_rows(xm, kh - 1)
        mk_r = shift_rows(msk, kh - 1)
        for kw in range(3):
            xs = shift_cols(xm_r, kw - 1)
            ms = shift_cols(mk_r, kw - 1)
            base0 = ((kh * 3 + kw) * 2 + 0) * Ch     # taps on mag*mask
            base1 = ((kh * 3 + kw) * 2 + 1) * Ch     # taps on mask
            for c in range(Ch):
                acc1[c] = acc1[c] + xs * w1_ref[base0 + c] + ms * w1_ref[base1 + c]

    hidden = [jnp.maximum(acc1[c] + b1_ref[c], 0.0) for c in range(Ch)]
    del acc1
    # TODO(synk): for realistic spectrogram F (>=256), tile F inside the kernel
    # (lax.fori_loop over 8-16 row sub-blocks) or add an F grid axis with a
    # two-pass Gram-Schmidt so accumulators stay within the 64-vreg file.

    # ---- conv2: Ch hidden channels -> Co = n_dirs output maps ---------------
    acc2 = [jnp.zeros((F, T), jnp.float32) for _ in range(Co)]
    for c in range(Ch):
        for kh in range(3):
            h_r = shift_rows(hidden[c], kh - 1)
            for kw in range(3):
                hs = shift_cols(h_r, kw - 1)
                wbase = ((kh * 3 + kw) * Ch + c) * Co
                for co in range(Co):
                    acc2[co] = acc2[co] + hs * w2_ref[wbase + co]
    # TODO(synk): with the real UNet (Cin/Cout >= ~32) move the per-tap channel
    # contraction onto the MXU (dot over the channel axis) instead of these
    # scalar-broadcast VPU MACs.

    pred = [acc2[co] + b2_ref[co] for co in range(Co)]

    # ---- Gram-Schmidt epilogue (fused; per batch element) -------------------
    # Matches the torch reference: projections use the previously *normalized*
    # directions, denominator is sum(w_hat*w_hat)+1e-8 (cached once per
    # direction - identical value, just not recomputed per pair), divisions
    # are exact, and the stored output is the UN-normalized residual.
    eps = 1e-8
    proj = []                               # list of (w_hat, den)
    for i in range(Co):
        w = pred[i]
        for w_hat, den in proj:
            num = jnp.sum(w * w_hat, axis=(0, 1), keepdims=True)      # (1, 1)
            w = w - w_hat * (num / den)
        o_ref[0, i, :, :] = w
        norm = jnp.sqrt(jnp.sum(w * w, axis=(0, 1), keepdims=True))
        w_hat = w / (norm + eps)
        den = jnp.sum(w_hat * w_hat, axis=(0, 1), keepdims=True) + eps
        proj.append((w_hat, den))


# -----------------------------------------------------------------------------
# pallas_call wrapper
# -----------------------------------------------------------------------------
def _run_pc_wrapper(mag, msk, w1_flat, b1, w2_flat, b2, n_dirs):
    B, F, T = mag.shape
    smem = pl.BlockSpec(memory_space=pltpu.MemorySpace.SMEM)
    # TODO(synk): for very large F*T (per-step block beyond ~8-12 MiB on v7x),
    # add an F/T grid axis + two-pass GS to keep blocks small and give each
    # TensorCore multiple grid steps.
    return pl.pallas_call(
        _pc_wrapper_kernel,
        out_shape=jax.ShapeDtypeStruct((B, n_dirs, F, T), jnp.float32),
        grid=(B,),
        in_specs=[smem, smem, smem, smem,
                  pl.BlockSpec((1, F, T), lambda b: (b, 0, 0)),
                  pl.BlockSpec((1, F, T), lambda b: (b, 0, 0))],
        out_specs=pl.BlockSpec((1, n_dirs, F, T), lambda b: (b, 0, 0, 0)),
        compiler_params=pltpu.CompilerParams(
            dimension_semantics=("parallel",),
            vmem_limit_bytes=_vmem_limit_bytes()),
    )(w1_flat, b1, w2_flat, b2, mag, msk)


# -----------------------------------------------------------------------------
# Module
# -----------------------------------------------------------------------------
class AudioInpaintingPCWrapper:
    """JAX/Pallas port of AudioInpaintingPCWrapper.forward (surrogate UNet)."""

    def __init__(self, n_dirs: int = 4, hidden: int = 8,
                 key=jax.random.PRNGKey(0)):
        self.n_dirs = n_dirs
        self.hidden = hidden
        k1, k2, k3, k4 = jax.random.split(key, 4)
        # Deterministic synthetic weights (surrogate for the UNet restoration net).
        self.w1 = 0.3 * jax.random.normal(k1, (3, 3, 2, hidden), jnp.float32)
        self.b1 = 0.05 * jax.random.normal(k2, (hidden,), jnp.float32)
        self.w2 = 0.3 * jax.random.normal(k3, (3, 3, hidden, n_dirs), jnp.float32)
        self.b2 = 0.05 * jax.random.normal(k4, (n_dirs,), jnp.float32)
        # Flattened scalar tables: these live in SMEM inside the fused kernel.
        self.w1_flat = self.w1.reshape(-1)
        self.w2_flat = self.w2.reshape(-1)

    def __call__(self, mag_spec: jnp.ndarray, mask: jnp.ndarray) -> jnp.ndarray:
        """mag_spec, mask: (B, 1, F, T) float32.  Returns (B, n_dirs, F, T)."""
        B, C, F, T = mag_spec.shape
        assert C == 1, "expected a single-channel magnitude spectrogram"
        # Drop the singleton channel; no pads, no transposes (T stays on lanes).
        mag = mag_spec.reshape(B, F, T)
        msk = mask.reshape(B, F, T)
        return _run_pc_wrapper(mag, msk, self.w1_flat, self.b1,
                               self.w2_flat, self.b2, self.n_dirs)


# -----------------------------------------------------------------------------
# Pure-JAX reference (same surrogate net + Gram-Schmidt) for validation
# -----------------------------------------------------------------------------
def _reference_forward(mag_spec, mask, w1, b1, w2, b2):
    x = jnp.concatenate([mag_spec * mask, mask], axis=1)          # (B, 2, F, T)
    dn = ("NCHW", "HWIO", "NCHW")
    h = jax.lax.conv_general_dilated(x, w1, (1, 1), "SAME", dimension_numbers=dn)
    h = jax.nn.relu(h + b1[None, :, None, None])
    p = jax.lax.conv_general_dilated(h, w2, (1, 1), "SAME", dimension_numbers=dn)
    p = p + b2[None, :, None, None]
    B, n_dirs, F, T = p.shape
    xf = p.reshape(B, n_dirs, -1)
    outs, proj = [], []
    for i in range(n_dirs):
        w = xf[:, i]
        for wh in proj:
            w = w - wh * (jnp.sum(w * wh, axis=1, keepdims=True)
                          / (jnp.sum(wh * wh, axis=1, keepdims=True) + 1e-8))
        outs.append(w)
        norm = jnp.sqrt(jnp.sum(w * w, axis=1, keepdims=True))
        proj.append(w / (norm + 1e-8))
    return jnp.stack(outs, axis=1).reshape(B, n_dirs, F, T)


# -----------------------------------------------------------------------------
# Demo / smoke test
# -----------------------------------------------------------------------------
if __name__ == "__main__":
    key = jax.random.PRNGKey(0)
    k_mag, k_mask, k_params = jax.random.split(key, 3)

    # Small but lane-dense shapes: T=128 puts the full 128-lane width to work.
    B, F, T, n_dirs, hidden = 2, 16, 128, 4, 8

    mag_spec = jnp.abs(jax.random.normal(k_mag, (B, 1, F, T), jnp.float32))
    mask = (jax.random.uniform(k_mask, (B, 1, F, T)) > 0.5).astype(jnp.float32)

    model = AudioInpaintingPCWrapper(n_dirs=n_dirs, hidden=hidden, key=k_params)
    w_mat = jax.block_until_ready(model(mag_spec, mask))

    assert w_mat.shape == (B, n_dirs, F, T), w_mat.shape
    assert w_mat.dtype == jnp.float32
    assert bool(jnp.all(jnp.isfinite(w_mat)))

    ref = _reference_forward(mag_spec, mask, model.w1, model.b1, model.w2, model.b2)
    rel_err = jnp.max(jnp.abs(w_mat - ref)) / (jnp.max(jnp.abs(ref)) + 1e-6)
    assert bool(rel_err < 1e-3), float(rel_err)

    print("KERNEL_OK")
</pallas_src>

<mosaic_0001>
module attributes {stable_mosaic.version = 11 : i64} {
  func.func @_pc_wrapper_kernel(%arg0: i32, %arg1: memref<144xf32, #tpu.memory_space<smem>>, %arg2: memref<8xf32, #tpu.memory_space<smem>>, %arg3: memref<288xf32, #tpu.memory_space<smem>>, %arg4: memref<4xf32, #tpu.memory_space<smem>>, %arg5: memref<1x16x128xf32, #tpu.memory_space<vmem>>, %arg6: memref<1x16x128xf32, #tpu.memory_space<vmem>>, %arg7: memref<1x4x16x128xf32, #tpu.memory_space<vmem>>) attributes {dimension_semantics = [#tpu.dimension_semantics<parallel>], iteration_bounds = array<i64: 2>, scalar_prefetch = 0 : i64, scratch_operands = 0 : i64, tpu.core_type = #tpu.core_type<tc>, window_params = [{transform_indices = @transform_0, window_bounds = array<i64: 144>}, {transform_indices = @transform_1, window_bounds = array<i64: 8>}, {transform_indices = @transform_2, window_bounds = array<i64: 288>}, {transform_indices = @transform_3, window_bounds = array<i64: 4>}, {transform_indices = @transform_4, window_bounds = array<i64: 1, 16, 128>}, {transform_indices = @transform_5, window_bounds = array<i64: 1, 16, 128>}, {transform_indices = @transform_6, window_bounds = array<i64: 1, 4, 16, 128>}]} {
    %c0 = arith.constant 0 : index
    %c0_0 = arith.constant 0 : index
    %c0_1 = arith.constant 0 : index
    %0 = vector.load %arg5[%c0, %c0_0, %c0_1] : memref<1x16x128xf32, #tpu.memory_space<vmem>>, vector<1x16x128xf32>
    %1 = vector.shape_cast %0 : vector<1x16x128xf32> to vector<16x128xf32>
    %c0_2 = arith.constant 0 : index
    %c0_3 = arith.constant 0 : index
    %c0_4 = arith.constant 0 : index
    %2 = vector.load %arg6[%c0_2, %c0_3, %c0_4] : memref<1x16x128xf32, #tpu.memory_space<vmem>>, vector<1x16x128xf32>
    %3 = vector.shape_cast %2 : vector<1x16x128xf32> to vector<16x128xf32>
    %4 = arith.mulf %1, %3 : vector<16x128xf32>
    %5 = tpu.iota {dimensions = array<i32: 0>} : vector<16x128xi32>
    %6 = tpu.iota {dimensions = array<i32: 1>} : vector<16x128xi32>
    %c1_i32 = arith.constant 1 : i32
    %7 = vector.broadcast %c1_i32 : i32 to vector<16x128xi32>
    %8 = arith.cmpi sge, %5, %7 : vector<16x128xi32>
    %c15_i32 = arith.constant 15 : i32
    %9 = vector.broadcast %c15_i32 : i32 to vector<16x128xi32>
    %10 = arith.cmpi slt, %5, %9 : vector<16x128xi32>
    %c1_i32_5 = arith.constant 1 : i32
    %11 = vector.broadcast %c1_i32_5 : i32 to vector<16x128xi32>
    %12 = arith.cmpi sge, %6, %11 : vector<16x128xi32>
    %c127_i32 = arith.constant 127 : i32
    %13 = vector.broadcast %c127_i32 : i32 to vector<16x128xi32>
    %14 = arith.cmpi slt, %6, %13 : vector<16x128xi32>
    %cst = arith.constant 0.000000e+00 : f32
    %15 = vector.broadcast %cst : f32 to vector<16x128xf32>
    %cst_6 = arith.constant 0.000000e+00 : f32
    %16 = vector.broadcast %cst_6 : f32 to vector<16x128xf32>
    %cst_7 = arith.constant 0.000000e+00 : f32
    %17 = vector.broadcast %cst_7 : f32 to vector<16x128xf32>
    %cst_8 = arith.constant 0.000000e+00 : f32
    %18 = vector.broadcast %cst_8 : f32 to vector<16x128xf32>
    %cst_9 = arith.constant 0.000000e+00 : f32
    %19 = vector.broadcast %cst_9 : f32 to vector<16x128xf32>
    %cst_10 = arith.constant 0.000000e+00 : f32
    %20 = vector.broadcast %cst_10 : f32 to vector<16x128xf32>
    %cst_11 = arith.constant 0.000000e+00 : f32
    %21 = vector.broadcast %cst_11 : f32 to vector<16x128xf32>
    %cst_12 = arith.constant 0.000000e+00 : f32
    %22 = vector.broadcast %cst_12 : f32 to vector<16x128xf32>
    %c1_i32_13 = arith.constant 1 : i32
    %23 = tpu.dynamic_rotate %4 by %c1_i32_13 dim 0 : vector<16x128xf32>, i32 -> vector<16x128xf32>
    %cst_14 = arith.constant 0.000000e+00 : f32
    %24 = vector.broadcast %cst_14 : f32 to vector<16x128xf32>
    %25 = arith.select %8, %23, %24 : vector<16x128xi1>, vector<16x128xf32>
    %c1_i32_15 = arith.constant 1 : i32
    %26 = tpu.dynamic_rotate %3 by %c1_i32_15 dim 0 : vector<16x128xf32>, i32 -> vector<16x128xf32>
    %cst_16 = arith.constant 0.000000e+00 : f32
    %27 = vector.broadcast %cst_16 : f32 to vector<16x128xf32>
    %28 = arith.select %8, %26, %27 : vector<16x128xi1>, vector<16x128xf32>
    %c1_i32_17 = arith.constant 1 : i32
    %29 = tpu.dynamic_rotate %25 by %c1_i32_17 dim 1 : vector<16x128xf32>, i32 -> vector<16x128xf32>
    %cst_18 = arith.constant 0.000000e+00 : f32
    %30 = vector.broadcast %cst_18 : f32 to vector<16x128xf32>
    %31 = arith.select %12, %29, %30 : vector<16x128xi1>, vector<16x128xf32>
    %c1_i32_19 = arith.constant 1 : i32
    %32 = tpu.dynamic_rotate %28 by %c1_i32_19 dim 1 : vector<16x128xf32>, i32 -> vector<16x128xf32>
    %cst_20 = arith.constant 0.000000e+00 : f32
    %33 = vector.broadcast %cst_20 : f32 to vector<16x128xf32>
    %34 = arith.select %12, %32, %33 : vector<16x128xi1>, vector<16x128xf32>
    %c0_21 = arith.constant 0 : index
    %35 = memref.load %arg1[%c0_21] : memref<144xf32, #tpu.memory_space<smem>>
    %36 = vector.broadcast %35 : f32 to vector<16x128xf32>
    %37 = arith.mulf %31, %36 : vector<16x128xf32>
    %38 = arith.addf %15, %37 : vector<16x128xf32>
    %c8 = arith.constant 8 : index
    %39 = memref.load %arg1[%c8] : memref<144xf32, #tpu.memory_space<smem>>
    %40 = vector.broadcast %39 : f32 to vector<16x128xf32>
    %41 = arith.mulf %34, %40 : vector<16x128xf32>
    %42 = arith.addf %38, %41 : vector<16x128xf32>
    %c1 = arith.constant 1 : index
    %43 = memref.load %arg1[%c1] : memref<144xf32, #tpu.memory_space<smem>>
    %44 = vector.broadcast %43 : f32 to vector<16x128xf32>
    %45 = arith.mulf %31, %44 : vector<16x128xf32>
    %46 = arith.addf %16, %45 : vector<16x128xf32>
    %c9 = arith.constant 9 : index
    %47 = memref.load %arg1[%c9] : memref<144xf32, #tpu.memory_space<smem>>
    %48 = vector.broadcast %47 : f32 to vector<16x128xf32>
    %49 = arith.mulf %34, %48 : vector<16x128xf32>
    %50 = arith.addf %46, %49 : vector<16x128xf32>
    %c2 = arith.constant 2 : index
    %51 = memref.load %arg1[%c2] : memref<144xf32, #tpu.memory_space<smem>>
    %52 = vector.broadcast %51 : f32 to vector<16x128xf32>
    %53 = arith.mulf %31, %52 : vector<16x128xf32>
    %54 = arith.addf %17, %53 : vector<16x128xf32>
    %c10 = arith.constant 10 : index
    %55 = memref.load %arg1[%c10] : memref<144xf32, #tpu.memory_space<smem>>
    %56 = vector.broadcast %55 : f32 to vector<16x128xf32>
    %57 = arith.mulf %34, %56 : vector<16x128xf32>
    %58 = arith.addf %54, %57 : vector<16x128xf32>
    %c3 = arith.constant 3 : index
    %59 = memref.load %arg1[%c3] : memref<144xf32, #tpu.memory_space<smem>>
    %60 = vector.broadcast %59 : f32 to vector<16x128xf32>
    %61 = arith.mulf %31, %60 : vector<16x128xf32>
    %62 = arith.addf %18, %61 : vector<16x128xf32>
    %c11 = arith.constant 11 : index
    %63 = memref.load %arg1[%c11] : memref<144xf32, #tpu.memory_space<smem>>
    %64 = vector.broadcast %63 : f32 to vector<16x128xf32>
    %65 = arith.mulf %34, %64 : vector<16x128xf32>
    %66 = arith.addf %62, %65 : vector<16x128xf32>
    %c4 = arith.constant 4 : index
    %67 = memref.load %arg1[%c4] : memref<144xf32, #tpu.memory_space<smem>>
    %68 = vector.broadcast %67 : f32 to vector<16x128xf32>
    %69 = arith.mulf %31, %68 : vector<16x128xf32>
    %70 = arith.addf %19, %69 : vector<16x128xf32>
    %c12 = arith.constant 12 : index
    %71 = memref.load %arg1[%c12] : memref<144xf32, #tpu.memory_space<smem>>
    %72 = vector.broadcast %71 : f32 to vector<16x128xf32>
    %73 = arith.mulf %34, %72 : vector<16x128xf32>
    %74 = arith.addf %70, %73 : vector<16x128xf32>
    %c5 = arith.constant 5 : index
    %75 = memref.load %arg1[%c5] : memref<144xf32, #tpu.memory_space<smem>>
    %76 = vector.broadcast %75 : f32 to vector<16x128xf32>
    %77 = arith.mulf %31, %76 : vector<16x128xf32>
    %78 = arith.addf %20, %77 : vector<16x128xf32>
    %c13 = arith.constant 13 : index
    %79 = memref.load %arg1[%c13] : memref<144xf32, #tpu.memory_space<smem>>
    %80 = vector.broadcast %79 : f32 to vector<16x128xf32>
    %81 = arith.mulf %34, %80 : vector<16x128xf32>
    %82 = arith.addf %78, %81 : vector<16x128xf32>
    %c6 = arith.constant 6 : index
    %83 = memref.load %arg1[%c6] : memref<144xf32, #tpu.memory_space<smem>>
    %84 = vector.broadcast %83 : f32 to vector<16x128xf32>
    %85 = arith.mulf %31, %84 : vector<16x128xf32>
    %86 = arith.addf %21, %85 : vector<16x128xf32>
    %c14 = arith.constant 14 : index
    %87 = memref.load %arg1[%c14] : memref<144xf32, #tpu.memory_space<smem>>
    %88 = vector.broadcast %87 : f32 to vector<16x128xf32>
    %89 = arith.mulf %34, %88 : vector<16x128xf32>
    %90 = arith.addf %86, %89 : vector<16x128xf32>
    %c7 = arith.constant 7 : index
    %91 = memref.load %arg1[%c7] : memref<144xf32, #tpu.memory_space<smem>>
    %92 = vector.broadcast %91 : f32 to vector<16x128xf32>
    %93 = arith.mulf %31, %92 : vector<16x128xf32>
    %94 = arith.addf %22, %93 : vector<16x128xf32>
    %c15 = arith.constant 15 : index
    %95 = memref.load %arg1[%c15] : memref<144xf32, #tpu.memory_space<smem>>
    %96 = vector.broadcast %95 : f32 to vector<16x128xf32>
    %97 = arith.mulf %34, %96 : vector<16x128xf32>
    %98 = arith.addf %94, %97 : vector<16x128xf32>
    %c16 = arith.constant 16 : index
    %99 = memref.load %arg1[%c16] : memref<144xf32, #tpu.memory_space<smem>>
    %100 = vector.broadcast %99 : f32 to vector<16x128xf32>
    %101 = arith.mulf %25, %100 : vector<16x128xf32>
    %102 = arith.addf %42, %101 : vector<16x128xf32>
    %c24 = arith.constant 24 : index
    %103 = memref.load %arg1[%c24] : memref<144xf32, #tpu.memory_space<smem>>
    %104 = vector.broadcast %103 : f32 to vector<16x128xf32>
    %105 = arith.mulf %28, %104 : vector<16x128xf32>
    %106 = arith.addf %102, %105 : vector<16x128xf32>
    %c17 = arith.constant 17 : index
    %107 = memref.load %arg1[%c17] : memref<144xf32, #tpu.memory_space<smem>>
    %108 = vector.broadcast %107 : f32 to vector<16x128xf32>
    %109 = arith.mulf %25, %108 : vector<16x128xf32>
    %110 = arith.addf %50, %109 : vector<16x128xf32>
    %c25 = arith.constant 25 : index
    %111 = memref.load %arg1[%c25] : memref<144xf32, #tpu.memory_space<smem>>
    %112 = vector.broadcast %111 : f32 to vector<16x128xf32>
    %113 = arith.mulf %28, %112 : vector<16x128xf32>
    %114 = arith.addf %110, %113 : vector<16x128xf32>
    %c18 = arith.constant 18 : index
    %115 = memref.load %arg1[%c18] : memref<144xf32, #tpu.memory_space<smem>>
    %116 = vector.broadcast %115 : f32 to vector<16x128xf32>
    %117 = arith.mulf %25, %116 : vector<16x128xf32>
    %118 = arith.addf %58, %117 : vector<16x128xf32>
    %c26 = arith.constant 26 : index
    %119 = memref.load %arg1[%c26] : memref<144xf32, #tpu.memory_space<smem>>
    %120 = vector.broadcast %119 : f32 to vector<16x128xf32>
    %121 = arith.mulf %28, %120 : vector<16x128xf32>
    %122 = arith.addf %118, %121 : vector<16x128xf32>
    %c19 = arith.constant 19 : index
    %123 = memref.load %arg1[%c19] : memref<144xf32, #tpu.memory_space<smem>>
    %124 = vector.broadcast %123 : f32 to vector<16x128xf32>
    %125 = arith.mulf %25, %124 : vector<16x128xf32>
    %126 = arith.addf %66, %125 : vector<16x128xf32>
    %c27 = arith.constant 27 : index
    %127 = memref.load %arg1[%c27] : memref<144xf32, #tpu.memory_space<smem>>
    %128 = vector.broadcast %127 : f32 to vector<16x128xf32>
    %129 = arith.mulf %28, %128 : vector<16x128xf32>
    %130 = arith.addf %126, %129 : vector<16x128xf32>
    %c20 = arith.constant 20 : index
    %131 = memref.load %arg1[%c20] : memref<144xf32, #tpu.memory_space<smem>>
    %132 = vector.broadcast %131 : f32 to vector<16x128xf32>
    %133 = arith.mulf %25, %132 : vector<16x128xf32>
    %134 = arith.addf %74, %133 : vector<16x128xf32>
    %c28 = arith.constant 28 : index
    %135 = memref.load %arg1[%c28] : memref<144xf32, #tpu.memory_space<smem>>
    %136 = vector.broadcast %135 : f32 to vector<16x128xf32>
    %137 = arith.mulf %28, %136 : vector<16x128xf32>
    %138 = arith.addf %134, %137 : vector<16x128xf32>
    %c21 = arith.constant 21 : index
    %139 = memref.load %arg1[%c21] : memref<144xf32, #tpu.memory_space<smem>>
    %140 = vector.broadcast %139 : f32 to vector<16x128xf32>
    %141 = arith.mulf %25, %140 : vector<16x128xf32>
    %142 = arith.addf %82, %141 : vector<16x128xf32>
    %c29 = arith.constant 29 : index
    %143 = memref.load %arg1[%c29] : memref<144xf32, #tpu.memory_space<smem>>
    %144 = vector.broadcast %143 : f32 to vector<16x128xf32>
    %145 = arith.mulf %28, %144 : vector<16x128xf32>
    %146 = arith.addf %142, %145 : vector<16x128xf32>
    %c22 = arith.constant 22 : index
    %147 = memref.load %arg1[%c22] : memref<144xf32, #tpu.memory_space<smem>>
    %148 = vector.broadcast %147 : f32 to vector<16x128xf32>
    %149 = arith.mulf %25, %148 : vector<16x128xf32>
    %150 = arith.addf %90, %149 : vector<16x128xf32>
    %c30 = arith.constant 30 : index
    %151 = memref.load %arg1[%c30] : memref<144xf32, #tpu.memory_space<smem>>
    %152 = vector.broadcast %151 : f32 to vector<16x128xf32>
    %153 = arith.mulf %28, %152 : vector<16x128xf32>
    %154 = arith.addf %150, %153 : vector<16x128xf32>
    %c23 = arith.constant 23 : index
    %155 = memref.load %arg1[%c23] : memref<144xf32, #tpu.memory_space<smem>>
    %156 = vector.broadcast %155 : f32 to vector<16x128xf32>
    %157 = arith.mulf %25, %156 : vector<16x128xf32>
    %158 = arith.addf %98, %157 : vector<16x128xf32>
    %c31 = arith.constant 31 : index
    %159 = memref.load %arg1[%c31] : memref<144xf32, #tpu.memory_space<smem>>
    %160 = vector.broadcast %159 : f32 to vector<16x128xf32>
    %161 = arith.mulf %28, %160 : vector<16x128xf32>
    %162 = arith.addf %158, %161 : vector<16x128xf32>
    %c127_i32_22 = arith.constant 127 : i32
    %163 = tpu.dynamic_rotate %25 by %c127_i32_22 dim 1 : vector<16x128xf32>, i32 -> vector<16x128xf32>
    %cst_23 = arith.constant 0.000000e+00 : f32
    %164 = vector.broadcast %cst_23 : f32 to vector<16x128xf32>
    %165 = arith.select %14, %163, %164 : vector<16x128xi1>, vector<16x128xf32>
    %c127_i32_24 = arith.constant 127 : i32
    %166 = tpu.dynamic_rotate %28 by %c127_i32_24 dim 1 : vector<16x128xf32>, i32 -> vector<16x128xf32>
    %cst_25 = arith.constant 0.000000e+00 : f32
    %167 = vector.broadcast %cst_25 : f32 to vector<16x128xf32>
    %168 = arith.select %14, %166, %167 : vector<16x128xi1>, vector<16x128xf32>
    %c32 = arith.constant 32 : index
    %169 = memref.load %arg1[%c32] : memref<144xf32, #tpu.memory_space<smem>>
    %170 = vector.broadcast %169 : f32 to vector<16x128xf32>
    %171 = arith.mulf %165, %170 : vector<16x128xf32>
    %172 = arith.addf %106, %171 : vector<16x128xf32>
    %c40 = arith.constant 40 : index
    %173 = memref.load %arg1[%c40] : memref<144xf32, #tpu.memory_space<smem>>
    %174 = vector.broadcast %173 : f32 to vector<16x128xf32>
    %175 = arith.mulf %168, %174 : vector<16x128xf32>
    %176 = arith.addf %172, %175 : vector<16x128xf32>
    %c33 = arith.constant 33 : index
    %177 = memref.load %arg1[%c33] : memref<144xf32, #tpu.memory_space<smem>>
    %178 = vector.broadcast %177 : f32 to vector<16x128xf32>
    %179 = arith.mulf %165, %178 : vector<16x128xf32>
    %180 = arith.addf %114, %179 : vector<16x128xf32>
    %c41 = arith.constant 41 : index
    %181 = memref.load %arg1[%c41] : memref<144xf32, #tpu.memory_space<smem>>
    %182 = vector.broadcast %181 : f32 to vector<16x128xf32>
    %183 = arith.mulf %168, %182 : vector<16x128xf32>
    %184 = arith.addf %180, %183 : vector<16x128xf32>
    %c34 = arith.constant 34 : index
    %185 = memref.load %arg1[%c34] : memref<144xf32, #tpu.memory_space<smem>>
    %186 = vector.broadcast %185 : f32 to vector<16x128xf32>
    %187 = arith.mulf %165, %186 : vector<16x128xf32>
    %188 = arith.addf %122, %187 : vector<16x128xf32>
    %c42 = arith.constant 42 : index
    %189 = memref.load %arg1[%c42] : memref<144xf32, #tpu.memory_space<smem>>
    %190 = vector.broadcast %189 : f32 to vector<16x128xf32>
    %191 = arith.mulf %168, %190 : vector<16x128xf32>
    %192 = arith.addf %188, %191 : vector<16x128xf32>
    %c35 = arith.constant 35 : index
    %193 = memref.load %arg1[%c35] : memref<144xf32, #tpu.memory_space<smem>>
    %194 = vector.broadcast %193 : f32 to vector<16x128xf32>
    %195 = arith.mulf %165, %194 : vector<16x128xf32>
    %196 = arith.addf %130, %195 : vector<16x128xf32>
    %c43 = arith.constant 43 : index
    %197 = memref.load %arg1[%c43] : memref<144xf32, #tpu.memory_space<smem>>
    %198 = vector.broadcast %197 : f32 to vector<16x128xf32>
    %199 = arith.mulf %168, %198 : vector<16x128xf32>
    %200 = arith.addf %196, %199 : vector<16x128xf32>
    %c36 = arith.constant 36 : index
    %201 = memref.load %arg1[%c36] : memref<144xf32, #tpu.memory_space<smem>>
    %202 = vector.broadcast %201 : f32 to vector<16x128xf32>
    %203 = arith.mulf %165, %202 : vector<16x128xf32>
    %204 = arith.addf %138, %203 : vector<16x128xf32>
    %c44 = arith.constant 44 : index
    %205 = memref.load %arg1[%c44] : memref<144xf32, #tpu.memory_space<smem>>
    %206 = vector.broadcast %205 : f32 to vector<16x128xf32>
    %207 = arith.mulf %168, %206 : vector<16x128xf32>
    %208 = arith.addf %204, %207 : vector<16x128xf32>
    %c37 = arith.constant 37 : index
    %209 = memref.load %arg1[%c37] : memref<144xf32, #tpu.memory_space<smem>>
    %210 = vector.broadcast %209 : f32 to vector<16x128xf32>
    %211 = arith.mulf %165, %210 : vector<16x128xf32>
    %212 = arith.addf %146, %211 : vector<16x128xf32>
    %c45 = arith.constant 45 : index
    %213 = memref.load %arg1[%c45] : memref<144xf32, #tpu.memory_space<smem>>
    %214 = vector.broadcast %213 : f32 to vector<16x128xf32>
    %215 = arith.mulf %168, %214 : vector<16x128xf32>
    %216 = arith.addf %212, %215 : vector<16x128xf32>
    %c38 = arith.constant 38 : index
    %217 = memref.load %arg1[%c38] : memref<144xf32, #tpu.memory_space<smem>>
    %218 = vector.broadcast %217 : f32 to vector<16x128xf32>
    %219 = arith.mulf %165, %218 : vector<16x128xf32>
    %220 = arith.addf %154, %219 : vector<16x128xf32>
    %c46 = arith.constant 46 : index
    %221 = memref.load %arg1[%c46] : memref<144xf32, #tpu.memory_space<smem>>
    %222 = vector.broadcast %221 : f32 to vector<16x128xf32>
    %223 = arith.mulf %168, %222 : vector<16x128xf32>
    %224 = arith.addf %220, %223 : vector<16x128xf32>
    %c39 = arith.constant 39 : index
    %225 = memref.load %arg1[%c39] : memref<144xf32, #tpu.memory_space<smem>>
    %226 = vector.broadcast %225 : f32 to vector<16x128xf32>
    %227 = arith.mulf %165, %226 : vector<16x128xf32>
    %228 = arith.addf %162, %227 : vector<16x128xf32>
    %c47 = arith.constant 47 : index
    %229 = memref.load %arg1[%c47] : memref<144xf32, #tpu.memory_space<smem>>
    %230 = vector.broadcast %229 : f32 to vector<16x128xf32>
    %231 = arith.mulf %168, %230 : vector<16x128xf32>
    %232 = arith.addf %228, %231 : vector<16x128xf32>
    %c1_i32_26 = arith.constant 1 : i32
    %233 = tpu.dynamic_rotate %4 by %c1_i32_26 dim 1 : vector<16x128xf32>, i32 -> vector<16x128xf32>
    %cst_27 = arith.constant 0.000000e+00 : f32
    %234 = vector.broadcast %cst_27 : f32 to vector<16x128xf32>
    %235 = arith.select %12, %233, %234 : vector<16x128xi1>, vector<16x128xf32>
    %c1_i32_28 = arith.constant 1 : i32
    %236 = tpu.dynamic_rotate %3 by %c1_i32_28 dim 1 : vector<16x128xf32>, i32 -> vector<16x128xf32>
    %cst_29 = arith.constant 0.000000e+00 : f32
    %237 = vector.broadcast %cst_29 : f32 to vector<16x128xf32>
    %238 = arith.select %12, %236, %237 : vector<16x128xi1>, vector<16x128xf32>
    %c48 = arith.constant 48 : index
    %239 = memref.load %arg1[%c48] : memref<144xf32, #tpu.memory_space<smem>>
    %240 = vector.broadcast %239 : f32 to vector<16x128xf32>
    %241 = arith.mulf %235, %240 : vector<16x128xf32>
    %242 = arith.addf %176, %241 : vector<16x128xf32>
    %c56 = arith.constant 56 : index
    %243 = memref.load %arg1[%c56] : memref<144xf32, #tpu.memory_space<smem>>
    %244 = vector.broadcast %243 : f32 to vector<16x128xf32>
    %245 = arith.mulf %238, %244 : vector<16x128xf32>
    %246 = arith.addf %242, %245 : vector<16x128xf32>
    %c49 = arith.constant 49 : index
    %247 = memref.load %arg1[%c49] : memref<144xf32, #tpu.memory_space<smem>>
    %248 = vector.broadcast %247 : f32 to vector<16x128xf32>
    %249 = arith.mulf %235, %248 : vector<16x128xf32>
    %250 = arith.addf %184, %249 : vector<16x128xf32>
    %c57 = arith.constant 57 : index
    %251 = memref.load %arg1[%c57] : memref<144xf32, #tpu.memory_space<smem>>
    %252 = vector.broadcast %251 : f32 to vector<16x128xf32>
    %253 = arith.mulf %238, %252 : vector<16x128xf32>
    %254 = arith.addf %250, %253 : vector<16x128xf32>
    %c50 = arith.constant 50 : index
    %255 = memref.load %arg1[%c50] : memref<144xf32, #tpu.memory_space<smem>>
    %256 = vector.broadcast %255 : f32 to vector<16x128xf32>
    %257 = arith.mulf %235, %256 : vector<16x128xf32>
    %258 = arith.addf %192, %257 : vector<16x128xf32>
    %c58 = arith.constant 58 : index
    %259 = memref.load %arg1[%c58] : memref<144xf32, #tpu.memory_space<smem>>
    %260 = vector.broadcast %259 : f32 to vector<16x128xf32>
    %261 = arith.mulf %238, %260 : vector<16x128xf32>
    %262 = arith.addf %258, %261 : vector<16x128xf32>
    %c51 = arith.constant 51 : index
    %263 = memref.load %arg1[%c51] : memref<144xf32, #tpu.memory_space<smem>>
    %264 = vector.broadcast %263 : f32 to vector<16x128xf32>
    %265 = arith.mulf %235, %264 : vector<16x128xf32>
    %266 = arith.addf %200, %265 : vector<16x128xf32>
    %c59 = arith.constant 59 : index
    %267 = memref.load %arg1[%c59] : memref<144xf32, #tpu.memory_space<smem>>
    %268 = vector.broadcast %267 : f32 to vector<16x128xf32>
    %269 = arith.mulf %238, %268 : vector<16x128xf32>
    %270 = arith.addf %266, %269 : vector<16x128xf32>
    %c52 = arith.constant 52 : index
    %271 = memref.load %arg1[%c52] : memref<144xf32, #tpu.memory_space<smem>>
    %272 = vector.broadcast %271 : f32 to vector<16x128xf32>
    %273 = arith.mulf %235, %272 : vector<16x128xf32>
    %274 = arith.addf %208, %273 : vector<16x128xf32>
    %c60 = arith.constant 60 : index
    %275 = memref.load %arg1[%c60] : memref<144xf32, #tpu.memory_space<smem>>
    %276 = vector.broadcast %275 : f32 to vector<16x128xf32>
    %277 = arith.mulf %238, %276 : vector<16x128xf32>
    %278 = arith.addf %274, %277 : vector<16x128xf32>
    %c53 = arith.constant 53 : index
    %279 = memref.load %arg1[%c53] : memref<144xf32, #tpu.memory_space<smem>>
    %280 = vector.broadcast %279 : f32 to vector<16x128xf32>
    %281 = arith.mulf %235, %280 : vector<16x128xf32>
    %282 = arith.addf %216, %281 : vector<16x128xf32>
    %c61 = arith.constant 61 : index
    %283 = memref.load %arg1[%c61] : memref<144xf32, #tpu.memory_space<smem>>
    %284 = vector.broadcast %283 : f32 to vector<16x128xf32>
    %285 = arith.mulf %238, %284 : vector<16x128xf32>
    %286 = arith.addf %282, %285 : vector<16x128xf32>
    %c54 = arith.constant 54 : index
    %287 = memref.load %arg1[%c54] : memref<144xf32, #tpu.memory_space<smem>>
    %288 = vector.broadcast %287 : f32 to vector<16x128xf32>
    %289 = arith.mulf %235, %288 : vector<16x128xf32>
    %290 = arith.addf %224, %289 : vector<16x128xf32>
    %c62 = arith.constant 62 : index
    %291 = memref.load %arg1[%c62] : memref<144xf32, #tpu.memory_space<smem>>
    %292 = vector.broadcast %291 : f32 to vector<16x128xf32>
    %293 = arith.mulf %238, %292 : vector<16x128xf32>
    %294 = arith.addf %290, %293 : vector<16x128xf32>
    %c55 = arith.constant 55 : index
    %295 = memref.load %arg1[%c55] : memref<144xf32, #tpu.memory_space<smem>>
    %296 = vector.broadcast %295 : f32 to vector<16x128xf32>
    %297 = arith.mulf %235, %296 : vector<16x128xf32>
    %298 = arith.addf %232, %297 : vector<16x128xf32>
    %c63 = arith.constant 63 : index
    %299 = memref.load %arg1[%c63] : memref<144xf32, #tpu.memory_space<smem>>
    %300 = vector.broadcast %299 : f32 to vector<16x128xf32>
    %301 = arith.mulf %238, %300 : vector<16x128xf32>
    %302 = arith.addf %298, %301 : vector<16x128xf32>
    %c64 = arith.constant 64 : index
    %303 = memref.load %arg1[%c64] : memref<144xf32, #tpu.memory_space<smem>>
    %304 = vector.broadcast %303 : f32 to vector<16x128xf32>
    %305 = arith.mulf %4, %304 : vector<16x128xf32>
    %306 = arith.addf %246, %305 : vector<16x128xf32>
    %c72 = arith.constant 72 : index
    %307 = memref.load %arg1[%c72] : memref<144xf32, #tpu.memory_space<smem>>
    %308 = vector.broadcast %307 : f32 to vector<16x128xf32>
    %309 = arith.mulf %3, %308 : vector<16x128xf32>
    %310 = arith.addf %306, %309 : vector<16x128xf32>
    %c65 = arith.constant 65 : index
    %311 = memref.load %arg1[%c65] : memref<144xf32, #tpu.memory_space<smem>>
    %312 = vector.broadcast %311 : f32 to vector<16x128xf32>
    %313 = arith.mulf %4, %312 : vector<16x128xf32>
    %314 = arith.addf %254, %313 : vector<16x128xf32>
    %c73 = arith.constant 73 : index
    %315 = memref.load %arg1[%c73] : memref<144xf32, #tpu.memory_space<smem>>
    %316 = vector.broadcast %315 : f32 to vector<16x128xf32>
    %317 = arith.mulf %3, %316 : vector<16x128xf32>
    %318 = arith.addf %314, %317 : vector<16x128xf32>
    %c66 = arith.constant 66 : index
    %319 = memref.load %arg1[%c66] : memref<144xf32, #tpu.memory_space<smem>>
    %320 = vector.broadcast %319 : f32 to vector<16x128xf32>
    %321 = arith.mulf %4, %320 : vector<16x128xf32>
    %322 = arith.addf %262, %321 : vector<16x128xf32>
    %c74 = arith.constant 74 : index
    %323 = memref.load %arg1[%c74] : memref<144xf32, #tpu.memory_space<smem>>
    %324 = vector.broadcast %323 : f32 to vector<16x128xf32>
    %325 = arith.mulf %3, %324 : vector<16x128xf32>
    %326 = arith.addf %322, %325 : vector<16x128xf32>
    %c67 = arith.constant 67 : index
    %327 = memref.load %arg1[%c67] : memref<144xf32, #tpu.memory_space<smem>>
    %328 = vector.broadcast %327 : f32 to vector<16x128xf32>
    %329 = arith.mulf %4, %328 : vector<16x128xf32>
    %330 = arith.addf %270, %329 : vector<16x128xf32>
    %c75 = arith.constant 75 : index
    %331 = memref.load %arg1[%c75] : memref<144xf32, #tpu.memory_space<smem>>
    %332 = vector.broadcast %331 : f32 to vector<16x128xf32>
    %333 = arith.mulf %3, %332 : vector<16x128xf32>
    %334 = arith.addf %330, %333 : vector<16x128xf32>
    %c68 = arith.constant 68 : index
    %335 = memref.load %arg1[%c68] : memref<144xf32, #tpu.memory_space<smem>>
    %336 = vector.broadcast %335 : f32 to vector<16x128xf32>
    %337 = arith.mulf %4, %336 : vector<16x128xf32>
    %338 = arith.addf %278, %337 : vector<16x128xf32>
    %c76 = arith.constant 76 : index
    %339 = memref.load %arg1[%c76] : memref<144xf32, #tpu.memory_space<smem>>
    %340 = vector.broadcast %339 : f32 to vector<16x128xf32>
    %341 = arith.mulf %3, %340 : vector<16x128xf32>
    %342 = arith.addf %338, %341 : vector<16x128xf32>
    %c69 = arith.constant 69 : index
    %343 = memref.load %arg1[%c69] : memref<144xf32, #tpu.memory_space<smem>>
    %344 = vector.broadcast %343 : f32 to vector<16x128xf32>
    %345 = arith.mulf %4, %344 : vector<16x128xf32>
    %346 = arith.addf %286, %345 : vector<16x128xf32>
    %c77 = arith.constant 77 : index
    %347 = memref.load %arg1[%c77] : memref<144xf32, #tpu.memory_space<smem>>
    %348 = vector.broadcast %347 : f32 to vector<16x128xf32>
    %349 = arith.mulf %3, %348 : vector<16x128xf32>
    %350 = arith.addf %346, %349 : vector<16x128xf32>
    %c70 = arith.constant 70 : index
    %351 = memref.load %arg1[%c70] : memref<144xf32, #tpu.memory_space<smem>>
    %352 = vector.broadcast %351 : f32 to vector<16x128xf32>
    %353 = arith.mulf %4, %352 : vector<16x128xf32>
    %354 = arith.addf %294, %353 : vector<16x128xf32>
    %c78 = arith.constant 78 : index
    %355 = memref.load %arg1[%c78] : memref<144xf32, #tpu.memory_space<smem>>
    %356 = vector.broadcast %355 : f32 to vector<16x128xf32>
    %357 = arith.mulf %3, %356 : vector<16x128xf32>
    %358 = arith.addf %354, %357 : vector<16x128xf32>
    %c71 = arith.constant 71 : index
    %359 = memref.load %arg1[%c71] : memref<144xf32, #tpu.memory_space<smem>>
    %360 = vector.broadcast %359 : f32 to vector<16x128xf32>
    %361 = arith.mulf %4, %360 : vector<16x128xf32>
    %362 = arith.addf %302, %361 : vector<16x128xf32>
    %c79 = arith.constant 79 : index
    %363 = memref.load %arg1[%c79] : memref<144xf32, #tpu.memory_space<smem>>
    %364 = vector.broadcast %363 : f32 to vector<16x128xf32>
    %365 = arith.mulf %3, %364 : vector<16x128xf32>
    %366 = arith.addf %362, %365 : vector<16x128xf32>
    %c127_i32_30 = arith.constant 127 : i32
    %367 = tpu.dynamic_rotate %4 by %c127_i32_30 dim 1 : vector<16x128xf32>, i32 -> vector<16x128xf32>
    %cst_31 = arith.constant 0.000000e+00 : f32
    %368 = vector.broadcast %cst_31 : f32 to vector<16x128xf32>
    %369 = arith.select %14, %367, %368 : vector<16x128xi1>, vector<16x128xf32>
    %c127_i32_32 = arith.constant 127 : i32
    %370 = tpu.dynamic_rotate %3 by %c127_i32_32 dim 1 : vector<16x128xf32>, i32 -> vector<16x128xf32>
    %cst_33 = arith.constant 0.000000e+00 : f32
    %371 = vector.broadcast %cst_33 : f32 to vector<16x128xf32>
    %372 = arith.select %14, %370, %371 : vector<16x128xi1>, vector<16x128xf32>
    %c80 = arith.constant 80 : index
    %373 = memref.load %arg1[%c80] : memref<144xf32, #tpu.memory_space<smem>>
    %374 = vector.broadcast %373 : f32 to vector<16x128xf32>
    %375 = arith.mulf %369, %374 : vector<16x128xf32>
    %376 = arith.addf %310, %375 : vector<16x128xf32>
    %c88 = arith.constant 88 : index
    %377 = memref.load %arg1[%c88] : memref<144xf32, #tpu.memory_space<smem>>
    %378 = vector.broadcast %377 : f32 to vector<16x128xf32>
    %379 = arith.mulf %372, %378 : vector<16x128xf32>
    %380 = arith.addf %376, %379 : vector<16x128xf32>
    %c81 = arith.constant 81 : index
    %381 = memref.load %arg1[%c81] : memref<144xf32, #tpu.memory_space<smem>>
    %382 = vector.broadcast %381 : f32 to vector<16x128xf32>
    %383 = arith.mulf %369, %382 : vector<16x128xf32>
    %384 = arith.addf %318, %383 : vector<16x128xf32>
    %c89 = arith.constant 89 : index
    %385 = memref.load %arg1[%c89] : memref<144xf32, #tpu.memory_space<smem>>
    %386 = vector.broadcast %385 : f32 to vector<16x128xf32>
    %387 = arith.mulf %372, %386 : vector<16x128xf32>
    %388 = arith.addf %384, %387 : vector<16x128xf32>
    %c82 = arith.constant 82 : index
    %389 = memref.load %arg1[%c82] : memref<144xf32, #tpu.memory_space<smem>>
    %390 = vector.broadcast %389 : f32 to vector<16x128xf32>
    %391 = arith.mulf %369, %390 : vector<16x128xf32>
    %392 = arith.addf %326, %391 : vector<16x128xf32>
    %c90 = arith.constant 90 : index
    %393 = memref.load %arg1[%c90] : memref<144xf32, #tpu.memory_space<smem>>
    %394 = vector.broadcast %393 : f32 to vector<16x128xf32>
    %395 = arith.mulf %372, %394 : vector<16x128xf32>
    %396 = arith.addf %392, %395 : vector<16x128xf32>
    %c83 = arith.constant 83 : index
    %397 = memref.load %arg1[%c83] : memref<144xf32, #tpu.memory_space<smem>>
    %398 = vector.broadcast %397 : f32 to vector<16x128xf32>
    %399 = arith.mulf %369, %398 : vector<16x128xf32>
    %400 = arith.addf %334, %399 : vector<16x128xf32>
    %c91 = arith.constant 91 : index
    %401 = memref.load %arg1[%c91] : memref<144xf32, #tpu.memory_space<smem>>
    %402 = vector.broadcast %401 : f32 to vector<16x128xf32>
    %403 = arith.mulf %372, %402 : vector<16x128xf32>
    %404 = arith.addf %400, %403 : vector<16x128xf32>
    %c84 = arith.constant 84 : index
    %405 = memref.load %arg1[%c84] : memref<144xf32, #tpu.memory_space<smem>>
    %406 = vector.broadcast %405 : f32 to vector<16x128xf32>
    %407 = arith.mulf %369, %406 : vector<16x128xf32>
    %408 = arith.addf %342, %407 : vector<16x128xf32>
    %c92 = arith.constant 92 : index
    %409 = memref.load %arg1[%c92] : memref<144xf32, #tpu.memory_space<smem>>
    %410 = vector.broadcast %409 : f32 to vector<16x128xf32>
    %411 = arith.mulf %372, %410 : vector<16x128xf32>
    %412 = arith.addf %408, %411 : vector<16x128xf32>
    %c85 = arith.constant 85 : index
    %413 = memref.load %arg1[%c85] : memref<144xf32, #tpu.memory_space<smem>>
    %414 = vector.broadcast %413 : f32 to vector<16x128xf32>
    %415 = arith.mulf %369, %414 : vector<16x128xf32>
    %416 = arith.addf %350, %415 : vector<16x128xf32>
    %c93 = arith.constant 93 : index
    %417 = memref.load %arg1[%c93] : memref<144xf32, #tpu.memory_space<smem>>
    %418 = vector.broadcast %417 : f32 to vector<16x128xf32>
    %419 = arith.mulf %372, %418 : vector<16x128xf32>
    %420 = arith.addf %416, %419 : vector<16x128xf32>
    %c86 = arith.constant 86 : index
    %421 = memref.load %arg1[%c86] : memref<144xf32, #tpu.memory_space<smem>>
    %422 = vector.broadcast %421 : f32 to vector<16x128xf32>
    %423 = arith.mulf %369, %422 : vector<16x128xf32>
    %424 = arith.addf %358, %423 : vector<16x128xf32>
    %c94 = arith.constant 94 : index
    %425 = memref.load %arg1[%c94] : memref<144xf32, #tpu.memory_space<smem>>
    %426 = vector.broadcast %425 : f32 to vector<16x128xf32>
    %427 = arith.mulf %372, %426 : vector<16x128xf32>
    %428 = arith.addf %424, %427 : vector<16x128xf32>
    %c87 = arith.constant 87 : index
    %429 = memref.load %arg1[%c87] : memref<144xf32, #tpu.memory_space<smem>>
    %430 = vector.broadcast %429 : f32 to vector<16x128xf32>
    %431 = arith.mulf %369, %430 : vector<16x128xf32>
    %432 = arith.addf %366, %431 : vector<16x128xf32>
    %c95 = arith.constant 95 : index
    %433 = memref.load %arg1[%c95] : memref<144xf32, #tpu.memory_space<smem>>
    %434 = vector.broadcast %433 : f32 to vector<16x128xf32>
    %435 = arith.mulf %372, %434 : vector<16x128xf32>
    %436 = arith.addf %432, %435 : vector<16x128xf32>
    %c15_i32_34 = arith.constant 15 : i32
    %437 = tpu.dynamic_rotate %4 by %c15_i32_34 dim 0 : vector<16x128xf32>, i32 -> vector<16x128xf32>
    %cst_35 = arith.constant 0.000000e+00 : f32
    %438 = vector.broadcast %cst_35 : f32 to vector<16x128xf32>
    %439 = arith.select %10, %437, %438 : vector<16x128xi1>, vector<16x128xf32>
    %c15_i32_36 = arith.constant 15 : i32
    %440 = tpu.dynamic_rotate %3 by %c15_i32_36 dim 0 : vector<16x128xf32>, i32 -> vector<16x128xf32>
    %cst_37 = arith.constant 0.000000e+00 : f32
    %441 = vector.broadcast %cst_37 : f32 to vector<16x128xf32>
    %442 = arith.select %10, %440, %441 : vector<16x128xi1>, vector<16x128xf32>
    %c1_i32_38 = arith.constant 1 : i32
    %443 = tpu.dynamic_rotate %439 by %c1_i32_38 dim 1 : vector<16x128xf32>, i32 -> vector<16x128xf32>
    %cst_39 = arith.constant 0.000000e+00 : f32
    %444 = vector.broadcast %cst_39 : f32 to vector<16x128xf32>
    %445 = arith.select %12, %443, %444 : vector<16x128xi1>, vector<16x128xf32>
    %c1_i32_40 = arith.constant 1 : i32
    %446 = tpu.dynamic_rotate %442 by %c1_i32_40 dim 1 : vector<16x128xf32>, i32 -> vector<16x128xf32>
    %cst_41 = arith.constant 0.000000e+00 : f32
    %447 = vector.broadcast %cst_41 : f32 to vector<16x128xf32>
    %448 = arith.select %12, %446, %447 : vector<16x128xi1>, vector<16x128xf32>
    %c96 = arith.constant 96 : index
    %449 = memref.load %arg1[%c96] : memref<144xf32, #tpu.memory_space<smem>>
    %450 = vector.broadcast %449 : f32 to vector<16x128xf32>
    %451 = arith.mulf %445, %450 : vector<16x128xf32>
    %452 = arith.addf %380, %451 : vector<16x128xf32>
    %c104 = arith.constant 104 : index
    %453 = memref.load %arg1[%c104] : memref<144xf32, #tpu.memory_space<smem>>
    %454 = vector.broadcast %453 : f32 to vector<16x128xf32>
    %455 = arith.mulf %448, %454 : vector<16x128xf32>
    %456 = arith.addf %452, %455 : vector<16x128xf32>
    %c97 = arith.constant 97 : index
    %457 = memref.load %arg1[%c97] : memref<144xf32, #tpu.memory_space<smem>>
    %458 = vector.broadcast %457 : f32 to vector<16x128xf32>
    %459 = arith.mulf %445, %458 : vector<16x128xf32>
    %460 = arith.addf %388, %459 : vector<16x128xf32>
    %c105 = arith.constant 105 : index
    %461 = memref.load %arg1[%c105] : memref<144xf32, #tpu.memory_space<smem>>
    %462 = vector.broadcast %461 : f32 to vector<16x128xf32>
    %463 = arith.mulf %448, %462 : vector<16x128xf32>
    %464 = arith.addf %460, %463 : vector<16x128xf32>
    %c98 = arith.constant 98 : index
    %465 = memref.load %arg1[%c98] : memref<144xf32, #tpu.memory_space<smem>>
    %466 = vector.broadcast %465 : f32 to vector<16x128xf32>
    %467 = arith.mulf %445, %466 : vector<16x128xf32>
    %468 = arith.addf %396, %467 : vector<16x128xf32>
    %c106 = arith.constant 106 : index
    %469 = memref.load %arg1[%c106] : memref<144xf32, #tpu.memory_space<smem>>
    %470 = vector.broadcast %469 : f32 to vector<16x128xf32>
    %471 = arith.mulf %448, %470 : vector<16x128xf32>
    %472 = arith.addf %468, %471 : vector<16x128xf32>
    %c99 = arith.constant 99 : index
    %473 = memref.load %arg1[%c99] : memref<144xf32, #tpu.memory_space<smem>>
    %474 = vector.broadcast %473 : f32 to vector<16x128xf32>
    %475 = arith.mulf %445, %474 : vector<16x128xf32>
    %476 = arith.addf %404, %475 : vector<16x128xf32>
    %c107 = arith.constant 107 : index
    %477 = memref.load %arg1[%c107] : memref<144xf32, #tpu.memory_space<smem>>
    %478 = vector.broadcast %477 : f32 to vector<16x128xf32>
    %479 = arith.mulf %448, %478 : vector<16x128xf32>
    %480 = arith.addf %476, %479 : vector<16x128xf32>
    %c100 = arith.constant 100 : index
    %481 = memref.load %arg1[%c100] : memref<144xf32, #tpu.memory_space<smem>>
    %482 = vector.broadcast %481 : f32 to vector<16x128xf32>
    %483 = arith.mulf %445, %482 : vector<16x128xf32>
    %484 = arith.addf %412, %483 : vector<16x128xf32>
    %c108 = arith.constant 108 : index
    %485 = memref.load %arg1[%c108] : memref<144xf32, #tpu.memory_space<smem>>
    %486 = vector.broadcast %485 : f32 to vector<16x128xf32>
    %487 = arith.mulf %448, %486 : vector<16x128xf32>
    %488 = arith.addf %484, %487 : vector<16x128xf32>
    %c101 = arith.constant 101 : index
    %489 = memref.load %arg1[%c101] : memref<144xf32, #tpu.memory_space<smem>>
    %490 = vector.broadcast %489 : f32 to vector<16x128xf32>
    %491 = arith.mulf %445, %490 : vector<16x128xf32>
    %492 = arith.addf %420, %491 : vector<16x128xf32>
    %c109 = arith.constant 109 : index
    %493 = memref.load %arg1[%c109] : memref<144xf32, #tpu.memory_space<smem>>
    %494 = vector.broadcast %493 : f32 to vector<16x128xf32>
    %495 = arith.mulf %448, %494 : vector<16x128xf32>
    %496 = arith.addf %492, %495 : vector<16x128xf32>
    %c102 = arith.constant 102 : index
    %497 = memref.load %arg1[%c102] : memref<144xf32, #tpu.memory_space<smem>>
    %498 = vector.broadcast %497 : f32 to vector<16x128xf32>
    %499 = arith.mulf %445, %498 : vector<16x128xf32>
    %500 = arith.addf %428, %499 : vector<16x128xf32>
    %c110 = arith.constant 110 : index
    %501 = memref.load %arg1[%c110] : memref<144xf32, #tpu.memory_space<smem>>
    %502 = vector.broadcast %501 : f32 to vector<16x128xf32>
    %503 = arith.mulf %448, %502 : vector<16x128xf32>
    %504 = arith.addf %500, %503 : vector<16x128xf32>
    %c103 = arith.constant 103 : index
    %505 = memref.load %arg1[%c103] : memref<144xf32, #tpu.memory_space<smem>>
    %506 = vector.broadcast %505 : f32 to vector<16x128xf32>
    %507 = arith.mulf %445, %506 : vector<16x128xf32>
    %508 = arith.addf %436, %507 : vector<16x128xf32>
    %c111 = arith.constant 111 : index
    %509 = memref.load %arg1[%c111] : memref<144xf32, #tpu.memory_space<smem>>
    %510 = vector.broadcast %509 : f32 to vector<16x128xf32>
    %511 = arith.mulf %448, %510 : vector<16x128xf32>
    %512 = arith.addf %508, %511 : vector<16x128xf32>
    %c112 = arith.constant 112 : index
    %513 = memref.load %arg1[%c112] : memref<144xf32, #tpu.memory_space<smem>>
    %514 = vector.broadcast %513 : f32 to vector<16x128xf32>
    %515 = arith.mulf %439, %514 : vector<16x128xf32>
    %516 = arith.addf %456, %515 : vector<16x128xf32>
    %c120 = arith.constant 120 : index
    %517 = memref.load %arg1[%c120] : memref<144xf32, #tpu.memory_space<smem>>
    %518 = vector.broadcast %517 : f32 to vector<16x128xf32>
    %519 = arith.mulf %442, %518 : vector<16x128xf32>
    %520 = arith.addf %516, %519 : vector<16x128xf32>
    %c113 = arith.constant 113 : index
    %521 = memref.load %arg1[%c113] : memref<144xf32, #tpu.memory_space<smem>>
    %522 = vector.broadcast %521 : f32 to vector<16x128xf32>
    %523 = arith.mulf %439, %522 : vector<16x128xf32>
    %524 = arith.addf %464, %523 : vector<16x128xf32>
    %c121 = arith.constant 121 : index
    %525 = memref.load %arg1[%c121] : memref<144xf32, #tpu.memory_space<smem>>
    %526 = vector.broadcast %525 : f32 to vector<16x128xf32>
    %527 = arith.mulf %442, %526 : vector<16x128xf32>
    %528 = arith.addf %524, %527 : vector<16x128xf32>
    %c114 = arith.constant 114 : index
    %529 = memref.load %arg1[%c114] : memref<144xf32, #tpu.memory_space<smem>>
    %530 = vector.broadcast %529 : f32 to vector<16x128xf32>
    %531 = arith.mulf %439, %530 : vector<16x128xf32>
    %532 = arith.addf %472, %531 : vector<16x128xf32>
    %c122 = arith.constant 122 : index
    %533 = memref.load %arg1[%c122] : memref<144xf32, #tpu.memory_space<smem>>
    %534 = vector.broadcast %533 : f32 to vector<16x128xf32>
    %535 = arith.mulf %442, %534 : vector<16x128xf32>
    %536 = arith.addf %532, %535 : vector<16x128xf32>
    %c115 = arith.constant 115 : index
    %537 = memref.load %arg1[%c115] : memref<144xf32, #tpu.memory_space<smem>>
    %538 = vector.broadcast %537 : f32 to vector<16x128xf32>
    %539 = arith.mulf %439, %538 : vector<16x128xf32>
    %540 = arith.addf %480, %539 : vector<16x128xf32>
    %c123 = arith.constant 123 : index
    %541 = memref.load %arg1[%c123] : memref<144xf32, #tpu.memory_space<smem>>
    %542 = vector.broadcast %541 : f32 to vector<16x128xf32>
    %543 = arith.mulf %442, %542 : vector<16x128xf32>
    %544 = arith.addf %540, %543 : vector<16x128xf32>
    %c116 = arith.constant 116 : index
    %545 = memref.load %arg1[%c116] : memref<144xf32, #tpu.memory_space<smem>>
    %546 = vector.broadcast %545 : f32 to vector<16x128xf32>
    %547 = arith.mulf %439, %546 : vector<16x128xf32>
    %548 = arith.addf %488, %547 : vector<16x128xf32>
    %c124 = arith.constant 124 : index
    %549 = memref.load %arg1[%c124] : memref<144xf32, #tpu.memory_space<smem>>
    %550 = vector.broadcast %549 : f32 to vector<16x128xf32>
    %551 = arith.mulf %442, %550 : vector<16x128xf32>
    %552 = arith.addf %548, %551 : vector<16x128xf32>
    %c117 = arith.constant 117 : index
    %553 = memref.load %arg1[%c117] : memref<144xf32, #tpu.memory_space<smem>>
    %554 = vector.broadcast %553 : f32 to vector<16x128xf32>
    %555 = arith.mulf %439, %554 : vector<16x128xf32>
    %556 = arith.addf %496, %555 : vector<16x128xf32>
    %c125 = arith.constant 125 : index
    %557 = memref.load %arg1[%c125] : memref<144xf32, #tpu.memory_space<smem>>
    %558 = vector.broadcast %557 : f32 to vector<16x128xf32>
    %559 = arith.mulf %442, %558 : vector<16x128xf32>
    %560 = arith.addf %556, %559 : vector<16x128xf32>
    %c118 = arith.constant 118 : index
    %561 = memref.load %arg1[%c118] : memref<144xf32, #tpu.memory_space<smem>>
    %562 = vector.broadcast %561 : f32 to vector<16x128xf32>
    %563 = arith.mulf %439, %562 : vector<16x128xf32>
    %564 = arith.addf %504, %563 : vector<16x128xf32>
    %c126 = arith.constant 126 : index
    %565 = memref.load %arg1[%c126] : memref<144xf32, #tpu.memory_space<smem>>
    %566 = vector.broadcast %565 : f32 to vector<16x128xf32>
    %567 = arith.mulf %442, %566 : vector<16x128xf32>
    %568 = arith.addf %564, %567 : vector<16x128xf32>
    %c119 = arith.constant 119 : index
    %569 = memref.load %arg1[%c119] : memref<144xf32, #tpu.memory_space<smem>>
    %570 = vector.broadcast %569 : f32 to vector<16x128xf32>
    %571 = arith.mulf %439, %570 : vector<16x128xf32>
    %572 = arith.addf %512, %571 : vector<16x128xf32>
    %c127 = arith.constant 127 : index
    %573 = memref.load %arg1[%c127] : memref<144xf32, #tpu.memory_space<smem>>
    %574 = vector.broadcast %573 : f32 to vector<16x128xf32>
    %575 = arith.mulf %442, %574 : vector<16x128xf32>
    %576 = arith.addf %572, %575 : vector<16x128xf32>
    %c127_i32_42 = arith.constant 127 : i32
    %577 = tpu.dynamic_rotate %439 by %c127_i32_42 dim 1 : vector<16x128xf32>, i32 -> vector<16x128xf32>
    %cst_43 = arith.constant 0.000000e+00 : f32
    %578 = vector.broadcast %cst_43 : f32 to vector<16x128xf32>
    %579 = arith.select %14, %577, %578 : vector<16x128xi1>, vector<16x128xf32>
    %c127_i32_44 = arith.constant 127 : i32
    %580 = tpu.dynamic_rotate %442 by %c127_i32_44 dim 1 : vector<16x128xf32>, i32 -> vector<16x128xf32>
    %cst_45 = arith.constant 0.000000e+00 : f32
    %581 = vector.broadcast %cst_45 : f32 to vector<16x128xf32>
    %582 = arith.select %14, %580, %581 : vector<16x128xi1>, vector<16x128xf32>
    %c128 = arith.constant 128 : index
    %583 = memref.load %arg1[%c128] : memref<144xf32, #tpu.memory_space<smem>>
    %584 = vector.broadcast %583 : f32 to vector<16x128xf32>
    %585 = arith.mulf %579, %584 : vector<16x128xf32>
    %586 = arith.addf %520, %585 : vector<16x128xf32>
    %c136 = arith.constant 136 : index
    %587 = memref.load %arg1[%c136] : memref<144xf32, #tpu.memory_space<smem>>
    %588 = vector.broadcast %587 : f32 to vector<16x128xf32>
    %589 = arith.mulf %582, %588 : vector<16x128xf32>
    %590 = arith.addf %586, %589 : vector<16x128xf32>
    %c129 = arith.constant 129 : index
    %591 = memref.load %arg1[%c129] : memref<144xf32, #tpu.memory_space<smem>>
    %592 = vector.broadcast %591 : f32 to vector<16x128xf32>
    %593 = arith.mulf %579, %592 : vector<16x128xf32>
    %594 = arith.addf %528, %593 : vector<16x128xf32>
    %c137 = arith.constant 137 : index
    %595 = memref.load %arg1[%c137] : memref<144xf32, #tpu.memory_space<smem>>
    %596 = vector.broadcast %595 : f32 to vector<16x128xf32>
    %597 = arith.mulf %582, %596 : vector<16x128xf32>
    %598 = arith.addf %594, %597 : vector<16x128xf32>
    %c130 = arith.constant 130 : index
    %599 = memref.load %arg1[%c130] : memref<144xf32, #tpu.memory_space<smem>>
    %600 = vector.broadcast %599 : f32 to vector<16x128xf32>
    %601 = arith.mulf %579, %600 : vector<16x128xf32>
    %602 = arith.addf %536, %601 : vector<16x128xf32>
    %c138 = arith.constant 138 : index
    %603 = memref.load %arg1[%c138] : memref<144xf32, #tpu.memory_space<smem>>
    %604 = vector.broadcast %603 : f32 to vector<16x128xf32>
    %605 = arith.mulf %582, %604 : vector<16x128xf32>
    %606 = arith.addf %602, %605 : vector<16x128xf32>
    %c131 = arith.constant 131 : index
    %607 = memref.load %arg1[%c131] : memref<144xf32, #tpu.memory_space<smem>>
    %608 = vector.broadcast %607 : f32 to vector<16x128xf32>
    %609 = arith.mulf %579, %608 : vector<16x128xf32>
    %610 = arith.addf %544, %609 : vector<16x128xf32>
    %c139 = arith.constant 139 : index
    %611 = memref.load %arg1[%c139] : memref<144xf32, #tpu.memory_space<smem>>
    %612 = vector.broadcast %611 : f32 to vector<16x128xf32>
    %613 = arith.mulf %582, %612 : vector<16x128xf32>
    %614 = arith.addf %610, %613 : vector<16x128xf32>
    %c132 = arith.constant 132 : index
    %615 = memref.load %arg1[%c132] : memref<144xf32, #tpu.memory_space<smem>>
    %616 = vector.broadcast %615 : f32 to vector<16x128xf32>
    %617 = arith.mulf %579, %616 : vector<16x128xf32>
    %618 = arith.addf %552, %617 : vector<16x128xf32>
    %c140 = arith.constant 140 : index
    %619 = memref.load %arg1[%c140] : memref<144xf32, #tpu.memory_space<smem>>
    %620 = vector.broadcast %619 : f32 to vector<16x128xf32>
    %621 = arith.mulf %582, %620 : vector<16x128xf32>
    %622 = arith.addf %618, %621 : vector<16x128xf32>
    %c133 = arith.constant 133 : index
    %623 = memref.load %arg1[%c133] : memref<144xf32, #tpu.memory_space<smem>>
    %624 = vector.broadcast %623 : f32 to vector<16x128xf32>
    %625 = arith.mulf %579, %624 : vector<16x128xf32>
    %626 = arith.addf %560, %625 : vector<16x128xf32>
    %c141 = arith.constant 141 : index
    %627 = memref.load %arg1[%c141] : memref<144xf32, #tpu.memory_space<smem>>
    %628 = vector.broadcast %627 : f32 to vector<16x128xf32>
    %629 = arith.mulf %582, %628 : vector<16x128xf32>
    %630 = arith.addf %626, %629 : vector<16x128xf32>
    %c134 = arith.constant 134 : index
    %631 = memref.load %arg1[%c134] : memref<144xf32, #tpu.memory_space<smem>>
    %632 = vector.broadcast %631 : f32 to vector<16x128xf32>
    %633 = arith.mulf %579, %632 : vector<16x128xf32>
    %634 = arith.addf %568, %633 : vector<16x128xf32>
    %c142 = arith.constant 142 : index
    %635 = memref.load %arg1[%c142] : memref<144xf32, #tpu.memory_space<smem>>
    %636 = vector.broadcast %635 : f32 to vector<16x128xf32>
    %637 = arith.mulf %582, %636 : vector<16x128xf32>
    %638 = arith.addf %634, %637 : vector<16x128xf32>
    %c135 = arith.constant 135 : index
    %639 = memref.load %arg1[%c135] : memref<144xf32, #tpu.memory_space<smem>>
    %640 = vector.broadcast %639 : f32 to vector<16x128xf32>
    %641 = arith.mulf %579, %640 : vector<16x128xf32>
    %642 = arith.addf %576, %641 : vector<16x128xf32>
    %c143 = arith.constant 143 : index
    %643 = memref.load %arg1[%c143] : memref<144xf32, #tpu.memory_space<smem>>
    %644 = vector.broadcast %643 : f32 to vector<16x128xf32>
    %645 = arith.mulf %582, %644 : vector<16x128xf32>
    %646 = arith.addf %642, %645 : vector<16x128xf32>
    %c0_46 = arith.constant 0 : index
    %647 = memref.load %arg2[%c0_46] : memref<8xf32, #tpu.memory_space<smem>>
    %648 = vector.broadcast %647 : f32 to vector<16x128xf32>
    %649 = arith.addf %590, %648 : vector<16x128xf32>
    %cst_47 = arith.constant 0.000000e+00 : f32
    %650 = vector.broadcast %cst_47 : f32 to vector<16x128xf32>
    %651 = arith.maximumf %649, %650 : vector<16x128xf32>
    %c1_48 = arith.constant 1 : index
    %652 = memref.load %arg2[%c1_48] : memref<8xf32, #tpu.memory_space<smem>>
    %653 = vector.broadcast %652 : f32 to vector<16x128xf32>
    %654 = arith.addf %598, %653 : vector<16x128xf32>
    %cst_49 = arith.constant 0.000000e+00 : f32
    %655 = vector.broadcast %cst_49 : f32 to vector<16x128xf32>
    %656 = arith.maximumf %654, %655 : vector<16x128xf32>
    %c2_50 = arith.constant 2 : index
    %657 = memref.load %arg2[%c2_50] : memref<8xf32, #tpu.memory_space<smem>>
    %658 = vector.broadcast %657 : f32 to vector<16x128xf32>
    %659 = arith.addf %606, %658 : vector<16x128xf32>
    %cst_51 = arith.constant 0.000000e+00 : f32
    %660 = vector.broadcast %cst_51 : f32 to vector<16x128xf32>
    %661 = arith.maximumf %659, %660 : vector<16x128xf32>
    %c3_52 = arith.constant 3 : index
    %662 = memref.load %arg2[%c3_52] : memref<8xf32, #tpu.memory_space<smem>>
    %663 = vector.broadcast %662 : f32 to vector<16x128xf32>
    %664 = arith.addf %614, %663 : vector<16x128xf32>
    %cst_53 = arith.constant 0.000000e+00 : f32
    %665 = vector.broadcast %cst_53 : f32 to vector<16x128xf32>
    %666 = arith.maximumf %664, %665 : vector<16x128xf32>
    %c4_54 = arith.constant 4 : index
    %667 = memref.load %arg2[%c4_54] : memref<8xf32, #tpu.memory_space<smem>>
    %668 = vector.broadcast %667 : f32 to vector<16x128xf32>
    %669 = arith.addf %622, %668 : vector<16x128xf32>
    %cst_55 = arith.constant 0.000000e+00 : f32
    %670 = vector.broadcast %cst_55 : f32 to vector<16x128xf32>
    %671 = arith.maximumf %669, %670 : vector<16x128xf32>
    %c5_56 = arith.constant 5 : index
    %672 = memref.load %arg2[%c5_56] : memref<8xf32, #tpu.memory_space<smem>>
    %673 = vector.broadcast %672 : f32 to vector<16x128xf32>
    %674 = arith.addf %630, %673 : vector<16x128xf32>
    %cst_57 = arith.constant 0.000000e+00 : f32
    %675 = vector.broadcast %cst_57 : f32 to vector<16x128xf32>
    %676 = arith.maximumf %674, %675 : vector<16x128xf32>
    %c6_58 = arith.constant 6 : index
    %677 = memref.load %arg2[%c6_58] : memref<8xf32, #tpu.memory_space<smem>>
    %678 = vector.broadcast %677 : f32 to vector<16x128xf32>
    %679 = arith.addf %638, %678 : vector<16x128xf32>
    %cst_59 = arith.constant 0.000000e+00 : f32
    %680 = vector.broadcast %cst_59 : f32 to vector<16x128xf32>
    %681 = arith.maximumf %679, %680 : vector<16x128xf32>
    %c7_60 = arith.constant 7 : index
    %682 = memref.load %arg2[%c7_60] : memref<8xf32, #tpu.memory_space<smem>>
    %683 = vector.broadcast %682 : f32 to vector<16x128xf32>
    %684 = arith.addf %646, %683 : vector<16x128xf32>
    %cst_61 = arith.constant 0.000000e+00 : f32
    %685 = vector.broadcast %cst_61 : f32 to vector<16x128xf32>
    %686 = arith.maximumf %684, %685 : vector<16x128xf32>
    %cst_62 = arith.constant 0.000000e+00 : f32
    %687 = vector.broadcast %cst_62 : f32 to vector<16x128xf32>
    %cst_63 = arith.constant 0.000000e+00 : f32
    %688 = vector.broadcast %cst_63 : f32 to vector<16x128xf32>
    %cst_64 = arith.constant 0.000000e+00 : f32
    %689 = vector.broadcast %cst_64 : f32 to vector<16x128xf32>
    %cst_65 = arith.constant 0.000000e+00 : f32
    %690 = vector.broadcast %cst_65 : f32 to vector<16x128xf32>
    %c1_i32_66 = arith.constant 1 : i32
    %691 = tpu.dynamic_rotate %651 by %c1_i32_66 dim 0 : vector<16x128xf32>, i32 -> vector<16x128xf32>
    %cst_67 = arith.constant 0.000000e+00 : f32
    %692 = vector.broadcast %cst_67 : f32 to vector<16x128xf32>
    %693 = arith.select %8, %691, %692 : vector<16x128xi1>, vector<16x128xf32>
    %c1_i32_68 = arith.constant 1 : i32
    %694 = tpu.dynamic_rotate %693 by %c1_i32_68 dim 1 : vector<16x128xf32>, i32 -> vector<16x128xf32>
    %cst_69 = arith.constant 0.000000e+00 : f32
    %695 = vector.broadcast %cst_69 : f32 to vector<16x128xf32>
    %696 = arith.select %12, %694, %695 : vector<16x128xi1>, vector<16x128xf32>
    %c0_70 = arith.constant 0 : index
    %697 = memref.load %arg3[%c0_70] : memref<288xf32, #tpu.memory_space<smem>>
    %698 = vector.broadcast %697 : f32 to vector<16x128xf32>
    %699 = arith.mulf %696, %698 : vector<16x128xf32>
    %700 = arith.addf %687, %699 : vector<16x128xf32>
    %c1_71 = arith.constant 1 : index
    %701 = memref.load %arg3[%c1_71] : memref<288xf32, #tpu.memory_space<smem>>
    %702 = vector.broadcast %701 : f32 to vector<16x128xf32>
    %703 = arith.mulf %696, %702 : vector<16x128xf32>
    %704 = arith.addf %688, %703 : vector<16x128xf32>
    %c2_72 = arith.constant 2 : index
    %705 = memref.load %arg3[%c2_72] : memref<288xf32, #tpu.memory_space<smem>>
    %706 = vector.broadcast %705 : f32 to vector<16x128xf32>
    %707 = arith.mulf %696, %706 : vector<16x128xf32>
    %708 = arith.addf %689, %707 : vector<16x128xf32>
    %c3_73 = arith.constant 3 : index
    %709 = memref.load %arg3[%c3_73] : memref<288xf32, #tpu.memory_space<smem>>
    %710 = vector.broadcast %709 : f32 to vector<16x128xf32>
    %711 = arith.mulf %696, %710 : vector<16x128xf32>
    %712 = arith.addf %690, %711 : vector<16x128xf32>
    %c32_74 = arith.constant 32 : index
    %713 = memref.load %arg3[%c32_74] : memref<288xf32, #tpu.memory_space<smem>>
    %714 = vector.broadcast %713 : f32 to vector<16x128xf32>
    %715 = arith.mulf %693, %714 : vector<16x128xf32>
    %716 = arith.addf %700, %715 : vector<16x128xf32>
    %c33_75 = arith.constant 33 : index
    %717 = memref.load %arg3[%c33_75] : memref<288xf32, #tpu.memory_space<smem>>
    %718 = vector.broadcast %717 : f32 to vector<16x128xf32>
    %719 = arith.mulf %693, %718 : vector<16x128xf32>
    %720 = arith.addf %704, %719 : vector<16x128xf32>
    %c34_76 = arith.constant 34 : index
    %721 = memref.load %arg3[%c34_76] : memref<288xf32, #tpu.memory_space<smem>>
    %722 = vector.broadcast %721 : f32 to vector<16x128xf32>
    %723 = arith.mulf %693, %722 : vector<16x128xf32>
    %724 = arith.addf %708, %723 : vector<16x128xf32>
    %c35_77 = arith.constant 35 : index
    %725 = memref.load %arg3[%c35_77] : memref<288xf32, #tpu.memory_space<smem>>
    %726 = vector.broadcast %725 : f32 to vector<16x128xf32>
    %727 = arith.mulf %693, %726 : vector<16x128xf32>
    %728 = arith.addf %712, %727 : vector<16x128xf32>
    %c127_i32_78 = arith.constant 127 : i32
    %729 = tpu.dynamic_rotate %693 by %c127_i32_78 dim 1 : vector<16x128xf32>, i32 -> vector<16x128xf32>
    %cst_79 = arith.constant 0.000000e+00 : f32
    %730 = vector.broadcast %cst_79 : f32 to vector<16x128xf32>
    %731 = arith.select %14, %729, %730 : vector<16x128xi1>, vector<16x128xf32>
    %c64_80 = arith.constant 64 : index
    %732 = memref.load %arg3[%c64_80] : memref<288xf32, #tpu.memory_space<smem>>
    %733 = vector.broadcast %732 : f32 to vector<16x128xf32>
    %734 = arith.mulf %731, %733 : vector<16x128xf32>
    %735 = arith.addf %716, %734 : vector<16x128xf32>
    %c65_81 = arith.constant 65 : index
    %736 = memref.load %arg3[%c65_81] : memref<288xf32, #tpu.memory_space<smem>>
    %737 = vector.broadcast %736 : f32 to vector<16x128xf32>
    %738 = arith.mulf %731, %737 : vector<16x128xf32>
    %739 = arith.addf %720, %738 : vector<16x128xf32>
    %c66_82 = arith.constant 66 : index
    %740 = memref.load %arg3[%c66_82] : memref<288xf32, #tpu.memory_space<smem>>
    %741 = vector.broadcast %740 : f32 to vector<16x128xf32>
    %742 = arith.mulf %731, %741 : vector<16x128xf32>
    %743 = arith.addf %724, %742 : vector<16x128xf32>
    %c67_83 = arith.constant 67 : index
    %744 = memref.load %arg3[%c67_83] : memref<288xf32, #tpu.memory_space<smem>>
    %745 = vector.broadcast %744 : f32 to vector<16x128xf32>
    %746 = arith.mulf %731, %745 : vector<16x128xf32>
    %747 = arith.addf %728, %746 : vector<16x128xf32>
    %c1_i32_84 = arith.constant 1 : i32
    %748 = tpu.dynamic_rotate %651 by %c1_i32_84 dim 1 : vector<16x128xf32>, i32 -> vector<16x128xf32>
    %cst_85 = arith.constant 0.000000e+00 : f32
    %749 = vector.broadcast %cst_85 : f32 to vector<16x128xf32>
    %750 = arith.select %12, %748, %749 : vector<16x128xi1>, vector<16x128xf32>
    %c96_86 = arith.constant 96 : index
    %751 = memref.load %arg3[%c96_86] : memref<288xf32, #tpu.memory_space<smem>>
    %752 = vector.broadcast %751 : f32 to vector<16x128xf32>
    %753 = arith.mulf %750, %752 : vector<16x128xf32>
    %754 = arith.addf %735, %753 : vector<16x128xf32>
    %c97_87 = arith.constant 97 : index
    %755 = memref.load %arg3[%c97_87] : memref<288xf32, #tpu.memory_space<smem>>
    %756 = vector.broadcast %755 : f32 to vector<16x128xf32>
    %757 = arith.mulf %750, %756 : vector<16x128xf32>
    %758 = arith.addf %739, %757 : vector<16x128xf32>
    %c98_88 = arith.constant 98 : index
    %759 = memref.load %arg3[%c98_88] : memref<288xf32, #tpu.memory_space<smem>>
    %760 = vector.broadcast %759 : f32 to vector<16x128xf32>
    %761 = arith.mulf %750, %760 : vector<16x128xf32>
    %762 = arith.addf %743, %761 : vector<16x128xf32>
    %c99_89 = arith.constant 99 : index
    %763 = memref.load %arg3[%c99_89] : memref<288xf32, #tpu.memory_space<smem>>
    %764 = vector.broadcast %763 : f32 to vector<16x128xf32>
    %765 = arith.mulf %750, %764 : vector<16x128xf32>
    %766 = arith.addf %747, %765 : vector<16x128xf32>
    %c128_90 = arith.constant 128 : index
    %767 = memref.load %arg3[%c128_90] : memref<288xf32, #tpu.memory_space<smem>>
    %768 = vector.broadcast %767 : f32 to vector<16x128xf32>
    %769 = arith.mulf %651, %768 : vector<16x128xf32>
    %770 = arith.addf %754, %769 : vector<16x128xf32>
    %c129_91 = arith.constant 129 : index
    %771 = memref.load %arg3[%c129_91] : memref<288xf32, #tpu.memory_space<smem>>
    %772 = vector.broadcast %771 : f32 to vector<16x128xf32>
    %773 = arith.mulf %651, %772 : vector<16x128xf32>
    %774 = arith.addf %758, %773 : vector<16x128xf32>
    %c130_92 = arith.constant 130 : index
    %775 = memref.load %arg3[%c130_92] : memref<288xf32, #tpu.memory_space<smem>>
    %776 = vector.broadcast %775 : f32 to vector<16x128xf32>
    %777 = arith.mulf %651, %776 : vector<16x128xf32>
    %778 = arith.addf %762, %777 : vector<16x128xf32>
    %c131_93 = arith.constant 131 : index
    %779 = memref.load %arg3[%c131_93] : memref<288xf32, #tpu.memory_space<smem>>
    %780 = vector.broadcast %779 : f32 to vector<16x128xf32>
    %781 = arith.mulf %651, %780 : vector<16x128xf32>
    %782 = arith.addf %766, %781 : vector<16x128xf32>
    %c127_i32_94 = arith.constant 127 : i32
    %783 = tpu.dynamic_rotate %651 by %c127_i32_94 dim 1 : vector<16x128xf32>, i32 -> vector<16x128xf32>
    %cst_95 = arith.constant 0.000000e+00 : f32
    %784 = vector.broadcast %cst_95 : f32 to vector<16x128xf32>
    %785 = arith.select %14, %783, %784 : vector<16x128xi1>, vector<16x128xf32>
    %c160 = arith.constant 160 : index
    %786 = memref.load %arg3[%c160] : memref<288xf32, #tpu.memory_space<smem>>
    %787 = vector.broadcast %786 : f32 to vector<16x128xf32>
    %788 = arith.mulf %785, %787 : vector<16x128xf32>
    %789 = arith.addf %770, %788 : vector<16x128xf32>
    %c161 = arith.constant 161 : index
    %790 = memref.load %arg3[%c161] : memref<288xf32, #tpu.memory_space<smem>>
    %791 = vector.broadcast %790 : f32 to vector<16x128xf32>
    %792 = arith.mulf %785, %791 : vector<16x128xf32>
    %793 = arith.addf %774, %792 : vector<16x128xf32>
    %c162 = arith.constant 162 : index
    %794 = memref.load %arg3[%c162] : memref<288xf32, #tpu.memory_space<smem>>
    %795 = vector.broadcast %794 : f32 to vector<16x128xf32>
    %796 = arith.mulf %785, %795 : vector<16x128xf32>
    %797 = arith.addf %778, %796 : vector<16x128xf32>
    %c163 = arith.constant 163 : index
    %798 = memref.load %arg3[%c163] : memref<288xf32, #tpu.memory_space<smem>>
    %799 = vector.broadcast %798 : f32 to vector<16x128xf32>
    %800 = arith.mulf %785, %799 : vector<16x128xf32>
    %801 = arith.addf %782, %800 : vector<16x128xf32>
    %c15_i32_96 = arith.constant 15 : i32
    %802 = tpu.dynamic_rotate %651 by %c15_i32_96 dim 0 : vector<16x128xf32>, i32 -> vector<16x128xf32>
    %cst_97 = arith.constant 0.000000e+00 : f32
    %803 = vector.broadcast %cst_97 : f32 to vector<16x128xf32>
    %804 = arith.select %10, %802, %803 : vector<16x128xi1>, vector<16x128xf32>
    %c1_i32_98 = arith.constant 1 : i32
    %805 = tpu.dynamic_rotate %804 by %c1_i32_98 dim 1 : vector<16x128xf32>, i32 -> vector<16x128xf32>
    %cst_99 = arith.constant 0.000000e+00 : f32
    %806 = vector.broadcast %cst_99 : f32 to vector<16x128xf32>
    %807 = arith.select %12, %805, %806 : vector<16x128xi1>, vector<16x128xf32>
    %c192 = arith.constant 192 : index
    %808 = memref.load %arg3[%c192] : memref<288xf32, #tpu.memory_space<smem>>
    %809 = vector.broadcast %808 : f32 to vector<16x128xf32>
    %810 = arith.mulf %807, %809 : vector<16x128xf32>
    %811 = arith.addf %789, %810 : vector<16x128xf32>
    %c193 = arith.constant 193 : index
    %812 = memref.load %arg3[%c193] : memref<288xf32, #tpu.memory_space<smem>>
    %813 = vector.broadcast %812 : f32 to vector<16x128xf32>
    %814 = arith.mulf %807, %813 : vector<16x128xf32>
    %815 = arith.addf %793, %814 : vector<16x128xf32>
    %c194 = arith.constant 194 : index
    %816 = memref.load %arg3[%c194] : memref<288xf32, #tpu.memory_space<smem>>
    %817 = vector.broadcast %816 : f32 to vector<16x128xf32>
    %818 = arith.mulf %807, %817 : vector<16x128xf32>
    %819 = arith.addf %797, %818 : vector<16x128xf32>
    %c195 = arith.constant 195 : index
    %820 = memref.load %arg3[%c195] : memref<288xf32, #tpu.memory_space<smem>>
    %821 = vector.broadcast %820 : f32 to vector<16x128xf32>
    %822 = arith.mulf %807, %821 : vector<16x128xf32>
    %823 = arith.addf %801, %822 : vector<16x128xf32>
    %c224 = arith.constant 224 : index
    %824 = memref.load %arg3[%c224] : memref<288xf32, #tpu.memory_space<smem>>
    %825 = vector.broadcast %824 : f32 to vector<16x128xf32>
    %826 = arith.mulf %804, %825 : vector<16x128xf32>
    %827 = arith.addf %811, %826 : vector<16x128xf32>
    %c225 = arith.constant 225 : index
    %828 = memref.load %arg3[%c225] : memref<288xf32, #tpu.memory_space<smem>>
    %829 = vector.broadcast %828 : f32 to vector<16x128xf32>
    %830 = arith.mulf %804, %829 : vector<16x128xf32>
    %831 = arith.addf %815, %830 : vector<16x128xf32>
    %c226 = arith.constant 226 : index
    %832 = memref.load %arg3[%c226] : memref<288xf32, #tpu.memory_space<smem>>
    %833 = vector.broadcast %832 : f32 to vector<16x128xf32>
    %834 = arith.mulf %804, %833 : vector<16x128xf32>
    %835 = arith.addf %819, %834 : vector<16x128xf32>
    %c227 = arith.constant 227 : index
    %836 = memref.load %arg3[%c227] : memref<288xf32, #tpu.memory_space<smem>>
    %837 = vector.broadcast %836 : f32 to vector<16x128xf32>
    %838 = arith.mulf %804, %837 : vector<16x128xf32>
    %839 = arith.addf %823, %838 : vector<16x128xf32>
    %c127_i32_100 = arith.constant 127 : i32
    %840 = tpu.dynamic_rotate %804 by %c127_i32_100 dim 1 : vector<16x128xf32>, i32 -> vector<16x128xf32>
    %cst_101 = arith.constant 0.000000e+00 : f32
    %841 = vector.broadcast %cst_101 : f32 to vector<16x128xf32>
    %842 = arith.select %14, %840, %841 : vector<16x128xi1>, vector<16x128xf32>
    %c256 = arith.constant 256 : index
    %843 = memref.load %arg3[%c256] : memref<288xf32, #tpu.memory_space<smem>>
    %844 = vector.broadcast %843 : f32 to vector<16x128xf32>
    %845 = arith.mulf %842, %844 : vector<16x128xf32>
    %846 = arith.addf %827, %845 : vector<16x128xf32>
    %c257 = arith.constant 257 : index
    %847 = memref.load %arg3[%c257] : memref<288xf32, #tpu.memory_space<smem>>
    %848 = vector.broadcast %847 : f32 to vector<16x128xf32>
    %849 = arith.mulf %842, %848 : vector<16x128xf32>
    %850 = arith.addf %831, %849 : vector<16x128xf32>
    %c258 = arith.constant 258 : index
    %851 = memref.load %arg3[%c258] : memref<288xf32, #tpu.memory_space<smem>>
    %852 = vector.broadcast %851 : f32 to vector<16x128xf32>
    %853 = arith.mulf %842, %852 : vector<16x128xf32>
    %854 = arith.addf %835, %853 : vector<16x128xf32>
    %c259 = arith.constant 259 : index
    %855 = memref.load %arg3[%c259] : memref<288xf32, #tpu.memory_space<smem>>
    %856 = vector.broadcast %855 : f32 to vector<16x128xf32>
    %857 = arith.mulf %842, %856 : vector<16x128xf32>
    %858 = arith.addf %839, %857 : vector<16x128xf32>
    %c1_i32_102 = arith.constant 1 : i32
    %859 = tpu.dynamic_rotate %656 by %c1_i32_102 dim 0 : vector<16x128xf32>, i32 -> vector<16x128xf32>
    %cst_103 = arith.constant 0.000000e+00 : f32
    %860 = vector.broadcast %cst_103 : f32 to vector<16x128xf32>
    %861 = arith.select %8, %859, %860 : vector<16x128xi1>, vector<16x128xf32>
    %c1_i32_104 = arith.constant 1 : i32
    %862 = tpu.dynamic_rotate %861 by %c1_i32_104 dim 1 : vector<16x128xf32>, i32 -> vector<16x128xf32>
    %cst_105 = arith.constant 0.000000e+00 : f32
    %863 = vector.broadcast %cst_105 : f32 to vector<16x128xf32>
    %864 = arith.select %12, %862, %863 : vector<16x128xi1>, vector<16x128xf32>
    %c4_106 = arith.constant 4 : index
    %865 = memref.load %arg3[%c4_106] : memref<288xf32, #tpu.memory_space<smem>>
    %866 = vector.broadcast %865 : f32 to vector<16x128xf32>
    %867 = arith.mulf %864, %866 : vector<16x128xf32>
    %868 = arith.addf %846, %867 : vector<16x128xf32>
    %c5_107 = arith.constant 5 : index
    %869 = memref.load %arg3[%c5_107] : memref<288xf32, #tpu.memory_space<smem>>
    %870 = vector.broadcast %869 : f32 to vector<16x128xf32>
    %871 = arith.mulf %864, %870 : vector<16x128xf32>
    %872 = arith.addf %850, %871 : vector<16x128xf32>
    %c6_108 = arith.constant 6 : index
    %873 = memref.load %arg3[%c6_108] : memref<288xf32, #tpu.memory_space<smem>>
    %874 = vector.broadcast %873 : f32 to vector<16x128xf32>
    %875 = arith.mulf %864, %874 : vector<16x128xf32>
    %876 = arith.addf %854, %875 : vector<16x128xf32>
    %c7_109 = arith.constant 7 : index
    %877 = memref.load %arg3[%c7_109] : memref<288xf32, #tpu.memory_space<smem>>
    %878 = vector.broadcast %877 : f32 to vector<16x128xf32>
    %879 = arith.mulf %864, %878 : vector<16x128xf32>
    %880 = arith.addf %858, %879 : vector<16x128xf32>
    %c36_110 = arith.constant 36 : index
    %881 = memref.load %arg3[%c36_110] : memref<288xf32, #tpu.memory_space<smem>>
    %882 = vector.broadcast %881 : f32 to vector<16x128xf32>
    %883 = arith.mulf %861, %882 : vector<16x128xf32>
    %884 = arith.addf %868, %883 : vector<16x128xf32>
    %c37_111 = arith.constant 37 : index
    %885 = memref.load %arg3[%c37_111] : memref<288xf32, #tpu.memory_space<smem>>
    %886 = vector.broadcast %885 : f32 to vector<16x128xf32>
    %887 = arith.mulf %861, %886 : vector<16x128xf32>
    %888 = arith.addf %872, %887 : vector<16x128xf32>
    %c38_112 = arith.constant 38 : index
    %889 = memref.load %arg3[%c38_112] : memref<288xf32, #tpu.memory_space<smem>>
    %890 = vector.broadcast %889 : f32 to vector<16x128xf32>
    %891 = arith.mulf %861, %890 : vector<16x128xf32>
    %892 = arith.addf %876, %891 : vector<16x128xf32>
    %c39_113 = arith.constant 39 : index
    %893 = memref.load %arg3[%c39_113] : memref<288xf32, #tpu.memory_space<smem>>
    %894 = vector.broadcast %893 : f32 to vector<16x128xf32>
    %895 = arith.mulf %861, %894 : vector<16x128xf32>
    %896 = arith.addf %880, %895 : vector<16x128xf32>
    %c127_i32_114 = arith.constant 127 : i32
    %897 = tpu.dynamic_rotate %861 by %c127_i32_114 dim 1 : vector<16x128xf32>, i32 -> vector<16x128xf32>
    %cst_115 = arith.constant 0.000000e+00 : f32
    %898 = vector.broadcast %cst_115 : f32 to vector<16x128xf32>
    %899 = arith.select %14, %897, %898 : vector<16x128xi1>, vector<16x128xf32>
    %c68_116 = arith.constant 68 : index
    %900 = memref.load %arg3[%c68_116] : memref<288xf32, #tpu.memory_space<smem>>
    %901 = vector.broadcast %900 : f32 to vector<16x128xf32>
    %902 = arith.mulf %899, %901 : vector<16x128xf32>
    %903 = arith.addf %884, %902 : vector<16x128xf32>
    %c69_117 = arith.constant 69 : index
    %904 = memref.load %arg3[%c69_117] : memref<288xf32, #tpu.memory_space<smem>>
    %905 = vector.broadcast %904 : f32 to vector<16x128xf32>
    %906 = arith.mulf %899, %905 : vector<16x128xf32>
    %907 = arith.addf %888, %906 : vector<16x128xf32>
    %c70_118 = arith.constant 70 : index
    %908 = memref.load %arg3[%c70_118] : memref<288xf32, #tpu.memory_space<smem>>
    %909 = vector.broadcast %908 : f32 to vector<16x128xf32>
    %910 = arith.mulf %899, %909 : vector<16x128xf32>
    %911 = arith.addf %892, %910 : vector<16x128xf32>
    %c71_119 = arith.constant 71 : index
    %912 = memref.load %arg3[%c71_119] : memref<288xf32, #tpu.memory_space<smem>>
    %913 = vector.broadcast %912 : f32 to vector<16x128xf32>
    %914 = arith.mulf %899, %913 : vector<16x128xf32>
    %915 = arith.addf %896, %914 : vector<16x128xf32>
    %c1_i32_120 = arith.constant 1 : i32
    %916 = tpu.dynamic_rotate %656 by %c1_i32_120 dim 1 : vector<16x128xf32>, i32 -> vector<16x128xf32>
    %cst_121 = arith.constant 0.000000e+00 : f32
    %917 = vector.broadcast %cst_121 : f32 to vector<16x128xf32>
    %918 = arith.select %12, %916, %917 : vector<16x128xi1>, vector<16x128xf32>
    %c100_122 = arith.constant 100 : index
    %919 = memref.load %arg3[%c100_122] : memref<288xf32, #tpu.memory_space<smem>>
    %920 = vector.broadcast %919 : f32 to vector<16x128xf32>
    %921 = arith.mulf %918, %920 : vector<16x128xf32>
    %922 = arith.addf %903, %921 : vector<16x128xf32>
    %c101_123 = arith.constant 101 : index
    %923 = memref.load %arg3[%c101_123] : memref<288xf32, #tpu.memory_space<smem>>
    %924 = vector.broadcast %923 : f32 to vector<16x128xf32>
    %925 = arith.mulf %918, %924 : vector<16x128xf32>
    %926 = arith.addf %907, %925 : vector<16x128xf32>
    %c102_124 = arith.constant 102 : index
    %927 = memref.load %arg3[%c102_124] : memref<288xf32, #tpu.memory_space<smem>>
    %928 = vector.broadcast %927 : f32 to vector<16x128xf32>
    %929 = arith.mulf %918, %928 : vector<16x128xf32>
    %930 = arith.addf %911, %929 : vector<16x128xf32>
    %c103_125 = arith.constant 103 : index
    %931 = memref.load %arg3[%c103_125] : memref<288xf32, #tpu.memory_space<smem>>
    %932 = vector.broadcast %931 : f32 to vector<16x128xf32>
    %933 = arith.mulf %918, %932 : vector<16x128xf32>
    %934 = arith.addf %915, %933 : vector<16x128xf32>
    %c132_126 = arith.constant 132 : index
    %935 = memref.load %arg3[%c132_126] : memref<288xf32, #tpu.memory_space<smem>>
    %936 = vector.broadcast %935 : f32 to vector<16x128xf32>
    %937 = arith.mulf %656, %936 : vector<16x128xf32>
    %938 = arith.addf %922, %937 : vector<16x128xf32>
    %c133_127 = arith.constant 133 : index
    %939 = memref.load %arg3[%c133_127] : memref<288xf32, #tpu.memory_space<smem>>
    %940 = vector.broadcast %939 : f32 to vector<16x128xf32>
    %941 = arith.mulf %656, %940 : vector<16x128xf32>
    %942 = arith.addf %926, %941 : vector<16x128xf32>
    %c134_128 = arith.constant 134 : index
    %943 = memref.load %arg3[%c134_128] : memref<288xf32, #tpu.memory_space<smem>>
    %944 = vector.broadcast %943 : f32 to vector<16x128xf32>
    %945 = arith.mulf %656, %944 : vector<16x128xf32>
    %946 = arith.addf %930, %945 : vector<16x128xf32>
    %c135_129 = arith.constant 135 : index
    %947 = memref.load %arg3[%c135_129] : memref<288xf32, #tpu.memory_space<smem>>
    %948 = vector.broadcast %947 : f32 to vector<16x128xf32>
    %949 = arith.mulf %656, %948 : vector<16x128xf32>
    %950 = arith.addf %934, %949 : vector<16x128xf32>
    %c127_i32_130 = arith.constant 127 : i32
    %951 = tpu.dynamic_rotate %656 by %c127_i32_130 dim 1 : vector<16x128xf32>, i32 -> vector<16x128xf32>
    %cst_131 = arith.constant 0.000000e+00 : f32
    %952 = vector.broadcast %cst_131 : f32 to vector<16x128xf32>
    %953 = arith.select %14, %951, %952 : vector<16x128xi1>, vector<16x128xf32>
    %c164 = arith.constant 164 : index
    %954 = memref.load %arg3[%c164] : memref<288xf32, #tpu.memory_space<smem>>
    %955 = vector.broadcast %954 : f32 to vector<16x128xf32>
    %956 = arith.mulf %953, %955 : vector<16x128xf32>
    %957 = arith.addf %938, %956 : vector<16x128xf32>
    %c165 = arith.constant 165 : index
    %958 = memref.load %arg3[%c165] : memref<288xf32, #tpu.memory_space<smem>>
    %959 = vector.broadcast %958 : f32 to vector<16x128xf32>
    %960 = arith.mulf %953, %959 : vector<16x128xf32>
    %961 = arith.addf %942, %960 : vector<16x128xf32>
    %c166 = arith.constant 166 : index
    %962 = memref.load %arg3[%c166] : memref<288xf32, #tpu.memory_space<smem>>
    %963 = vector.broadcast %962 : f32 to vector<16x128xf32>
    %964 = arith.mulf %953, %963 : vector<16x128xf32>
    %965 = arith.addf %946, %964 : vector<16x128xf32>
    %c167 = arith.constant 167 : index
    %966 = memref.load %arg3[%c167] : memref<288xf32, #tpu.memory_space<smem>>
    %967 = vector.broadcast %966 : f32 to vector<16x128xf32>
    %968 = arith.mulf %953, %967 : vector<16x128xf32>
    %969 = arith.addf %950, %968 : vector<16x128xf32>
    %c15_i32_132 = arith.constant 15 : i32
    %970 = tpu.dynamic_rotate %656 by %c15_i32_132 dim 0 : vector<16x128xf32>, i32 -> vector<16x128xf32>
    %cst_133 = arith.constant 0.000000e+00 : f32
    %971 = vector.broadcast %cst_133 : f32 to vector<16x128xf32>
    %972 = arith.select %10, %970, %971 : vector<16x128xi1>, vector<16x128xf32>
    %c1_i32_134 = arith.constant 1 : i32
    %973 = tpu.dynamic_rotate %972 by %c1_i32_134 dim 1 : vector<16x128xf32>, i32 -> vector<16x128xf32>
    %cst_135 = arith.constant 0.000000e+00 : f32
    %974 = vector.broadcast %cst_135 : f32 to vector<16x128xf32>
    %975 = arith.select %12, %973, %974 : vector<16x128xi1>, vector<16x128xf32>
    %c196 = arith.constant 196 : index
    %976 = memref.load %arg3[%c196] : memref<288xf32, #tpu.memory_space<smem>>
    %977 = vector.broadcast %976 : f32 to vector<16x128xf32>
    %978 = arith.mulf %975, %977 : vector<16x128xf32>
    %979 = arith.addf %957, %978 : vector<16x128xf32>
    %c197 = arith.constant 197 : index
    %980 = memref.load %arg3[%c197] : memref<288xf32, #tpu.memory_space<smem>>
    %981 = vector.broadcast %980 : f32 to vector<16x128xf32>
    %982 = arith.mulf %975, %981 : vector<16x128xf32>
    %983 = arith.addf %961, %982 : vector<16x128xf32>
    %c198 = arith.constant 198 : index
    %984 = memref.load %arg3[%c198] : memref<288xf32, #tpu.memory_space<smem>>
    %985 = vector.broadcast %984 : f32 to vector<16x128xf32>
    %986 = arith.mulf %975, %985 : vector<16x128xf32>
    %987 = arith.addf %965, %986 : vector<16x128xf32>
    %c199 = arith.constant 199 : index
    %988 = memref.load %arg3[%c199] : memref<288xf32, #tpu.memory_space<smem>>
    %989 = vector.broadcast %988 : f32 to vector<16x128xf32>
    %990 = arith.mulf %975, %989 : vector<16x128xf32>
    %991 = arith.addf %969, %990 : vector<16x128xf32>
    %c228 = arith.constant 228 : index
    %992 = memref.load %arg3[%c228] : memref<288xf32, #tpu.memory_space<smem>>
    %993 = vector.broadcast %992 : f32 to vector<16x128xf32>
    %994 = arith.mulf %972, %993 : vector<16x128xf32>
    %995 = arith.addf %979, %994 : vector<16x128xf32>
    %c229 = arith.constant 229 : index
    %996 = memref.load %arg3[%c229] : memref<288xf32, #tpu.memory_space<smem>>
    %997 = vector.broadcast %996 : f32 to vector<16x128xf32>
    %998 = arith.mulf %972, %997 : vector<16x128xf32>
    %999 = arith.addf %983, %998 : vector<16x128xf32>
    %c230 = arith.constant 230 : index
    %1000 = memref.load %arg3[%c230] : memref<288xf32, #tpu.memory_space<smem>>
    %1001 = vector.broadcast %1000 : f32 to vector<16x128xf32>
    %1002 = arith.mulf %972, %1001 : vector<16x128xf32>
    %1003 = arith.addf %987, %1002 : vector<16x128xf32>
    %c231 = arith.constant 231 : index
    %1004 = memref.load %arg3[%c231] : memref<288xf32, #tpu.memory_space<smem>>
    %1005 = vector.broadcast %1004 : f32 to vector<16x128xf32>
    %1006 = arith.mulf %972, %1005 : vector<16x128xf32>
    %1007 = arith.addf %991, %1006 : vector<16x128xf32>
    %c127_i32_136 = arith.constant 127 : i32
    %1008 = tpu.dynamic_rotate %972 by %c127_i32_136 dim 1 : vector<16x128xf32>, i32 -> vector<16x128xf32>
    %cst_137 = arith.constant 0.000000e+00 : f32
    %1009 = vector.broadcast %cst_137 : f32 to vector<16x128xf32>
    %1010 = arith.select %14, %1008, %1009 : vector<16x128xi1>, vector<16x128xf32>
    %c260 = arith.constant 260 : index
    %1011 = memref.load %arg3[%c260] : memref<288xf32, #tpu.memory_space<smem>>
    %1012 = vector.broadcast %1011 : f32 to vector<16x128xf32>
    %1013 = arith.mulf %1010, %1012 : vector<16x128xf32>
    %1014 = arith.addf %995, %1013 : vector<16x128xf32>
    %c261 = arith.constant 261 : index
    %1015 = memref.load %arg3[%c261] : memref<288xf32, #tpu.memory_space<smem>>
    %1016 = vector.broadcast %1015 : f32 to vector<16x128xf32>
    %1017 = arith.mulf %1010, %1016 : vector<16x128xf32>
    %1018 = arith.addf %999, %1017 : vector<16x128xf32>
    %c262 = arith.constant 262 : index
    %1019 = memref.load %arg3[%c262] : memref<288xf32, #tpu.memory_space<smem>>
    %1020 = vector.broadcast %1019 : f32 to vector<16x128xf32>
    %1021 = arith.mulf %1010, %1020 : vector<16x128xf32>
    %1022 = arith.addf %1003, %1021 : vector<16x128xf32>
    %c263 = arith.constant 263 : index
    %1023 = memref.load %arg3[%c263] : memref<288xf32, #tpu.memory_space<smem>>
    %1024 = vector.broadcast %1023 : f32 to vector<16x128xf32>
    %1025 = arith.mulf %1010, %1024 : vector<16x128xf32>
    %1026 = arith.addf %1007, %1025 : vector<16x128xf32>
    %c1_i32_138 = arith.constant 1 : i32
    %1027 = tpu.dynamic_rotate %661 by %c1_i32_138 dim 0 : vector<16x128xf32>, i32 -> vector<16x128xf32>
    %cst_139 = arith.constant 0.000000e+00 : f32
    %1028 = vector.broadcast %cst_139 : f32 to vector<16x128xf32>
    %1029 = arith.select %8, %1027, %1028 : vector<16x128xi1>, vector<16x128xf32>
    %c1_i32_140 = arith.constant 1 : i32
    %1030 = tpu.dynamic_rotate %1029 by %c1_i32_140 dim 1 : vector<16x128xf32>, i32 -> vector<16x128xf32>
    %cst_141 = arith.constant 0.000000e+00 : f32
    %1031 = vector.broadcast %cst_141 : f32 to vector<16x128xf32>
    %1032 = arith.select %12, %1030, %1031 : vector<16x128xi1>, vector<16x128xf32>
    %c8_142 = arith.constant 8 : index
    %1033 = memref.load %arg3[%c8_142] : memref<288xf32, #tpu.memory_space<smem>>
    %1034 = vector.broadcast %1033 : f32 to vector<16x128xf32>
    %1035 = arith.mulf %1032, %1034 : vector<16x128xf32>
    %1036 = arith.addf %1014, %1035 : vector<16x128xf32>
    %c9_143 = arith.constant 9 : index
    %1037 = memref.load %arg3[%c9_143] : memref<288xf32, #tpu.memory_space<smem>>
    %1038 = vector.broadcast %1037 : f32 to vector<16x128xf32>
    %1039 = arith.mulf %1032, %1038 : vector<16x128xf32>
    %1040 = arith.addf %1018, %1039 : vector<16x128xf32>
    %c10_144 = arith.constant 10 : index
    %1041 = memref.load %arg3[%c10_144] : memref<288xf32, #tpu.memory_space<smem>>
    %1042 = vector.broadcast %1041 : f32 to vector<16x128xf32>
    %1043 = arith.mulf %1032, %1042 : vector<16x128xf32>
    %1044 = arith.addf %1022, %1043 : vector<16x128xf32>
    %c11_145 = arith.constant 11 : index
    %1045 = memref.load %arg3[%c11_145] : memref<288xf32, #tpu.memory_space<smem>>
    %1046 = vector.broadcast %1045 : f32 to vector<16x128xf32>
    %1047 = arith.mulf %1032, %1046 : vector<16x128xf32>
    %1048 = arith.addf %1026, %1047 : vector<16x128xf32>
    %c40_146 = arith.constant 40 : index
    %1049 = memref.load %arg3[%c40_146] : memref<288xf32, #tpu.memory_space<smem>>
    %1050 = vector.broadcast %1049 : f32 to vector<16x128xf32>
    %1051 = arith.mulf %1029, %1050 : vector<16x128xf32>
    %1052 = arith.addf %1036, %1051 : vector<16x128xf32>
    %c41_147 = arith.constant 41 : index
    %1053 = memref.load %arg3[%c41_147] : memref<288xf32, #tpu.memory_space<smem>>
    %1054 = vector.broadcast %1053 : f32 to vector<16x128xf32>
    %1055 = arith.mulf %1029, %1054 : vector<16x128xf32>
    %1056 = arith.addf %1040, %1055 : vector<16x128xf32>
    %c42_148 = arith.constant 42 : index
    %1057 = memref.load %arg3[%c42_148] : memref<288xf32, #tpu.memory_space<smem>>
    %1058 = vector.broadcast %1057 : f32 to vector<16x128xf32>
    %1059 = arith.mulf %1029, %1058 : vector<16x128xf32>
    %1060 = arith.addf %1044, %1059 : vector<16x128xf32>
    %c43_149 = arith.constant 43 : index
    %1061 = memref.load %arg3[%c43_149] : memref<288xf32, #tpu.memory_space<smem>>
    %1062 = vector.broadcast %1061 : f32 to vector<16x128xf32>
    %1063 = arith.mulf %1029, %1062 : vector<16x128xf32>
    %1064 = arith.addf %1048, %1063 : vector<16x128xf32>
    %c127_i32_150 = arith.constant 127 : i32
    %1065 = tpu.dynamic_rotate %1029 by %c127_i32_150 dim 1 : vector<16x128xf32>, i32 -> vector<16x128xf32>
    %cst_151 = arith.constant 0.000000e+00 : f32
    %1066 = vector.broadcast %cst_151 : f32 to vector<16x128xf32>
    %1067 = arith.select %14, %1065, %1066 : vector<16x128xi1>, vector<16x128xf32>
    %c72_152 = arith.constant 72 : index
    %1068 = memref.load %arg3[%c72_152] : memref<288xf32, #tpu.memory_space<smem>>
    %1069 = vector.broadcast %1068 : f32 to vector<16x128xf32>
    %1070 = arith.mulf %1067, %1069 : vector<16x128xf32>
    %1071 = arith.addf %1052, %1070 : vector<16x128xf32>
    %c73_153 = arith.constant 73 : index
    %1072 = memref.load %arg3[%c73_153] : memref<288xf32, #tpu.memory_space<smem>>
    %1073 = vector.broadcast %1072 : f32 to vector<16x128xf32>
    %1074 = arith.mulf %1067, %1073 : vector<16x128xf32>
    %1075 = arith.addf %1056, %1074 : vector<16x128xf32>
    %c74_154 = arith.constant 74 : index
    %1076 = memref.load %arg3[%c74_154] : memref<288xf32, #tpu.memory_space<smem>>
    %1077 = vector.broadcast %1076 : f32 to vector<16x128xf32>
    %1078 = arith.mulf %1067, %1077 : vector<16x128xf32>
    %1079 = arith.addf %1060, %1078 : vector<16x128xf32>
    %c75_155 = arith.constant 75 : index
    %1080 = memref.load %arg3[%c75_155] : memref<288xf32, #tpu.memory_space<smem>>
    %1081 = vector.broadcast %1080 : f32 to vector<16x128xf32>
    %1082 = arith.mulf %1067, %1081 : vector<16x128xf32>
    %1083 = arith.addf %1064, %1082 : vector<16x128xf32>
    %c1_i32_156 = arith.constant 1 : i32
    %1084 = tpu.dynamic_rotate %661 by %c1_i32_156 dim 1 : vector<16x128xf32>, i32 -> vector<16x128xf32>
    %cst_157 = arith.constant 0.000000e+00 : f32
    %1085 = vector.broadcast %cst_157 : f32 to vector<16x128xf32>
    %1086 = arith.select %12, %1084, %1085 : vector<16x128xi1>, vector<16x128xf32>
    %c104_158 = arith.constant 104 : index
    %1087 = memref.load %arg3[%c104_158] : memref<288xf32, #tpu.memory_space<smem>>
    %1088 = vector.broadcast %1087 : f32 to vector<16x128xf32>
    %1089 = arith.mulf %1086, %1088 : vector<16x128xf32>
    %1090 = arith.addf %1071, %1089 : vector<16x128xf32>
    %c105_159 = arith.constant 105 : index
    %1091 = memref.load %arg3[%c105_159] : memref<288xf32, #tpu.memory_space<smem>>
    %1092 = vector.broadcast %1091 : f32 to vector<16x128xf32>
    %1093 = arith.mulf %1086, %1092 : vector<16x128xf32>
    %1094 = arith.addf %1075, %1093 : vector<16x128xf32>
    %c106_160 = arith.constant 106 : index
    %1095 = memref.load %arg3[%c106_160] : memref<288xf32, #tpu.memory_space<smem>>
    %1096 = vector.broadcast %1095 : f32 to vector<16x128xf32>
    %1097 = arith.mulf %1086, %1096 : vector<16x128xf32>
    %1098 = arith.addf %1079, %1097 : vector<16x128xf32>
    %c107_161 = arith.constant 107 : index
    %1099 = memref.load %arg3[%c107_161] : memref<288xf32, #tpu.memory_space<smem>>
    %1100 = vector.broadcast %1099 : f32 to vector<16x128xf32>
    %1101 = arith.mulf %1086, %1100 : vector<16x128xf32>
    %1102 = arith.addf %1083, %1101 : vector<16x128xf32>
    %c136_162 = arith.constant 136 : index
    %1103 = memref.load %arg3[%c136_162] : memref<288xf32, #tpu.memory_space<smem>>
    %1104 = vector.broadcast %1103 : f32 to vector<16x128xf32>
    %1105 = arith.mulf %661, %1104 : vector<16x128xf32>
    %1106 = arith.addf %1090, %1105 : vector<16x128xf32>
    %c137_163 = arith.constant 137 : index
    %1107 = memref.load %arg3[%c137_163] : memref<288xf32, #tpu.memory_space<smem>>
    %1108 = vector.broadcast %1107 : f32 to vector<16x128xf32>
    %1109 = arith.mulf %661, %1108 : vector<16x128xf32>
    %1110 = arith.addf %1094, %1109 : vector<16x128xf32>
    %c138_164 = arith.constant 138 : index
    %1111 = memref.load %arg3[%c138_164] : memref<288xf32, #tpu.memory_space<smem>>
    %1112 = vector.broadcast %1111 : f32 to vector<16x128xf32>
    %1113 = arith.mulf %661, %1112 : vector<16x128xf32>
    %1114 = arith.addf %1098, %1113 : vector<16x128xf32>
    %c139_165 = arith.constant 139 : index
    %1115 = memref.load %arg3[%c139_165] : memref<288xf32, #tpu.memory_space<smem>>
    %1116 = vector.broadcast %1115 : f32 to vector<16x128xf32>
    %1117 = arith.mulf %661, %1116 : vector<16x128xf32>
    %1118 = arith.addf %1102, %1117 : vector<16x128xf32>
    %c127_i32_166 = arith.constant 127 : i32
    %1119 = tpu.dynamic_rotate %661 by %c127_i32_166 dim 1 : vector<16x128xf32>, i32 -> vector<16x128xf32>
    %cst_167 = arith.constant 0.000000e+00 : f32
    %1120 = vector.broadcast %cst_167 : f32 to vector<16x128xf32>
    %1121 = arith.select %14, %1119, %1120 : vector<16x128xi1>, vector<16x128xf32>
    %c168 = arith.constant 168 : index
    %1122 = memref.load %arg3[%c168] : memref<288xf32, #tpu.memory_space<smem>>
    %1123 = vector.broadcast %1122 : f32 to vector<16x128xf32>
    %1124 = arith.mulf %1121, %1123 : vector<16x128xf32>
    %1125 = arith.addf %1106, %1124 : vector<16x128xf32>
    %c169 = arith.constant 169 : index
    %1126 = memref.load %arg3[%c169] : memref<288xf32, #tpu.memory_space<smem>>
    %1127 = vector.broadcast %1126 : f32 to vector<16x128xf32>
    %1128 = arith.mulf %1121, %1127 : vector<16x128xf32>
    %1129 = arith.addf %1110, %1128 : vector<16x128xf32>
    %c170 = arith.constant 170 : index
    %1130 = memref.load %arg3[%c170] : memref<288xf32, #tpu.memory_space<smem>>
    %1131 = vector.broadcast %1130 : f32 to vector<16x128xf32>
    %1132 = arith.mulf %1121, %1131 : vector<16x128xf32>
    %1133 = arith.addf %1114, %1132 : vector<16x128xf32>
    %c171 = arith.constant 171 : index
    %1134 = memref.load %arg3[%c171] : memref<288xf32, #tpu.memory_space<smem>>
    %1135 = vector.broadcast %1134 : f32 to vector<16x128xf32>
    %1136 = arith.mulf %1121, %1135 : vector<16x128xf32>
    %1137 = arith.addf %1118, %1136 : vector<16x128xf32>
    %c15_i32_168 = arith.constant 15 : i32
    %1138 = tpu.dynamic_rotate %661 by %c15_i32_168 dim 0 : vector<16x128xf32>, i32 -> vector<16x128xf32>
    %cst_169 = arith.constant 0.000000e+00 : f32
    %1139 = vector.broadcast %cst_169 : f32 to vector<16x128xf32>
    %1140 = arith.select %10, %1138, %1139 : vector<16x128xi1>, vector<16x128xf32>
    %c1_i32_170 = arith.constant 1 : i32
    %1141 = tpu.dynamic_rotate %1140 by %c1_i32_170 dim 1 : vector<16x128xf32>, i32 -> vector<16x128xf32>
    %cst_171 = arith.constant 0.000000e+00 : f32
    %1142 = vector.broadcast %cst_171 : f32 to vector<16x128xf32>
    %1143 = arith.select %12, %1141, %1142 : vector<16x128xi1>, vector<16x128xf32>
    %c200 = arith.constant 200 : index
    %1144 = memref.load %arg3[%c200] : memref<288xf32, #tpu.memory_space<smem>>
    %1145 = vector.broadcast %1144 : f32 to vector<16x128xf32>
    %1146 = arith.mulf %1143, %1145 : vector<16x128xf32>
    %1147 = arith.addf %1125, %1146 : vector<16x128xf32>
    %c201 = arith.constant 201 : index
    %1148 = memref.load %arg3[%c201] : memref<288xf32, #tpu.memory_space<smem>>
    %1149 = vector.broadcast %1148 : f32 to vector<16x128xf32>
    %1150 = arith.mulf %1143, %1149 : vector<16x128xf32>
    %1151 = arith.addf %1129, %1150 : vector<16x128xf32>
    %c202 = arith.constant 202 : index
    %1152 = memref.load %arg3[%c202] : memref<288xf32, #tpu.memory_space<smem>>
    %1153 = vector.broadcast %1152 : f32 to vector<16x128xf32>
    %1154 = arith.mulf %1143, %1153 : vector<16x128xf32>
    %1155 = arith.addf %1133, %1154 : vector<16x128xf32>
    %c203 = arith.constant 203 : index
    %1156 = memref.load %arg3[%c203] : memref<288xf32, #tpu.memory_space<smem>>
    %1157 = vector.broadcast %1156 : f32 to vector<16x128xf32>
    %1158 = arith.mulf %1143, %1157 : vector<16x128xf32>
    %1159 = arith.addf %1137, %1158 : vector<16x128xf32>
    %c232 = arith.constant 232 : index
    %1160 = memref.load %arg3[%c232] : memref<288xf32, #tpu.memory_space<smem>>
    %1161 = vector.broadcast %1160 : f32 to vector<16x128xf32>
    %1162 = arith.mulf %1140, %1161 : vector<16x128xf32>
    %1163 = arith.addf %1147, %1162 : vector<16x128xf32>
    %c233 = arith.constant 233 : index
    %1164 = memref.load %arg3[%c233] : memref<288xf32, #tpu.memory_space<smem>>
    %1165 = vector.broadcast %1164 : f32 to vector<16x128xf32>
    %1166 = arith.mulf %1140, %1165 : vector<16x128xf32>
    %1167 = arith.addf %1151, %1166 : vector<16x128xf32>
    %c234 = arith.constant 234 : index
    %1168 = memref.load %arg3[%c234] : memref<288xf32, #tpu.memory_space<smem>>
    %1169 = vector.broadcast %1168 : f32 to vector<16x128xf32>
    %1170 = arith.mulf %1140, %1169 : vector<16x128xf32>
    %1171 = arith.addf %1155, %1170 : vector<16x128xf32>
    %c235 = arith.constant 235 : index
    %1172 = memref.load %arg3[%c235] : memref<288xf32, #tpu.memory_space<smem>>
    %1173 = vector.broadcast %1172 : f32 to vector<16x128xf32>
    %1174 = arith.mulf %1140, %1173 : vector<16x128xf32>
    %1175 = arith.addf %1159, %1174 : vector<16x128xf32>
    %c127_i32_172 = arith.constant 127 : i32
    %1176 = tpu.dynamic_rotate %1140 by %c127_i32_172 dim 1 : vector<16x128xf32>, i32 -> vector<16x128xf32>
    %cst_173 = arith.constant 0.000000e+00 : f32
    %1177 = vector.broadcast %cst_173 : f32 to vector<16x128xf32>
    %1178 = arith.select %14, %1176, %1177 : vector<16x128xi1>, vector<16x128xf32>
    %c264 = arith.constant 264 : index
    %1179 = memref.load %arg3[%c264] : memref<288xf32, #tpu.memory_space<smem>>
    %1180 = vector.broadcast %1179 : f32 to vector<16x128xf32>
    %1181 = arith.mulf %1178, %1180 : vector<16x128xf32>
    %1182 = arith.addf %1163, %1181 : vector<16x128xf32>
    %c265 = arith.constant 265 : index
    %1183 = memref.load %arg3[%c265] : memref<288xf32, #tpu.memory_space<smem>>
    %1184 = vector.broadcast %1183 : f32 to vector<16x128xf32>
    %1185 = arith.mulf %1178, %1184 : vector<16x128xf32>
    %1186 = arith.addf %1167, %1185 : vector<16x128xf32>
    %c266 = arith.constant 266 : index
    %1187 = memref.load %arg3[%c266] : memref<288xf32, #tpu.memory_space<smem>>
    %1188 = vector.broadcast %1187 : f32 to vector<16x128xf32>
    %1189 = arith.mulf %1178, %1188 : vector<16x128xf32>
    %1190 = arith.addf %1171, %1189 : vector<16x128xf32>
    %c267 = arith.constant 267 : index
    %1191 = memref.load %arg3[%c267] : memref<288xf32, #tpu.memory_space<smem>>
    %1192 = vector.broadcast %1191 : f32 to vector<16x128xf32>
    %1193 = arith.mulf %1178, %1192 : vector<16x128xf32>
    %1194 = arith.addf %1175, %1193 : vector<16x128xf32>
    %c1_i32_174 = arith.constant 1 : i32
    %1195 = tpu.dynamic_rotate %666 by %c1_i32_174 dim 0 : vector<16x128xf32>, i32 -> vector<16x128xf32>
    %cst_175 = arith.constant 0.000000e+00 : f32
    %1196 = vector.broadcast %cst_175 : f32 to vector<16x128xf32>
    %1197 = arith.select %8, %1195, %1196 : vector<16x128xi1>, vector<16x128xf32>
    %c1_i32_176 = arith.constant 1 : i32
    %1198 = tpu.dynamic_rotate %1197 by %c1_i32_176 dim 1 : vector<16x128xf32>, i32 -> vector<16x128xf32>
    %cst_177 = arith.constant 0.000000e+00 : f32
    %1199 = vector.broadcast %cst_177 : f32 to vector<16x128xf32>
    %1200 = arith.select %12, %1198, %1199 : vector<16x128xi1>, vector<16x128xf32>
    %c12_178 = arith.constant 12 : index
    %1201 = memref.load %arg3[%c12_178] : memref<288xf32, #tpu.memory_space<smem>>
    %1202 = vector.broadcast %1201 : f32 to vector<16x128xf32>
    %1203 = arith.mulf %1200, %1202 : vector<16x128xf32>
    %1204 = arith.addf %1182, %1203 : vector<16x128xf32>
    %c13_179 = arith.constant 13 : index
    %1205 = memref.load %arg3[%c13_179] : memref<288xf32, #tpu.memory_space<smem>>
    %1206 = vector.broadcast %1205 : f32 to vector<16x128xf32>
    %1207 = arith.mulf %1200, %1206 : vector<16x128xf32>
    %1208 = arith.addf %1186, %1207 : vector<16x128xf32>
    %c14_180 = arith.constant 14 : index
    %1209 = memref.load %arg3[%c14_180] : memref<288xf32, #tpu.memory_space<smem>>
    %1210 = vector.broadcast %1209 : f32 to vector<16x128xf32>
    %1211 = arith.mulf %1200, %1210 : vector<16x128xf32>
    %1212 = arith.addf %1190, %1211 : vector<16x128xf32>
    %c15_181 = arith.constant 15 : index
    %1213 = memref.load %arg3[%c15_181] : memref<288xf32, #tpu.memory_space<smem>>
    %1214 = vector.broadcast %1213 : f32 to vector<16x128xf32>
    %1215 = arith.mulf %1200, %1214 : vector<16x128xf32>
    %1216 = arith.addf %1194, %1215 : vector<16x128xf32>
    %c44_182 = arith.constant 44 : index
    %1217 = memref.load %arg3[%c44_182] : memref<288xf32, #tpu.memory_space<smem>>
    %1218 = vector.broadcast %1217 : f32 to vector<16x128xf32>
    %1219 = arith.mulf %1197, %1218 : vector<16x128xf32>
    %1220 = arith.addf %1204, %1219 : vector<16x128xf32>
    %c45_183 = arith.constant 45 : index
    %1221 = memref.load %arg3[%c45_183] : memref<288xf32, #tpu.memory_space<smem>>
    %1222 = vector.broadcast %1221 : f32 to vector<16x128xf32>
    %1223 = arith.mulf %1197, %1222 : vector<16x128xf32>
    %1224 = arith.addf %1208, %1223 : vector<16x128xf32>
    %c46_184 = arith.constant 46 : index
    %1225 = memref.load %arg3[%c46_184] : memref<288xf32, #tpu.memory_space<smem>>
    %1226 = vector.broadcast %1225 : f32 to vector<16x128xf32>
    %1227 = arith.mulf %1197, %1226 : vector<16x128xf32>
    %1228 = arith.addf %1212, %1227 : vector<16x128xf32>
    %c47_185 = arith.constant 47 : index
    %1229 = memref.load %arg3[%c47_185] : memref<288xf32, #tpu.memory_space<smem>>
    %1230 = vector.broadcast %1229 : f32 to vector<16x128xf32>
    %1231 = arith.mulf %1197, %1230 : vector<16x128xf32>
    %1232 = arith.addf %1216, %1231 : vector<16x128xf32>
    %c127_i32_186 = arith.constant 127 : i32
    %1233 = tpu.dynamic_rotate %1197 by %c127_i32_186 dim 1 : vector<16x128xf32>, i32 -> vector<16x128xf32>
    %cst_187 = arith.constant 0.000000e+00 : f32
    %1234 = vector.broadcast %cst_187 : f32 to vector<16x128xf32>
    %1235 = arith.select %14, %1233, %1234 : vector<16x128xi1>, vector<16x128xf32>
    %c76_188 = arith.constant 76 : index
    %1236 = memref.load %arg3[%c76_188] : memref<288xf32, #tpu.memory_space<smem>>
    %1237 = vector.broadcast %1236 : f32 to vector<16x128xf32>
    %1238 = arith.mulf %1235, %1237 : vector<16x128xf32>
    %1239 = arith.addf %1220, %1238 : vector<16x128xf32>
    %c77_189 = arith.constant 77 : index
    %1240 = memref.load %arg3[%c77_189] : memref<288xf32, #tpu.memory_space<smem>>
    %1241 = vector.broadcast %1240 : f32 to vector<16x128xf32>
    %1242 = arith.mulf %1235, %1241 : vector<16x128xf32>
    %1243 = arith.addf %1224, %1242 : vector<16x128xf32>
    %c78_190 = arith.constant 78 : index
    %1244 = memref.load %arg3[%c78_190] : memref<288xf32, #tpu.memory_space<smem>>
    %1245 = vector.broadcast %1244 : f32 to vector<16x128xf32>
    %1246 = arith.mulf %1235, %1245 : vector<16x128xf32>
    %1247 = arith.addf %1228, %1246 : vector<16x128xf32>
    %c79_191 = arith.constant 79 : index
    %1248 = memref.load %arg3[%c79_191] : memref<288xf32, #tpu.memory_space<smem>>
    %1249 = vector.broadcast %1248 : f32 to vector<16x128xf32>
    %1250 = arith.mulf %1235, %1249 : vector<16x128xf32>
    %1251 = arith.addf %1232, %1250 : vector<16x128xf32>
    %c1_i32_192 = arith.constant 1 : i32
    %1252 = tpu.dynamic_rotate %666 by %c1_i32_192 dim 1 : vector<16x128xf32>, i32 -> vector<16x128xf32>
    %cst_193 = arith.constant 0.000000e+00 : f32
    %1253 = vector.broadcast %cst_193 : f32 to vector<16x128xf32>
    %1254 = arith.select %12, %1252, %1253 : vector<16x128xi1>, vector<16x128xf32>
    %c108_194 = arith.constant 108 : index
    %1255 = memref.load %arg3[%c108_194] : memref<288xf32, #tpu.memory_space<smem>>
    %1256 = vector.broadcast %1255 : f32 to vector<16x128xf32>
    %1257 = arith.mulf %1254, %1256 : vector<16x128xf32>
    %1258 = arith.addf %1239, %1257 : vector<16x128xf32>
    %c109_195 = arith.constant 109 : index
    %1259 = memref.load %arg3[%c109_195] : memref<288xf32, #tpu.memory_space<smem>>
    %1260 = vector.broadcast %1259 : f32 to vector<16x128xf32>
    %1261 = arith.mulf %1254, %1260 : vector<16x128xf32>
    %1262 = arith.addf %1243, %1261 : vector<16x128xf32>
    %c110_196 = arith.constant 110 : index
    %1263 = memref.load %arg3[%c110_196] : memref<288xf32, #tpu.memory_space<smem>>
    %1264 = vector.broadcast %1263 : f32 to vector<16x128xf32>
    %1265 = arith.mulf %1254, %1264 : vector<16x128xf32>
    %1266 = arith.addf %1247, %1265 : vector<16x128xf32>
    %c111_197 = arith.constant 111 : index
    %1267 = memref.load %arg3[%c111_197] : memref<288xf32, #tpu.memory_space<smem>>
    %1268 = vector.broadcast %1267 : f32 to vector<16x128xf32>
    %1269 = arith.mulf %1254, %1268 : vector<16x128xf32>
    %1270 = arith.addf %1251, %1269 : vector<16x128xf32>
    %c140_198 = arith.constant 140 : index
    %1271 = memref.load %arg3[%c140_198] : memref<288xf32, #tpu.memory_space<smem>>
    %1272 = vector.broadcast %1271 : f32 to vector<16x128xf32>
    %1273 = arith.mulf %666, %1272 : vector<16x128xf32>
    %1274 = arith.addf %1258, %1273 : vector<16x128xf32>
    %c141_199 = arith.constant 141 : index
    %1275 = memref.load %arg3[%c141_199] : memref<288xf32, #tpu.memory_space<smem>>
    %1276 = vector.broadcast %1275 : f32 to vector<16x128xf32>
    %1277 = arith.mulf %666, %1276 : vector<16x128xf32>
    %1278 = arith.addf %1262, %1277 : vector<16x128xf32>
    %c142_200 = arith.constant 142 : index
    %1279 = memref.load %arg3[%c142_200] : memref<288xf32, #tpu.memory_space<smem>>
    %1280 = vector.broadcast %1279 : f32 to vector<16x128xf32>
    %1281 = arith.mulf %666, %1280 : vector<16x128xf32>
    %1282 = arith.addf %1266, %1281 : vector<16x128xf32>
    %c143_201 = arith.constant 143 : index
    %1283 = memref.load %arg3[%c143_201] : memref<288xf32, #tpu.memory_space<smem>>
    %1284 = vector.broadcast %1283 : f32 to vector<16x128xf32>
    %1285 = arith.mulf %666, %1284 : vector<16x128xf32>
    %1286 = arith.addf %1270, %1285 : vector<16x128xf32>
    %c127_i32_202 = arith.constant 127 : i32
    %1287 = tpu.dynamic_rotate %666 by %c127_i32_202 dim 1 : vector<16x128xf32>, i32 -> vector<16x128xf32>
    %cst_203 = arith.constant 0.000000e+00 : f32
    %1288 = vector.broadcast %cst_203 : f32 to vector<16x128xf32>
    %1289 = arith.select %14, %1287, %1288 : vector<16x128xi1>, vector<16x128xf32>
    %c172 = arith.constant 172 : index
    %1290 = memref.load %arg3[%c172] : memref<288xf32, #tpu.memory_space<smem>>
    %1291 = vector.broadcast %1290 : f32 to vector<16x128xf32>
    %1292 = arith.mulf %1289, %1291 : vector<16x128xf32>
    %1293 = arith.addf %1274, %1292 : vector<16x128xf32>
    %c173 = arith.constant 173 : index
    %1294 = memref.load %arg3[%c173] : memref<288xf32, #tpu.memory_space<smem>>
    %1295 = vector.broadcast %1294 : f32 to vector<16x128xf32>
    %1296 = arith.mulf %1289, %1295 : vector<16x128xf32>
    %1297 = arith.addf %1278, %1296 : vector<16x128xf32>
    %c174 = arith.constant 174 : index
    %1298 = memref.load %arg3[%c174] : memref<288xf32, #tpu.memory_space<smem>>
    %1299 = vector.broadcast %1298 : f32 to vector<16x128xf32>
    %1300 = arith.mulf %1289, %1299 : vector<16x128xf32>
    %1301 = arith.addf %1282, %1300 : vector<16x128xf32>
    %c175 = arith.constant 175 : index
    %1302 = memref.load %arg3[%c175] : memref<288xf32, #tpu.memory_space<smem>>
    %1303 = vector.broadcast %1302 : f32 to vector<16x128xf32>
    %1304 = arith.mulf %1289, %1303 : vector<16x128xf32>
    %1305 = arith.addf %1286, %1304 : vector<16x128xf32>
    %c15_i32_204 = arith.constant 15 : i32
    %1306 = tpu.dynamic_rotate %666 by %c15_i32_204 dim 0 : vector<16x128xf32>, i32 -> vector<16x128xf32>
    %cst_205 = arith.constant 0.000000e+00 : f32
    %1307 = vector.broadcast %cst_205 : f32 to vector<16x128xf32>
    %1308 = arith.select %10, %1306, %1307 : vector<16x128xi1>, vector<16x128xf32>
    %c1_i32_206 = arith.constant 1 : i32
    %1309 = tpu.dynamic_rotate %1308 by %c1_i32_206 dim 1 : vector<16x128xf32>, i32 -> vector<16x128xf32>
    %cst_207 = arith.constant 0.000000e+00 : f32
    %1310 = vector.broadcast %cst_207 : f32 to vector<16x128xf32>
    %1311 = arith.select %12, %1309, %1310 : vector<16x128xi1>, vector<16x128xf32>
    %c204 = arith.constant 204 : index
    %1312 = memref.load %arg3[%c204] : memref<288xf32, #tpu.memory_space<smem>>
    %1313 = vector.broadcast %1312 : f32 to vector<16x128xf32>
    %1314 = arith.mulf %1311, %1313 : vector<16x128xf32>
    %1315 = arith.addf %1293, %1314 : vector<16x128xf32>
    %c205 = arith.constant 205 : index
    %1316 = memref.load %arg3[%c205] : memref<288xf32, #tpu.memory_space<smem>>
    %1317 = vector.broadcast %1316 : f32 to vector<16x128xf32>
    %1318 = arith.mulf %1311, %1317 : vector<16x128xf32>
    %1319 = arith.addf %1297, %1318 : vector<16x128xf32>
    %c206 = arith.constant 206 : index
    %1320 = memref.load %arg3[%c206] : memref<288xf32, #tpu.memory_space<smem>>
    %1321 = vector.broadcast %1320 : f32 to vector<16x128xf32>
    %1322 = arith.mulf %1311, %1321 : vector<16x128xf32>
    %1323 = arith.addf %1301, %1322 : vector<16x128xf32>
    %c207 = arith.constant 207 : index
    %1324 = memref.load %arg3[%c207] : memref<288xf32, #tpu.memory_space<smem>>
    %1325 = vector.broadcast %1324 : f32 to vector<16x128xf32>
    %1326 = arith.mulf %1311, %1325 : vector<16x128xf32>
    %1327 = arith.addf %1305, %1326 : vector<16x128xf32>
    %c236 = arith.constant 236 : index
    %1328 = memref.load %arg3[%c236] : memref<288xf32, #tpu.memory_space<smem>>
    %1329 = vector.broadcast %1328 : f32 to vector<16x128xf32>
    %1330 = arith.mulf %1308, %1329 : vector<16x128xf32>
    %1331 = arith.addf %1315, %1330 : vector<16x128xf32>
    %c237 = arith.constant 237 : index
    %1332 = memref.load %arg3[%c237] : memref<288xf32, #tpu.memory_space<smem>>
    %1333 = vector.broadcast %1332 : f32 to vector<16x128xf32>
    %1334 = arith.mulf %1308, %1333 : vector<16x128xf32>
    %1335 = arith.addf %1319, %1334 : vector<16x128xf32>
    %c238 = arith.constant 238 : index
    %1336 = memref.load %arg3[%c238] : memref<288xf32, #tpu.memory_space<smem>>
    %1337 = vector.broadcast %1336 : f32 to vector<16x128xf32>
    %1338 = arith.mulf %1308, %1337 : vector<16x128xf32>
    %1339 = arith.addf %1323, %1338 : vector<16x128xf32>
    %c239 = arith.constant 239 : index
    %1340 = memref.load %arg3[%c239] : memref<288xf32, #tpu.memory_space<smem>>
    %1341 = vector.broadcast %1340 : f32 to vector<16x128xf32>
    %1342 = arith.mulf %1308, %1341 : vector<16x128xf32>
    %1343 = arith.addf %1327, %1342 : vector<16x128xf32>
    %c127_i32_208 = arith.constant 127 : i32
    %1344 = tpu.dynamic_rotate %1308 by %c127_i32_208 dim 1 : vector<16x128xf32>, i32 -> vector<16x128xf32>
    %cst_209 = arith.constant 0.000000e+00 : f32
    %1345 = vector.broadcast %cst_209 : f32 to vector<16x128xf32>
    %1346 = arith.select %14, %1344, %1345 : vector<16x128xi1>, vector<16x128xf32>
    %c268 = arith.constant 268 : index
    %1347 = memref.load %arg3[%c268] : memref<288xf32, #tpu.memory_space<smem>>
    %1348 = vector.broadcast %1347 : f32 to vector<16x128xf32>
    %1349 = arith.mulf %1346, %1348 : vector<16x128xf32>
    %1350 = arith.addf %1331, %1349 : vector<16x128xf32>
    %c269 = arith.constant 269 : index
    %1351 = memref.load %arg3[%c269] : memref<288xf32, #tpu.memory_space<smem>>
    %1352 = vector.broadcast %1351 : f32 to vector<16x128xf32>
    %1353 = arith.mulf %1346, %1352 : vector<16x128xf32>
    %1354 = arith.addf %1335, %1353 : vector<16x128xf32>
    %c270 = arith.constant 270 : index
    %1355 = memref.load %arg3[%c270] : memref<288xf32, #tpu.memory_space<smem>>
    %1356 = vector.broadcast %1355 : f32 to vector<16x128xf32>
    %1357 = arith.mulf %1346, %1356 : vector<16x128xf32>
    %1358 = arith.addf %1339, %1357 : vector<16x128xf32>
    %c271 = arith.constant 271 : index
    %1359 = memref.load %arg3[%c271] : memref<288xf32, #tpu.memory_space<smem>>
    %1360 = vector.broadcast %1359 : f32 to vector<16x128xf32>
    %1361 = arith.mulf %1346, %1360 : vector<16x128xf32>
    %1362 = arith.addf %1343, %1361 : vector<16x128xf32>
    %c1_i32_210 = arith.constant 1 : i32
    %1363 = tpu.dynamic_rotate %671 by %c1_i32_210 dim 0 : vector<16x128xf32>, i32 -> vector<16x128xf32>
    %cst_211 = arith.constant 0.000000e+00 : f32
    %1364 = vector.broadcast %cst_211 : f32 to vector<16x128xf32>
    %1365 = arith.select %8, %1363, %1364 : vector<16x128xi1>, vector<16x128xf32>
    %c1_i32_212 = arith.constant 1 : i32
    %1366 = tpu.dynamic_rotate %1365 by %c1_i32_212 dim 1 : vector<16x128xf32>, i32 -> vector<16x128xf32>
    %cst_213 = arith.constant 0.000000e+00 : f32
    %1367 = vector.broadcast %cst_213 : f32 to vector<16x128xf32>
    %1368 = arith.select %12, %1366, %1367 : vector<16x128xi1>, vector<16x128xf32>
    %c16_214 = arith.constant 16 : index
    %1369 = memref.load %arg3[%c16_214] : memref<288xf32, #tpu.memory_space<smem>>
    %1370 = vector.broadcast %1369 : f32 to vector<16x128xf32>
    %1371 = arith.mulf %1368, %1370 : vector<16x128xf32>
    %1372 = arith.addf %1350, %1371 : vector<16x128xf32>
    %c17_215 = arith.constant 17 : index
    %1373 = memref.load %arg3[%c17_215] : memref<288xf32, #tpu.memory_space<smem>>
    %1374 = vector.broadcast %1373 : f32 to vector<16x128xf32>
    %1375 = arith.mulf %1368, %1374 : vector<16x128xf32>
    %1376 = arith.addf %1354, %1375 : vector<16x128xf32>
    %c18_216 = arith.constant 18 : index
    %1377 = memref.load %arg3[%c18_216] : memref<288xf32, #tpu.memory_space<smem>>
    %1378 = vector.broadcast %1377 : f32 to vector<16x128xf32>
    %1379 = arith.mulf %1368, %1378 : vector<16x128xf32>
    %1380 = arith.addf %1358, %1379 : vector<16x128xf32>
    %c19_217 = arith.constant 19 : index
    %1381 = memref.load %arg3[%c19_217] : memref<288xf32, #tpu.memory_space<smem>>
    %1382 = vector.broadcast %1381 : f32 to vector<16x128xf32>
    %1383 = arith.mulf %1368, %1382 : vector<16x128xf32>
    %1384 = arith.addf %1362, %1383 : vector<16x128xf32>
    %c48_218 = arith.constant 48 : index
    %1385 = memref.load %arg3[%c48_218] : memref<288xf32, #tpu.memory_space<smem>>
    %1386 = vector.broadcast %1385 : f32 to vector<16x128xf32>
    %1387 = arith.mulf %1365, %1386 : vector<16x128xf32>
    %1388 = arith.addf %1372, %1387 : vector<16x128xf32>
    %c49_219 = arith.constant 49 : index
    %1389 = memref.load %arg3[%c49_219] : memref<288xf32, #tpu.memory_space<smem>>
    %1390 = vector.broadcast %1389 : f32 to vector<16x128xf32>
    %1391 = arith.mulf %1365, %1390 : vector<16x128xf32>
    %1392 = arith.addf %1376, %1391 : vector<16x128xf32>
    %c50_220 = arith.constant 50 : index
    %1393 = memref.load %arg3[%c50_220] : memref<288xf32, #tpu.memory_space<smem>>
    %1394 = vector.broadcast %1393 : f32 to vector<16x128xf32>
    %1395 = arith.mulf %1365, %1394 : vector<16x128xf32>
    %1396 = arith.addf %1380, %1395 : vector<16x128xf32>
    %c51_221 = arith.constant 51 : index
    %1397 = memref.load %arg3[%c51_221] : memref<288xf32, #tpu.memory_space<smem>>
    %1398 = vector.broadcast %1397 : f32 to vector<16x128xf32>
    %1399 = arith.mulf %1365, %1398 : vector<16x128xf32>
    %1400 = arith.addf %1384, %1399 : vector<16x128xf32>
    %c127_i32_222 = arith.constant 127 : i32
    %1401 = tpu.dynamic_rotate %1365 by %c127_i32_222 dim 1 : vector<16x128xf32>, i32 -> vector<16x128xf32>
    %cst_223 = arith.constant 0.000000e+00 : f32
    %1402 = vector.broadcast %cst_223 : f32 to vector<16x128xf32>
    %1403 = arith.select %14, %1401, %1402 : vector<16x128xi1>, vector<16x128xf32>
    %c80_224 = arith.constant 80 : index
    %1404 = memref.load %arg3[%c80_224] : memref<288xf32, #tpu.memory_space<smem>>
    %1405 = vector.broadcast %1404 : f32 to vector<16x128xf32>
    %1406 = arith.mulf %1403, %1405 : vector<16x128xf32>
    %1407 = arith.addf %1388, %1406 : vector<16x128xf32>
    %c81_225 = arith.constant 81 : index
    %1408 = memref.load %arg3[%c81_225] : memref<288xf32, #tpu.memory_space<smem>>
    %1409 = vector.broadcast %1408 : f32 to vector<16x128xf32>
    %1410 = arith.mulf %1403, %1409 : vector<16x128xf32>
    %1411 = arith.addf %1392, %1410 : vector<16x128xf32>
    %c82_226 = arith.constant 82 : index
    %1412 = memref.load %arg3[%c82_226] : memref<288xf32, #tpu.memory_space<smem>>
    %1413 = vector.broadcast %1412 : f32 to vector<16x128xf32>
    %1414 = arith.mulf %1403, %1413 : vector<16x128xf32>
    %1415 = arith.addf %1396, %1414 : vector<16x128xf32>
    %c83_227 = arith.constant 83 : index
    %1416 = memref.load %arg3[%c83_227] : memref<288xf32, #tpu.memory_space<smem>>
    %1417 = vector.broadcast %1416 : f32 to vector<16x128xf32>
    %1418 = arith.mulf %1403, %1417 : vector<16x128xf32>
    %1419 = arith.addf %1400, %1418 : vector<16x128xf32>
    %c1_i32_228 = arith.constant 1 : i32
    %1420 = tpu.dynamic_rotate %671 by %c1_i32_228 dim 1 : vector<16x128xf32>, i32 -> vector<16x128xf32>
    %cst_229 = arith.constant 0.000000e+00 : f32
    %1421 = vector.broadcast %cst_229 : f32 to vector<16x128xf32>
    %1422 = arith.select %12, %1420, %1421 : vector<16x128xi1>, vector<16x128xf32>
    %c112_230 = arith.constant 112 : index
    %1423 = memref.load %arg3[%c112_230] : memref<288xf32, #tpu.memory_space<smem>>
    %1424 = vector.broadcast %1423 : f32 to vector<16x128xf32>
    %1425 = arith.mulf %1422, %1424 : vector<16x128xf32>
    %1426 = arith.addf %1407, %1425 : vector<16x128xf32>
    %c113_231 = arith.constant 113 : index
    %1427 = memref.load %arg3[%c113_231] : memref<288xf32, #tpu.memory_space<smem>>
    %1428 = vector.broadcast %1427 : f32 to vector<16x128xf32>
    %1429 = arith.mulf %1422, %1428 : vector<16x128xf32>
    %1430 = arith.addf %1411, %1429 : vector<16x128xf32>
    %c114_232 = arith.constant 114 : index
    %1431 = memref.load %arg3[%c114_232] : memref<288xf32, #tpu.memory_space<smem>>
    %1432 = vector.broadcast %1431 : f32 to vector<16x128xf32>
    %1433 = arith.mulf %1422, %1432 : vector<16x128xf32>
    %1434 = arith.addf %1415, %1433 : vector<16x128xf32>
    %c115_233 = arith.constant 115 : index
    %1435 = memref.load %arg3[%c115_233] : memref<288xf32, #tpu.memory_space<smem>>
    %1436 = vector.broadcast %1435 : f32 to vector<16x128xf32>
    %1437 = arith.mulf %1422, %1436 : vector<16x128xf32>
    %1438 = arith.addf %1419, %1437 : vector<16x128xf32>
    %c144 = arith.constant 144 : index
    %1439 = memref.load %arg3[%c144] : memref<288xf32, #tpu.memory_space<smem>>
    %1440 = vector.broadcast %1439 : f32 to vector<16x128xf32>
    %1441 = arith.mulf %671, %1440 : vector<16x128xf32>
    %1442 = arith.addf %1426, %1441 : vector<16x128xf32>
    %c145 = arith.constant 145 : index
    %1443 = memref.load %arg3[%c145] : memref<288xf32, #tpu.memory_space<smem>>
    %1444 = vector.broadcast %1443 : f32 to vector<16x128xf32>
    %1445 = arith.mulf %671, %1444 : vector<16x128xf32>
    %1446 = arith.addf %1430, %1445 : vector<16x128xf32>
    %c146 = arith.constant 146 : index
    %1447 = memref.load %arg3[%c146] : memref<288xf32, #tpu.memory_space<smem>>
    %1448 = vector.broadcast %1447 : f32 to vector<16x128xf32>
    %1449 = arith.mulf %671, %1448 : vector<16x128xf32>
    %1450 = arith.addf %1434, %1449 : vector<16x128xf32>
    %c147 = arith.constant 147 : index
    %1451 = memref.load %arg3[%c147] : memref<288xf32, #tpu.memory_space<smem>>
    %1452 = vector.broadcast %1451 : f32 to vector<16x128xf32>
    %1453 = arith.mulf %671, %1452 : vector<16x128xf32>
    %1454 = arith.addf %1438, %1453 : vector<16x128xf32>
    %c127_i32_234 = arith.constant 127 : i32
    %1455 = tpu.dynamic_rotate %671 by %c127_i32_234 dim 1 : vector<16x128xf32>, i32 -> vector<16x128xf32>
    %cst_235 = arith.constant 0.000000e+00 : f32
    %1456 = vector.broadcast %cst_235 : f32 to vector<16x128xf32>
    %1457 = arith.select %14, %1455, %1456 : vector<16x128xi1>, vector<16x128xf32>
    %c176 = arith.constant 176 : index
    %1458 = memref.load %arg3[%c176] : memref<288xf32, #tpu.memory_space<smem>>
    %1459 = vector.broadcast %1458 : f32 to vector<16x128xf32>
    %1460 = arith.mulf %1457, %1459 : vector<16x128xf32>
    %1461 = arith.addf %1442, %1460 : vector<16x128xf32>
    %c177 = arith.constant 177 : index
    %1462 = memref.load %arg3[%c177] : memref<288xf32, #tpu.memory_space<smem>>
    %1463 = vector.broadcast %1462 : f32 to vector<16x128xf32>
    %1464 = arith.mulf %1457, %1463 : vector<16x128xf32>
    %1465 = arith.addf %1446, %1464 : vector<16x128xf32>
    %c178 = arith.constant 178 : index
    %1466 = memref.load %arg3[%c178] : memref<288xf32, #tpu.memory_space<smem>>
    %1467 = vector.broadcast %1466 : f32 to vector<16x128xf32>
    %1468 = arith.mulf %1457, %1467 : vector<16x128xf32>
    %1469 = arith.addf %1450, %1468 : vector<16x128xf32>
    %c179 = arith.constant 179 : index
    %1470 = memref.load %arg3[%c179] : memref<288xf32, #tpu.memory_space<smem>>
    %1471 = vector.broadcast %1470 : f32 to vector<16x128xf32>
    %1472 = arith.mulf %1457, %1471 : vector<16x128xf32>
    %1473 = arith.addf %1454, %1472 : vector<16x128xf32>
    %c15_i32_236 = arith.constant 15 : i32
    %1474 = tpu.dynamic_rotate %671 by %c15_i32_236 dim 0 : vector<16x128xf32>, i32 -> vector<16x128xf32>
    %cst_237 = arith.constant 0.000000e+00 : f32
    %1475 = vector.broadcast %cst_237 : f32 to vector<16x128xf32>
    %1476 = arith.select %10, %1474, %1475 : vector<16x128xi1>, vector<16x128xf32>
    %c1_i32_238 = arith.constant 1 : i32
    %1477 = tpu.dynamic_rotate %1476 by %c1_i32_238 dim 1 : vector<16x128xf32>, i32 -> vector<16x128xf32>
    %cst_239 = arith.constant 0.000000e+00 : f32
    %1478 = vector.broadcast %cst_239 : f32 to vector<16x128xf32>
    %1479 = arith.select %12, %1477, %1478 : vector<16x128xi1>, vector<16x128xf32>
    %c208 = arith.constant 208 : index
    %1480 = memref.load %arg3[%c208] : memref<288xf32, #tpu.memory_space<smem>>
    %1481 = vector.broadcast %1480 : f32 to vector<16x128xf32>
    %1482 = arith.mulf %1479, %1481 : vector<16x128xf32>
    %1483 = arith.addf %1461, %1482 : vector<16x128xf32>
    %c209 = arith.constant 209 : index
    %1484 = memref.load %arg3[%c209] : memref<288xf32, #tpu.memory_space<smem>>
    %1485 = vector.broadcast %1484 : f32 to vector<16x128xf32>
    %1486 = arith.mulf %1479, %1485 : vector<16x128xf32>
    %1487 = arith.addf %1465, %1486 : vector<16x128xf32>
    %c210 = arith.constant 210 : index
    %1488 = memref.load %arg3[%c210] : memref<288xf32, #tpu.memory_space<smem>>
    %1489 = vector.broadcast %1488 : f32 to vector<16x128xf32>
    %1490 = arith.mulf %1479, %1489 : vector<16x128xf32>
    %1491 = arith.addf %1469, %1490 : vector<16x128xf32>
    %c211 = arith.constant 211 : index
    %1492 = memref.load %arg3[%c211] : memref<288xf32, #tpu.memory_space<smem>>
    %1493 = vector.broadcast %1492 : f32 to vector<16x128xf32>
    %1494 = arith.mulf %1479, %1493 : vector<16x128xf32>
    %1495 = arith.addf %1473, %1494 : vector<16x128xf32>
    %c240 = arith.constant 240 : index
    %1496 = memref.load %arg3[%c240] : memref<288xf32, #tpu.memory_space<smem>>
    %1497 = vector.broadcast %1496 : f32 to vector<16x128xf32>
    %1498 = arith.mulf %1476, %1497 : vector<16x128xf32>
    %1499 = arith.addf %1483, %1498 : vector<16x128xf32>
    %c241 = arith.constant 241 : index
    %1500 = memref.load %arg3[%c241] : memref<288xf32, #tpu.memory_space<smem>>
    %1501 = vector.broadcast %1500 : f32 to vector<16x128xf32>
    %1502 = arith.mulf %1476, %1501 : vector<16x128xf32>
    %1503 = arith.addf %1487, %1502 : vector<16x128xf32>
    %c242 = arith.constant 242 : index
    %1504 = memref.load %arg3[%c242] : memref<288xf32, #tpu.memory_space<smem>>
    %1505 = vector.broadcast %1504 : f32 to vector<16x128xf32>
    %1506 = arith.mulf %1476, %1505 : vector<16x128xf32>
    %1507 = arith.addf %1491, %1506 : vector<16x128xf32>
    %c243 = arith.constant 243 : index
    %1508 = memref.load %arg3[%c243] : memref<288xf32, #tpu.memory_space<smem>>
    %1509 = vector.broadcast %1508 : f32 to vector<16x128xf32>
    %1510 = arith.mulf %1476, %1509 : vector<16x128xf32>
    %1511 = arith.addf %1495, %1510 : vector<16x128xf32>
    %c127_i32_240 = arith.constant 127 : i32
    %1512 = tpu.dynamic_rotate %1476 by %c127_i32_240 dim 1 : vector<16x128xf32>, i32 -> vector<16x128xf32>
    %cst_241 = arith.constant 0.000000e+00 : f32
    %1513 = vector.broadcast %cst_241 : f32 to vector<16x128xf32>
    %1514 = arith.select %14, %1512, %1513 : vector<16x128xi1>, vector<16x128xf32>
    %c272 = arith.constant 272 : index
    %1515 = memref.load %arg3[%c272] : memref<288xf32, #tpu.memory_space<smem>>
    %1516 = vector.broadcast %1515 : f32 to vector<16x128xf32>
    %1517 = arith.mulf %1514, %1516 : vector<16x128xf32>
    %1518 = arith.addf %1499, %1517 : vector<16x128xf32>
    %c273 = arith.constant 273 : index
    %1519 = memref.load %arg3[%c273] : memref<288xf32, #tpu.memory_space<smem>>
    %1520 = vector.broadcast %1519 : f32 to vector<16x128xf32>
    %1521 = arith.mulf %1514, %1520 : vector<16x128xf32>
    %1522 = arith.addf %1503, %1521 : vector<16x128xf32>
    %c274 = arith.constant 274 : index
    %1523 = memref.load %arg3[%c274] : memref<288xf32, #tpu.memory_space<smem>>
    %1524 = vector.broadcast %1523 : f32 to vector<16x128xf32>
    %1525 = arith.mulf %1514, %1524 : vector<16x128xf32>
    %1526 = arith.addf %1507, %1525 : vector<16x128xf32>
    %c275 = arith.constant 275 : index
    %1527 = memref.load %arg3[%c275] : memref<288xf32, #tpu.memory_space<smem>>
    %1528 = vector.broadcast %1527 : f32 to vector<16x128xf32>
    %1529 = arith.mulf %1514, %1528 : vector<16x128xf32>
    %1530 = arith.addf %1511, %1529 : vector<16x128xf32>
    %c1_i32_242 = arith.constant 1 : i32
    %1531 = tpu.dynamic_rotate %676 by %c1_i32_242 dim 0 : vector<16x128xf32>, i32 -> vector<16x128xf32>
    %cst_243 = arith.constant 0.000000e+00 : f32
    %1532 = vector.broadcast %cst_243 : f32 to vector<16x128xf32>
    %1533 = arith.select %8, %1531, %1532 : vector<16x128xi1>, vector<16x128xf32>
    %c1_i32_244 = arith.constant 1 : i32
    %1534 = tpu.dynamic_rotate %1533 by %c1_i32_244 dim 1 : vector<16x128xf32>, i32 -> vector<16x128xf32>
    %cst_245 = arith.constant 0.000000e+00 : f32
    %1535 = vector.broadcast %cst_245 : f32 to vector<16x128xf32>
    %1536 = arith.select %12, %1534, %1535 : vector<16x128xi1>, vector<16x128xf32>
    %c20_246 = arith.constant 20 : index
    %1537 = memref.load %arg3[%c20_246] : memref<288xf32, #tpu.memory_space<smem>>
    %1538 = vector.broadcast %1537 : f32 to vector<16x128xf32>
    %1539 = arith.mulf %1536, %1538 : vector<16x128xf32>
    %1540 = arith.addf %1518, %1539 : vector<16x128xf32>
    %c21_247 = arith.constant 21 : index
    %1541 = memref.load %arg3[%c21_247] : memref<288xf32, #tpu.memory_space<smem>>
    %1542 = vector.broadcast %1541 : f32 to vector<16x128xf32>
    %1543 = arith.mulf %1536, %1542 : vector<16x128xf32>
    %1544 = arith.addf %1522, %1543 : vector<16x128xf32>
    %c22_248 = arith.constant 22 : index
    %1545 = memref.load %arg3[%c22_248] : memref<288xf32, #tpu.memory_space<smem>>
    %1546 = vector.broadcast %1545 : f32 to vector<16x128xf32>
    %1547 = arith.mulf %1536, %1546 : vector<16x128xf32>
    %1548 = arith.addf %1526, %1547 : vector<16x128xf32>
    %c23_249 = arith.constant 23 : index
    %1549 = memref.load %arg3[%c23_249] : memref<288xf32, #tpu.memory_space<smem>>
    %1550 = vector.broadcast %1549 : f32 to vector<16x128xf32>
    %1551 = arith.mulf %1536, %1550 : vector<16x128xf32>
    %1552 = arith.addf %1530, %1551 : vector<16x128xf32>
    %c52_250 = arith.constant 52 : index
    %1553 = memref.load %arg3[%c52_250] : memref<288xf32, #tpu.memory_space<smem>>
    %1554 = vector.broadcast %1553 : f32 to vector<16x128xf32>
    %1555 = arith.mulf %1533, %1554 : vector<16x128xf32>
    %1556 = arith.addf %1540, %1555 : vector<16x128xf32>
    %c53_251 = arith.constant 53 : index
    %1557 = memref.load %arg3[%c53_251] : memref<288xf32, #tpu.memory_space<smem>>
    %1558 = vector.broadcast %1557 : f32 to vector<16x128xf32>
    %1559 = arith.mulf %1533, %1558 : vector<16x128xf32>
    %1560 = arith.addf %1544, %1559 : vector<16x128xf32>
    %c54_252 = arith.constant 54 : index
    %1561 = memref.load %arg3[%c54_252] : memref<288xf32, #tpu.memory_space<smem>>
    %1562 = vector.broadcast %1561 : f32 to vector<16x128xf32>
    %1563 = arith.mulf %1533, %1562 : vector<16x128xf32>
    %1564 = arith.addf %1548, %1563 : vector<16x128xf32>
    %c55_253 = arith.constant 55 : index
    %1565 = memref.load %arg3[%c55_253] : memref<288xf32, #tpu.memory_space<smem>>
    %1566 = vector.broadcast %1565 : f32 to vector<16x128xf32>
    %1567 = arith.mulf %1533, %1566 : vector<16x128xf32>
    %1568 = arith.addf %1552, %1567 : vector<16x128xf32>
    %c127_i32_254 = arith.constant 127 : i32
    %1569 = tpu.dynamic_rotate %1533 by %c127_i32_254 dim 1 : vector<16x128xf32>, i32 -> vector<16x128xf32>
    %cst_255 = arith.constant 0.000000e+00 : f32
    %1570 = vector.broadcast %cst_255 : f32 to vector<16x128xf32>
    %1571 = arith.select %14, %1569, %1570 : vector<16x128xi1>, vector<16x128xf32>
    %c84_256 = arith.constant 84 : index
    %1572 = memref.load %arg3[%c84_256] : memref<288xf32, #tpu.memory_space<smem>>
    %1573 = vector.broadcast %1572 : f32 to vector<16x128xf32>
    %1574 = arith.mulf %1571, %1573 : vector<16x128xf32>
    %1575 = arith.addf %1556, %1574 : vector<16x128xf32>
    %c85_257 = arith.constant 85 : index
    %1576 = memref.load %arg3[%c85_257] : memref<288xf32, #tpu.memory_space<smem>>
    %1577 = vector.broadcast %1576 : f32 to vector<16x128xf32>
    %1578 = arith.mulf %1571, %1577 : vector<16x128xf32>
    %1579 = arith.addf %1560, %1578 : vector<16x128xf32>
    %c86_258 = arith.constant 86 : index
    %1580 = memref.load %arg3[%c86_258] : memref<288xf32, #tpu.memory_space<smem>>
    %1581 = vector.broadcast %1580 : f32 to vector<16x128xf32>
    %1582 = arith.mulf %1571, %1581 : vector<16x128xf32>
    %1583 = arith.addf %1564, %1582 : vector<16x128xf32>
    %c87_259 = arith.constant 87 : index
    %1584 = memref.load %arg3[%c87_259] : memref<288xf32, #tpu.memory_space<smem>>
    %1585 = vector.broadcast %1584 : f32 to vector<16x128xf32>
    %1586 = arith.mulf %1571, %1585 : vector<16x128xf32>
    %1587 = arith.addf %1568, %1586 : vector<16x128xf32>
    %c1_i32_260 = arith.constant 1 : i32
    %1588 = tpu.dynamic_rotate %676 by %c1_i32_260 dim 1 : vector<16x128xf32>, i32 -> vector<16x128xf32>
    %cst_261 = arith.constant 0.000000e+00 : f32
    %1589 = vector.broadcast %cst_261 : f32 to vector<16x128xf32>
    %1590 = arith.select %12, %1588, %1589 : vector<16x128xi1>, vector<16x128xf32>
    %c116_262 = arith.constant 116 : index
    %1591 = memref.load %arg3[%c116_262] : memref<288xf32, #tpu.memory_space<smem>>
    %1592 = vector.broadcast %1591 : f32 to vector<16x128xf32>
    %1593 = arith.mulf %1590, %1592 : vector<16x128xf32>
    %1594 = arith.addf %1575, %1593 : vector<16x128xf32>
    %c117_263 = arith.constant 117 : index
    %1595 = memref.load %arg3[%c117_263] : memref<288xf32, #tpu.memory_space<smem>>
    %1596 = vector.broadcast %1595 : f32 to vector<16x128xf32>
    %1597 = arith.mulf %1590, %1596 : vector<16x128xf32>
    %1598 = arith.addf %1579, %1597 : vector<16x128xf32>
    %c118_264 = arith.constant 118 : index
    %1599 = memref.load %arg3[%c118_264] : memref<288xf32, #tpu.memory_space<smem>>
    %1600 = vector.broadcast %1599 : f32 to vector<16x128xf32>
    %1601 = arith.mulf %1590, %1600 : vector<16x128xf32>
    %1602 = arith.addf %1583, %1601 : vector<16x128xf32>
    %c119_265 = arith.constant 119 : index
    %1603 = memref.load %arg3[%c119_265] : memref<288xf32, #tpu.memory_space<smem>>
    %1604 = vector.broadcast %1603 : f32 to vector<16x128xf32>
    %1605 = arith.mulf %1590, %1604 : vector<16x128xf32>
    %1606 = arith.addf %1587, %1605 : vector<16x128xf32>
    %c148 = arith.constant 148 : index
    %1607 = memref.load %arg3[%c148] : memref<288xf32, #tpu.memory_space<smem>>
    %1608 = vector.broadcast %1607 : f32 to vector<16x128xf32>
    %1609 = arith.mulf %676, %1608 : vector<16x128xf32>
    %1610 = arith.addf %1594, %1609 : vector<16x128xf32>
    %c149 = arith.constant 149 : index
    %1611 = memref.load %arg3[%c149] : memref<288xf32, #tpu.memory_space<smem>>
    %1612 = vector.broadcast %1611 : f32 to vector<16x128xf32>
    %1613 = arith.mulf %676, %1612 : vector<16x128xf32>
    %1614 = arith.addf %1598, %1613 : vector<16x128xf32>
    %c150 = arith.constant 150 : index
    %1615 = memref.load %arg3[%c150] : memref<288xf32, #tpu.memory_space<smem>>
    %1616 = vector.broadcast %1615 : f32 to vector<16x128xf32>
    %1617 = arith.mulf %676, %1616 : vector<16x128xf32>
    %1618 = arith.addf %1602, %1617 : vector<16x128xf32>
    %c151 = arith.constant 151 : index
    %1619 = memref.load %arg3[%c151] : memref<288xf32, #tpu.memory_space<smem>>
    %1620 = vector.broadcast %1619 : f32 to vector<16x128xf32>
    %1621 = arith.mulf %676, %1620 : vector<16x128xf32>
    %1622 = arith.addf %1606, %1621 : vector<16x128xf32>
    %c127_i32_266 = arith.constant 127 : i32
    %1623 = tpu.dynamic_rotate %676 by %c127_i32_266 dim 1 : vector<16x128xf32>, i32 -> vector<16x128xf32>
    %cst_267 = arith.constant 0.000000e+00 : f32
    %1624 = vector.broadcast %cst_267 : f32 to vector<16x128xf32>
    %1625 = arith.select %14, %1623, %1624 : vector<16x128xi1>, vector<16x128xf32>
    %c180 = arith.constant 180 : index
    %1626 = memref.load %arg3[%c180] : memref<288xf32, #tpu.memory_space<smem>>
    %1627 = vector.broadcast %1626 : f32 to vector<16x128xf32>
    %1628 = arith.mulf %1625, %1627 : vector<16x128xf32>
    %1629 = arith.addf %1610, %1628 : vector<16x128xf32>
    %c181 = arith.constant 181 : index
    %1630 = memref.load %arg3[%c181] : memref<288xf32, #tpu.memory_space<smem>>
    %1631 = vector.broadcast %1630 : f32 to vector<16x128xf32>
    %1632 = arith.mulf %1625, %1631 : vector<16x128xf32>
    %1633 = arith.addf %1614, %1632 : vector<16x128xf32>
    %c182 = arith.constant 182 : index
    %1634 = memref.load %arg3[%c182] : memref<288xf32, #tpu.memory_space<smem>>
    %1635 = vector.broadcast %1634 : f32 to vector<16x128xf32>
    %1636 = arith.mulf %1625, %1635 : vector<16x128xf32>
    %1637 = arith.addf %1618, %1636 : vector<16x128xf32>
    %c183 = arith.constant 183 : index
    %1638 = memref.load %arg3[%c183] : memref<288xf32, #tpu.memory_space<smem>>
    %1639 = vector.broadcast %1638 : f32 to vector<16x128xf32>
    %1640 = arith.mulf %1625, %1639 : vector<16x128xf32>
    %1641 = arith.addf %1622, %1640 : vector<16x128xf32>
    %c15_i32_268 = arith.constant 15 : i32
    %1642 = tpu.dynamic_rotate %676 by %c15_i32_268 dim 0 : vector<16x128xf32>, i32 -> vector<16x128xf32>
    %cst_269 = arith.constant 0.000000e+00 : f32
    %1643 = vector.broadcast %cst_269 : f32 to vector<16x128xf32>
    %1644 = arith.select %10, %1642, %1643 : vector<16x128xi1>, vector<16x128xf32>
    %c1_i32_270 = arith.constant 1 : i32
    %1645 = tpu.dynamic_rotate %1644 by %c1_i32_270 dim 1 : vector<16x128xf32>, i32 -> vector<16x128xf32>
    %cst_271 = arith.constant 0.000000e+00 : f32
    %1646 = vector.broadcast %cst_271 : f32 to vector<16x128xf32>
    %1647 = arith.select %12, %1645, %1646 : vector<16x128xi1>, vector<16x128xf32>
    %c212 = arith.constant 212 : index
    %1648 = memref.load %arg3[%c212] : memref<288xf32, #tpu.memory_space<smem>>
    %1649 = vector.broadcast %1648 : f32 to vector<16x128xf32>
    %1650 = arith.mulf %1647, %1649 : vector<16x128xf32>
    %1651 = arith.addf %1629, %1650 : vector<16x128xf32>
    %c213 = arith.constant 213 : index
    %1652 = memref.load %arg3[%c213] : memref<288xf32, #tpu.memory_space<smem>>
    %1653 = vector.broadcast %1652 : f32 to vector<16x128xf32>
    %1654 = arith.mulf %1647, %1653 : vector<16x128xf32>
    %1655 = arith.addf %1633, %1654 : vector<16x128xf32>
    %c214 = arith.constant 214 : index
    %1656 = memref.load %arg3[%c214] : memref<288xf32, #tpu.memory_space<smem>>
    %1657 = vector.broadcast %1656 : f32 to vector<16x128xf32>
    %1658 = arith.mulf %1647, %1657 : vector<16x128xf32>
    %1659 = arith.addf %1637, %1658 : vector<16x128xf32>
    %c215 = arith.constant 215 : index
    %1660 = memref.load %arg3[%c215] : memref<288xf32, #tpu.memory_space<smem>>
    %1661 = vector.broadcast %1660 : f32 to vector<16x128xf32>
    %1662 = arith.mulf %1647, %1661 : vector<16x128xf32>
    %1663 = arith.addf %1641, %1662 : vector<16x128xf32>
    %c244 = arith.constant 244 : index
    %1664 = memref.load %arg3[%c244] : memref<288xf32, #tpu.memory_space<smem>>
    %1665 = vector.broadcast %1664 : f32 to vector<16x128xf32>
    %1666 = arith.mulf %1644, %1665 : vector<16x128xf32>
    %1667 = arith.addf %1651, %1666 : vector<16x128xf32>
    %c245 = arith.constant 245 : index
    %1668 = memref.load %arg3[%c245] : memref<288xf32, #tpu.memory_space<smem>>
    %1669 = vector.broadcast %1668 : f32 to vector<16x128xf32>
    %1670 = arith.mulf %1644, %1669 : vector<16x128xf32>
    %1671 = arith.addf %1655, %1670 : vector<16x128xf32>
    %c246 = arith.constant 246 : index
    %1672 = memref.load %arg3[%c246] : memref<288xf32, #tpu.memory_space<smem>>
    %1673 = vector.broadcast %1672 : f32 to vector<16x128xf32>
    %1674 = arith.mulf %1644, %1673 : vector<16x128xf32>
    %1675 = arith.addf %1659, %1674 : vector<16x128xf32>
    %c247 = arith.constant 247 : index
    %1676 = memref.load %arg3[%c247] : memref<288xf32, #tpu.memory_space<smem>>
    %1677 = vector.broadcast %1676 : f32 to vector<16x128xf32>
    %1678 = arith.mulf %1644, %1677 : vector<16x128xf32>
    %1679 = arith.addf %1663, %1678 : vector<16x128xf32>
    %c127_i32_272 = arith.constant 127 : i32
    %1680 = tpu.dynamic_rotate %1644 by %c127_i32_272 dim 1 : vector<16x128xf32>, i32 -> vector<16x128xf32>
    %cst_273 = arith.constant 0.000000e+00 : f32
    %1681 = vector.broadcast %cst_273 : f32 to vector<16x128xf32>
    %1682 = arith.select %14, %1680, %1681 : vector<16x128xi1>, vector<16x128xf32>
    %c276 = arith.constant 276 : index
    %1683 = memref.load %arg3[%c276] : memref<288xf32, #tpu.memory_space<smem>>
    %1684 = vector.broadcast %1683 : f32 to vector<16x128xf32>
    %1685 = arith.mulf %1682, %1684 : vector<16x128xf32>
    %1686 = arith.addf %1667, %1685 : vector<16x128xf32>
    %c277 = arith.constant 277 : index
    %1687 = memref.load %arg3[%c277] : memref<288xf32, #tpu.memory_space<smem>>
    %1688 = vector.broadcast %1687 : f32 to vector<16x128xf32>
    %1689 = arith.mulf %1682, %1688 : vector<16x128xf32>
    %1690 = arith.addf %1671, %1689 : vector<16x128xf32>
    %c278 = arith.constant 278 : index
    %1691 = memref.load %arg3[%c278] : memref<288xf32, #tpu.memory_space<smem>>
    %1692 = vector.broadcast %1691 : f32 to vector<16x128xf32>
    %1693 = arith.mulf %1682, %1692 : vector<16x128xf32>
    %1694 = arith.addf %1675, %1693 : vector<16x128xf32>
    %c279 = arith.constant 279 : index
    %1695 = memref.load %arg3[%c279] : memref<288xf32, #tpu.memory_space<smem>>
    %1696 = vector.broadcast %1695 : f32 to vector<16x128xf32>
    %1697 = arith.mulf %1682, %1696 : vector<16x128xf32>
    %1698 = arith.addf %1679, %1697 : vector<16x128xf32>
    %c1_i32_274 = arith.constant 1 : i32
    %1699 = tpu.dynamic_rotate %681 by %c1_i32_274 dim 0 : vector<16x128xf32>, i32 -> vector<16x128xf32>
    %cst_275 = arith.constant 0.000000e+00 : f32
    %1700 = vector.broadcast %cst_275 : f32 to vector<16x128xf32>
    %1701 = arith.select %8, %1699, %1700 : vector<16x128xi1>, vector<16x128xf32>
    %c1_i32_276 = arith.constant 1 : i32
    %1702 = tpu.dynamic_rotate %1701 by %c1_i32_276 dim 1 : vector<16x128xf32>, i32 -> vector<16x128xf32>
    %cst_277 = arith.constant 0.000000e+00 : f32
    %1703 = vector.broadcast %cst_277 : f32 to vector<16x128xf32>
    %1704 = arith.select %12, %1702, %1703 : vector<16x128xi1>, vector<16x128xf32>
    %c24_278 = arith.constant 24 : index
    %1705 = memref.load %arg3[%c24_278] : memref<288xf32, #tpu.memory_space<smem>>
    %1706 = vector.broadcast %1705 : f32 to vector<16x128xf32>
    %1707 = arith.mulf %1704, %1706 : vector<16x128xf32>
    %1708 = arith.addf %1686, %1707 : vector<16x128xf32>
    %c25_279 = arith.constant 25 : index
    %1709 = memref.load %arg3[%c25_279] : memref<288xf32, #tpu.memory_space<smem>>
    %1710 = vector.broadcast %1709 : f32 to vector<16x128xf32>
    %1711 = arith.mulf %1704, %1710 : vector<16x128xf32>
    %1712 = arith.addf %1690, %1711 : vector<16x128xf32>
    %c26_280 = arith.constant 26 : index
    %1713 = memref.load %arg3[%c26_280] : memref<288xf32, #tpu.memory_space<smem>>
    %1714 = vector.broadcast %1713 : f32 to vector<16x128xf32>
    %1715 = arith.mulf %1704, %1714 : vector<16x128xf32>
    %1716 = arith.addf %1694, %1715 : vector<16x128xf32>
    %c27_281 = arith.constant 27 : index
    %1717 = memref.load %arg3[%c27_281] : memref<288xf32, #tpu.memory_space<smem>>
    %1718 = vector.broadcast %1717 : f32 to vector<16x128xf32>
    %1719 = arith.mulf %1704, %1718 : vector<16x128xf32>
    %1720 = arith.addf %1698, %1719 : vector<16x128xf32>
    %c56_282 = arith.constant 56 : index
    %1721 = memref.load %arg3[%c56_282] : memref<288xf32, #tpu.memory_space<smem>>
    %1722 = vector.broadcast %1721 : f32 to vector<16x128xf32>
    %1723 = arith.mulf %1701, %1722 : vector<16x128xf32>
    %1724 = arith.addf %1708, %1723 : vector<16x128xf32>
    %c57_283 = arith.constant 57 : index
    %1725 = memref.load %arg3[%c57_283] : memref<288xf32, #tpu.memory_space<smem>>
    %1726 = vector.broadcast %1725 : f32 to vector<16x128xf32>
    %1727 = arith.mulf %1701, %1726 : vector<16x128xf32>
    %1728 = arith.addf %1712, %1727 : vector<16x128xf32>
    %c58_284 = arith.constant 58 : index
    %1729 = memref.load %arg3[%c58_284] : memref<288xf32, #tpu.memory_space<smem>>
    %1730 = vector.broadcast %1729 : f32 to vector<16x128xf32>
    %1731 = arith.mulf %1701, %1730 : vector<16x128xf32>
    %1732 = arith.addf %1716, %1731 : vector<16x128xf32>
    %c59_285 = arith.constant 59 : index
    %1733 = memref.load %arg3[%c59_285] : memref<288xf32, #tpu.memory_space<smem>>
    %1734 = vector.broadcast %1733 : f32 to vector<16x128xf32>
    %1735 = arith.mulf %1701, %1734 : vector<16x128xf32>
    %1736 = arith.addf %1720, %1735 : vector<16x128xf32>
    %c127_i32_286 = arith.constant 127 : i32
    %1737 = tpu.dynamic_rotate %1701 by %c127_i32_286 dim 1 : vector<16x128xf32>, i32 -> vector<16x128xf32>
    %cst_287 = arith.constant 0.000000e+00 : f32
    %1738 = vector.broadcast %cst_287 : f32 to vector<16x128xf32>
    %1739 = arith.select %14, %1737, %1738 : vector<16x128xi1>, vector<16x128xf32>
    %c88_288 = arith.constant 88 : index
    %1740 = memref.load %arg3[%c88_288] : memref<288xf32, #tpu.memory_space<smem>>
    %1741 = vector.broadcast %1740 : f32 to vector<16x128xf32>
    %1742 = arith.mulf %1739, %1741 : vector<16x128xf32>
    %1743 = arith.addf %1724, %1742 : vector<16x128xf32>
    %c89_289 = arith.constant 89 : index
    %1744 = memref.load %arg3[%c89_289] : memref<288xf32, #tpu.memory_space<smem>>
    %1745 = vector.broadcast %1744 : f32 to vector<16x128xf32>
    %1746 = arith.mulf %1739, %1745 : vector<16x128xf32>
    %1747 = arith.addf %1728, %1746 : vector<16x128xf32>
    %c90_290 = arith.constant 90 : index
    %1748 = memref.load %arg3[%c90_290] : memref<288xf32, #tpu.memory_space<smem>>
    %1749 = vector.broadcast %1748 : f32 to vector<16x128xf32>
    %1750 = arith.mulf %1739, %1749 : vector<16x128xf32>
    %1751 = arith.addf %1732, %1750 : vector<16x128xf32>
    %c91_291 = arith.constant 91 : index
    %1752 = memref.load %arg3[%c91_291] : memref<288xf32, #tpu.memory_space<smem>>
    %1753 = vector.broadcast %1752 : f32 to vector<16x128xf32>
    %1754 = arith.mulf %1739, %1753 : vector<16x128xf32>
    %1755 = arith.addf %1736, %1754 : vector<16x128xf32>
    %c1_i32_292 = arith.constant 1 : i32
    %1756 = tpu.dynamic_rotate %681 by %c1_i32_292 dim 1 : vector<16x128xf32>, i32 -> vector<16x128xf32>
    %cst_293 = arith.constant 0.000000e+00 : f32
    %1757 = vector.broadcast %cst_293 : f32 to vector<16x128xf32>
    %1758 = arith.select %12, %1756, %1757 : vector<16x128xi1>, vector<16x128xf32>
    %c120_294 = arith.constant 120 : index
    %1759 = memref.load %arg3[%c120_294] : memref<288xf32, #tpu.memory_space<smem>>
    %1760 = vector.broadcast %1759 : f32 to vector<16x128xf32>
    %1761 = arith.mulf %1758, %1760 : vector<16x128xf32>
    %1762 = arith.addf %1743, %1761 : vector<16x128xf32>
    %c121_295 = arith.constant 121 : index
    %1763 = memref.load %arg3[%c121_295] : memref<288xf32, #tpu.memory_space<smem>>
    %1764 = vector.broadcast %1763 : f32 to vector<16x128xf32>
    %1765 = arith.mulf %1758, %1764 : vector<16x128xf32>
    %1766 = arith.addf %1747, %1765 : vector<16x128xf32>
    %c122_296 = arith.constant 122 : index
    %1767 = memref.load %arg3[%c122_296] : memref<288xf32, #tpu.memory_space<smem>>
    %1768 = vector.broadcast %1767 : f32 to vector<16x128xf32>
    %1769 = arith.mulf %1758, %1768 : vector<16x128xf32>
    %1770 = arith.addf %1751, %1769 : vector<16x128xf32>
    %c123_297 = arith.constant 123 : index
    %1771 = memref.load %arg3[%c123_297] : memref<288xf32, #tpu.memory_space<smem>>
    %1772 = vector.broadcast %1771 : f32 to vector<16x128xf32>
    %1773 = arith.mulf %1758, %1772 : vector<16x128xf32>
    %1774 = arith.addf %1755, %1773 : vector<16x128xf32>
    %c152 = arith.constant 152 : index
    %1775 = memref.load %arg3[%c152] : memref<288xf32, #tpu.memory_space<smem>>
    %1776 = vector.broadcast %1775 : f32 to vector<16x128xf32>
    %1777 = arith.mulf %681, %1776 : vector<16x128xf32>
    %1778 = arith.addf %1762, %1777 : vector<16x128xf32>
    %c153 = arith.constant 153 : index
    %1779 = memref.load %arg3[%c153] : memref<288xf32, #tpu.memory_space<smem>>
    %1780 = vector.broadcast %1779 : f32 to vector<16x128xf32>
    %1781 = arith.mulf %681, %1780 : vector<16x128xf32>
    %1782 = arith.addf %1766, %1781 : vector<16x128xf32>
    %c154 = arith.constant 154 : index
    %1783 = memref.load %arg3[%c154] : memref<288xf32, #tpu.memory_space<smem>>
    %1784 = vector.broadcast %1783 : f32 to vector<16x128xf32>
    %1785 = arith.mulf %681, %1784 : vector<16x128xf32>
    %1786 = arith.addf %1770, %1785 : vector<16x128xf32>
    %c155 = arith.constant 155 : index
    %1787 = memref.load %arg3[%c155] : memref<288xf32, #tpu.memory_space<smem>>
    %1788 = vector.broadcast %1787 : f32 to vector<16x128xf32>
    %1789 = arith.mulf %681, %1788 : vector<16x128xf32>
    %1790 = arith.addf %1774, %1789 : vector<16x128xf32>
    %c127_i32_298 = arith.constant 127 : i32
    %1791 = tpu.dynamic_rotate %681 by %c127_i32_298 dim 1 : vector<16x128xf32>, i32 -> vector<16x128xf32>
    %cst_299 = arith.constant 0.000000e+00 : f32
    %1792 = vector.broadcast %cst_299 : f32 to vector<16x128xf32>
    %1793 = arith.select %14, %1791, %1792 : vector<16x128xi1>, vector<16x128xf32>
    %c184 = arith.constant 184 : index
    %1794 = memref.load %arg3[%c184] : memref<288xf32, #tpu.memory_space<smem>>
    %1795 = vector.broadcast %1794 : f32 to vector<16x128xf32>
    %1796 = arith.mulf %1793, %1795 : vector<16x128xf32>
    %1797 = arith.addf %1778, %1796 : vector<16x128xf32>
    %c185 = arith.constant 185 : index
    %1798 = memref.load %arg3[%c185] : memref<288xf32, #tpu.memory_space<smem>>
    %1799 = vector.broadcast %1798 : f32 to vector<16x128xf32>
    %1800 = arith.mulf %1793, %1799 : vector<16x128xf32>
    %1801 = arith.addf %1782, %1800 : vector<16x128xf32>
    %c186 = arith.constant 186 : index
    %1802 = memref.load %arg3[%c186] : memref<288xf32, #tpu.memory_space<smem>>
    %1803 = vector.broadcast %1802 : f32 to vector<16x128xf32>
    %1804 = arith.mulf %1793, %1803 : vector<16x128xf32>
    %1805 = arith.addf %1786, %1804 : vector<16x128xf32>
    %c187 = arith.constant 187 : index
    %1806 = memref.load %arg3[%c187] : memref<288xf32, #tpu.memory_space<smem>>
    %1807 = vector.broadcast %1806 : f32 to vector<16x128xf32>
    %1808 = arith.mulf %1793, %1807 : vector<16x128xf32>
    %1809 = arith.addf %1790, %1808 : vector<16x128xf32>
    %c15_i32_300 = arith.constant 15 : i32
    %1810 = tpu.dynamic_rotate %681 by %c15_i32_300 dim 0 : vector<16x128xf32>, i32 -> vector<16x128xf32>
    %cst_301 = arith.constant 0.000000e+00 : f32
    %1811 = vector.broadcast %cst_301 : f32 to vector<16x128xf32>
    %1812 = arith.select %10, %1810, %1811 : vector<16x128xi1>, vector<16x128xf32>
    %c1_i32_302 = arith.constant 1 : i32
    %1813 = tpu.dynamic_rotate %1812 by %c1_i32_302 dim 1 : vector<16x128xf32>, i32 -> vector<16x128xf32>
    %cst_303 = arith.constant 0.000000e+00 : f32
    %1814 = vector.broadcast %cst_303 : f32 to vector<16x128xf32>
    %1815 = arith.select %12, %1813, %1814 : vector<16x128xi1>, vector<16x128xf32>
    %c216 = arith.constant 216 : index
    %1816 = memref.load %arg3[%c216] : memref<288xf32, #tpu.memory_space<smem>>
    %1817 = vector.broadcast %1816 : f32 to vector<16x128xf32>
    %1818 = arith.mulf %1815, %1817 : vector<16x128xf32>
    %1819 = arith.addf %1797, %1818 : vector<16x128xf32>
    %c217 = arith.constant 217 : index
    %1820 = memref.load %arg3[%c217] : memref<288xf32, #tpu.memory_space<smem>>
    %1821 = vector.broadcast %1820 : f32 to vector<16x128xf32>
    %1822 = arith.mulf %1815, %1821 : vector<16x128xf32>
    %1823 = arith.addf %1801, %1822 : vector<16x128xf32>
    %c218 = arith.constant 218 : index
    %1824 = memref.load %arg3[%c218] : memref<288xf32, #tpu.memory_space<smem>>
    %1825 = vector.broadcast %1824 : f32 to vector<16x128xf32>
    %1826 = arith.mulf %1815, %1825 : vector<16x128xf32>
    %1827 = arith.addf %1805, %1826 : vector<16x128xf32>
    %c219 = arith.constant 219 : index
    %1828 = memref.load %arg3[%c219] : memref<288xf32, #tpu.memory_space<smem>>
    %1829 = vector.broadcast %1828 : f32 to vector<16x128xf32>
    %1830 = arith.mulf %1815, %1829 : vector<16x128xf32>
    %1831 = arith.addf %1809, %1830 : vector<16x128xf32>
    %c248 = arith.constant 248 : index
    %1832 = memref.load %arg3[%c248] : memref<288xf32, #tpu.memory_space<smem>>
    %1833 = vector.broadcast %1832 : f32 to vector<16x128xf32>
    %1834 = arith.mulf %1812, %1833 : vector<16x128xf32>
    %1835 = arith.addf %1819, %1834 : vector<16x128xf32>
    %c249 = arith.constant 249 : index
    %1836 = memref.load %arg3[%c249] : memref<288xf32, #tpu.memory_space<smem>>
    %1837 = vector.broadcast %1836 : f32 to vector<16x128xf32>
    %1838 = arith.mulf %1812, %1837 : vector<16x128xf32>
    %1839 = arith.addf %1823, %1838 : vector<16x128xf32>
    %c250 = arith.constant 250 : index
    %1840 = memref.load %arg3[%c250] : memref<288xf32, #tpu.memory_space<smem>>
    %1841 = vector.broadcast %1840 : f32 to vector<16x128xf32>
    %1842 = arith.mulf %1812, %1841 : vector<16x128xf32>
    %1843 = arith.addf %1827, %1842 : vector<16x128xf32>
    %c251 = arith.constant 251 : index
    %1844 = memref.load %arg3[%c251] : memref<288xf32, #tpu.memory_space<smem>>
    %1845 = vector.broadcast %1844 : f32 to vector<16x128xf32>
    %1846 = arith.mulf %1812, %1845 : vector<16x128xf32>
    %1847 = arith.addf %1831, %1846 : vector<16x128xf32>
    %c127_i32_304 = arith.constant 127 : i32
    %1848 = tpu.dynamic_rotate %1812 by %c127_i32_304 dim 1 : vector<16x128xf32>, i32 -> vector<16x128xf32>
    %cst_305 = arith.constant 0.000000e+00 : f32
    %1849 = vector.broadcast %cst_305 : f32 to vector<16x128xf32>
    %1850 = arith.select %14, %1848, %1849 : vector<16x128xi1>, vector<16x128xf32>
    %c280 = arith.constant 280 : index
    %1851 = memref.load %arg3[%c280] : memref<288xf32, #tpu.memory_space<smem>>
    %1852 = vector.broadcast %1851 : f32 to vector<16x128xf32>
    %1853 = arith.mulf %1850, %1852 : vector<16x128xf32>
    %1854 = arith.addf %1835, %1853 : vector<16x128xf32>
    %c281 = arith.constant 281 : index
    %1855 = memref.load %arg3[%c281] : memref<288xf32, #tpu.memory_space<smem>>
    %1856 = vector.broadcast %1855 : f32 to vector<16x128xf32>
    %1857 = arith.mulf %1850, %1856 : vector<16x128xf32>
    %1858 = arith.addf %1839, %1857 : vector<16x128xf32>
    %c282 = arith.constant 282 : index
    %1859 = memref.load %arg3[%c282] : memref<288xf32, #tpu.memory_space<smem>>
    %1860 = vector.broadcast %1859 : f32 to vector<16x128xf32>
    %1861 = arith.mulf %1850, %1860 : vector<16x128xf32>
    %1862 = arith.addf %1843, %1861 : vector<16x128xf32>
    %c283 = arith.constant 283 : index
    %1863 = memref.load %arg3[%c283] : memref<288xf32, #tpu.memory_space<smem>>
    %1864 = vector.broadcast %1863 : f32 to vector<16x128xf32>
    %1865 = arith.mulf %1850, %1864 : vector<16x128xf32>
    %1866 = arith.addf %1847, %1865 : vector<16x128xf32>
    %c1_i32_306 = arith.constant 1 : i32
    %1867 = tpu.dynamic_rotate %686 by %c1_i32_306 dim 0 : vector<16x128xf32>, i32 -> vector<16x128xf32>
    %cst_307 = arith.constant 0.000000e+00 : f32
    %1868 = vector.broadcast %cst_307 : f32 to vector<16x128xf32>
    %1869 = arith.select %8, %1867, %1868 : vector<16x128xi1>, vector<16x128xf32>
    %c1_i32_308 = arith.constant 1 : i32
    %1870 = tpu.dynamic_rotate %1869 by %c1_i32_308 dim 1 : vector<16x128xf32>, i32 -> vector<16x128xf32>
    %cst_309 = arith.constant 0.000000e+00 : f32
    %1871 = vector.broadcast %cst_309 : f32 to vector<16x128xf32>
    %1872 = arith.select %12, %1870, %1871 : vector<16x128xi1>, vector<16x128xf32>
    %c28_310 = arith.constant 28 : index
    %1873 = memref.load %arg3[%c28_310] : memref<288xf32, #tpu.memory_space<smem>>
    %1874 = vector.broadcast %1873 : f32 to vector<16x128xf32>
    %1875 = arith.mulf %1872, %1874 : vector<16x128xf32>
    %1876 = arith.addf %1854, %1875 : vector<16x128xf32>
    %c29_311 = arith.constant 29 : index
    %1877 = memref.load %arg3[%c29_311] : memref<288xf32, #tpu.memory_space<smem>>
    %1878 = vector.broadcast %1877 : f32 to vector<16x128xf32>
    %1879 = arith.mulf %1872, %1878 : vector<16x128xf32>
    %1880 = arith.addf %1858, %1879 : vector<16x128xf32>
    %c30_312 = arith.constant 30 : index
    %1881 = memref.load %arg3[%c30_312] : memref<288xf32, #tpu.memory_space<smem>>
    %1882 = vector.broadcast %1881 : f32 to vector<16x128xf32>
    %1883 = arith.mulf %1872, %1882 : vector<16x128xf32>
    %1884 = arith.addf %1862, %1883 : vector<16x128xf32>
    %c31_313 = arith.constant 31 : index
    %1885 = memref.load %arg3[%c31_313] : memref<288xf32, #tpu.memory_space<smem>>
    %1886 = vector.broadcast %1885 : f32 to vector<16x128xf32>
    %1887 = arith.mulf %1872, %1886 : vector<16x128xf32>
    %1888 = arith.addf %1866, %1887 : vector<16x128xf32>
    %c60_314 = arith.constant 60 : index
    %1889 = memref.load %arg3[%c60_314] : memref<288xf32, #tpu.memory_space<smem>>
    %1890 = vector.broadcast %1889 : f32 to vector<16x128xf32>
    %1891 = arith.mulf %1869, %1890 : vector<16x128xf32>
    %1892 = arith.addf %1876, %1891 : vector<16x128xf32>
    %c61_315 = arith.constant 61 : index
    %1893 = memref.load %arg3[%c61_315] : memref<288xf32, #tpu.memory_space<smem>>
    %1894 = vector.broadcast %1893 : f32 to vector<16x128xf32>
    %1895 = arith.mulf %1869, %1894 : vector<16x128xf32>
    %1896 = arith.addf %1880, %1895 : vector<16x128xf32>
    %c62_316 = arith.constant 62 : index
    %1897 = memref.load %arg3[%c62_316] : memref<288xf32, #tpu.memory_space<smem>>
    %1898 = vector.broadcast %1897 : f32 to vector<16x128xf32>
    %1899 = arith.mulf %1869, %1898 : vector<16x128xf32>
    %1900 = arith.addf %1884, %1899 : vector<16x128xf32>
    %c63_317 = arith.constant 63 : index
    %1901 = memref.load %arg3[%c63_317] : memref<288xf32, #tpu.memory_space<smem>>
    %1902 = vector.broadcast %1901 : f32 to vector<16x128xf32>
    %1903 = arith.mulf %1869, %1902 : vector<16x128xf32>
    %1904 = arith.addf %1888, %1903 : vector<16x128xf32>
    %c127_i32_318 = arith.constant 127 : i32
    %1905 = tpu.dynamic_rotate %1869 by %c127_i32_318 dim 1 : vector<16x128xf32>, i32 -> vector<16x128xf32>
    %cst_319 = arith.constant 0.000000e+00 : f32
    %1906 = vector.broadcast %cst_319 : f32 to vector<16x128xf32>
    %1907 = arith.select %14, %1905, %1906 : vector<16x128xi1>, vector<16x128xf32>
    %c92_320 = arith.constant 92 : index
    %1908 = memref.load %arg3[%c92_320] : memref<288xf32, #tpu.memory_space<smem>>
    %1909 = vector.broadcast %1908 : f32 to vector<16x128xf32>
    %1910 = arith.mulf %1907, %1909 : vector<16x128xf32>
    %1911 = arith.addf %1892, %1910 : vector<16x128xf32>
    %c93_321 = arith.constant 93 : index
    %1912 = memref.load %arg3[%c93_321] : memref<288xf32, #tpu.memory_space<smem>>
    %1913 = vector.broadcast %1912 : f32 to vector<16x128xf32>
    %1914 = arith.mulf %1907, %1913 : vector<16x128xf32>
    %1915 = arith.addf %1896, %1914 : vector<16x128xf32>
    %c94_322 = arith.constant 94 : index
    %1916 = memref.load %arg3[%c94_322] : memref<288xf32, #tpu.memory_space<smem>>
    %1917 = vector.broadcast %1916 : f32 to vector<16x128xf32>
    %1918 = arith.mulf %1907, %1917 : vector<16x128xf32>
    %1919 = arith.addf %1900, %1918 : vector<16x128xf32>
    %c95_323 = arith.constant 95 : index
    %1920 = memref.load %arg3[%c95_323] : memref<288xf32, #tpu.memory_space<smem>>
    %1921 = vector.broadcast %1920 : f32 to vector<16x128xf32>
    %1922 = arith.mulf %1907, %1921 : vector<16x128xf32>
    %1923 = arith.addf %1904, %1922 : vector<16x128xf32>
    %c1_i32_324 = arith.constant 1 : i32
    %1924 = tpu.dynamic_rotate %686 by %c1_i32_324 dim 1 : vector<16x128xf32>, i32 -> vector<16x128xf32>
    %cst_325 = arith.constant 0.000000e+00 : f32
    %1925 = vector.broadcast %cst_325 : f32 to vector<16x128xf32>
    %1926 = arith.select %12, %1924, %1925 : vector<16x128xi1>, vector<16x128xf32>
    %c124_326 = arith.constant 124 : index
    %1927 = memref.load %arg3[%c124_326] : memref<288xf32, #tpu.memory_space<smem>>
    %1928 = vector.broadcast %1927 : f32 to vector<16x128xf32>
    %1929 = arith.mulf %1926, %1928 : vector<16x128xf32>
    %1930 = arith.addf %1911, %1929 : vector<16x128xf32>
    %c125_327 = arith.constant 125 : index
    %1931 = memref.load %arg3[%c125_327] : memref<288xf32, #tpu.memory_space<smem>>
    %1932 = vector.broadcast %1931 : f32 to vector<16x128xf32>
    %1933 = arith.mulf %1926, %1932 : vector<16x128xf32>
    %1934 = arith.addf %1915, %1933 : vector<16x128xf32>
    %c126_328 = arith.constant 126 : index
    %1935 = memref.load %arg3[%c126_328] : memref<288xf32, #tpu.memory_space<smem>>
    %1936 = vector.broadcast %1935 : f32 to vector<16x128xf32>
    %1937 = arith.mulf %1926, %1936 : vector<16x128xf32>
    %1938 = arith.addf %1919, %1937 : vector<16x128xf32>
    %c127_329 = arith.constant 127 : index
    %1939 = memref.load %arg3[%c127_329] : memref<288xf32, #tpu.memory_space<smem>>
    %1940 = vector.broadcast %1939 : f32 to vector<16x128xf32>
    %1941 = arith.mulf %1926, %1940 : vector<16x128xf32>
    %1942 = arith.addf %1923, %1941 : vector<16x128xf32>
    %c156 = arith.constant 156 : index
    %1943 = memref.load %arg3[%c156] : memref<288xf32, #tpu.memory_space<smem>>
    %1944 = vector.broadcast %1943 : f32 to vector<16x128xf32>
    %1945 = arith.mulf %686, %1944 : vector<16x128xf32>
    %1946 = arith.addf %1930, %1945 : vector<16x128xf32>
    %c157 = arith.constant 157 : index
    %1947 = memref.load %arg3[%c157] : memref<288xf32, #tpu.memory_space<smem>>
    %1948 = vector.broadcast %1947 : f32 to vector<16x128xf32>
    %1949 = arith.mulf %686, %1948 : vector<16x128xf32>
    %1950 = arith.addf %1934, %1949 : vector<16x128xf32>
    %c158 = arith.constant 158 : index
    %1951 = memref.load %arg3[%c158] : memref<288xf32, #tpu.memory_space<smem>>
    %1952 = vector.broadcast %1951 : f32 to vector<16x128xf32>
    %1953 = arith.mulf %686, %1952 : vector<16x128xf32>
    %1954 = arith.addf %1938, %1953 : vector<16x128xf32>
    %c159 = arith.constant 159 : index
    %1955 = memref.load %arg3[%c159] : memref<288xf32, #tpu.memory_space<smem>>
    %1956 = vector.broadcast %1955 : f32 to vector<16x128xf32>
    %1957 = arith.mulf %686, %1956 : vector<16x128xf32>
    %1958 = arith.addf %1942, %1957 : vector<16x128xf32>
    %c127_i32_330 = arith.constant 127 : i32
    %1959 = tpu.dynamic_rotate %686 by %c127_i32_330 dim 1 : vector<16x128xf32>, i32 -> vector<16x128xf32>
    %cst_331 = arith.constant 0.000000e+00 : f32
    %1960 = vector.broadcast %cst_331 : f32 to vector<16x128xf32>
    %1961 = arith.select %14, %1959, %1960 : vector<16x128xi1>, vector<16x128xf32>
    %c188 = arith.constant 188 : index
    %1962 = memref.load %arg3[%c188] : memref<288xf32, #tpu.memory_space<smem>>
    %1963 = vector.broadcast %1962 : f32 to vector<16x128xf32>
    %1964 = arith.mulf %1961, %1963 : vector<16x128xf32>
    %1965 = arith.addf %1946, %1964 : vector<16x128xf32>
    %c189 = arith.constant 189 : index
    %1966 = memref.load %arg3[%c189] : memref<288xf32, #tpu.memory_space<smem>>
    %1967 = vector.broadcast %1966 : f32 to vector<16x128xf32>
    %1968 = arith.mulf %1961, %1967 : vector<16x128xf32>
    %1969 = arith.addf %1950, %1968 : vector<16x128xf32>
    %c190 = arith.constant 190 : index
    %1970 = memref.load %arg3[%c190] : memref<288xf32, #tpu.memory_space<smem>>
    %1971 = vector.broadcast %1970 : f32 to vector<16x128xf32>
    %1972 = arith.mulf %1961, %1971 : vector<16x128xf32>
    %1973 = arith.addf %1954, %1972 : vector<16x128xf32>
    %c191 = arith.constant 191 : index
    %1974 = memref.load %arg3[%c191] : memref<288xf32, #tpu.memory_space<smem>>
    %1975 = vector.broadcast %1974 : f32 to vector<16x128xf32>
    %1976 = arith.mulf %1961, %1975 : vector<16x128xf32>
    %1977 = arith.addf %1958, %1976 : vector<16x128xf32>
    %c15_i32_332 = arith.constant 15 : i32
    %1978 = tpu.dynamic_rotate %686 by %c15_i32_332 dim 0 : vector<16x128xf32>, i32 -> vector<16x128xf32>
    %cst_333 = arith.constant 0.000000e+00 : f32
    %1979 = vector.broadcast %cst_333 : f32 to vector<16x128xf32>
    %1980 = arith.select %10, %1978, %1979 : vector<16x128xi1>, vector<16x128xf32>
    %c1_i32_334 = arith.constant 1 : i32
    %1981 = tpu.dynamic_rotate %1980 by %c1_i32_334 dim 1 : vector<16x128xf32>, i32 -> vector<16x128xf32>
    %cst_335 = arith.constant 0.000000e+00 : f32
    %1982 = vector.broadcast %cst_335 : f32 to vector<16x128xf32>
    %1983 = arith.select %12, %1981, %1982 : vector<16x128xi1>, vector<16x128xf32>
    %c220 = arith.constant 220 : index
    %1984 = memref.load %arg3[%c220] : memref<288xf32, #tpu.memory_space<smem>>
    %1985 = vector.broadcast %1984 : f32 to vector<16x128xf32>
    %1986 = arith.mulf %1983, %1985 : vector<16x128xf32>
    %1987 = arith.addf %1965, %1986 : vector<16x128xf32>
    %c221 = arith.constant 221 : index
    %1988 = memref.load %arg3[%c221] : memref<288xf32, #tpu.memory_space<smem>>
    %1989 = vector.broadcast %1988 : f32 to vector<16x128xf32>
    %1990 = arith.mulf %1983, %1989 : vector<16x128xf32>
    %1991 = arith.addf %1969, %1990 : vector<16x128xf32>
    %c222 = arith.constant 222 : index
    %1992 = memref.load %arg3[%c222] : memref<288xf32, #tpu.memory_space<smem>>
    %1993 = vector.broadcast %1992 : f32 to vector<16x128xf32>
    %1994 = arith.mulf %1983, %1993 : vector<16x128xf32>
    %1995 = arith.addf %1973, %1994 : vector<16x128xf32>
    %c223 = arith.constant 223 : index
    %1996 = memref.load %arg3[%c223] : memref<288xf32, #tpu.memory_space<smem>>
    %1997 = vector.broadcast %1996 : f32 to vector<16x128xf32>
    %1998 = arith.mulf %1983, %1997 : vector<16x128xf32>
    %1999 = arith.addf %1977, %1998 : vector<16x128xf32>
    %c252 = arith.constant 252 : index
    %2000 = memref.load %arg3[%c252] : memref<288xf32, #tpu.memory_space<smem>>
    %2001 = vector.broadcast %2000 : f32 to vector<16x128xf32>
    %2002 = arith.mulf %1980, %2001 : vector<16x128xf32>
    %2003 = arith.addf %1987, %2002 : vector<16x128xf32>
    %c253 = arith.constant 253 : index
    %2004 = memref.load %arg3[%c253] : memref<288xf32, #tpu.memory_space<smem>>
    %2005 = vector.broadcast %2004 : f32 to vector<16x128xf32>
    %2006 = arith.mulf %1980, %2005 : vector<16x128xf32>
    %2007 = arith.addf %1991, %2006 : vector<16x128xf32>
    %c254 = arith.constant 254 : index
    %2008 = memref.load %arg3[%c254] : memref<288xf32, #tpu.memory_space<smem>>
    %2009 = vector.broadcast %2008 : f32 to vector<16x128xf32>
    %2010 = arith.mulf %1980, %2009 : vector<16x128xf32>
    %2011 = arith.addf %1995, %2010 : vector<16x128xf32>
    %c255 = arith.constant 255 : index
    %2012 = memref.load %arg3[%c255] : memref<288xf32, #tpu.memory_space<smem>>
    %2013 = vector.broadcast %2012 : f32 to vector<16x128xf32>
    %2014 = arith.mulf %1980, %2013 : vector<16x128xf32>
    %2015 = arith.addf %1999, %2014 : vector<16x128xf32>
    %c127_i32_336 = arith.constant 127 : i32
    %2016 = tpu.dynamic_rotate %1980 by %c127_i32_336 dim 1 : vector<16x128xf32>, i32 -> vector<16x128xf32>
    %cst_337 = arith.constant 0.000000e+00 : f32
    %2017 = vector.broadcast %cst_337 : f32 to vector<16x128xf32>
    %2018 = arith.select %14, %2016, %2017 : vector<16x128xi1>, vector<16x128xf32>
    %c284 = arith.constant 284 : index
    %2019 = memref.load %arg3[%c284] : memref<288xf32, #tpu.memory_space<smem>>
    %2020 = vector.broadcast %2019 : f32 to vector<16x128xf32>
    %2021 = arith.mulf %2018, %2020 : vector<16x128xf32>
    %2022 = arith.addf %2003, %2021 : vector<16x128xf32>
    %c285 = arith.constant 285 : index
    %2023 = memref.load %arg3[%c285] : memref<288xf32, #tpu.memory_space<smem>>
    %2024 = vector.broadcast %2023 : f32 to vector<16x128xf32>
    %2025 = arith.mulf %2018, %2024 : vector<16x128xf32>
    %2026 = arith.addf %2007, %2025 : vector<16x128xf32>
    %c286 = arith.constant 286 : index
    %2027 = memref.load %arg3[%c286] : memref<288xf32, #tpu.memory_space<smem>>
    %2028 = vector.broadcast %2027 : f32 to vector<16x128xf32>
    %2029 = arith.mulf %2018, %2028 : vector<16x128xf32>
    %2030 = arith.addf %2011, %2029 : vector<16x128xf32>
    %c287 = arith.constant 287 : index
    %2031 = memref.load %arg3[%c287] : memref<288xf32, #tpu.memory_space<smem>>
    %2032 = vector.broadcast %2031 : f32 to vector<16x128xf32>
    %2033 = arith.mulf %2018, %2032 : vector<16x128xf32>
    %2034 = arith.addf %2015, %2033 : vector<16x128xf32>
    %c0_338 = arith.constant 0 : index
    %2035 = memref.load %arg4[%c0_338] : memref<4xf32, #tpu.memory_space<smem>>
    %2036 = vector.broadcast %2035 : f32 to vector<16x128xf32>
    %2037 = arith.addf %2022, %2036 : vector<16x128xf32>
    %c1_339 = arith.constant 1 : index
    %2038 = memref.load %arg4[%c1_339] : memref<4xf32, #tpu.memory_space<smem>>
    %2039 = vector.broadcast %2038 : f32 to vector<16x128xf32>
    %2040 = arith.addf %2026, %2039 : vector<16x128xf32>
    %c2_340 = arith.constant 2 : index
    %2041 = memref.load %arg4[%c2_340] : memref<4xf32, #tpu.memory_space<smem>>
    %2042 = vector.broadcast %2041 : f32 to vector<16x128xf32>
    %2043 = arith.addf %2030, %2042 : vector<16x128xf32>
    %c3_341 = arith.constant 3 : index
    %2044 = memref.load %arg4[%c3_341] : memref<4xf32, #tpu.memory_space<smem>>
    %2045 = vector.broadcast %2044 : f32 to vector<16x128xf32>
    %2046 = arith.addf %2034, %2045 : vector<16x128xf32>
    %c0_342 = arith.constant 0 : index
    %c0_343 = arith.constant 0 : index
    %c0_344 = arith.constant 0 : index
    %c0_345 = arith.constant 0 : index
    %2047 = vector.load %arg7[%c0_342, %c0_343, %c0_344, %c0_345] : memref<1x4x16x128xf32, #tpu.memory_space<vmem>>, vector<1x1x16x128xf32>
    %2048 = vector.shape_cast %2047 : vector<1x1x16x128xf32> to vector<16x128xf32>
    %2049 = vector.shape_cast %2037 : vector<16x128xf32> to vector<1x1x16x128xf32>
    tpu.vector_store %arg7[%c0_342, %c0_343, %c0_344, %c0_345], %2049 {strides = array<i32>} : memref<1x4x16x128xf32, #tpu.memory_space<vmem>>, vector<1x1x16x128xf32>,
    %2050 = arith.mulf %2037, %2037 : vector<16x128xf32>
    %2051 = vector.shape_cast %2050 : vector<16x128xf32> to vector<1x16x128xf32>
    %cst_346 = arith.constant dense<0.000000e+00> : vector<1xf32>
    %2052 = vector.multi_reduction <add>, %2051, %cst_346 [1, 2] : vector<1x16x128xf32> to vector<1xf32>
    %2053 = vector.shape_cast %2052 : vector<1xf32> to vector<1x1x1xf32>
    %2054 = vector.extract %2053[0, 0, 0] : f32 from vector<1x1x1xf32>
    %2055 = vector.broadcast %2054 : f32 to vector<1x1xf32>
    %2056 = math.sqrt %2055 : vector<1x1xf32>
    %cst_347 = arith.constant 9.99999993E-9 : f32
    %2057 = vector.broadcast %cst_347 : f32 to vector<1x1xf32>
    %2058 = arith.addf %2056, %2057 : vector<1x1xf32>
    %2059 = vector.broadcast %2058 : vector<1x1xf32> to vector<16x128xf32>
    %2060 = arith.divf %2037, %2059 : vector<16x128xf32>
    %2061 = arith.mulf %2060, %2060 : vector<16x128xf32>
    %2062 = vector.shape_cast %2061 : vector<16x128xf32> to vector<1x16x128xf32>
    %cst_348 = arith.constant dense<0.000000e+00> : vector<1xf32>
    %2063 = vector.multi_reduction <add>, %2062, %cst_348 [1, 2] : vector<1x16x128xf32> to vector<1xf32>
    %2064 = vector.shape_cast %2063 : vector<1xf32> to vector<1x1x1xf32>
    %2065 = vector.extract %2064[0, 0, 0] : f32 from vector<1x1x1xf32>
    %2066 = vector.broadcast %2065 : f32 to vector<1x1xf32>
    %cst_349 = arith.constant 9.99999993E-9 : f32
    %2067 = vector.broadcast %cst_349 : f32 to vector<1x1xf32>
    %2068 = arith.addf %2066, %2067 : vector<1x1xf32>
    %2069 = arith.mulf %2040, %2060 : vector<16x128xf32>
    %2070 = vector.shape_cast %2069 : vector<16x128xf32> to vector<1x16x128xf32>
    %cst_350 = arith.constant dense<0.000000e+00> : vector<1xf32>
    %2071 = vector.multi_reduction <add>, %2070, %cst_350 [1, 2] : vector<1x16x128xf32> to vector<1xf32>
    %2072 = vector.shape_cast %2071 : vector<1xf32> to vector<1x1x1xf32>
    %2073 = vector.extract %2072[0, 0, 0] : f32 from vector<1x1x1xf32>
    %2074 = vector.broadcast %2073 : f32 to vector<1x1xf32>
    %2075 = arith.divf %2074, %2068 : vector<1x1xf32>
    %2076 = vector.broadcast %2075 : vector<1x1xf32> to vector<16x128xf32>
    %2077 = arith.mulf %2060, %2076 : vector<16x128xf32>
    %2078 = arith.subf %2040, %2077 : vector<16x128xf32>
    %c0_351 = arith.constant 0 : index
    %c1_352 = arith.constant 1 : index
    %c0_353 = arith.constant 0 : index
    %c0_354 = arith.constant 0 : index
    %2079 = vector.load %arg7[%c0_351, %c1_352, %c0_353, %c0_354] : memref<1x4x16x128xf32, #tpu.memory_space<vmem>>, vector<1x1x16x128xf32>
    %2080 = vector.shape_cast %2079 : vector<1x1x16x128xf32> to vector<16x128xf32>
    %2081 = vector.shape_cast %2078 : vector<16x128xf32> to vector<1x1x16x128xf32>
    tpu.vector_store %arg7[%c0_351, %c1_352, %c0_353, %c0_354], %2081 {strides = array<i32>} : memref<1x4x16x128xf32, #tpu.memory_space<vmem>>, vector<1x1x16x128xf32>,
    %2082 = arith.mulf %2078, %2078 : vector<16x128xf32>
    %2083 = vector.shape_cast %2082 : vector<16x128xf32> to vector<1x16x128xf32>
    %cst_355 = arith.constant dense<0.000000e+00> : vector<1xf32>
    %2084 = vector.multi_reduction <add>, %2083, %cst_355 [1, 2] : vector<1x16x128xf32> to vector<1xf32>
    %2085 = vector.shape_cast %2084 : vector<1xf32> to vector<1x1x1xf32>
    %2086 = vector.extract %2085[0, 0, 0] : f32 from vector<1x1x1xf32>
    %2087 = vector.broadcast %2086 : f32 to vector<1x1xf32>
    %2088 = math.sqrt %2087 : vector<1x1xf32>
    %cst_356 = arith.constant 9.99999993E-9 : f32
    %2089 = vector.broadcast %cst_356 : f32 to vector<1x1xf32>
    %2090 = arith.addf %2088, %2089 : vector<1x1xf32>
    %2091 = vector.broadcast %2090 : vector<1x1xf32> to vector<16x128xf32>
    %2092 = arith.divf %2078, %2091 : vector<16x128xf32>
    %2093 = arith.mulf %2092, %2092 : vector<16x128xf32>
    %2094 = vector.shape_cast %2093 : vector<16x128xf32> to vector<1x16x128xf32>
    %cst_357 = arith.constant dense<0.000000e+00> : vector<1xf32>
    %2095 = vector.multi_reduction <add>, %2094, %cst_357 [1, 2] : vector<1x16x128xf32> to vector<1xf32>
    %2096 = vector.shape_cast %2095 : vector<1xf32> to vector<1x1x1xf32>
    %2097 = vector.extract %2096[0, 0, 0] : f32 from vector<1x1x1xf32>
    %2098 = vector.broadcast %2097 : f32 to vector<1x1xf32>
    %cst_358 = arith.constant 9.99999993E-9 : f32
    %2099 = vector.broadcast %cst_358 : f32 to vector<1x1xf32>
    %2100 = arith.addf %2098, %2099 : vector<1x1xf32>
    %2101 = arith.mulf %2043, %2060 : vector<16x128xf32>
    %2102 = vector.shape_cast %2101 : vector<16x128xf32> to vector<1x16x128xf32>
    %cst_359 = arith.constant dense<0.000000e+00> : vector<1xf32>
    %2103 = vector.multi_reduction <add>, %2102, %cst_359 [1, 2] : vector<1x16x128xf32> to vector<1xf32>
    %2104 = vector.shape_cast %2103 : vector<1xf32> to vector<1x1x1xf32>
    %2105 = vector.extract %2104[0, 0, 0] : f32 from vector<1x1x1xf32>
    %2106 = vector.broadcast %2105 : f32 to vector<1x1xf32>
    %2107 = arith.divf %2106, %2068 : vector<1x1xf32>
    %2108 = vector.broadcast %2107 : vector<1x1xf32> to vector<16x128xf32>
    %2109 = arith.mulf %2060, %2108 : vector<16x128xf32>
    %2110 = arith.subf %2043, %2109 : vector<16x128xf32>
    %2111 = arith.mulf %2110, %2092 : vector<16x128xf32>
    %2112 = vector.shape_cast %2111 : vector<16x128xf32> to vector<1x16x128xf32>
    %cst_360 = arith.constant dense<0.000000e+00> : vector<1xf32>
    %2113 = vector.multi_reduction <add>, %2112, %cst_360 [1, 2] : vector<1x16x128xf32> to vector<1xf32>
    %2114 = vector.shape_cast %2113 : vector<1xf32> to vector<1x1x1xf32>
    %2115 = vector.extract %2114[0, 0, 0] : f32 from vector<1x1x1xf32>
    %2116 = vector.broadcast %2115 : f32 to vector<1x1xf32>
    %2117 = arith.divf %2116, %2100 : vector<1x1xf32>
    %2118 = vector.broadcast %2117 : vector<1x1xf32> to vector<16x128xf32>
    %2119 = arith.mulf %2092, %2118 : vector<16x128xf32>
    %2120 = arith.subf %2110, %2119 : vector<16x128xf32>
    %c0_361 = arith.constant 0 : index
    %c2_362 = arith.constant 2 : index
    %c0_363 = arith.constant 0 : index
    %c0_364 = arith.constant 0 : index
    %2121 = vector.load %arg7[%c0_361, %c2_362, %c0_363, %c0_364] : memref<1x4x16x128xf32, #tpu.memory_space<vmem>>, vector<1x1x16x128xf32>
    %2122 = vector.shape_cast %2121 : vector<1x1x16x128xf32> to vector<16x128xf32>
    %2123 = vector.shape_cast %2120 : vector<16x128xf32> to vector<1x1x16x128xf32>
    tpu.vector_store %arg7[%c0_361, %c2_362, %c0_363, %c0_364], %2123 {strides = array<i32>} : memref<1x4x16x128xf32, #tpu.memory_space<vmem>>, vector<1x1x16x128xf32>,
    %2124 = arith.mulf %2120, %2120 : vector<16x128xf32>
    %2125 = vector.shape_cast %2124 : vector<16x128xf32> to vector<1x16x128xf32>
    %cst_365 = arith.constant dense<0.000000e+00> : vector<1xf32>
    %2126 = vector.multi_reduction <add>, %2125, %cst_365 [1, 2] : vector<1x16x128xf32> to vector<1xf32>
    %2127 = vector.shape_cast %2126 : vector<1xf32> to vector<1x1x1xf32>
    %2128 = vector.extract %2127[0, 0, 0] : f32 from vector<1x1x1xf32>
    %2129 = vector.broadcast %2128 : f32 to vector<1x1xf32>
    %2130 = math.sqrt %2129 : vector<1x1xf32>
    %cst_366 = arith.constant 9.99999993E-9 : f32
    %2131 = vector.broadcast %cst_366 : f32 to vector<1x1xf32>
    %2132 = arith.addf %2130, %2131 : vector<1x1xf32>
    %2133 = vector.broadcast %2132 : vector<1x1xf32> to vector<16x128xf32>
    %2134 = arith.divf %2120, %2133 : vector<16x128xf32>
    %2135 = arith.mulf %2134, %2134 : vector<16x128xf32>
    %2136 = vector.shape_cast %2135 : vector<16x128xf32> to vector<1x16x128xf32>
    %cst_367 = arith.constant dense<0.000000e+00> : vector<1xf32>
    %2137 = vector.multi_reduction <add>, %2136, %cst_367 [1, 2] : vector<1x16x128xf32> to vector<1xf32>
    %2138 = vector.shape_cast %2137 : vector<1xf32> to vector<1x1x1xf32>
    %2139 = vector.extract %2138[0, 0, 0] : f32 from vector<1x1x1xf32>
    %2140 = vector.broadcast %2139 : f32 to vector<1x1xf32>
    %cst_368 = arith.constant 9.99999993E-9 : f32
    %2141 = vector.broadcast %cst_368 : f32 to vector<1x1xf32>
    %2142 = arith.addf %2140, %2141 : vector<1x1xf32>
    %2143 = arith.mulf %2046, %2060 : vector<16x128xf32>
    %2144 = vector.shape_cast %2143 : vector<16x128xf32> to vector<1x16x128xf32>
    %cst_369 = arith.constant dense<0.000000e+00> : vector<1xf32>
    %2145 = vector.multi_reduction <add>, %2144, %cst_369 [1, 2] : vector<1x16x128xf32> to vector<1xf32>
    %2146 = vector.shape_cast %2145 : vector<1xf32> to vector<1x1x1xf32>
    %2147 = vector.extract %2146[0, 0, 0] : f32 from vector<1x1x1xf32>
    %2148 = vector.broadcast %2147 : f32 to vector<1x1xf32>
    %2149 = arith.divf %2148, %2068 : vector<1x1xf32>
    %2150 = vector.broadcast %2149 : vector<1x1xf32> to vector<16x128xf32>
    %2151 = arith.mulf %2060, %2150 : vector<16x128xf32>
    %2152 = arith.subf %2046, %2151 : vector<16x128xf32>
    %2153 = arith.mulf %2152, %2092 : vector<16x128xf32>
    %2154 = vector.shape_cast %2153 : vector<16x128xf32> to vector<1x16x128xf32>
    %cst_370 = arith.constant dense<0.000000e+00> : vector<1xf32>
    %2155 = vector.multi_reduction <add>, %2154, %cst_370 [1, 2] : vector<1x16x128xf32> to vector<1xf32>
    %2156 = vector.shape_cast %2155 : vector<1xf32> to vector<1x1x1xf32>
    %2157 = vector.extract %2156[0, 0, 0] : f32 from vector<1x1x1xf32>
    %2158 = vector.broadcast %2157 : f32 to vector<1x1xf32>
    %2159 = arith.divf %2158, %2100 : vector<1x1xf32>
    %2160 = vector.broadcast %2159 : vector<1x1xf32> to vector<16x128xf32>
    %2161 = arith.mulf %2092, %2160 : vector<16x128xf32>
    %2162 = arith.subf %2152, %2161 : vector<16x128xf32>
    %2163 = arith.mulf %2162, %2134 : vector<16x128xf32>
    %2164 = vector.shape_cast %2163 : vector<16x128xf32> to vector<1x16x128xf32>
    %cst_371 = arith.constant dense<0.000000e+00> : vector<1xf32>
    %2165 = vector.multi_reduction <add>, %2164, %cst_371 [1, 2] : vector<1x16x128xf32> to vector<1xf32>
    %2166 = vector.shape_cast %2165 : vector<1xf32> to vector<1x1x1xf32>
    %2167 = vector.extract %2166[0, 0, 0] : f32 from vector<1x1x1xf32>
    %2168 = vector.broadcast %2167 : f32 to vector<1x1xf32>
    %2169 = arith.divf %2168, %2142 : vector<1x1xf32>
    %2170 = vector.broadcast %2169 : vector<1x1xf32> to vector<16x128xf32>
    %2171 = arith.mulf %2134, %2170 : vector<16x128xf32>
    %2172 = arith.subf %2162, %2171 : vector<16x128xf32>
    %c0_372 = arith.constant 0 : index
    %c3_373 = arith.constant 3 : index
    %c0_374 = arith.constant 0 : index
    %c0_375 = arith.constant 0 : index
    %2173 = vector.load %arg7[%c0_372, %c3_373, %c0_374, %c0_375] : memref<1x4x16x128xf32, #tpu.memory_space<vmem>>, vector<1x1x16x128xf32>
    %2174 = vector.shape_cast %2173 : vector<1x1x16x128xf32> to vector<16x128xf32>
    %2175 = vector.shape_cast %2172 : vector<16x128xf32> to vector<1x1x16x128xf32>
    tpu.vector_store %arg7[%c0_372, %c3_373, %c0_374, %c0_375], %2175 {strides = array<i32>} : memref<1x4x16x128xf32, #tpu.memory_space<vmem>>, vector<1x1x16x128xf32>,
    return
  }
  func.func @transform_0(%arg0: i32) -> i32 {
    %c0_i32 = arith.constant 0 : i32
    %c0_i32_0 = arith.constant 0 : i32
    return %c0_i32 : i32
  }
  func.func @transform_1(%arg0: i32) -> i32 {
    %c0_i32 = arith.constant 0 : i32
    %c0_i32_0 = arith.constant 0 : i32
    return %c0_i32 : i32
  }
  func.func @transform_2(%arg0: i32) -> i32 {
    %c0_i32 = arith.constant 0 : i32
    %c0_i32_0 = arith.constant 0 : i32
    return %c0_i32 : i32
  }
  func.func @transform_3(%arg0: i32) -> i32 {
    %c0_i32 = arith.constant 0 : i32
    %c0_i32_0 = arith.constant 0 : i32
    return %c0_i32 : i32
  }
  func.func @transform_4(%arg0: i32) -> (i32, i32, i32) {
    %c0_i32 = arith.constant 0 : i32
    %c0_i32_0 = arith.constant 0 : i32
    %c0_i32_1 = arith.constant 0 : i32
    return %arg0, %c0_i32, %c0_i32_0 : i32, i32, i32
  }
  func.func @transform_5(%arg0: i32) -> (i32, i32, i32) {
    %c0_i32 = arith.constant 0 : i32
    %c0_i32_0 = arith.constant 0 : i32
    %c0_i32_1 = arith.constant 0 : i32
    return %arg0, %c0_i32, %c0_i32_0 : i32, i32, i32
  }
  func.func @transform_6(%arg0: i32) -> (i32, i32, i32, i32) {
    %c0_i32 = arith.constant 0 : i32
    %c0_i32_0 = arith.constant 0 : i32
    %c0_i32_1 = arith.constant 0 : i32
    %c0_i32_2 = arith.constant 0 : i32
    return %arg0, %c0_i32, %c0_i32_0, %c0_i32_1 : i32, i32, i32, i32
  }
}

</mosaic_0001>

<bundles_post_ra>
// kernel: tpu_custom_call.1
= control target key start
LH: loop header
LB: loop body
LE: loop exit
PB: predicated region body
PF: predicated region fallthrough
CT: control target
= control target key end

     0   :  { %s10193_s0 = inlined_call_operand.hbm [shape: f32[144], index: 0, kind: input, shape index: {}]   ;;  %s10194_s1 = inlined_call_operand.hbm [shape: f32[8], index: 1, kind: input, shape index: {}]   ;;  %s10195_s2 = inlined_call_operand.hbm [shape: f32[288], index: 2, kind: input, shape index: {}]   ;;  %s10196_s3 = inlined_call_operand.vmem [shape: f32[4], index: 3, kind: input, shape index: {}]   ;;  %s10197_s4 = inlined_call_operand.hbm [shape: f32[2,16,128], index: 4, kind: input, shape index: {}]   ;;  %s10198_s5 = inlined_call_operand.hbm [shape: f32[2,16,128], index: 5, kind: input, shape index: {}]   ;;  %s10199_s6 = inlined_call_operand.hbm [shape: f32[2,4,16,128], index: 6, kind: output, shape index: {}]  }
   0x1   :  { %10368 = sst [smem:[#allocation302_spill]] %s10193_s0 }
   0x2   :  { %10369 = sst [smem:[#allocation303_spill]] %s10194_s1 }
   0x3   :  { %10370 = sst [smem:[#allocation304_spill]] %s10195_s2 }
   0x4   :  { %10371 = sst [smem:[#allocation305_spill]] %s10196_s3 }
   0x5   :  { %10372 = sst [smem:[#allocation306_spill]] %s10197_s4 }
   0x6   :  { %10373 = sst [smem:[#allocation307_spill]] %s10198_s5 }
   0x7   :  { %10374 = sst [smem:[#allocation308_spill]] %s10199_s6 }
   0x8   :  { %11 = vsyncpa [#allocation5], 0 }
   0x9   :  { %12 = vsyncpa [#allocation8], 0 }
   0xa   :  { %13 = vsyncpa [#allocation6], 0 }
   0xb   :  { %14 = vsyncpa [#allocation3], 0 }
   0xc   :  { %16 = vsyncpa [#allocation3 + $0x1], 0 }
   0xd   :  { %17 = vsyncpa [#allocation13], 0 }
   0xe   :  { %19 = vsyncpa [#allocation13 + $0x1], 0 }
   0xf   :  { %20 = vsyncpa [#allocation4], 0 }
  0x10   :  { %22 = vsyncpa [#allocation4 + $0x1], 0  ;;  %s4871_s21 = smov 0   ;;  %s4873_s22 = smov 0  }
  0x11   :  { %s4875_s23 = smov 0   ;;  %s4877_s24 = smov 0  }
  0x12 LB: > { %10375 = sst [smem:[#allocation21_spill]] %s4812_s21  ;;  %s4892_s25 = sadd.s32 4294967295, %s4824_s24   ;;  %s4824_s24 = sphi %s4877_s24, %s11346_s24   ;;  %s4820_s23 = sphi %s4875_s23, %s11349_s23   ;;  %s4816_s22 = sphi %s4873_s22, %s11348_s22   ;;  %s4812_s21 = sphi %s4871_s21, %s11347_s21  }
  0x13   : > { %10376 = sst [smem:[#allocation22_spill]] %s4816_s22  ;;  %s4005_s26 = sadd.s32 4294967294, %s4824_s24  }
  0x14   : > { %10377 = sst [smem:[#allocation23_spill]] %s4820_s23  ;;  %p132_p0 = scmp.ne.s32.totalorder %s4816_s22, %s4812_s21 }
  0x15   : > { %10378 = sst [smem:[#allocation24_spill]] %s4824_s24  ;;  %p133_p1 = scmp.eq.s32.totalorder %s4892_s25, 0 }
  0x16   : > { %10379 = sst [smem:[#allocation25_spill]] %s4892_s25  ;;  %p182_p2 = scmp.eq.s32.totalorder %s4892_s25, 1 }
  0x17   : > { %p188_p3 = scmp.eq.s32.totalorder %s4005_s26, 1  ;;  %p4901_p4 = por %p133_p1, %p132_p0 }
  0x18   : > { %p4006_p5 = scmp.ge.s32.totalorder %s4824_s24, 1  ;;  %p195_p7 = scmp.lt.s32.totalorder %s4824_s24, 3 }
  0x19   : > { %p4906_p6 = por %p188_p3, %p132_p0  ;;  %s10383_s1 = sld [smem:[#allocation303_spill]] }
  0x1a   : > { %p4914_p8 = pnand %p4006_p5, %p195_p7  ;;  %s10385_s0 = sld [smem:[#allocation302_spill]] }
  0x1b   : > { %s10381_s28 = scalar_select %p4906_p6, 1, 0 }
  0x1c   : > { %p4526_p10 = pneg %p4914_p8  ;;  %s10386_s2 = sld [smem:[#allocation304_spill]] }
  0x1d   : > { %10382 = sst [smem:[#allocation26_spill]] %s10381_s28  ;;  %s4826_s18 = smov [#allocation7]  }
  0x1e   : > { %p4527_p11 = pnand %p4526_p10, %p133_p1  ;;  %s10387_s3 = sld [smem:[#allocation305_spill]] }
  0x1f   : > { %s217_s7 = sshll.u32 %s10383_s1, 4  ;;  %s4827_s19 = smov [#allocation2]   ;;  %s218_s7 = int_to_ptr.hbm [resolvable:$true] %s217_s7 }
  0x20   : > { %s207_s11 = sshll.u32 %s10385_s0, 4  ;;  %s4828_s20 = smov [#allocation9]   ;;  %s208_s11 = int_to_ptr.hbm [resolvable:$true] %s207_s11 }
  0x21   : > { %4532 = dma.hbm_to_smem (!%p4527_p11), %s218_s7, 16, %s4826_s18, [#allocation8]  }
  0x22   : > { %s227_s14 = sshll.u32 %s10386_s2, 4  ;;  %s4829_s26 = smov [#allocation10]   ;;  %s228_s14 = int_to_ptr.hbm [resolvable:$true] %s227_s14 }
  0x23   : > { %4529 = dma.hbm_to_smem (!%p4527_p11), %s208_s11, 32, %s4827_s19, [#allocation5]  }
  0x24   : > { %s237_s17 = sshll.u32 %s10387_s3, 4  ;;  %s4933_s29 = sadd.s32 1, %s4824_s24   ;;  %s238_s17 = int_to_ptr.vmem [resolvable:$true] %s237_s17 }
  0x25   : > { %4535 = dma.hbm_to_smem (!%p4527_p11), %s228_s14, 48, %s4828_s20, [#allocation8]  }
  0x26   : > { %4538 = dma.vmem_to_smem (!%p4527_p11), %s238_s17, 16, %s4829_s26, [#allocation6]  }
  0x27   : > { %10388 = sst [smem:[#allocation27_spill]] %s4933_s29  ;;  %s116_s30 = ssub.s32 %s4824_s24, %s4933_s29 }
  0x28   : > { %p117_p12 = scmp.eq.s32.totalorder %s116_s30, 0  ;;  %s119_s9 = sadd.s32 1, %s4820_s23 }
  0x29   : > { %p126_p13 = scmp.ne.s32.totalorder %s4820_s23, %s4816_s22  ;;  %p127_p0 = scmp.eq.s32.totalorder %s4824_s24, 0 }
  0x2a   : > { %s4942_s7 = scalar_select %p117_p12, %s4820_s23, %s119_s9  }
  0x2b   : > { %p128_p3 = por %p127_p0, %p126_p13  ;;  %p4946_p5 = por %p182_p2, %p126_p13 }
  0x2c   : > { %10389 = sst [smem:[#allocation28_spill]] %s4942_s7  ;;  %p4554_p7 = scmp.lt.s32.totalorder %s4824_s24, 2 }
  0x2d   : > { %s10390_s10 = scalar_select %p4946_p5, 1, 0 }
  0x2e   : > { %s4952_s11 = sand.u32 1, %s4820_s23   ;;  %s10201_s13 = sshll.u32 %s4824_s24, 4 }
  0x2f   : > { %10391 = sst [smem:[#allocation29_spill]] %s10390_s10  ;;  %s10200_s12 = sshll.u32 %s4952_s11, 4 }
  0x30   : > { %s10392_s4 = sld [smem:[#allocation306_spill]]  ;;  %s252_s17 = scalar_lea.vmem [#allocation11], %s10200_s12 }
  0x31   : > { %s260_s18 = sshll.u32 %s252_s17, 4  ;;  %p4963_p2 = pnand %p4554_p7, %p128_p3  ;;  %s261_s18 = int_to_ptr.vmem [resolvable:$true] %s260_s18 }
  0x32   : > { %s249_s26 = scalar_lea.sflag [#allocation3], %s4952_s11 }
  0x33   : > { %p4686_p11 = pneg %p4963_p2 }
  0x36   : > { %s257_s16 = scalar_lea.hbm %s10392_s4, %s10201_s13 }
  0x37   : > { %s258_s19 = sshll.u32 %s257_s16, 4  ;;  %s4689_s16 = scalar_lea.hbm %s10392_s4, 32  ;;  %s259_s19 = int_to_ptr.hbm [resolvable:$true] %s258_s19 }
  0x38   : > { %s4682_s30 = sshra.s32 %s259_s19, 4  ;;  %s4683_s30 = int_to_ptr.hbm [resolvable:$true] %s4682_s30 }
  0x39   : > { %s4684_s9 = scalar_lea.hbm %s4683_s30, 16  ;;  %p4690_p0 = scmp.lt.s32.totalorder %s4683_s30, %s10392_s4 }
  0x3a   : > { %p4685_p10 = scmp.ne.s32.totalorder %s4683_s30, %s4684_s9  ;;  %p4691_p3 = scmp.lt.s32.totalorder %s4689_s16, %s4684_s9 }
  0x3c   : > { %p4687_p12 = pnand %p4686_p11, %p4685_p10  ;;  %p4692_p7 = por %p4691_p3, %p4690_p0 }
  0x3e   : > { %p4688_p13 = pneg %p4687_p12 }
  0x40   : > { %p4693_p9 = pnand %p4692_p7, %p4688_p13 }
  0x42   : > { %4696 = shalt.err (!%p4693_p9)
}
  0x43   : > { %s4830_s13 = smov 128   ;;  %s4831_s0 = smov 8  }
  0x44   : > { %4542 = dma.hbm_to_vmem [thread:$0]  (!%p4963_p2), %s259_s19, 256, %s261_s18, %s249_s26, %s4830_s13, %s4830_s13, %s4831_s0  }
  0x45   : > { %s10394_s1 = sshll.u32 %s4824_s24, 4  ;;  %s10395_s5 = sld [smem:[#allocation307_spill]] }
  0x46   : > { %s10396_s30 = sshll.u32 %s4952_s11, 4  ;;  %s271_s17 = scalar_lea.sflag [#allocation13], %s4952_s11 }
  0x47   : > { %s274_s9 = scalar_lea.vmem [#allocation12], %s10396_s30 }
  0x48   : > { %s282_s16 = sshll.u32 %s274_s9, 4  ;;  %s283_s16 = int_to_ptr.vmem [resolvable:$true] %s282_s16 }
  0x4b   : > { %s279_s2 = scalar_lea.hbm %s10395_s5, %s10394_s1  ;;  %s4719_s26 = scalar_lea.hbm %s10395_s5, 32 }
  0x4c   : > { %s280_s12 = sshll.u32 %s279_s2, 4  ;;  %s281_s12 = int_to_ptr.hbm [resolvable:$true] %s280_s12 }
  0x4d   : > { %s4712_s3 = sshra.s32 %s281_s12, 4  ;;  %s4713_s3 = int_to_ptr.hbm [resolvable:$true] %s4712_s3 }
  0x4e   : > { %s4714_s4 = scalar_lea.hbm %s4713_s3, 16  ;;  %p4720_p13 = scmp.lt.s32.totalorder %s4713_s3, %s10395_s5 }
  0x4f   : > { %p4715_p9 = scmp.ne.s32.totalorder %s4713_s3, %s4714_s4  ;;  %p4721_p0 = scmp.lt.s32.totalorder %s4719_s26, %s4714_s4 }
  0x51   : > { %p4717_p10 = pnand %p4715_p9, %p4686_p11  ;;  %p4722_p3 = por %p4721_p0, %p4720_p13 }
  0x53   : > { %p4718_p12 = pneg %p4717_p10 }
  0x55   : > { %p4723_p7 = pnand %p4722_p3, %p4718_p12 }
  0x57   : > { %4726 = shalt.err (!%p4723_p7)
}
  0x58   : > { %4545 = dma.hbm_to_vmem [thread:$0]  (!%p4963_p2), %s281_s12, 256, %s283_s16, %s271_s17, %s4830_s13, %s4830_s13, %s4831_s0  }
  0x59   : > { %294 = sbr.rel (%p4914_p8) target bundleno = 2843 (0xb1b), region = 44 }
  0x5e   : > { %4787 = dma.done.wait (%p133_p1), [#allocation5], 32  }
  0x5f   : > { %4789 = vsyncadd (%p133_p1), [#allocation5], 4294967264 }
  0x60   : > { %4791 = dma.done.wait (%p133_p1), [#allocation8], 64  }
  0x61   : > { %4793 = vsyncadd (%p133_p1), [#allocation8], 4294967232 }
  0x62   : > { %4795 = dma.done.wait (%p133_p1), [#allocation6], 16  }
  0x63   : > { %4797 = vsyncadd (%p133_p1), [#allocation6], 4294967280  ;;  %s5015_s0 = sand.u32 1, %s4816_s22  }
  0x64   : > { %10397 = sst [smem:[#allocation30_spill]] %s5015_s0  ;;  %s4023_s3 = sshll.u32 %s5015_s0, 4 }
  0x65   : > { %s317_s4 = scalar_lea.sflag [#allocation3], %s5015_s0  ;;  %s320_s8 = scalar_lea.vmem [#allocation11], %s4023_s3 }
  0x66   : > { %4799 = dma.done.wait (%p4901_p4), %s317_s4, 256  }
  0x67   : > { %4801 = vsyncadd (%p4901_p4), %s317_s4, 4294967040  ;;  %s327_s11 = scalar_lea.sflag [#allocation13], %s5015_s0  ;;  %s5024_s13 = scalar_lea.vmem [#allocation12], %s4023_s3 }
  0x68   : > { %10398 = sst [smem:[#allocation31_spill]] %s5024_s13 }
  0x69   : > { %4803 = dma.done.wait (%p4901_p4), %s327_s11, 256  }
  0x6a   : > { %4805 = vsyncadd (%p4901_p4), %s327_s11, 4294967040 }
  0x6b   : > { %336 = sfence }
  0x6c   : > { %v368_v0 = vld [vmem:[%s5024_s13] sm:$0xff]  ;;  %v5032_v1 = vld [vmem:[%s5024_s13 + $0x8] sm:$0xff]  ;;  %v372_v2 = vlaneseq  ;;  %s10202_s27 = smov 1   ;;  %s10204_s20 = smov 127  }
  0x6d   : > { %10399 = vst [vmem:[#allocation32_spill] sm:$0xff] %v5032_v1  ;;  %v366_v3 = vld [vmem:[%s320_s8] sm:$0xff]  ;;  %v390_v4 = vrot.slane %v368_v0, 7  ;;  %v391_v5 = vrot.slane %v5032_v1, 7  ;;  %v367_v6 = vld [vmem:[%s320_s8 + $0x8] sm:$0xff]  ;;  %v1027_v22 = vrot.slane %v368_v0, 1 }
  0x6e   : > { %v5035_v7 = vmul.f32 %v368_v0, %v366_v3  ;;  %v5038_v8 = vshrl.u32 %v372_v2, 7  ;;  %v5041_v9 = vmul.f32 %v5032_v1, %v367_v6  ;;  %v1028_v23 = vrot.slane %v5032_v1, 1  ;;  %s5141_s14 = sld [smem:[#allocation2 + $0x8]] }
  0x6f   : > { %s5143_s15 = sld [smem:[#allocation2 + $0x9]]  ;;  %v5208_v29 = vand.u32 127, %v372_v2 }
  0x70   : > { %10400 = vst [vmem:[#allocation33_spill] sm:$0xff] %v5035_v7  ;;  %v383_v10 = vrot.slane %v5035_v7, 7  ;;  %vm377_vm0 = vcmp.ge.s32.totalorder %v5038_v8, 1  ;;  %vm385_vm1 = vcmp.lt.s32.totalorder %v5038_v8, 1  ;;  %v384_v12 = vrot.slane %v5041_v9, 7  ;;  %s5145_s12 = sld [smem:[#allocation2 + $0xa]] }
  0x71   : > { %10401 = vst [vmem:[#allocation34_spill] sm:$0xff] %v5038_v8  ;;  %v393_v11 = vsel %vm385_vm1, %v391_v5, %v390_v4  ;;  %v5067_v16 = vsel %vm385_vm1, %v390_v4, %v391_v5  ;;  %v1020_v18 = vrot.slane %v5035_v7, 1  ;;  %v1021_v19 = vrot.slane %v5041_v9, 1  ;;  %s5147_s30 = sld [smem:[#allocation2 + $0xb]] }
  0x72   : > { %10402 = vst [vmem:[#allocation35_spill] sm:$0xff] %v5041_v9  ;;  %v5051_v13 = vsel %vm377_vm0, %v393_v11, 0.0  ;;  %v387_v14 = vsel %vm385_vm1, %v384_v12, %v383_v10  ;;  %v5071_v17 = vsel %vm385_vm1, %v383_v10, %v384_v12  ;;  %vm1022_vm2 = vcmp.lt.s32.totalorder %v5038_v8, 7  ;;  %s5149_s9 = sld [smem:[#allocation2 + $0xc]] }
  0x73   : > { %402 = vrot.lane.b32.xlu1 %v5051_v13, %s10202_s27  ;;  %v5059_v15 = vsel %vm377_vm0, %v387_v14, 0.0  ;;  %v5099_v20 = vadd.s32 8, %v5038_v8  ;;  %v5103_v21 = vsel %vm1022_vm2, %v1020_v18, %v1021_v19  ;;  %v1024_v24 = vsel %vm1022_vm2, %v1021_v19, %v1020_v18  ;;  %s5151_s16 = sld [smem:[#allocation2 + $0xd]] }
  0x74   : > { %396 = vrot.lane.b32.xlu0 %v5059_v15, %s10202_s27  ;;  %600 = vrot.lane.b32.xlu2 %v5059_v15, %s10204_s20  ;;  %10404 = vst [vmem:[#allocation37_spill] sm:$0xff] %v5103_v21  ;;  %v1030_v26 = vsel %vm1022_vm2, %v1028_v23, %v1027_v22  ;;  %v5127_v28 = vsel %vm1022_vm2, %v1027_v22, %v1028_v23  ;;  %10408 = sst [smem:[#allocation41_spill]] %s5141_s14  ;;  %vm382_vm4 = vcmp.lt.s32.totalorder %v5208_v29, 127  ;;  %vm381_vm5 = vcmp.ge.s32.totalorder %v5208_v29, 1 }
  0x75   : > { %10403 = vst [vmem:[#allocation36_spill] sm:$0xff] %v5099_v20  ;;  %vm380_vm3 = vcmp.lt.s32.totalorder %v5099_v20, 15  ;;  %10409 = sst [smem:[#allocation42_spill]] %s5143_s15 }
  0x76   : > { %v5113_v25 = vsel %vm380_vm3, %v1024_v24, 0.0  ;;  %v5123_v27 = vsel %vm380_vm3, %v1030_v26, 0.0  ;;  %10407 = vst [vmem:[#allocation40_spill] sm:$0xff] %v5127_v28  ;;  %10410 = sst [smem:[#allocation43_spill]] %s5145_s12 }
  0x77   : > { %10405 = vst [vmem:[#allocation38_spill] sm:$0xff] %v5113_v25  ;;  %s5153_s17 = sld [smem:[#allocation2 + $0xe]] }
  0x78   : > { %10406 = vst [vmem:[#allocation39_spill] sm:$0xff] %v5123_v27  ;;  %10411 = sst [smem:[#allocation44_spill]] %s5149_s9 }
  0x79   : > { %s5155_s18 = sld [smem:[#allocation2 + $0xf]] }
  0x7a   : > { %s5157_s19 = sld [smem:[#allocation2]] }
  0x7b   : > { %404 = vrot.lane.b32.xlu1 %v5067_v16, %s10202_s27  ;;  %s5159_s26 = sld [smem:[#allocation2 + $0x1]] }
  0x7c   : > { %398 = vrot.lane.b32.xlu0 %v5071_v17, %s10202_s27  ;;  %602 = vrot.lane.b32.xlu2 %v5071_v17, %s10204_s20  ;;  %s5161_s1 = sld [smem:[#allocation2 + $0x2]] }
  0x7d   : > { %10412 = sst [smem:[#allocation45_spill]] %s5153_s17 }
  0x7e   : > { %s5163_s2 = sld [smem:[#allocation2 + $0x3]] }
  0x7f   : > { %s5165_s3 = sld [smem:[#allocation2 + $0x4]] }
  0x80   : > { %10413 = sst [smem:[#allocation46_spill]] %s5157_s19 }
  0x81   : > { %10414 = sst [smem:[#allocation47_spill]] %s5159_s26 }
  0x82   : > { %10415 = sst [smem:[#allocation48_spill]] %s5161_s1 }
  0x83   : > { %608 = vrot.lane.b32.xlu1 %v5067_v16, %s10204_s20  ;;  %s5167_s4 = sld [smem:[#allocation2 + $0x5]] }
  0x84   : > { %606 = vrot.lane.b32.xlu0 %v5051_v13, %s10204_s20  ;;  %708 = vrot.lane.b32.xlu2 %v5035_v7, %s10202_s27  ;;  %s5169_s8 = sld [smem:[#allocation2 + $0x6]] }
  0x85   : > { %s5171_s11 = sld [smem:[#allocation2 + $0x7]] }
  0x86   : > { %s5177_s5 = sld [smem:[#allocation2 + $0x12]] }
  0x87   : > { %s5179_s7 = sld [smem:[#allocation2 + $0x13]] }
  0x88   : > { %s5181_s23 = sld [smem:[#allocation2 + $0x14]] }
  0x89   : > { %s5183_s22 = sld [smem:[#allocation2 + $0x15]] }
  0x8a   : > { %s5185_s29 = sld [smem:[#allocation2 + $0x16]] }
  0x8b   : > { %714 = vrot.lane.b32.xlu1 %v368_v0, %s10202_s27  ;;  %s5187_s24 = sld [smem:[#allocation2 + $0x17]] }
  0x8c   : > { %710 = vrot.lane.b32.xlu0 %v5041_v9, %s10202_s27  ;;  %716 = vrot.lane.b32.xlu2 %v5032_v1, %s10202_s27  ;;  %s5189_s28 = sld [smem:[#allocation2 + $0x18]]  ;;  %v529_v48 = vstv %s5177_s5 }
  0x8d   : > { %s5191_s21 = sld [smem:[#allocation2 + $0x19]]  ;;  %v541_v49 = vstv %s5179_s7  ;;  %v5261_v60 = vmul.f32 %v529_v48, %v5059_v15  ;;  %v5343_v33 = vmul.f32 %v529_v48, %v5071_v17 }
  0x8e   : > { %s5193_s10 = sld [smem:[#allocation2 + $0x1a]]  ;;  %v553_v50 = vstv %s5181_s23  ;;  %v5264_v61 = vmul.f32 %v541_v49, %v5059_v15  ;;  %v5346_v20 = vmul.f32 %v541_v49, %v5071_v17 }
  0x8f   : > { %s5195_s6 = sld [smem:[#allocation2 + $0x1b]]  ;;  %v565_v51 = vstv %s5183_s22  ;;  %v5267_v62 = vmul.f32 %v553_v50, %v5059_v15 }
  0x90   : > { %s5197_s25 = sld [smem:[#allocation2 + $0x1c]]  ;;  %v577_v52 = vstv %s5185_s29  ;;  %v5270_v63 = vmul.f32 %v565_v51, %v5059_v15 }
  0x91   : > { %10416 = sst [smem:[#allocation49_spill]] %s5187_s24 }
  0x92   : > { %10417 = sst [smem:[#allocation50_spill]] %s5189_s28 }
  0x93   : > { %914 = vrot.lane.b32.xlu1 %v5041_v9, %s10204_s20  ;;  %s5199_s0 = sld [smem:[#allocation2 + $0x1d]]  ;;  %v523_v56 = vstv %s5191_s21 }
  0x94   : > { %912 = vrot.lane.b32.xlu0 %v5035_v7, %s10204_s20  ;;  %918 = vrot.lane.b32.xlu2 %v368_v0, %s10204_s20  ;;  %s5201_s13 = sld [smem:[#allocation2 + $0x1e]]  ;;  %v535_v57 = vstv %s5193_s10  ;;  %v5273_v0 = vmul.f32 %v577_v52, %v5059_v15  ;;  %v5282_v5 = vmul.f32 %v523_v56, %v5051_v13 }
  0x95   : > { %10418 = sst [smem:[#allocation51_spill]] %s5195_s6  ;;  %v5285_v6 = vmul.f32 %v535_v57, %v5051_v13 }
  0x96   : > { %10419 = sst [smem:[#allocation52_spill]] %s5197_s25 }
  0x97   : > { %s5203_s24 = sld [smem:[#allocation2 + $0x1f]] }
  0x98   : > { %s5205_s28 = sld [smem:[#allocation2 + $0x20]] }
  0x99   : > { %s5210_s6 = sld [smem:[#allocation2 + $0x21]]  ;;  %v571_v12 = vstv %s5199_s0 }
  0x9a   : > { %s5213_s25 = sld [smem:[#allocation2 + $0x22]]  ;;  %v583_v14 = vstv %s5201_s13  ;;  %v5308_v38 = vmul.f32 %v571_v12, %v5051_v13 }
  0x9b   : > { %1033 = vrot.lane.b32.xlu1 %v5103_v21, %s10202_s27  ;;  %s5226_s14 = sld [smem:[#allocation2 + $0x24]]  ;;  %v5311_v30 = vmul.f32 %v583_v14, %v5051_v13 }
  0x9c   : > { %920 = vrot.lane.b32.xlu0 %v5032_v1, %s10204_s20  ;;  %1035 = vrot.lane.b32.xlu2 %v5113_v25, %s10202_s27  ;;  %s10421_s12 = sld [smem:[#allocation49_spill]] }
  0x9d   : > { %s10422_s15 = sld [smem:[#allocation50_spill]] }
  0x9e   : > { %10420 = sst [smem:[#allocation53_spill]] %s5205_s28 }
  0x9f   : > { %s5220_s28 = sld [smem:[#allocation2 + $0x23]]  ;;  %v625_v19 = vstv %s5210_s6 }
  0xa0   : > { %s5232_s9 = sld [smem:[#allocation2 + $0x25]]  ;;  %v637_v22 = vstv %s5213_s25 }
  0xa1   : > { %s10423_s17 = sld [smem:[#allocation51_spill]]  ;;  %v661_v26 = vstv %s5226_s14 }
  0xa2   : > { %s5238_s19 = sld [smem:[#allocation2 + $0x26]]  ;;  %v589_v53 = vstv %s10421_s12 }
  0xa3   : > { %1041 = vrot.lane.b32.xlu1 %v5123_v27, %s10202_s27  ;;  %s5244_s1 = sld [smem:[#allocation2 + $0x27]]  ;;  %v511_v54 = vstv %s10422_s15  ;;  %v5276_v2 = vmul.f32 %v589_v53, %v5059_v15 }
  0xa4   : > { %1039 = vrot.lane.b32.xlu0 %v5127_v28, %s10202_s27  ;;  %1237 = vrot.lane.b32.xlu2 %v5103_v21, %s10204_s20  ;;  %s5173_s27 = sld [smem:[#allocation2 + $0x10]]  ;;  %v5279_v3 = vmul.f32 %v511_v54, %v5051_v13  ;;  %v5365_v49 = vmul.f32 %v511_v54, %v5067_v16  ;;  %v5382_v54 = vmul.f32 %v571_v12, %v5067_v16 }
  0xa5   : > { %s10424_s26 = sld [smem:[#allocation52_spill]]  ;;  %v649_v23 = vstv %s5220_s28 }
  0xa6   : > { %s10425_s5 = sld [smem:[#allocation53_spill]]  ;;  %v673_v40 = vstv %s5232_s9 }
  0xa7   : > { %v547_v58 = vstv %s10423_s17  ;;  %s10429_s6 = sld [smem:[#allocation44_spill]] }
  0xa8   : > { %v5288_v10 = vmul.f32 %v547_v58, %v5051_v13  ;;  %v10244_v39 = vstv %s5238_s19  ;;  %s10430_s21 = sld [smem:[#allocation45_spill]] }
  0xa9   : > { %v10243_v32 = vstv %s5244_s1  ;;  %s5373_s22 = sld [smem:[#allocation2 + $0x28]] }
  0xaa   : > { %v505_v46 = vstv %s5173_s27  ;;  %s5386_s23 = sld [smem:[#allocation2 + $0x29]] }
  0xab   : > { %1243 = vrot.lane.b32.xlu1 %v5127_v28, %s10204_s20  ;;  %v5251_v55 = vmul.f32 %v505_v46, %v5059_v15  ;;  %v559_v11 = vstv %s10424_s26  ;;  %s5413_s25 = sld [smem:[#allocation2 + $0x2b]] }
  0xac   : > { %1239 = vrot.lane.b32.xlu0 %v5113_v25, %s10204_s20  ;;  %1245 = vrot.lane.b32.xlu2 %v5123_v27, %s10204_s20  ;;  %s5175_s20 = sld [smem:[#allocation2 + $0x11]]  ;;  %v613_v18 = vstv %s10425_s5  ;;  %v5305_v31 = vmul.f32 %v559_v11, %v5051_v13  ;;  %v5349_v27 = vmul.f32 %v553_v50, %v5071_v17  ;;  %v5368_v50 = vmul.f32 %v523_v56, %v5067_v16 }
  0xad   : > { %v10436_v25 = vstv %s5155_s18  ;;  %s5423_s28 = sld [smem:[#allocation2 + $0x2c]] }
  0xae   : > { %v10435_v21 = vstv %s10430_s21  ;;  %s10445_s29 = sld [smem:[#allocation41_spill]] }
  0xaf   : > { %s10446_s7 = sld [smem:[#allocation46_spill]] }
  0xb0   : > { %s5439_s10 = sld [smem:[#allocation2 + $0x2d]] }
  0xb1   : > { %s5451_s0 = sld [smem:[#allocation2 + $0x2e]] }
  0xb2   : > { %v517_v47 = vstv %s5175_s20  ;;  %s5457_s13 = sld [smem:[#allocation2 + $0x2f]] }
  0xb3   : > { %v5258_v59 = vmul.f32 %v517_v47, %v5059_v15  ;;  %v595_v15 = vstv %s5203_s24  ;;  %v5340_v34 = vmul.f32 %v517_v47, %v5071_v17  ;;  %v5358_v47 = vmul.f32 %v589_v53, %v5071_v17  ;;  %s5400_s24 = sld [smem:[#allocation2 + $0x2a]] }
  0xb4   : > { %v5314_v45 = vmul.f32 %v595_v15, %v5051_v13  ;;  %v5337_v13 = vmul.f32 %v505_v46, %v5071_v17  ;;  %v5355_v46 = vmul.f32 %v577_v52, %v5071_v17  ;;  %v5379_v53 = vmul.f32 %v559_v11, %v5067_v16  ;;  %s10451_s27 = sld [smem:[#allocation42_spill]] }
  0xb5   : > { %v5395_v11 = vmul.f32 %v583_v14, %v5067_v16  ;;  %v5398_v12 = vmul.f32 %v595_v15, %v5067_v16  ;;  %v10437_v14 = vstv %s5163_s2  ;;  %s10452_s20 = sld [smem:[#allocation43_spill]] }
  0xb6   : > { %s10453_s14 = sld [smem:[#allocation47_spill]] }
  0xb7   : > { %s10454_s15 = sld [smem:[#allocation48_spill]] }
  0xb8   : > { %s5517_s12 = sld [smem:[#allocation2 + $0x30]] }
  0xb9   : > { %s5541_s9 = sld [smem:[#allocation2 + $0x33]] }
  0xba   : > { %s5560_s17 = sld [smem:[#allocation2 + $0x35]] }
  0xbb   : > { %s5581_s26 = sld [smem:[#allocation2 + $0x37]] }
  0xbc   : > { %s5641_s5 = sld [smem:[#allocation2 + $0x3f]] }
  0xce   : > { %v601_v4 = vpop.permute.xlu2 %600 }
  0xcf   : > { %v604_v24 = vsel %vm382_vm4, %v601_v4, 0.0 }
  0xd0   : > { %v5316_v44 = vmul.f32 %v613_v18, %v604_v24  ;;  %v5318_v4 = vmul.f32 %v625_v19, %v604_v24  ;;  %v5320_v43 = vmul.f32 %v637_v22, %v604_v24  ;;  %v5322_v42 = vmul.f32 %v649_v23, %v604_v24 }
  0xd1   : > { %v5324_v41 = vmul.f32 %v661_v26, %v604_v24  ;;  %v5326_v37 = vmul.f32 %v673_v40, %v604_v24  ;;  %v5330_v36 = vmul.f32 %v10244_v39, %v604_v24  ;;  %v5334_v35 = vmul.f32 %v10243_v32, %v604_v24 }
  0xd2   : > { %10426 = vst [vmem:[#allocation54_spill] sm:$0xff] %v5316_v44  ;;  %v5352_v24 = vmul.f32 %v565_v51, %v5071_v17  ;;  %v5371_v51 = vmul.f32 %v535_v57, %v5067_v16  ;;  %v10432_v57 = vstv %s5147_s30  ;;  %v10433_v39 = vstv %s10429_s6 }
  0xd3   : > { %10427 = vst [vmem:[#allocation55_spill] sm:$0xff] %v5318_v4  ;;  %v10444_v44 = vstv %s5171_s11 }
  0xd4   : > { %10428 = vst [vmem:[#allocation56_spill] sm:$0xff] %v5320_v43 }
  0xd5   : > { %10431 = vst [vmem:[#allocation57_spill] sm:$0xff] %v5371_v51 }
  0xd6   : > { %v603_v52 = vpop.permute.xlu2 %602 }
  0xd7   : > { %v605_v56 = vsel %vm382_vm4, %v603_v52, 0.0  ;;  %v10434_v52 = vstv %s5151_s16 }
  0xd8   : > { %v5419_v15 = vmul.f32 %v625_v19, %v605_v56  ;;  %v5421_v7 = vmul.f32 %v637_v22, %v605_v56  ;;  %v5435_v19 = vmul.f32 %v661_v26, %v605_v56  ;;  %v5437_v22 = vmul.f32 %v673_v40, %v605_v56 }
  0xda   : > { %10439 = vst [vmem:[#allocation59_spill] sm:$0xff] %v5419_v15 }
  0xdb   : > { %10440 = vst [vmem:[#allocation60_spill] sm:$0xff] %v5421_v7 }
  0xe5   : > { %v403_v8 = vpop.permute.xlu1 %402 }
  0xe6   : > { %v5362_v48 = vsel %vm381_vm5, %v403_v8, 0.0  ;;  %v397_v17 = vpop.permute.xlu0 %396  ;;  %v5376_v8 = vmul.f32 %v547_v58, %v5067_v16  ;;  %v5417_v16 = vmul.f32 %v613_v18, %v605_v56  ;;  %v5433_v18 = vmul.f32 %v649_v23, %v605_v56 }
  0xe7   : > { %v452_v32 = vmul.f32 %v10432_v57, %v5362_v48  ;;  %v464_v58 = vmul.f32 %v10433_v39, %v5362_v48  ;;  %v476_v28 = vmul.f32 %v10434_v52, %v5362_v48  ;;  %v488_v57 = vmul.f32 %v10435_v21, %v5362_v48 }
  0xe8   : > { %v500_v1 = vmul.f32 %v10436_v25, %v5362_v48  ;;  %v400_v39 = vsel %vm381_vm5, %v397_v17, 0.0  ;;  %10438 = vst [vmem:[#allocation58_spill] sm:$0xff] %v5417_v16  ;;  %v10441_v21 = vstv %s5165_s3  ;;  %v10442_v25 = vstv %s5167_s4 }
  0xe9   : > { %v446_v9 = vmul.f32 %v10437_v14, %v400_v39  ;;  %v458_v52 = vmul.f32 %v10441_v21, %v400_v39  ;;  %v470_v43 = vmul.f32 %v10442_v25, %v400_v39  ;;  %v10443_v17 = vstv %s5169_s8 }
  0xea   : > { %v482_v4 = vmul.f32 %v10443_v17, %v400_v39  ;;  %v494_v51 = vmul.f32 %v10444_v44, %v400_v39  ;;  %v10447_v17 = vstv %s5238_s19  ;;  %s5574_s19 = sld [smem:[#allocation2 + $0x32]] }
  0xeb   : > { %v454_v14 = vadd.f32 %v452_v32, %v446_v9  ;;  %v466_v7 = vadd.f32 %v464_v58, %v458_v52  ;;  %v478_v15 = vadd.f32 %v476_v28, %v470_v43  ;;  %v5444_v44 = vmul.f32 %v10447_v17, %v605_v56 }
  0xec   : > { %v490_v16 = vadd.f32 %v488_v57, %v482_v4  ;;  %v502_v21 = vadd.f32 %v500_v1, %v494_v51  ;;  %v10448_v9 = vstv %s5244_s1  ;;  %v10450_v4 = vstv %s10446_s7  ;;  %s5595_s1 = sld [smem:[#allocation2 + $0x38]] }
  0xed   : > { %v544_v25 = vadd.f32 %v5264_v61, %v454_v14  ;;  %v5448_v32 = vmul.f32 %v10448_v9, %v605_v56  ;;  %v556_v40 = vadd.f32 %v5267_v62, %v466_v7  ;;  %v568_v28 = vadd.f32 %v5270_v63, %v478_v15  ;;  %v405_v58 = vpop.permute.xlu1 %404 }
  0xee   : > { %v580_v1 = vadd.f32 %v5273_v0, %v490_v16  ;;  %v592_v43 = vadd.f32 %v5276_v2, %v502_v21  ;;  %v10449_v61 = vstv %s10445_s29  ;;  %v410_v51 = vmul.f32 %v10450_v4, %v400_v39  ;;  %v399_v57 = vpop.permute.xlu0 %398 }
  0xef   : > { %v416_v26 = vmul.f32 %v10449_v61, %v5362_v48  ;;  %v550_v56 = vadd.f32 %v5288_v10, %v544_v25  ;;  %v562_v62 = vadd.f32 %v5305_v31, %v556_v40  ;;  %v574_v63 = vadd.f32 %v5308_v38, %v568_v28 }
  0xf0   : > { %v586_v0 = vadd.f32 %v5311_v30, %v580_v1  ;;  %v598_v2 = vadd.f32 %v5314_v45, %v592_v43  ;;  %v655_v15 = vstv %s5413_s25  ;;  %v10455_v52 = vstv %s10451_s27  ;;  %s5667_s25 = sld [smem:[#allocation2 + $0x41]] }
  0xf1   : > { %v5471_v16 = vadd.f32 %v5322_v42, %v550_v56  ;;  %v5477_v38 = vadd.f32 %v5324_v41, %v562_v62  ;;  %v5480_v30 = vadd.f32 %v5326_v37, %v574_v63  ;;  %v428_v14 = vmul.f32 %v10455_v52, %v5362_v48 }
  0xf2   : > { %v5483_v45 = vadd.f32 %v5330_v36, %v586_v0  ;;  %v5486_v42 = vadd.f32 %v5334_v35, %v598_v2  ;;  %v10456_v21 = vstv %s10452_s20  ;;  %v407_v37 = vsel %vm381_vm5, %v405_v58, 0.0 }
  0xf3   : > { %v440_v41 = vmul.f32 %v10456_v21, %v5362_v48  ;;  %v401_v36 = vsel %vm381_vm5, %v399_v57, 0.0  ;;  %v418_v25 = vadd.f32 %v416_v26, %v410_v51  ;;  %v10457_v17 = vstv %s10453_s14 }
  0xf4   : > { %v422_v35 = vmul.f32 %v10457_v17, %v400_v39  ;;  %v10458_v9 = vstv %s10454_s15  ;;  %v10459_v28 = vstv %s5147_s30  ;;  %v10460_v43 = vstv %s10429_s6  ;;  %s5528_s30 = sld [smem:[#allocation2 + $0x31]] }
  0xf5   : > { %v434_v40 = vmul.f32 %v10458_v9, %v400_v39  ;;  %v453_v1 = vmul.f32 %v10459_v28, %v407_v37  ;;  %v465_v61 = vmul.f32 %v10460_v43, %v407_v37  ;;  %v10461_v48 = vstv %s5151_s16  ;;  %s5554_s16 = sld [smem:[#allocation2 + $0x34]] }
  0xf6   : > { %v477_v4 = vmul.f32 %v10461_v48, %v407_v37  ;;  %v10462_v56 = vstv %s10430_s21  ;;  %v10463_v63 = vstv %s5155_s18  ;;  %v10464_v2 = vstv %s5163_s2  ;;  %s5566_s18 = sld [smem:[#allocation2 + $0x36]] }
  0xf7   : > { %v489_v62 = vmul.f32 %v10462_v56, %v407_v37  ;;  %v501_v0 = vmul.f32 %v10463_v63, %v407_v37  ;;  %v447_v58 = vmul.f32 %v10464_v2, %v401_v36  ;;  %v10465_v39 = vstv %s5165_s3  ;;  %s5602_s2 = sld [smem:[#allocation2 + $0x39]] }
  0xf8   : > { %v459_v51 = vmul.f32 %v10465_v39, %v401_v36  ;;  %v10466_v21 = vstv %s5167_s4  ;;  %v10467_v9 = vstv %s5169_s8  ;;  %v10468_v43 = vstv %s5171_s11  ;;  %s5612_s3 = sld [smem:[#allocation2 + $0x3b]] }
  0xf9   : > { %v471_v17 = vmul.f32 %v10466_v21, %v401_v36  ;;  %v483_v28 = vmul.f32 %v10467_v9, %v401_v36  ;;  %v495_v48 = vmul.f32 %v10468_v43, %v401_v36  ;;  %v430_v56 = vadd.f32 %v428_v14, %v422_v35  ;;  %s5619_s4 = sld [smem:[#allocation2 + $0x3c]] }
  0xfa   : > { %v442_v63 = vadd.f32 %v440_v41, %v434_v40  ;;  %v508_v2 = vadd.f32 %v5251_v55, %v418_v25  ;;  %v455_v10 = vadd.f32 %v453_v1, %v447_v58  ;;  %v467_v7 = vadd.f32 %v465_v61, %v459_v51  ;;  %s5629_s8 = sld [smem:[#allocation2 + $0x3d]] }
  0xfb   : > { %v479_v23 = vadd.f32 %v477_v4, %v471_v17  ;;  %v491_v26 = vadd.f32 %v489_v62, %v483_v28  ;;  %v503_v39 = vadd.f32 %v501_v0, %v495_v48  ;;  %v10469_v52 = vstv %s10445_s29  ;;  %s5635_s11 = sld [smem:[#allocation2 + $0x3e]] }
  0xfc   : > { %v417_v21 = vmul.f32 %v10469_v52, %v407_v37  ;;  %v10470_v57 = vstv %s10451_s27  ;;  %v10471_v31 = vstv %s10452_s20  ;;  %v545_v14 = vadd.f32 %v5346_v20, %v455_v10  ;;  %s5648_s6 = sld [smem:[#allocation2 + $0x3a]] }
  0xfd   : > { %v429_v9 = vmul.f32 %v10470_v57, %v407_v37  ;;  %v441_v43 = vmul.f32 %v10471_v31, %v407_v37  ;;  %v557_v55 = vadd.f32 %v5349_v27, %v467_v7  ;;  %v569_v41 = vadd.f32 %v5352_v24, %v479_v23  ;;  %s5657_s21 = sld [smem:[#allocation2 + $0x40]] }
  0xfe   : > { %v581_v25 = vadd.f32 %v5355_v46, %v491_v26  ;;  %v593_v35 = vadd.f32 %v5358_v47, %v503_v39  ;;  %v10472_v40 = vstv %s10446_s7  ;;  %v10473_v61 = vstv %s10453_s14  ;;  %v609_v47 = vpop.permute.xlu1 %608  ;;  %s5675_s29 = sld [smem:[#allocation2 + $0x43]] }
  0xff   : > { %v411_v1 = vmul.f32 %v10472_v40, %v401_v36  ;;  %v423_v4 = vmul.f32 %v10473_v61, %v401_v36  ;;  %v10474_v62 = vstv %s10454_s15  ;;  %v551_v31 = vadd.f32 %v5376_v8, %v545_v14  ;;  %v607_v8 = vpop.permute.xlu0 %606  ;;  %s5685_s7 = sld [smem:[#allocation2 + $0x44]] }
 0x100   : > { %v435_v0 = vmul.f32 %v10474_v62, %v401_v36  ;;  %v563_v20 = vadd.f32 %v5379_v53, %v557_v55  ;;  %v575_v27 = vadd.f32 %v5382_v54, %v569_v41  ;;  %v587_v24 = vadd.f32 %v5395_v11, %v581_v25  ;;  %s5802_s27 = sld [smem:[#allocation2 + $0x4e]] }
 0x101   : > { %v599_v46 = vadd.f32 %v5398_v12, %v593_v35  ;;  %v520_v23 = vadd.f32 %v5258_v59, %v430_v56  ;;  %v532_v7 = vadd.f32 %v5261_v60, %v442_v63  ;;  %v653_v10 = vadd.f32 %v5433_v18, %v551_v31  ;;  %s5810_s20 = sld [smem:[#allocation2 + $0x4f]] }
 0x102   : > { %v721_v37 = vstv %s5517_s12  ;;  %v665_v53 = vadd.f32 %v5435_v19, %v563_v20  ;;  %v677_v54 = vadd.f32 %v5437_v22, %v575_v27  ;;  %v689_v11 = vadd.f32 %v5444_v44, %v587_v24  ;;  %s5820_s14 = sld [smem:[#allocation2 + $0x53]] }
 0x103   : > { %v701_v59 = vadd.f32 %v5448_v32, %v599_v46  ;;  %v514_v60 = vadd.f32 %v5279_v3, %v508_v2  ;;  %v419_v12 = vadd.f32 %v417_v21, %v411_v1  ;;  %v5571_v18 = vsel %vm382_vm4, %v609_v47, 0.0  ;;  %s5830_s15 = sld [smem:[#allocation2 + $0x54]] }
 0x104   : > { %v733_v19 = vstv %s5528_s30  ;;  %v431_v22 = vadd.f32 %v429_v9, %v423_v4  ;;  %v443_v36 = vadd.f32 %v441_v43, %v435_v0  ;;  %v657_v44 = vmul.f32 %v655_v15, %v5571_v18  ;;  %v709_v0 = vpop.permute.xlu2 %708  ;;  %s5835_s12 = sld [smem:[#allocation2 + $0x55]] }
 0x105   : > { %v610_v32 = vsel %vm382_vm4, %v607_v8, 0.0  ;;  %v10475_v3 = vstv %s5423_s28  ;;  %v10476_v57 = vstv %s5439_s10  ;;  %v10477_v26 = vstv %s5451_s0  ;;  %s5673_s28 = sld [smem:[#allocation2 + $0x42]] }
 0x106   : > { %v669_v58 = vmul.f32 %v10475_v3, %v5571_v18  ;;  %v681_v52 = vmul.f32 %v10476_v57, %v5571_v18  ;;  %v693_v51 = vmul.f32 %v10477_v26, %v5571_v18  ;;  %v10478_v17 = vstv %s5457_s13  ;;  %s5691_s10 = sld [smem:[#allocation2 + $0x45]] }
 0x107   : > { %v705_v28 = vmul.f32 %v10478_v17, %v5571_v18  ;;  %v526_v48 = vadd.f32 %v5282_v5, %v520_v23  ;;  %v538_v56 = vadd.f32 %v5285_v6, %v532_v7  ;;  %v5599_v63 = vadd.f32 %v657_v44, %v653_v10  ;;  %s5697_s0 = sld [smem:[#allocation2 + $0x46]] }
 0x108   : > { %v757_v2 = vstv %s5541_s9  ;;  %v5604_v39 = vadd.f32 %v669_v58, %v665_v53  ;;  %v5606_v21 = vadd.f32 %v681_v52, %v677_v54  ;;  %v5608_v9 = vadd.f32 %v693_v51, %v689_v11  ;;  %v10486_v11 = vld [vmem:[#allocation54_spill] sm:$0xff]  ;;  %v10489_v51 = vld [vmem:[#allocation56_spill] sm:$0xff]  ;;  %s5701_s13 = sld [smem:[#allocation2 + $0x47]] }
 0x109   : > { %v5610_v43 = vadd.f32 %v705_v28, %v701_v59  ;;  %v509_v5 = vadd.f32 %v5337_v13, %v419_v12  ;;  %v521_v6 = vadd.f32 %v5340_v34, %v431_v22  ;;  %v533_v14 = vadd.f32 %v5343_v33, %v443_v36  ;;  %v10487_v12 = vld [vmem:[#allocation55_spill] sm:$0xff]  ;;  %s5837_s9 = sld [smem:[#allocation2 + $0x56]] }
 0x10a   : > { %v656_v55 = vmul.f32 %v655_v15, %v610_v32  ;;  %v10479_v41 = vmov %v10475_v3  ;;  %v10480_v35 = vmov %v10476_v57  ;;  %v10481_v1 = vmov %v10477_v26  ;;  %s5872_s30 = sld [smem:[#allocation2 + $0x49]] }
 0x10b   : > { %v668_v25 = vmul.f32 %v10479_v41, %v610_v32  ;;  %v680_v40 = vmul.f32 %v10480_v35, %v610_v32  ;;  %v692_v61 = vmul.f32 %v10481_v1, %v610_v32  ;;  %v10482_v4 = vmov %v10478_v17  ;;  %v10490_v17 = vld [vmem:[#allocation58_spill] sm:$0xff] }
 0x10c   : > { %v704_v62 = vmul.f32 %v10482_v4, %v610_v32  ;;  %v658_v34 = vadd.f32 %v656_v55, %v5471_v16  ;;  %v769_v33 = vstv %s5554_s16  ;;  %v781_v13 = vstv %s5560_s17  ;;  %s5851_s16 = sld [smem:[#allocation2 + $0x57]] }
 0x10d   : > { %v793_v15 = vstv %s5566_s18  ;;  %v670_v31 = vadd.f32 %v668_v25, %v5477_v38  ;;  %v682_v20 = vadd.f32 %v680_v40, %v5480_v30  ;;  %v694_v27 = vadd.f32 %v692_v61, %v5483_v45  ;;  %v10483_v30 = vld [vmem:[#allocation57_spill] sm:$0xff]  ;;  %s5866_s17 = sld [smem:[#allocation2 + $0x48]] }
 0x10e   : > { %v706_v16 = vadd.f32 %v704_v62, %v5486_v42  ;;  %v515_v24 = vadd.f32 %v5365_v49, %v509_v5  ;;  %v527_v46 = vadd.f32 %v5368_v50, %v521_v6  ;;  %v805_v47 = vstv %s5581_s26  ;;  %v715_v6 = vpop.permute.xlu1 %714  ;;  %s5881_s18 = sld [smem:[#allocation2 + $0x4a]] }
 0x10f   : > { %v712_v38 = vsel %vm381_vm5, %v709_v0, 0.0  ;;  %v539_v23 = vadd.f32 %v10483_v30, %v533_v14  ;;  %v10484_v7 = vstv %s5373_s22  ;;  %v10485_v10 = vstv %s5386_s23  ;;  %v10492_v14 = vld [vmem:[#allocation60_spill] sm:$0xff]  ;;  %s5784_s22 = sld [smem:[#allocation2 + $0x4b]] }
 0x110   : > { %v620_v45 = vmul.f32 %v10484_v7, %v610_v32  ;;  %v632_v8 = vmul.f32 %v10485_v10, %v610_v32  ;;  %v758_v42 = vmul.f32 %v757_v2, %v712_v38  ;;  %v770_v49 = vmul.f32 %v769_v33, %v712_v38  ;;  %s5790_s23 = sld [smem:[#allocation2 + $0x4c]] }
 0x111   : > { %v782_v50 = vmul.f32 %v781_v13, %v712_v38  ;;  %v794_v53 = vmul.f32 %v793_v15, %v712_v38  ;;  %v806_v54 = vmul.f32 %v805_v47, %v712_v38  ;;  %v616_v59 = vadd.f32 %v10486_v11, %v514_v60  ;;  %v711_v11 = vpop.permute.xlu0 %710  ;;  %s5892_s26 = sld [smem:[#allocation2 + $0x51]] }
 0x112   : > { %v628_v22 = vadd.f32 %v10487_v12, %v526_v48  ;;  %v10488_v36 = vstv %s5400_s24  ;;  %v760_v3 = vadd.f32 %v758_v42, %v658_v34  ;;  %v772_v58 = vadd.f32 %v770_v49, %v670_v31  ;;  %s5795_s24 = sld [smem:[#allocation2 + $0x4d]] }
 0x113   : > { %v644_v44 = vmul.f32 %v10488_v36, %v610_v32  ;;  %v784_v57 = vadd.f32 %v782_v50, %v682_v20  ;;  %v796_v52 = vadd.f32 %v794_v53, %v694_v27  ;;  %v808_v26 = vadd.f32 %v806_v54, %v706_v16  ;;  %v10491_v32 = vld [vmem:[#allocation59_spill] sm:$0xff] }
 0x114   : > { %v640_v60 = vadd.f32 %v10489_v51, %v538_v56  ;;  %v5679_v28 = vadd.f32 %v10490_v17, %v515_v24  ;;  %v5682_v48 = vadd.f32 %v10491_v32, %v527_v46  ;;  %v745_v5 = vstv %s5574_s19  ;;  %s5888_s19 = sld [smem:[#allocation2 + $0x50]] }
 0x115   : > { %v5688_v55 = vadd.f32 %v10492_v14, %v539_v23  ;;  %v622_v41 = vadd.f32 %v620_v45, %v616_v59  ;;  %v634_v56 = vadd.f32 %v632_v8, %v628_v22  ;;  %v763_v25 = vstv %s5612_s3  ;;  %s5914_s3 = sld [smem:[#allocation2 + $0x5b]] }
 0x116   : > { %v775_v35 = vstv %s5619_s4  ;;  %v787_v40 = vstv %s5629_s8  ;;  %v799_v1 = vstv %s5635_s11  ;;  %v811_v61 = vstv %s5641_s5  ;;  %s5918_s4 = sld [smem:[#allocation2 + $0x5c]] }
 0x117   : > { %v646_v4 = vadd.f32 %v644_v44, %v640_v60  ;;  %v727_v62 = vstv %s5595_s1  ;;  %v739_v0 = vstv %s5602_s2  ;;  %v718_v34 = vsel %vm381_vm5, %v715_v6, 0.0  ;;  %s5907_s1 = sld [smem:[#allocation2 + $0x52]] }
 0x118   : > { %v722_v31 = vmul.f32 %v721_v37, %v712_v38  ;;  %v734_v20 = vmul.f32 %v733_v19, %v712_v38  ;;  %v746_v27 = vmul.f32 %v745_v5, %v712_v38  ;;  %v764_v16 = vmul.f32 %v763_v25, %v718_v34  ;;  %s10497_s2 = sld [smem:[#allocation31_spill]] }
 0x119   : > { %v776_v24 = vmul.f32 %v775_v35, %v718_v34  ;;  %v788_v46 = vmul.f32 %v787_v40, %v718_v34  ;;  %v800_v30 = vmul.f32 %v799_v1, %v718_v34  ;;  %v812_v23 = vmul.f32 %v811_v61, %v718_v34  ;;  %s5928_s8 = sld [smem:[#allocation2 + $0x5d]] }
 0x11a   : > { %v621_v45 = vmul.f32 %v10484_v7, %v5571_v18  ;;  %v633_v38 = vmul.f32 %v10485_v10, %v5571_v18  ;;  %v751_v8 = vstv %s5648_s6  ;;  %v5728_v42 = vadd.f32 %v764_v16, %v760_v3  ;;  %s5934_s11 = sld [smem:[#allocation2 + $0x5e]] }
 0x11b   : > { %v5730_v49 = vadd.f32 %v776_v24, %v772_v58  ;;  %v5732_v50 = vadd.f32 %v788_v46, %v784_v57  ;;  %v5734_v53 = vadd.f32 %v800_v30, %v796_v52  ;;  %v5736_v54 = vadd.f32 %v812_v23, %v808_v26  ;;  %s5936_s5 = sld [smem:[#allocation2 + $0x5f]] }
 0x11c   : > { %v10493_v59 = vmov %v10488_v36  ;;  %v724_v22 = vadd.f32 %v722_v31, %v622_v41  ;;  %v728_v36 = vmul.f32 %v727_v62, %v718_v34  ;;  %v740_v44 = vmul.f32 %v739_v0, %v718_v34  ;;  %s5945_s6 = sld [smem:[#allocation2 + $0x63]] }
 0x11d   : > { %v645_v12 = vmul.f32 %v10493_v59, %v5571_v18  ;;  %v736_v3 = vadd.f32 %v734_v20, %v634_v56  ;;  %v748_v58 = vadd.f32 %v746_v27, %v646_v4  ;;  %v817_v57 = vstv %s5657_s21  ;;  %v10494_v4 = vld [vmem:[#allocation33_spill] sm:$0xff]  ;;  %s5951_s21 = sld [smem:[#allocation2 + $0x64]] }
 0x11e   : > { %v829_v52 = vstv %s5667_s25  ;;  %v841_v26 = vstv %s5673_s28  ;;  %v853_v51 = vstv %s5675_s29  ;;  %v752_v18 = vmul.f32 %v751_v8, %v718_v34  ;;  %s5957_s25 = sld [smem:[#allocation2 + $0x65]] }
 0x11f   : > { %v5753_v60 = vsel %vm381_vm5, %v711_v11, 0.0  ;;  %v865_v17 = vstv %s5685_s7  ;;  %v877_v32 = vstv %s5691_s10  ;;  %v889_v6 = vstv %s5697_s0  ;;  %s5961_s28 = sld [smem:[#allocation2 + $0x66]] }
 0x120   : > { %v901_v14 = vstv %s5701_s13  ;;  %v730_v41 = vadd.f32 %v728_v36, %v724_v22  ;;  %v742_v56 = vadd.f32 %v740_v44, %v736_v3  ;;  %v818_v31 = vmul.f32 %v817_v57, %v10494_v4  ;;  %s5963_s29 = sld [smem:[#allocation2 + $0x67]] }
 0x121   : > { %v759_v20 = vmul.f32 %v757_v2, %v5753_v60  ;;  %v771_v34 = vmul.f32 %v769_v33, %v5753_v60  ;;  %v783_v27 = vmul.f32 %v781_v13, %v5753_v60  ;;  %v795_v16 = vmul.f32 %v793_v15, %v5753_v60  ;;  %s5970_s7 = sld [smem:[#allocation2 + $0x58]] }
 0x122   : > { %v807_v24 = vmul.f32 %v805_v47, %v5753_v60  ;;  %v754_v46 = vadd.f32 %v752_v18, %v748_v58  ;;  %v830_v30 = vmul.f32 %v829_v52, %v10494_v4  ;;  %v842_v23 = vmul.f32 %v841_v26, %v10494_v4  ;;  %v717_v47 = vpop.permute.xlu2 %716  ;;  %s6001_s10 = sld [smem:[#allocation2 + $0x59]] }
 0x123   : > { %v761_v2 = vadd.f32 %v759_v20, %v5599_v63  ;;  %v773_v33 = vadd.f32 %v771_v34, %v5604_v39  ;;  %v785_v13 = vadd.f32 %v783_v27, %v5606_v21  ;;  %v797_v15 = vadd.f32 %v795_v16, %v5608_v9  ;;  %s6003_s0 = sld [smem:[#allocation2 + $0x5a]] }
 0x124   : > { %v809_v7 = vadd.f32 %v807_v24, %v5610_v43  ;;  %v623_v10 = vadd.f32 %v621_v45, %v5679_v28  ;;  %v635_v11 = vadd.f32 %v633_v38, %v5682_v48  ;;  %v647_v63 = vadd.f32 %v645_v12, %v5688_v55  ;;  %v10495_v12 = vld [vmem:[#allocation35_spill] sm:$0xff]  ;;  %v10496_v24 = vld [vmem:[#allocation32_spill] sm:$0xff]  ;;  %s6010_s13 = sld [smem:[#allocation2 + $0x60]] }
 0x125   : > { %v5797_v39 = vadd.f32 %v818_v31, %v730_v41  ;;  %v854_v21 = vmul.f32 %v853_v51, %v10494_v4  ;;  %v866_v9 = vmul.f32 %v865_v17, %v10494_v4  ;;  %v878_v43 = vmul.f32 %v877_v32, %v10494_v4 }
 0x126   : > { %v5804_v28 = vadd.f32 %v830_v30, %v742_v56  ;;  %v890_v48 = vmul.f32 %v889_v6, %v10494_v4  ;;  %v902_v55 = vmul.f32 %v901_v14, %v10494_v4  ;;  %v719_v45 = vsel %vm381_vm5, %v717_v47, 0.0 }
 0x127   : > { %v5812_v38 = vadd.f32 %v842_v23, %v754_v46  ;;  %v723_v59 = vmul.f32 %v721_v37, %v5753_v60  ;;  %v855_v22 = vmul.f32 %v853_v51, %v10495_v12  ;;  %v765_v36 = vmul.f32 %v763_v25, %v719_v45 }
 0x128   : > { %v777_v44 = vmul.f32 %v775_v35, %v719_v45  ;;  %v789_v3 = vmul.f32 %v787_v40, %v719_v45  ;;  %v801_v58 = vmul.f32 %v799_v1, %v719_v45  ;;  %v813_v18 = vmul.f32 %v811_v61, %v719_v45 }
 0x129   : > { %v867_v41 = vmul.f32 %v865_v17, %v10495_v12  ;;  %v879_v37 = vmul.f32 %v877_v32, %v10495_v12  ;;  %v891_v25 = vmul.f32 %v889_v6, %v10495_v12  ;;  %v767_v51 = vadd.f32 %v765_v36, %v761_v2 }
 0x12a   : > { %v779_v35 = vadd.f32 %v777_v44, %v773_v33  ;;  %v791_v56 = vadd.f32 %v789_v3, %v785_v13  ;;  %v803_v40 = vadd.f32 %v801_v58, %v797_v15  ;;  %v815_v1 = vadd.f32 %v813_v18, %v809_v7 }
 0x12b   : > { %v5840_v61 = vadd.f32 %v854_v21, %v5728_v42  ;;  %v5843_v17 = vadd.f32 %v866_v9, %v5730_v49  ;;  %v5846_v32 = vadd.f32 %v878_v43, %v5732_v50  ;;  %v5849_v6 = vadd.f32 %v890_v48, %v5734_v53 }
 0x12c   : > { %v5854_v4 = vadd.f32 %v902_v55, %v5736_v54  ;;  %v735_v42 = vmul.f32 %v733_v19, %v5753_v60  ;;  %v747_v49 = vmul.f32 %v745_v5, %v5753_v60  ;;  %v903_v50 = vmul.f32 %v901_v14, %v10495_v12 }
 0x12d   : > { %v725_v31 = vadd.f32 %v723_v59, %v623_v10  ;;  %v857_v20 = vadd.f32 %v855_v22, %v767_v51  ;;  %v869_v53 = vadd.f32 %v867_v41, %v779_v35  ;;  %v859_v34 = vstv %s5784_s22  ;;  %v915_v10 = vpop.permute.xlu1 %914  ;;  %s6013_s22 = sld [smem:[#allocation2 + $0x61]] }
 0x12e   : > { %v881_v27 = vadd.f32 %v879_v37, %v791_v56  ;;  %v893_v16 = vadd.f32 %v891_v25, %v803_v40  ;;  %v861_v54 = vmul.f32 %v859_v34, %v10496_v24  ;;  %v871_v46 = vstv %s5790_s23  ;;  %v913_v40 = vpop.permute.xlu0 %912  ;;  %s6035_s23 = sld [smem:[#allocation2 + $0x62]] }
 0x12f   : > { %v873_v19 = vmul.f32 %v871_v46, %v10496_v24  ;;  %v883_v5 = vstv %s5795_s24  ;;  %v895_v60 = vstv %s5802_s27  ;;  %v907_v14 = vstv %s5810_s20  ;;  %s6044_s24 = sld [smem:[#allocation2 + $0x68]] }
 0x130   : > { %v905_v30 = vadd.f32 %v903_v50, %v815_v1  ;;  %v885_v23 = vmul.f32 %v883_v5, %v10496_v24  ;;  %v897_v2 = vmul.f32 %v895_v60, %v10496_v24  ;;  %v909_v33 = vmul.f32 %v907_v14, %v10496_v24  ;;  %v4620_v50 = vld [vmem:[%s10497_s2] sm:$0xff]  ;;  %s6054_s27 = sld [smem:[#allocation2 + $0x69]] }
 0x131   : > { %v737_v13 = vadd.f32 %v735_v42, %v635_v11  ;;  %v749_v15 = vadd.f32 %v747_v49, %v647_v63  ;;  %v729_v7 = vmul.f32 %v727_v62, %v719_v45  ;;  %v741_v47 = vmul.f32 %v739_v0, %v719_v45  ;;  %s6065_s20 = sld [smem:[#allocation2 + $0x6b]] }
 0x132   : > { %v753_v21 = vmul.f32 %v751_v8, %v719_v45  ;;  %v961_v9 = vstv %s5820_s14  ;;  %v973_v43 = vstv %s5830_s15  ;;  %v985_v48 = vstv %s5835_s12  ;;  %s6079_s14 = sld [smem:[#allocation2 + $0x6c]] }
 0x133   : > { %v997_v55 = vstv %s5837_s9  ;;  %v1009_v11 = vstv %s5851_s16  ;;  %v863_v63 = vadd.f32 %v861_v54, %v857_v20  ;;  %v875_v59 = vadd.f32 %v873_v19, %v869_v53  ;;  %s6084_s15 = sld [smem:[#allocation2 + $0x6d]] }
 0x134   : > { %v887_v62 = vadd.f32 %v885_v23, %v881_v27  ;;  %v899_v0 = vadd.f32 %v897_v2, %v893_v16  ;;  %v911_v22 = vadd.f32 %v909_v33, %v905_v30  ;;  %v5896_v36 = vsel %vm382_vm4, %v915_v10, 0.0  ;;  %v4621_v23 = vld [vmem:[%s10497_s2 + $0x8] sm:$0xff]  ;;  %v919_v10 = vpop.permute.xlu2 %918  ;;  %s6090_s12 = sld [smem:[#allocation2 + $0x6e]] }
 0x135   : > { %v819_v8 = vmul.f32 %v817_v57, %v10495_v12  ;;  %v831_v45 = vmul.f32 %v829_v52, %v10495_v12  ;;  %v843_v44 = vmul.f32 %v841_v26, %v10495_v12  ;;  %v963_v3 = vmul.f32 %v961_v9, %v5896_v36  ;;  %s6100_s9 = sld [smem:[#allocation2 + $0x6f]] }
 0x136   : > { %v975_v58 = vmul.f32 %v973_v43, %v5896_v36  ;;  %v987_v18 = vmul.f32 %v985_v48, %v5896_v36  ;;  %v999_v41 = vmul.f32 %v997_v55, %v5896_v36  ;;  %v1011_v57 = vmul.f32 %v1009_v11, %v5896_v36  ;;  %s6106_s16 = sld [smem:[#allocation2 + $0x6a]] }
 0x137   : > { %v731_v52 = vadd.f32 %v729_v7, %v725_v31  ;;  %v743_v26 = vadd.f32 %v741_v47, %v737_v13  ;;  %v755_v12 = vadd.f32 %v753_v21, %v749_v15  ;;  %v5916_v37 = vadd.f32 %v963_v3, %v863_v63  ;;  %s6144_s2 = sld [smem:[#allocation2 + $0x76]] }
 0x138   : > { %v5920_v25 = vadd.f32 %v975_v58, %v875_v59  ;;  %v5922_v51 = vadd.f32 %v987_v18, %v887_v62  ;;  %v5924_v35 = vadd.f32 %v999_v41, %v899_v0  ;;  %v5926_v56 = vadd.f32 %v1011_v57, %v911_v22 }
 0x139   : > { %v823_v1 = vstv %s5866_s17  ;;  %v835_v42 = vstv %s5872_s30  ;;  %v847_v49 = vstv %s5881_s18  ;;  %v860_v31 = vmul.f32 %v4620_v50, %v859_v34  ;;  %s6111_s17 = sld [smem:[#allocation2 + $0x70]] }
 0x13a   : > { %v872_v20 = vmul.f32 %v4620_v50, %v871_v46  ;;  %v884_v53 = vmul.f32 %v4620_v50, %v883_v5  ;;  %v896_v27 = vmul.f32 %v4620_v50, %v895_v60  ;;  %v908_v16 = vmul.f32 %v4620_v50, %v907_v14  ;;  %s6113_s30 = sld [smem:[#allocation2 + $0x71]] }
 0x13b   : > { %v821_v24 = vadd.f32 %v819_v8, %v731_v52  ;;  %v833_v54 = vadd.f32 %v831_v45, %v743_v26  ;;  %v845_v19 = vadd.f32 %v843_v44, %v755_v12  ;;  %v5940_v30 = vsel %vm382_vm4, %v913_v40, 0.0  ;;  %s6117_s18 = sld [smem:[#allocation2 + $0x73]] }
 0x13c   : > { %v825_v2 = vmul.f32 %v4621_v23, %v823_v1  ;;  %v837_v33 = vmul.f32 %v4621_v23, %v835_v42  ;;  %v862_v34 = vadd.f32 %v860_v31, %v5840_v61  ;;  %v874_v46 = vadd.f32 %v872_v20, %v5843_v17 }
 0x13d   : > { %v886_v5 = vadd.f32 %v884_v53, %v5846_v32  ;;  %v898_v60 = vadd.f32 %v896_v27, %v5849_v6  ;;  %v910_v14 = vadd.f32 %v908_v16, %v5854_v4  ;;  %v962_v13 = vmul.f32 %v961_v9, %v5940_v30  ;;  %v1034_v16 = vpop.permute.xlu1 %1033 }
 0x13e   : > { %v974_v15 = vmul.f32 %v973_v43, %v5940_v30  ;;  %v986_v7 = vmul.f32 %v985_v48, %v5940_v30  ;;  %v998_v61 = vmul.f32 %v997_v55, %v5940_v30  ;;  %v1010_v17 = vmul.f32 %v1009_v11, %v5940_v30 }
 0x13f   : > { %v849_v32 = vmul.f32 %v4621_v23, %v847_v49  ;;  %v925_v6 = vstv %s5888_s19  ;;  %v937_v4 = vstv %s5892_s26  ;;  %v964_v47 = vadd.f32 %v962_v13, %v862_v34  ;;  %s6123_s19 = sld [smem:[#allocation2 + $0x74]] }
 0x140   : > { %v976_v21 = vadd.f32 %v974_v15, %v874_v46  ;;  %v988_v9 = vadd.f32 %v986_v7, %v886_v5  ;;  %v1000_v43 = vadd.f32 %v998_v61, %v898_v60  ;;  %v1012_v48 = vadd.f32 %v1010_v17, %v910_v14  ;;  %v1036_v61 = vpop.permute.xlu2 %1035  ;;  %s6130_s26 = sld [smem:[#allocation2 + $0x75]] }
 0x141   : > { %v949_v55 = vstv %s5907_s1  ;;  %v5966_v11 = vadd.f32 %v825_v2, %v821_v24  ;;  %v967_v63 = vstv %s5914_s3  ;;  %v979_v59 = vstv %s5918_s4  ;;  %s6138_s1 = sld [smem:[#allocation2 + $0x72]] }
 0x142   : > { %v991_v62 = vstv %s5928_s8  ;;  %v1003_v0 = vstv %s5934_s11  ;;  %v1015_v22 = vstv %s5936_s5  ;;  %v5977_v8 = vsel %vm382_vm4, %v919_v10, 0.0  ;;  %s6151_s3 = sld [smem:[#allocation2 + $0x77]] }
 0x143   : > { %v5979_v45 = vadd.f32 %v837_v33, %v833_v54  ;;  %v5981_v44 = vadd.f32 %v849_v32, %v845_v19  ;;  %v824_v3 = vmul.f32 %v4620_v50, %v823_v1  ;;  %v968_v58 = vmul.f32 %v967_v63, %v5977_v8  ;;  %v921_v54 = vpop.permute.xlu0 %920  ;;  %s6160_s4 = sld [smem:[#allocation2 + $0x78]] }
 0x144   : > { %v980_v18 = vmul.f32 %v979_v59, %v5977_v8  ;;  %v992_v41 = vmul.f32 %v991_v62, %v5977_v8  ;;  %v1004_v57 = vmul.f32 %v1003_v0, %v5977_v8  ;;  %v1016_v52 = vmul.f32 %v1015_v22, %v5977_v8  ;;  %s6166_s8 = sld [smem:[#allocation2 + $0x79]] }
 0x145   : > { %v5999_v26 = vmul.f32 %v925_v6, %v5896_v36  ;;  %v836_v12 = vmul.f32 %v4620_v50, %v835_v42  ;;  %v848_v40 = vmul.f32 %v4620_v50, %v847_v49  ;;  %v970_v1 = vadd.f32 %v968_v58, %v964_v47  ;;  %s6173_s11 = sld [smem:[#allocation2 + $0x7a]] }
 0x146   : > { %v982_v31 = vadd.f32 %v980_v18, %v976_v21  ;;  %v994_v20 = vadd.f32 %v992_v41, %v988_v9  ;;  %v1006_v53 = vadd.f32 %v1004_v57, %v1000_v43  ;;  %v1018_v27 = vadd.f32 %v1016_v52, %v1012_v48  ;;  %s6183_s5 = sld [smem:[#allocation2 + $0x7b]] }
 0x147   : > { %v6006_v24 = vmul.f32 %v937_v4, %v5896_v36  ;;  %v926_v42 = vmul.f32 %v925_v6, %v5940_v30  ;;  %v938_v49 = vmul.f32 %v937_v4, %v5940_v30  ;;  %v1082_v50 = vstv %s5945_s6  ;;  %s6192_s6 = sld [smem:[#allocation2 + $0x7c]] }
 0x148   : > { %v1094_v19 = vstv %s5951_s21  ;;  %v1106_v23 = vstv %s5957_s25  ;;  %v1118_v2 = vstv %s5961_s28  ;;  %v1130_v33 = vstv %s5963_s29  ;;  %s6200_s21 = sld [smem:[#allocation2 + $0x7d]] }
 0x149   : > { %v6020_v34 = vmul.f32 %v949_v55, %v5896_v36  ;;  %v826_v46 = vadd.f32 %v824_v3, %v5797_v39  ;;  %v838_v5 = vadd.f32 %v836_v12, %v5804_v28  ;;  %v6026_v60 = vsel %vm381_vm5, %v1034_v16, 0.0  ;;  %s6212_s25 = sld [smem:[#allocation2 + $0x7e]] }
 0x14a   : > { %v850_v14 = vadd.f32 %v848_v40, %v5812_v38  ;;  %v931_v13 = vstv %s5970_s7  ;;  %v1083_v15 = vmul.f32 %v1082_v50, %v6026_v60  ;;  %v6033_v7 = vsel %vm382_vm4, %v921_v54, 0.0  ;;  %s6222_s28 = sld [smem:[#allocation2 + $0x7f]] }
 0x14b   : > { %v1095_v39 = vmul.f32 %v1094_v19, %v6026_v60  ;;  %v1107_v28 = vmul.f32 %v1106_v23, %v6026_v60  ;;  %v1119_v36 = vmul.f32 %v1118_v2, %v6026_v60  ;;  %v1131_v38 = vmul.f32 %v1130_v33, %v6026_v60  ;;  %10498 = sst [smem:[#allocation49_spill]] %s6173_s11 }
 0x14c   : > { %v928_v17 = vadd.f32 %v926_v42, %v826_v46  ;;  %v940_v32 = vadd.f32 %v938_v49, %v838_v5  ;;  %v950_v6 = vmul.f32 %v949_v55, %v5940_v30  ;;  %v6042_v4 = vadd.f32 %v1083_v15, %v970_v1  ;;  %s6233_s29 = sld [smem:[#allocation2 + $0x80]] }
 0x14d   : > { %v6046_v47 = vadd.f32 %v1095_v39, %v982_v31  ;;  %v6048_v10 = vadd.f32 %v1107_v28, %v994_v20  ;;  %v6050_v21 = vadd.f32 %v1119_v36, %v1006_v53  ;;  %v6052_v9 = vadd.f32 %v1131_v38, %v1018_v27  ;;  %s6237_s7 = sld [smem:[#allocation2 + $0x83]] }
 0x14e   : > { %v943_v43 = vstv %s6001_s10  ;;  %v955_v48 = vstv %s6003_s0  ;;  %v969_v30 = vmul.f32 %v967_v63, %v6033_v7  ;;  %v6063_v55 = vsel %vm381_vm5, %v1036_v61, 0.0  ;;  %s6239_s10 = sld [smem:[#allocation2 + $0x84]] }
 0x14f   : > { %v981_v3 = vmul.f32 %v979_v59, %v6033_v7  ;;  %v993_v58 = vmul.f32 %v991_v62, %v6033_v7  ;;  %v1005_v18 = vmul.f32 %v1003_v0, %v6033_v7  ;;  %v1017_v63 = vmul.f32 %v1015_v22, %v6033_v7  ;;  %s6244_s0 = sld [smem:[#allocation2 + $0x85]] }
 0x150   : > { %v952_v41 = vadd.f32 %v950_v6, %v850_v14  ;;  %v1046_v57 = vstv %s6010_s13  ;;  %v1058_v52 = vstv %s6013_s22  ;;  %v971_v12 = vadd.f32 %v969_v30, %v5916_v37  ;;  %s6250_s13 = sld [smem:[#allocation2 + $0x86]] }
 0x151   : > { %v983_v59 = vadd.f32 %v981_v3, %v5920_v25  ;;  %v995_v62 = vadd.f32 %v993_v58, %v5922_v51  ;;  %v1007_v40 = vadd.f32 %v1005_v18, %v5924_v35  ;;  %v1019_v0 = vadd.f32 %v1017_v63, %v5926_v56  ;;  %s6262_s22 = sld [smem:[#allocation2 + $0x87]] }
 0x152   : > { %v932_v22 = vmul.f32 %v931_v13, %v5977_v8  ;;  %v944_v1 = vmul.f32 %v943_v43, %v5977_v8  ;;  %v956_v37 = vmul.f32 %v955_v48, %v5977_v8  ;;  %v1084_v31 = vmul.f32 %v1082_v50, %v6063_v55 }
 0x153   : > { %v1096_v25 = vmul.f32 %v1094_v19, %v6063_v55  ;;  %v1108_v51 = vmul.f32 %v1106_v23, %v6063_v55  ;;  %v1120_v35 = vmul.f32 %v1118_v2, %v6063_v55  ;;  %v1132_v56 = vmul.f32 %v1130_v33, %v6063_v55 }
 0x154   : > { %v1070_v20 = vstv %s6035_s23  ;;  %v1047_v53 = vmul.f32 %v1046_v57, %v6026_v60  ;;  %v1059_v8 = vmul.f32 %v1058_v52, %v6026_v60  ;;  %v1086_v27 = vadd.f32 %v1084_v31, %v971_v12  ;;  %s6269_s23 = sld [smem:[#allocation2 + $0x81]] }
 0x155   : > { %v1098_v16 = vadd.f32 %v1096_v25, %v983_v59  ;;  %v1110_v42 = vadd.f32 %v1108_v51, %v995_v62  ;;  %v1122_v49 = vadd.f32 %v1120_v35, %v1007_v40  ;;  %v1134_v50 = vadd.f32 %v1132_v56, %v1019_v0  ;;  %v1040_v51 = vpop.permute.xlu0 %1039  ;;  %v10499_v35 = vld [vmem:[#allocation38_spill] sm:$0xff] }
 0x156   : > { %v929_v54 = vadd.f32 %v5999_v26, %v5966_v11  ;;  %v934_v19 = vadd.f32 %v932_v22, %v928_v17  ;;  %v946_v23 = vadd.f32 %v944_v1, %v940_v32  ;;  %v1071_v2 = vmul.f32 %v1070_v20, %v6026_v60  ;;  %v1042_v60 = vpop.permute.xlu1 %1041 }
 0x157   : > { %v933_v33 = vmul.f32 %v931_v13, %v6033_v7  ;;  %v941_v46 = vadd.f32 %v6006_v24, %v5979_v45  ;;  %v953_v11 = vadd.f32 %v6020_v34, %v5981_v44  ;;  %v958_v26 = vadd.f32 %v956_v37, %v952_v41 }
 0x158   : > { %v945_v5 = vmul.f32 %v943_v43, %v6033_v7  ;;  %v6132_v14 = vadd.f32 %v1047_v53, %v934_v19  ;;  %v6134_v15 = vadd.f32 %v1059_v8, %v946_v23  ;;  %v1052_v13 = vstv %s6044_s24  ;;  %s6273_s24 = sld [smem:[#allocation2 + $0x82]] }
 0x159   : > { %v1088_v39 = vstv %s6065_s20  ;;  %v1100_v28 = vstv %s6079_s14  ;;  %v1112_v45 = vstv %s6084_s15  ;;  %v1124_v24 = vstv %s6090_s12  ;;  %s6287_s20 = sld [smem:[#allocation2 + $0x8b]] }
 0x15a   : > { %v1136_v36 = vstv %s6100_s9  ;;  %v6146_v44 = vadd.f32 %v1071_v2, %v958_v26  ;;  %v935_v34 = vadd.f32 %v933_v33, %v929_v54  ;;  %v957_v38 = vmul.f32 %v955_v48, %v6033_v7  ;;  %v10500_v54 = vld [vmem:[#allocation37_spill] sm:$0xff]  ;;  %s6298_s14 = sld [smem:[#allocation2 + $0x8c]] }
 0x15b   : > { %v6155_v61 = vsel %vm381_vm5, %v1042_v60, 0.0  ;;  %v947_v17 = vadd.f32 %v945_v5, %v941_v46  ;;  %v1048_v32 = vmul.f32 %v1046_v57, %v6063_v55  ;;  %v1060_v6 = vmul.f32 %v1058_v52, %v6063_v55  ;;  %s6304_s15 = sld [smem:[#allocation2 + $0x8d]] }
 0x15c   : > { %v1090_v43 = vmul.f32 %v1088_v39, %v6155_v61  ;;  %v1102_v30 = vmul.f32 %v1100_v28, %v6155_v61  ;;  %v1114_v3 = vmul.f32 %v1112_v45, %v6155_v61  ;;  %v1126_v7 = vmul.f32 %v1124_v24, %v6155_v61  ;;  %s6310_s12 = sld [smem:[#allocation2 + $0x8e]] }
 0x15d   : > { %v1138_v48 = vmul.f32 %v1136_v36, %v6155_v61  ;;  %v1142_v58 = vstv %s6111_s17  ;;  %v1154_v18 = vstv %s6113_s30  ;;  %v1178_v63 = vstv %s6117_s18  ;;  %s6314_s9 = sld [smem:[#allocation2 + $0x8f]] }
 0x15e   : > { %v6171_v41 = vadd.f32 %v1090_v43, %v1086_v27  ;;  %v6175_v57 = vadd.f32 %v1102_v30, %v1098_v16  ;;  %v6177_v52 = vadd.f32 %v1114_v3, %v1110_v42  ;;  %v6179_v12 = vadd.f32 %v1126_v7, %v1122_v49  ;;  %10501 = sst [smem:[#allocation50_spill]] %s6273_s24 }
 0x15f   : > { %v6181_v59 = vadd.f32 %v1138_v48, %v1134_v50  ;;  %v6185_v62 = vadd.f32 %v957_v38, %v953_v11  ;;  %v6188_v40 = vmul.f32 %v1070_v20, %v6063_v55  ;;  %v1190_v0 = vstv %s6123_s19  ;;  %s6318_s17 = sld [smem:[#allocation2 + $0x89]] }
 0x160   : > { %v1202_v22 = vstv %s6130_s26  ;;  %v6194_v1 = vadd.f32 %v1048_v32, %v935_v34  ;;  %v6196_v37 = vadd.f32 %v1060_v6, %v947_v17  ;;  %v1064_v31 = vstv %s6054_s27  ;;  %s6278_s27 = sld [smem:[#allocation2 + $0x88]] }
 0x161   : > { %v1076_v25 = vstv %s6106_s16  ;;  %v6203_v56 = vmul.f32 %v1142_v58, %v10499_v35  ;;  %v6206_v55 = vmul.f32 %v1154_v18, %v10499_v35  ;;  %v1166_v20 = vstv %s6138_s1  ;;  %s6325_s30 = sld [smem:[#allocation7]] }
 0x162   : > { %v6210_v53 = vmul.f32 %v1178_v63, %v10499_v35  ;;  %v6215_v8 = vmul.f32 %v1190_v0, %v10499_v35  ;;  %v6218_v27 = vmul.f32 %v1202_v22, %v10499_v35  ;;  %v1214_v16 = vstv %s6144_s2  ;;  %s6341_s18 = sld [smem:[#allocation2 + $0x8a]] }
 0x163   : > { %v1226_v42 = vstv %s6151_s3  ;;  %v6225_v49 = vmul.f32 %v1052_v13, %v6155_v61  ;;  %v6228_v50 = vmul.f32 %v1064_v31, %v6155_v61  ;;  %v1143_v19 = vmul.f32 %v1142_v58, %v10500_v54  ;;  %s6359_s19 = sld [smem:[#allocation7 + $0x1]] }
 0x164   : > { %v1043_v23 = vsel %vm381_vm5, %v1040_v51, 0.0  ;;  %v1155_v2 = vmul.f32 %v1154_v18, %v10500_v54  ;;  %v1179_v33 = vmul.f32 %v1178_v63, %v10500_v54  ;;  %v1191_v38 = vmul.f32 %v1190_v0, %v10500_v54  ;;  %s6364_s26 = sld [smem:[#allocation7 + $0x2]] }
 0x165   : > { %v1053_v46 = vmul.f32 %v1052_v13, %v1043_v23  ;;  %v1089_v11 = vmul.f32 %v1088_v39, %v1043_v23  ;;  %v1101_v26 = vmul.f32 %v1100_v28, %v1043_v23  ;;  %v1113_v5 = vmul.f32 %v1112_v45, %v1043_v23  ;;  %s6416_s2 = sld [smem:[#allocation7 + $0x7]] }
 0x166   : > { %v1125_v60 = vmul.f32 %v1124_v24, %v1043_v23  ;;  %v1137_v34 = vmul.f32 %v1136_v36, %v1043_v23  ;;  %v1203_v17 = vmul.f32 %v1202_v22, %v10500_v54  ;;  %v1065_v13 = vmul.f32 %v1064_v31, %v1043_v23  ;;  %v10502_v22 = vld [vmem:[#allocation40_spill] sm:$0xff]  ;;  %s6425_s16 = sld [smem:[#allocation9 + $0x80]] }
 0x167   : > { %v1091_v39 = vadd.f32 %v1089_v11, %v6042_v4  ;;  %v1103_v28 = vadd.f32 %v1101_v26, %v6046_v47  ;;  %v1115_v45 = vadd.f32 %v1113_v5, %v6048_v10  ;;  %v1167_v32 = vmul.f32 %v1166_v20, %v10500_v54  ;;  %s6434_s3 = sld [smem:[#allocation9 + $0x20]] }
 0x168   : > { %v1127_v24 = vadd.f32 %v1125_v60, %v6050_v21  ;;  %v1139_v36 = vadd.f32 %v1137_v34, %v6052_v9  ;;  %v1215_v4 = vmul.f32 %v1214_v16, %v10500_v54  ;;  %v1227_v47 = vmul.f32 %v1226_v42, %v10500_v54  ;;  %s6511_s1 = sld [smem:[#allocation9 + $0xe3]] }
 0x169   : > { %v1148_v10 = vstv %s6160_s4  ;;  %v1055_v21 = vadd.f32 %v1053_v46, %v6132_v14  ;;  %v1077_v9 = vmul.f32 %v1076_v25, %v1043_v23  ;;  %v1160_v6 = vstv %s6166_s8  ;;  %s10507_s4 = smov 127   ;;  %s6475_s8 = sld [smem:[#allocation9 + $0x82]] }
 0x16a   : > { %v10260_v43 = vstv %s6173_s11  ;;  %v1067_v30 = vadd.f32 %v1065_v13, %v6134_v15  ;;  %v1181_v3 = vadd.f32 %v1179_v33, %v1091_v39  ;;  %v1193_v7 = vadd.f32 %v1191_v38, %v1103_v28  ;;  %s6370_s11 = sld [smem:[#allocation7 + $0x3]] }
 0x16b   : > { %v1184_v48 = vstv %s6183_s5  ;;  %v1205_v14 = vadd.f32 %v1203_v17, %v1115_v45  ;;  %v1196_v58 = vstv %s6192_s6  ;;  %v1208_v18 = vstv %s6200_s21  ;;  %s6458_s5 = sld [smem:[#allocation9 + $0x22]] }
 0x16c   : > { %v1220_v63 = vstv %s6212_s25  ;;  %v1217_v0 = vadd.f32 %v1215_v4, %v1127_v24  ;;  %v1185_v15 = vmul.f32 %v1184_v48, %v10502_v22  ;;  %v1197_v31 = vmul.f32 %v1196_v58, %v10502_v22  ;;  %10506 = sst [smem:[#allocation53_spill]] %s6425_s16 }
 0x16d   : > { %v1232_v51 = vstv %s6222_s28  ;;  %v1229_v54 = vadd.f32 %v1227_v47, %v1139_v36  ;;  %v1209_v23 = vmul.f32 %v1208_v18, %v10502_v22  ;;  %v1221_v33 = vmul.f32 %v1220_v63, %v10502_v22  ;;  %s6446_s16 = sld [smem:[#allocation9 + $0x21]] }
 0x16e   : > { %v1233_v46 = vmul.f32 %v1232_v51, %v10502_v22  ;;  %v1079_v11 = vadd.f32 %v1077_v9, %v6146_v44  ;;  %v1145_v26 = vadd.f32 %v1143_v19, %v1055_v21  ;;  %v1157_v5 = vadd.f32 %v1155_v2, %v1067_v30  ;;  %v1238_v44 = vpop.permute.xlu2 %1237  ;;  %s6465_s6 = sld [smem:[#allocation9 + $0x23]] }
 0x16f   : > { %v1149_v60 = vmul.f32 %v1148_v10, %v10502_v22  ;;  %v1250_v34 = vstv %s6233_s29  ;;  %v1286_v38 = vstv %s6237_s7  ;;  %v1298_v17 = vstv %s6239_s10  ;;  %s6469_s21 = sld [smem:[#allocation9 + $0x81]] }
 0x170   : > { %v1310_v13 = vstv %s6244_s0  ;;  %v1322_v39 = vstv %s6250_s13  ;;  %v1334_v28 = vstv %s6262_s22  ;;  %v1187_v19 = vadd.f32 %v1185_v15, %v1181_v3  ;;  %10503 = sst [smem:[#allocation51_spill]] %s6370_s11 }
 0x171   : > { %v1199_v2 = vadd.f32 %v1197_v31, %v1193_v7  ;;  %v1211_v45 = vadd.f32 %v1209_v23, %v1205_v14  ;;  %v1223_v24 = vadd.f32 %v1221_v33, %v1217_v0  ;;  %v1235_v36 = vadd.f32 %v1233_v46, %v1229_v54  ;;  %s6387_s11 = sld [smem:[#allocation7 + $0x5]] }
 0x172   : > { %v1241_v4 = vsel %vm382_vm4, %v1238_v44, 0.0  ;;  %v1169_v47 = vadd.f32 %v1167_v32, %v1079_v11  ;;  %v1161_v21 = vmul.f32 %v1160_v6, %v10502_v22  ;;  %v1151_v9 = vadd.f32 %v1149_v60, %v1145_v26  ;;  %s6485_s25 = sld [smem:[#allocation9 + $0x83]] }
 0x173   : > { %v1287_v30 = vmul.f32 %v1286_v38, %v1241_v4  ;;  %v1299_v3 = vmul.f32 %v1298_v17, %v1241_v4  ;;  %v1311_v7 = vmul.f32 %v1310_v13, %v1241_v4  ;;  %v1323_v14 = vmul.f32 %v1322_v39, %v1241_v4  ;;  %s6491_s28 = sld [smem:[#allocation9 + $0xe0]] }
 0x174   : > { %v1335_v0 = vmul.f32 %v1334_v28, %v1241_v4  ;;  %v1173_v32 = vmul.f32 %v10260_v43, %v10502_v22  ;;  %v1262_v15 = vstv %s6269_s23  ;;  %v1251_v31 = vmul.f32 %v1250_v34, %v1241_v4  ;;  %s6493_s29 = sld [smem:[#allocation9 + $0xe1]] }
 0x175   : > { %v1289_v54 = vadd.f32 %v1287_v30, %v1187_v19  ;;  %v1301_v23 = vadd.f32 %v1299_v3, %v1199_v2  ;;  %v1313_v33 = vadd.f32 %v1311_v7, %v1211_v45  ;;  %v1325_v46 = vadd.f32 %v1323_v14, %v1223_v24  ;;  %v1244_v19 = vpop.permute.xlu1 %1243  ;;  %s6503_s7 = sld [smem:[#allocation9 + $0xe2]] }
 0x176   : > { %v1337_v11 = vadd.f32 %v1335_v0, %v1235_v36  ;;  %v1056_v22 = vadd.f32 %v6225_v49, %v6194_v1  ;;  %v1068_v26 = vadd.f32 %v6228_v50, %v6196_v37  ;;  %v10259_v60 = vstv %s6273_s24  ;;  %s6381_s24 = sld [smem:[#allocation7 + $0x4]] }
 0x177   : > { %v1163_v44 = vadd.f32 %v1161_v21, %v1157_v5  ;;  %v1253_v30 = vadd.f32 %v1251_v31, %v1151_v9  ;;  %v1263_v2 = vmul.f32 %v1262_v15, %v1241_v4  ;;  %v1256_v45 = vstv %s6278_s27  ;;  %10504 = sst [smem:[#allocation52_spill]] %s6387_s11 }
 0x178   : > { %v1292_v24 = vstv %s6287_s20  ;;  %v10264_v36 = vstv %s6298_s14  ;;  %v10261_v3 = vstv %s6304_s15  ;;  %v10262_v1 = vstv %s6310_s12  ;;  %s6407_s11 = sld [smem:[#allocation7 + $0x6]] }
 0x179   : > { %v10263_v49 = vstv %s6314_s9  ;;  %v1175_v37 = vadd.f32 %v1173_v32, %v1169_v47  ;;  %v1275_v50 = vmul.f32 %v10259_v60, %v1241_v4  ;;  %v1268_v5 = vstv %s6318_s17  ;;  %s10510_s10 = sld [smem:[#allocation49_spill]] }
 0x17a   : > { %v1247_v21 = vsel %vm382_vm4, %v1244_v19, 0.0  ;;  %v1265_v9 = vadd.f32 %v1263_v2, %v1163_v44  ;;  %v1346_v7 = vstv %s6325_s30  ;;  %v1280_v44 = vstv %s6341_s18  ;;  %s6521_s0 = sld [smem:[#allocation9 + $0x84]] }
 0x17b   : > { %v1257_v14 = vmul.f32 %v1256_v45, %v1247_v21  ;;  %v1293_v0 = vmul.f32 %v1292_v24, %v1247_v21  ;;  %v1305_v4 = vmul.f32 %v10264_v36, %v1247_v21  ;;  %v1317_v47 = vmul.f32 %v10261_v3, %v1247_v21  ;;  %s10513_s13 = sld [smem:[#allocation50_spill]] }
 0x17c   : > { %v1329_v32 = vmul.f32 %v10262_v1, %v1247_v21  ;;  %v1341_v31 = vmul.f32 %v10263_v49, %v1247_v21  ;;  %v1269_v2 = vmul.f32 %v1268_v5, %v1247_v21  ;;  %v6399_v36 = vadd.f32 %v6188_v40, %v6185_v62  ;;  %s6527_s22 = sld [smem:[#allocation9 + $0x24]] }
 0x17d   : > { %v1259_v19 = vadd.f32 %v1257_v14, %v1253_v30  ;;  %v6385_v60 = vadd.f32 %v1293_v0, %v1289_v54  ;;  %v6389_v43 = vadd.f32 %v1305_v4, %v1301_v23  ;;  %v6391_v3 = vadd.f32 %v1317_v47, %v1313_v33  ;;  %v10505_v14 = vld [vmem:[#allocation39_spill] sm:$0xff]  ;;  %s6537_s23 = sld [smem:[#allocation9 + $0x25]] }
 0x17e   : > { %v6393_v1 = vadd.f32 %v1329_v32, %v1325_v46  ;;  %v6395_v49 = vadd.f32 %v1341_v31, %v1337_v11  ;;  %v1216_v54 = vmul.f32 %v1214_v16, %v10499_v35  ;;  %v1228_v30 = vmul.f32 %v1226_v42, %v10499_v35  ;;  %s6544_s27 = sld [smem:[#allocation9 + $0x26]] }
 0x17f   : > { %v1347_v23 = vadd.f32 %v1346_v7, %v1259_v19  ;;  %v1078_v33 = vmul.f32 %v1076_v25, %v6155_v61  ;;  %v1146_v46 = vadd.f32 %v6203_v56, %v1056_v22  ;;  %v1158_v62 = vadd.f32 %v6206_v55, %v1068_v26  ;;  %v1246_v19 = vpop.permute.xlu2 %1245  ;;  %s6548_s20 = sld [smem:[#allocation9 + $0x27]] }
 0x180   : > { %v1277_v40 = vadd.f32 %v1275_v50, %v1175_v37  ;;  %v1271_v16 = vadd.f32 %v1269_v2, %v1265_v9  ;;  %v1281_v42 = vmul.f32 %v1280_v44, %v1247_v21  ;;  %v1150_v0 = vmul.f32 %v1148_v10, %v10505_v14  ;;  %s6566_s17 = sld [smem:[#allocation9 + $0xe4]] }
 0x181   : > { %v6420_v11 = vmax.f32 %v1347_v23, 0.0  ;;  %v1182_v61 = vadd.f32 %v6210_v53, %v6171_v41  ;;  %v1194_v25 = vadd.f32 %v6215_v8, %v6175_v57  ;;  %v1206_v56 = vadd.f32 %v6218_v27, %v6177_v52  ;;  %v1240_v53 = vpop.permute.xlu0 %1239  ;;  %s6573_s30 = sld [smem:[#allocation9 + $0xe5]] }
 0x182   : > { %v1352_v55 = vstv %s6359_s19  ;;  %v1218_v10 = vadd.f32 %v1216_v54, %v6179_v12  ;;  %v1230_v22 = vadd.f32 %v1228_v30, %v6181_v59  ;;  %v1186_v26 = vmul.f32 %v1184_v48, %v10505_v14  ;;  %s6592_s18 = sld [smem:[#allocation9 + $0x29]] }
 0x183   : > { %v1198_v41 = vmul.f32 %v1196_v58, %v10505_v14  ;;  %1537 = vrot.lane.b32.xlu0 %v6420_v11, %s10507_s4  ;;  %v1358_v57 = vstv %s6364_s26  ;;  %v1210_v52 = vmul.f32 %v1208_v18, %v10505_v14  ;;  %v1222_v12 = vmul.f32 %v1220_v63, %v10505_v14  ;;  %s6596_s19 = sld [smem:[#allocation9 + $0x2a]] }
 0x184   : > { %v1234_v59 = vmul.f32 %v1232_v51, %v10505_v14  ;;  %v1283_v8 = vadd.f32 %v1281_v42, %v1277_v40  ;;  %v1353_v27 = vadd.f32 %v1352_v55, %v1271_v16  ;;  %v1162_v48 = vmul.f32 %v1160_v6, %v10505_v14  ;;  %s6628_s26 = sld [smem:[#allocation9 + $0xe9]] }
 0x185   : > { %v1152_v58 = vadd.f32 %v1150_v0, %v1146_v46  ;;  %v1188_v18 = vadd.f32 %v1186_v26, %v1182_v61  ;;  %v1200_v63 = vadd.f32 %v1198_v41, %v1194_v25  ;;  %v1212_v37 = vadd.f32 %v1210_v52, %v1206_v56 }
 0x186   : > { %v1242_v51 = vsel %vm382_vm4, %v1240_v53, 0.0  ;;  %v1224_v50 = vadd.f32 %v1222_v12, %v1218_v10  ;;  %v1236_v21 = vadd.f32 %v1234_v59, %v1230_v22  ;;  %v6487_v2 = vmax.f32 %v1353_v27, 0.0 }
 0x187   : > { %v1252_v9 = vmul.f32 %v1250_v34, %v1242_v51  ;;  %v1288_v4 = vmul.f32 %v1286_v38, %v1242_v51  ;;  %v1300_v6 = vmul.f32 %v1298_v17, %v1242_v51  ;;  %v1312_v47 = vmul.f32 %v1310_v13, %v1242_v51  ;;  %10520 = sst [smem:[#allocation46_spill]] %s6573_s30 }
 0x188   : > { %v1324_v32 = vmul.f32 %v1322_v39, %v1242_v51  ;;  %v1336_v31 = vmul.f32 %v1334_v28, %v1242_v51  ;;  %v1264_v38 = vmul.f32 %v1262_v15, %v1242_v51  ;;  %v1168_v30 = vmul.f32 %v1166_v20, %v10499_v35  ;;  %10525 = sst [smem:[#allocation48_spill]] %s6592_s18 }
 0x189   : > { %v1254_v34 = vadd.f32 %v1252_v9, %v1152_v58  ;;  %v1290_v54 = vadd.f32 %v1288_v4, %v1188_v18  ;;  %v1302_v17 = vadd.f32 %v1300_v6, %v1200_v63  ;;  %v1314_v13 = vadd.f32 %v1312_v47, %v1212_v37  ;;  %10526 = sst [smem:[#allocation31_spill]] %s6596_s19 }
 0x18a   : > { %v1326_v39 = vadd.f32 %v1324_v32, %v1224_v50  ;;  %v1338_v28 = vadd.f32 %v1336_v31, %v1236_v21  ;;  %v1080_v23 = vadd.f32 %v1078_v33, %v6399_v36  ;;  %v1248_v15 = vsel %vm382_vm4, %v1246_v19, 0.0  ;;  %s10529_s18 = sld [smem:[#allocation52_spill]] }
 0x18b   : > { %1801 = vrot.lane.b32.xlu0 %v6487_v2, %s10507_s4  ;;  %v1359_v46 = vadd.f32 %v1358_v57, %v1283_v8  ;;  %v1164_v40 = vadd.f32 %v1162_v48, %v1158_v62  ;;  %v1258_v16 = vmul.f32 %v1256_v45, %v1248_v15  ;;  %v1294_v42 = vmul.f32 %v1292_v24, %v1248_v15  ;;  %s6611_s19 = sld [smem:[#allocation9 + $0x8a]] }
 0x18c   : > { %v10508_v35 = vstv %s6298_s14  ;;  %v10509_v36 = vstv %s6304_s15  ;;  %v10511_v0 = vstv %s6310_s12  ;;  %v10512_v25 = vstv %s6314_s9  ;;  %s6554_s14 = sld [smem:[#allocation9 + $0x85]]  ;;  %s10518_s12 = smov 1  }
 0x18d   : > { %v1306_v20 = vmul.f32 %v10508_v35, %v1248_v15  ;;  %v1318_v33 = vmul.f32 %v10509_v36, %v1248_v15  ;;  %v1330_v61 = vmul.f32 %v10511_v0, %v1248_v15  ;;  %v1342_v56 = vmul.f32 %v10512_v25, %v1248_v15  ;;  %s6558_s15 = sld [smem:[#allocation9 + $0x86]] }
 0x18e   : > { %v1266_v10 = vadd.f32 %v1264_v38, %v1164_v40  ;;  %v1260_v62 = vadd.f32 %v1258_v16, %v1254_v34  ;;  %v1270_v45 = vmul.f32 %v1268_v5, %v1248_v15  ;;  %v6525_v24 = vadd.f32 %v1294_v42, %v1290_v54  ;;  %s6564_s9 = sld [smem:[#allocation9 + $0x87]] }
 0x18f   : > { %v6529_v22 = vadd.f32 %v1306_v20, %v1302_v17  ;;  %v6531_v26 = vadd.f32 %v1318_v33, %v1314_v13  ;;  %v6533_v41 = vadd.f32 %v1330_v61, %v1326_v39  ;;  %v6535_v53 = vadd.f32 %v1342_v56, %v1338_v28  ;;  %s6616_s30 = sld [smem:[#allocation9 + $0xe8]] }
 0x190   : > { %v1170_v52 = vadd.f32 %v1168_v30, %v1080_v23  ;;  %v10514_v12 = vstv %s10510_s10  ;;  %v1348_v5 = vadd.f32 %v1346_v7, %v1260_v62  ;;  %v6546_v8 = vmax.f32 %v1359_v46, 0.0  ;;  %s6575_s10 = sld [smem:[#allocation9 + $0xe6]] }
 0x191   : > { %v1174_v59 = vmul.f32 %v10514_v12, %v10505_v14  ;;  %v10515_v27 = vstv %s10513_s13  ;;  %v1272_v58 = vadd.f32 %v1270_v45, %v1266_v10  ;;  %v1282_v63 = vmul.f32 %v1280_v44, %v1248_v15  ;;  %s6578_s13 = sld [smem:[#allocation9 + $0xe7]] }
 0x192   : > { %v1276_v48 = vmul.f32 %v10515_v27, %v1242_v51  ;;  %v6552_v18 = vmax.f32 %v1348_v5, 0.0  ;;  %10516 = sst [smem:[#allocation44_spill]] %s6554_s14  ;;  %v1393_v50 = vrot.slane %v6420_v11, 7  ;;  %v1657_v47 = vrot.slane %v6487_v2, 7 }
 0x193   : > { %2065 = vrot.lane.b32.xlu0 %v6546_v8, %s10507_s4  ;;  %10517 = sst [smem:[#allocation45_spill]] %s6558_s15  ;;  %v1176_v7 = vadd.f32 %v1174_v59, %v1170_v52  ;;  %v1354_v37 = vadd.f32 %v1352_v55, %v1272_v58  ;;  %v1370_v19 = vstv %s6381_s24  ;;  %v1376_v34 = vstv %s10529_s18 }
 0x194   : > { %1539 = vrot.lane.b32.xlu1 %v6552_v18, %s10507_s4  ;;  %1485 = vrot.lane.b32.xlu2 %v6552_v18, %s10518_s12  ;;  %10519 = sst [smem:[#allocation41_spill]] %s6564_s9  ;;  %v1394_v51 = vrot.slane %v6552_v18, 7  ;;  %v1382_v38 = vstv %s6407_s11  ;;  %v1388_v54 = vstv %s6416_s2  ;;  %v1568_v28 = vrot.slane %v6552_v18, 1 }
 0x195   : > { %v1278_v14 = vadd.f32 %v1276_v48, %v1176_v7  ;;  %s6580_s15 = sld [smem:[#allocation9 + $0x28]]  ;;  %v6582_v9 = vmax.f32 %v1354_v37, 0.0  ;;  %v1371_v30 = vadd.f32 %v1370_v19, %v6389_v43  ;;  %v1377_v23 = vadd.f32 %v1376_v34, %v6391_v3 }
 0x196   : > { %10521 = sst [smem:[#allocation42_spill]] %s6575_s10  ;;  %v6590_v55 = vsel %vm385_vm1, %v1393_v50, %v1394_v51  ;;  %v1921_v15 = vrot.slane %v6546_v8, 7  ;;  %v1383_v46 = vadd.f32 %v1382_v38, %v6393_v1  ;;  %v1389_v40 = vadd.f32 %v1388_v54, %v6395_v49 }
 0x197   : > { %10522 = sst [smem:[#allocation43_spill]] %s6578_s13  ;;  %v1284_v21 = vadd.f32 %v1282_v63, %v1278_v14  ;;  %v1658_v6 = vrot.slane %v6582_v9, 7  ;;  %v1567_v16 = vrot.slane %v6420_v11, 1  ;;  %v1378_v42 = vadd.f32 %v1376_v34, %v6531_v26 }
 0x198   : > { %s6602_s9 = sld [smem:[#allocation9 + $0x2b]]  ;;  %v1384_v43 = vadd.f32 %v1382_v38, %v6533_v41  ;;  %v6686_v20 = vmax.f32 %v1371_v30, 0.0  ;;  %v6688_v36 = vmax.f32 %v1377_v23, 0.0  ;;  %v1390_v33 = vadd.f32 %v1388_v54, %v6535_v53 }
 0x199   : > { %s6604_s13 = sld [smem:[#allocation9 + $0x88]]  ;;  %v1360_v4 = vadd.f32 %v1358_v57, %v1284_v21  ;;  %v6626_v57 = vsel %vm385_vm1, %v1657_v47, %v1658_v6  ;;  %v6680_v49 = vsel %vm1022_vm2, %v1567_v16, %v1568_v28  ;;  %v1832_v0 = vrot.slane %v6582_v9, 1 }
 0x19a   : > { %s6609_s14 = sld [smem:[#allocation9 + $0x89]]  ;;  %v6698_v61 = vmax.f32 %v1383_v46, 0.0  ;;  %v6700_v25 = vmax.f32 %v1389_v40, 0.0  ;;  %v6707_v62 = vmax.f32 %v1378_v42, 0.0  ;;  %v6709_v45 = vmax.f32 %v1384_v43, 0.0 }
 0x19b   : > { %10523 = sst [smem:[#allocation47_spill]] %s6580_s15  ;;  %1455 = vrot.lane.b32.xlu0 %v6590_v55, %s10507_s4  ;;  %v6618_v32 = vmax.f32 %v1360_v4, 0.0  ;;  %v1396_v26 = vsel %vm385_vm1, %v1394_v51, %v1393_v50  ;;  %v1570_v41 = vsel %vm1022_vm2, %v1568_v28, %v1567_v16  ;;  %v6727_v12 = vmax.f32 %v1390_v33, 0.0 }
 0x19c   : > { %1803 = vrot.lane.b32.xlu1 %v6582_v9, %s10507_s4  ;;  %s10527_s15 = sld [smem:[#allocation51_spill]]  ;;  %1749 = vrot.lane.b32.xlu2 %v6582_v9, %s10518_s12  ;;  %10538 = vst [vmem:[#allocation57_spill] sm:$0xff] %v6698_v61  ;;  %v1660_v5 = vsel %vm385_vm1, %v1658_v6, %v1657_v47  ;;  %v6757_v37 = vsel %vm377_vm0, %v1396_v26, 0.0  ;;  %v6761_v50 = vsel %vm380_vm3, %v1570_v41, 0.0  ;;  %v2449_v54 = vrot.slane %v6686_v20, 7 }
 0x19d   : > { %10531 = sst [smem:[#allocation51_spill]] %s6611_s19  ;;  %v1922_v17 = vrot.slane %v6618_v32, 7  ;;  %10539 = vst [vmem:[#allocation54_spill] sm:$0xff] %v6700_v25  ;;  %v2096_v10 = vrot.slane %v6618_v32, 1  ;;  %v6770_v4 = vsel %vm377_vm0, %v1660_v5, 0.0  ;;  %v2714_v28 = vrot.slane %v6707_v62, 7 }
 0x19e   : > { %s6614_s10 = sld [smem:[#allocation9 + $0x8b]]  ;;  %10541 = vst [vmem:[#allocation55_spill] sm:$0xff] %v6709_v45  ;;  %v1430_v16 = vstv %s6434_s3  ;;  %v1436_v42 = vstv %s6446_s16  ;;  %v1442_v43 = vstv %s6458_s5  ;;  %v1448_v33 = vstv %s6465_s6 }
 0x19f   : > { %10528 = sst [smem:[#allocation49_spill]] %s6604_s13  ;;  %v6670_v3 = vsel %vm385_vm1, %v1921_v15, %v1922_v17  ;;  %10544 = vst [vmem:[#allocation56_spill] sm:$0xff] %v6727_v12  ;;  %v1924_v48 = vsel %vm385_vm1, %v1922_v17, %v1921_v15  ;;  %v1526_v41 = vstv %s6475_s8  ;;  %v6860_v5 = vmul.f32 %v1436_v42, %v6757_v37 }
 0x1a0   : > { %10530 = sst [smem:[#allocation50_spill]] %s6609_s14  ;;  %v6789_v34 = vsel %vm377_vm0, %v1924_v48, 0.0  ;;  %v6868_v48 = vmul.f32 %v1442_v43, %v6757_v37 }
 0x1a1   : > { %s6632_s19 = sld [smem:[#allocation9 + $0xea]] }
 0x1a2   : > { %v1364_v31 = vstv %s10527_s15  ;;  %s6643_s14 = sld [smem:[#allocation9 + $0x2c]] }
 0x1a3   : > { %1719 = vrot.lane.b32.xlu0 %v6626_v57, %s10507_s4  ;;  %s6648_s13 = sld [smem:[#allocation9 + $0x2d]]  ;;  %v1365_v13 = vadd.f32 %v1364_v31, %v6385_v60  ;;  %v1366_v39 = vadd.f32 %v1364_v31, %v6525_v24  ;;  %v1372_v60 = vadd.f32 %v1370_v19, %v6529_v22  ;;  %v1831_v24 = vrot.slane %v6487_v2, 1 }
 0x1a4   : > { %10532 = sst [smem:[#allocation52_spill]] %s6614_s10  ;;  %2067 = vrot.lane.b32.xlu1 %v6618_v32, %s10507_s4  ;;  %2013 = vrot.lane.b32.xlu2 %v6618_v32, %s10518_s12  ;;  %v2095_v22 = vrot.slane %v6546_v8, 1 }
 0x1a5   : > { %s6639_s10 = sld [smem:[#allocation9 + $0xeb]]  ;;  %v6674_v35 = vmax.f32 %v1365_v13, 0.0  ;;  %v6676_v1 = vmax.f32 %v1366_v39, 0.0  ;;  %v6702_v56 = vmax.f32 %v1372_v60, 0.0  ;;  %v6731_v59 = vsel %vm1022_vm2, %v1831_v24, %v1832_v0 }
 0x1a6   : > { %s6653_s15 = sld [smem:[#allocation9 + $0x2e]]  ;;  %v1834_v27 = vsel %vm1022_vm2, %v1832_v0, %v1831_v24  ;;  %v2098_v58 = vsel %vm1022_vm2, %v2096_v10, %v2095_v22  ;;  %v6753_v63 = vsel %vm1022_vm2, %v2095_v22, %v2096_v10  ;;  %v2623_v13 = vrot.slane %v6686_v20, 1 }
 0x1a7   : > { %s6658_s11 = sld [smem:[#allocation9 + $0x2f]]  ;;  %v2186_v53 = vrot.slane %v6676_v1, 7  ;;  %v2360_v52 = vrot.slane %v6676_v1, 1  ;;  %v2185_v7 = vrot.slane %v6674_v35, 7  ;;  %v2359_v14 = vrot.slane %v6674_v35, 1 }
 0x1a8   : > { %s6664_s24 = sld [smem:[#allocation9 + $0x8c]]  ;;  %v2450_v21 = vrot.slane %v6702_v56, 7  ;;  %v2624_v31 = vrot.slane %v6702_v56, 1  ;;  %v6785_v19 = vsel %vm380_vm3, %v1834_v27, 0.0  ;;  %v6793_v38 = vsel %vm380_vm3, %v2098_v58, 0.0 }
 0x1a9   : > { %s6672_s2 = sld [smem:[#allocation9 + $0x8d]]  ;;  %v2188_v6 = vsel %vm385_vm1, %v2186_v53, %v2185_v7  ;;  %v2362_v47 = vsel %vm1022_vm2, %v2360_v52, %v2359_v14  ;;  %v6800_v17 = vsel %vm385_vm1, %v2185_v7, %v2186_v53  ;;  %v2713_v39 = vrot.slane %v6688_v36, 7 }
 0x1aa   : > { %s6684_s18 = sld [smem:[#allocation9 + $0x8e]]  ;;  %v6809_v30 = vsel %vm377_vm0, %v2188_v6, 0.0  ;;  %v6813_v23 = vsel %vm1022_vm2, %v2359_v14, %v2360_v52  ;;  %v6817_v15 = vsel %vm380_vm3, %v2362_v47, 0.0  ;;  %v2452_v46 = vsel %vm385_vm1, %v2450_v21, %v2449_v54 }
 0x1ab   : > { %1983 = vrot.lane.b32.xlu0 %v6670_v3, %s10507_s4  ;;  %v6825_v40 = vsel %vm385_vm1, %v2449_v54, %v2450_v21  ;;  %v2626_v60 = vsel %vm1022_vm2, %v2624_v31, %v2623_v13  ;;  %v1520_v10 = vstv %s6469_s21  ;;  %v6841_v24 = vsel %vm377_vm0, %v2452_v46, 0.0  ;;  %s6850_s16 = sld [smem:[#allocation9 + $0xf0]] }
 0x1ac   : > { %1483 = vrot.lane.b32.xlu1 %v6420_v11, %s10518_s12  ;;  %1573 = vrot.lane.b32.xlu2 %v6680_v49, %s10518_s12  ;;  %v6845_v22 = vsel %vm1022_vm2, %v2623_v13, %v2624_v31  ;;  %v2716_v26 = vsel %vm385_vm1, %v2714_v28, %v2713_v39  ;;  %v6854_v53 = vsel %vm380_vm3, %v2626_v60, 0.0  ;;  %v6857_v52 = vmul.f32 %v1430_v16, %v6757_v37  ;;  %s6863_s3 = sld [smem:[#allocation9 + $0xf1]] }
 0x1ad   : > { %10533 = sst [smem:[#allocation61_spill]] %s6658_s11  ;;  %v1532_v27 = vstv %s6485_s25  ;;  %v6871_v58 = vmul.f32 %v1448_v33, %v6757_v37  ;;  %v6877_v14 = vmul.f32 %v1520_v10, %v6420_v11  ;;  %v6887_v21 = vsel %vm377_vm0, %v2716_v26, 0.0 }
 0x1ae   : > { %10534 = sst [smem:[#allocation62_spill]] %s6664_s24  ;;  %v6890_v6 = vmul.f32 %v1526_v41, %v6420_v11  ;;  %v6894_v47 = vsel %vm385_vm1, %v2713_v39, %v2714_v28  ;;  %v6897_v31 = vmul.f32 %v1430_v16, %v6590_v55  ;;  %v6902_v54 = vmul.f32 %v1532_v27, %v6420_v11 }
 0x1af   : > { %10535 = sst [smem:[#allocation63_spill]] %s6672_s2  ;;  %v6905_v13 = vmul.f32 %v1436_v42, %v6590_v55  ;;  %v6908_v46 = vmul.f32 %v1442_v43, %v6590_v55  ;;  %v1604_v60 = vstv %s6491_s28  ;;  %v6914_v39 = vmul.f32 %v1448_v33, %v6590_v55 }
 0x1b0   : > { %10536 = sst [smem:[#allocation64_spill]] %s6684_s18  ;;  %10553 = vst [vmem:[#allocation58_spill] sm:$0xff] %v6897_v31  ;;  %v1616_v16 = vstv %s6503_s7  ;;  %v6924_v42 = vmul.f32 %v1520_v10, %v6552_v18  ;;  %v6927_v43 = vmul.f32 %v1526_v41, %v6552_v18  ;;  %v6930_v26 = vmul.f32 %v1532_v27, %v6552_v18 }
 0x1b1   : > { %s6696_s2 = sld [smem:[#allocation9 + $0x8f]]  ;;  %10554 = vst [vmem:[#allocation59_spill] sm:$0xff] %v6905_v13  ;;  %v1622_v33 = vstv %s6511_s1  ;;  %v6947_v41 = vmul.f32 %v1616_v16, %v6761_v50  ;;  %v1712_v27 = vstv %s6548_s20 }
 0x1b2   : > { %s6705_s18 = sld [smem:[#allocation9 + $0xec]]  ;;  %10555 = vst [vmem:[#allocation60_spill] sm:$0xff] %v6908_v46  ;;  %v1700_v46 = vstv %s6537_s23 }
 0x1b3   : > { %s6713_s24 = sld [smem:[#allocation9 + $0xed]]  ;;  %1399 = vrot.lane.b32.xlu0 %v6757_v37, %s10518_s12  ;;  %10556 = vst [vmem:[#allocation33_spill] sm:$0xff] %v6914_v39  ;;  %v1694_v39 = vstv %s6527_s22 }
 0x1b4   : > { %1747 = vrot.lane.b32.xlu1 %v6487_v2, %s10518_s12  ;;  %1837 = vrot.lane.b32.xlu2 %v6731_v59, %s10518_s12  ;;  %s6837_s11 = sld [smem:[#allocation9 + $0x93]]  ;;  %10558 = vst [vmem:[#allocation32_spill] sm:$0xff] %v6924_v42  ;;  %v2887_v42 = vrot.slane %v6688_v36, 1 }
 0x1b5   : > { %s6879_s5 = sld [smem:[#allocation9 + $0xf2]]  ;;  %10559 = vst [vmem:[#allocation38_spill] sm:$0xff] %v6927_v43 }
 0x1b6   : > { %s6899_s6 = sld [smem:[#allocation9 + $0xf3]]  ;;  %10560 = vst [vmem:[#allocation37_spill] sm:$0xff] %v6930_v26  ;;  %v6954_v26 = vmul.f32 %v1622_v33, %v6761_v50 }
 0x1b7   : > { %10537 = sst [smem:[#allocation65_spill]] %s6696_s2  ;;  %10564 = vst [vmem:[#allocation34_spill] sm:$0xff] %v6947_v41  ;;  %v6968_v41 = vmul.f32 %v1616_v16, %v6680_v49 }
 0x1b8   : > { %10540 = sst [smem:[#allocation66_spill]] %s6705_s18  ;;  %10566 = vst [vmem:[#allocation36_spill] sm:$0xff] %v6954_v26  ;;  %v6974_v26 = vmul.f32 %v1694_v39, %v6770_v4 }
 0x1b9   : > { %10542 = sst [smem:[#allocation67_spill]] %s6713_s24  ;;  %10569 = vst [vmem:[#allocation78_spill] sm:$0xff] %v6968_v41 }
 0x1ba   : > { %s6725_s18 = sld [smem:[#allocation9 + $0xee]]  ;;  %10571 = vst [vmem:[#allocation80_spill] sm:$0xff] %v6974_v26 }
 0x1bb   : > { %s6741_s24 = sld [smem:[#allocation9 + $0xef]]  ;;  %1575 = vrot.lane.b32.xlu0 %v6761_v50, %s10518_s12 }
 0x1bc   : > { %s6805_s2 = sld [smem:[#allocation9 + $0x90]]  ;;  %2011 = vrot.lane.b32.xlu1 %v6546_v8, %s10518_s12  ;;  %2101 = vrot.lane.b32.xlu2 %v6753_v63, %s10518_s12 }
 0x1bd   : > { %s6911_s21 = sld [smem:[#allocation9 + $0x34]] }
 0x1be   : > { %s6921_s8 = sld [smem:[#allocation9 + $0x35]] }
 0x1bf   : > { %s6933_s25 = sld [smem:[#allocation9 + $0x36]] }
 0x1c0   : > { %10543 = sst [smem:[#allocation68_spill]] %s6725_s18 }
 0x1c1   : > { %10545 = sst [smem:[#allocation69_spill]] %s6741_s24 }
 0x1c2   : > { %s6749_s18 = sld [smem:[#allocation9 + $0x30]] }
 0x1c3   : > { %s6764_s24 = sld [smem:[#allocation9 + $0x31]]  ;;  %1663 = vrot.lane.b32.xlu0 %v6770_v4, %s10518_s12 }
 0x1c4   : > { %s6941_s28 = sld [smem:[#allocation9 + $0x37]]  ;;  %1453 = vrot.lane.b32.xlu2 %v6757_v37, %s10507_s4  ;;  %1401 = vrot.lane.b32.xlu1 %v6590_v55, %s10518_s12  ;;  %v6999_v37 = vmul.f32 %v1694_v39, %v6626_v57  ;;  %v7002_v55 = vmul.f32 %v1700_v46, %v6626_v57 }
 0x1c5   : > { %s6963_s7 = sld [smem:[#allocation9 + $0x95]] }
 0x1c6   : > { %s10573_s1 = sld [smem:[#allocation46_spill]]  ;;  %10583 = vst [vmem:[#allocation85_spill] sm:$0xff] %v6999_v37 }
 0x1c7   : > { %s6979_s22 = sld [smem:[#allocation9 + $0x96]]  ;;  %10584 = vst [vmem:[#allocation86_spill] sm:$0xff] %v7002_v55 }
 0x1c8   : > { %10546 = sst [smem:[#allocation70_spill]] %s6749_s18 }
 0x1c9   : > { %10548 = sst [smem:[#allocation71_spill]] %s6764_s24 }
 0x1ca   : > { %s6777_s18 = sld [smem:[#allocation9 + $0x32]] }
 0x1cb   : > { %s10551_s24 = sld [smem:[#allocation53_spill]]  ;;  %1839 = vrot.lane.b32.xlu0 %v6785_v19, %s10518_s12 }
 0x1cc   : > { %10552 = sst [smem:[#allocation53_spill]] %s6805_s2  ;;  %v1874_v41 = vstv %s10573_s1  ;;  %1629 = vrot.lane.b32.xlu2 %v6761_v50, %s10507_s4  ;;  %1627 = vrot.lane.b32.xlu1 %v6680_v49, %s10507_s4 }
 0x1cd   : > { %s6831_s2 = sld [smem:[#allocation9 + $0x92]]  ;;  %v7044_v37 = vmul.f32 %v1874_v41, %v6785_v19 }
 0x1ce   : > { %10562 = sst [smem:[#allocation74_spill]] %s6941_s28 }
 0x1cf   : > { %10568 = sst [smem:[#allocation77_spill]] %s6963_s7  ;;  %10597 = vst [vmem:[#allocation94_spill] sm:$0xff] %v7044_v37 }
 0x1d0   : > { %10549 = sst [smem:[#allocation72_spill]] %s6777_s18 }
 0x1d1   : > { %s6796_s18 = sld [smem:[#allocation9 + $0x33]]  ;;  %v1514_v0 = vstv %s10551_s24 }
 0x1d2   : > { %v6874_v7 = vmul.f32 %v1514_v0, %v6420_v11  ;;  %v6917_v28 = vmul.f32 %v1514_v0, %v6552_v18  ;;  %v1610_v11 = vstv %s6493_s29  ;;  %v6936_v0 = vmul.f32 %v1604_v60, %v6761_v50  ;;  %s6951_s29 = sld [smem:[#allocation9 + $0x94]] }
 0x1d3   : > { %v6944_v10 = vmul.f32 %v1610_v11, %v6761_v50  ;;  %v1706_v18 = vstv %s6544_s27  ;;  %v6960_v43 = vmul.f32 %v1610_v11, %v6680_v49  ;;  %10574 = sst [smem:[#allocation46_spill]] %s6979_s22  ;;  %1927 = vrot.lane.b32.xlu0 %v6789_v34, %s10518_s12 }
 0x1d4   : > { %10557 = vst [vmem:[#allocation35_spill] sm:$0xff] %v6917_v28  ;;  %v2888_v28 = vrot.slane %v6707_v62, 1  ;;  %s10575_s23 = sld [smem:[#allocation42_spill]]  ;;  %v6990_v16 = vmul.f32 %v1706_v18, %v6770_v4  ;;  %v7005_v26 = vmul.f32 %v1706_v18, %v6626_v57  ;;  %1717 = vrot.lane.b32.xlu2 %v6770_v4, %s10507_s4  ;;  %1665 = vrot.lane.b32.xlu1 %v6626_v57, %s10518_s12 }
 0x1d5   : > { %10561 = vst [vmem:[#allocation40_spill] sm:$0xff] %v6936_v0  ;;  %v6957_v0 = vmul.f32 %v1604_v60, %v6680_v49  ;;  %v6977_v60 = vmul.f32 %v1700_v46, %v6770_v4  ;;  %s10577_s27 = sld [smem:[#allocation44_spill]] }
 0x1d6   : > { %10563 = vst [vmem:[#allocation39_spill] sm:$0xff] %v6944_v10  ;;  %v6971_v10 = vmul.f32 %v1622_v33, %v6680_v49  ;;  %v6987_v11 = vsel %vm1022_vm2, %v2887_v42, %v2888_v28  ;;  %s10579_s20 = sld [smem:[#allocation45_spill]]  ;;  %v6993_v33 = vmul.f32 %v1712_v27, %v6770_v4  ;;  %v7093_v49 = vmul.f32 %v1874_v41, %v6731_v59 }
 0x1d7   : > { %10550 = sst [smem:[#allocation73_spill]] %s6796_s18  ;;  %10567 = vst [vmem:[#allocation76_spill] sm:$0xff] %v6960_v43  ;;  %v1976_v43 = vstv %s6602_s9 }
 0x1d8   : > { %s6821_s18 = sld [smem:[#allocation9 + $0x91]]  ;;  %10570 = vst [vmem:[#allocation79_spill] sm:$0xff] %v6971_v10  ;;  %v1868_v10 = vstv %s6566_s17 }
 0x1d9   : > { %10565 = sst [smem:[#allocation75_spill]] %s6951_s29  ;;  %10572 = vst [vmem:[#allocation81_spill] sm:$0xff] %v6977_v60  ;;  %v1778_v60 = vstv %s6521_s0  ;;  %v7090_v50 = vmul.f32 %v1868_v10, %v6731_v59 }
 0x1da   : > { %10576 = vst [vmem:[#allocation82_spill] sm:$0xff] %v6987_v11  ;;  %s10581_s24 = sld [smem:[#allocation43_spill]]  ;;  %v1880_v13 = vstv %s10575_s23  ;;  %v7020_v46 = vmul.f32 %v1778_v60, %v6582_v9  ;;  %v7055_v31 = vmul.f32 %v1778_v60, %v6487_v2 }
 0x1db   : > { %10578 = vst [vmem:[#allocation83_spill] sm:$0xff] %v6990_v16  ;;  %s6996_s22 = sld [smem:[#allocation9 + $0x97]]  ;;  %v7008_v16 = vmul.f32 %v1712_v27, %v6626_v57  ;;  %v1784_v39 = vstv %s10577_s27  ;;  %v3151_v57 = vrot.slane %v6698_v61, 1  ;;  %2103 = vrot.lane.b32.xlu0 %v6793_v38, %s10518_s12 }
 0x1dc   : > { %10580 = vst [vmem:[#allocation84_spill] sm:$0xff] %v6993_v33  ;;  %s10585_s7 = sld [smem:[#allocation41_spill]]  ;;  %v2890_v33 = vsel %vm1022_vm2, %v2888_v28, %v2887_v42  ;;  %v1790_v55 = vstv %s10579_s20  ;;  %v7028_v27 = vmul.f32 %v1784_v39, %v6582_v9  ;;  %v2978_v42 = vrot.slane %v6709_v45, 7  ;;  %1893 = vrot.lane.b32.xlu2 %v6785_v19, %s10507_s4  ;;  %1891 = vrot.lane.b32.xlu1 %v6731_v59, %s10507_s4 }
 0x1dd   : > { %10586 = vst [vmem:[#allocation87_spill] sm:$0xff] %v7005_v26  ;;  %s7010_s29 = sld [smem:[#allocation9 + $0xf4]]  ;;  %v7041_v26 = vmul.f32 %v1868_v10, %v6785_v19  ;;  %v7064_v37 = vmul.f32 %v1784_v39, %v6487_v2  ;;  %v7077_v60 = vsel %vm380_vm3, %v2890_v33, 0.0  ;;  %v7096_v33 = vmul.f32 %v1880_v13, %v6731_v59 }
 0x1de   : > { %10587 = vst [vmem:[#allocation88_spill] sm:$0xff] %v7008_v16  ;;  %s7017_s0 = sld [smem:[#allocation9 + $0xf5]]  ;;  %v7031_v16 = vmul.f32 %v1790_v55, %v6582_v9 }
 0x1df   : > { %10588 = vst [vmem:[#allocation89_spill] sm:$0xff] %v7020_v46  ;;  %s7025_s28 = sld [smem:[#allocation9 + $0xf6]] }
 0x1e0   : > { %v1886_v18 = vstv %s10581_s24  ;;  %10590 = vst [vmem:[#allocation90_spill] sm:$0xff] %v7028_v27  ;;  %s10592_s17 = sld [smem:[#allocation48_spill]]  ;;  %v7047_v27 = vmul.f32 %v1880_v13, %v6785_v19  ;;  %v7113_v13 = vmul.f32 %v1976_v43, %v6789_v34 }
 0x1e1   : > { %10582 = sst [smem:[#allocation42_spill]] %s6996_s22  ;;  %10591 = vst [vmem:[#allocation91_spill] sm:$0xff] %v7031_v16  ;;  %v7052_v16 = vmul.f32 %v1886_v18, %v6785_v19 }
 0x1e2   : > { %s10589_s22 = sld [smem:[#allocation47_spill]]  ;;  %v1796_v28 = vstv %s10585_s7  ;;  %10596 = vst [vmem:[#allocation93_spill] sm:$0xff] %v7041_v26 }
 0x1e3   : > { %s10593_s1 = sld [smem:[#allocation31_spill]]  ;;  %v7038_v46 = vmul.f32 %v1796_v28, %v6582_v9  ;;  %10598 = vst [vmem:[#allocation95_spill] sm:$0xff] %v7047_v27  ;;  %v2977_v9 = vrot.slane %v6698_v61, 7  ;;  %v7083_v39 = vmul.f32 %v1796_v28, %v6487_v2  ;;  %2191 = vrot.lane.b32.xlu0 %v6809_v30, %s10518_s12 }
 0x1e4   : > { %s7035_s23 = sld [smem:[#allocation9 + $0xf7]]  ;;  %10600 = vst [vmem:[#allocation96_spill] sm:$0xff] %v7052_v16  ;;  %v7080_v16 = vmul.f32 %v1790_v55, %v6487_v2  ;;  %v7099_v55 = vmul.f32 %v1886_v18, %v6731_v59  ;;  %1981 = vrot.lane.b32.xlu2 %v6789_v34, %s10507_s4  ;;  %1929 = vrot.lane.b32.xlu1 %v6670_v3, %s10518_s12 }
 0x1e5   : > { %10595 = vst [vmem:[#allocation92_spill] sm:$0xff] %v7038_v46  ;;  %s7049_s27 = sld [smem:[#allocation9 + $0x38]]  ;;  %v7123_v28 = vsel %vm385_vm1, %v2977_v9, %v2978_v42 }
 0x1e6   : > { %10601 = vst [vmem:[#allocation97_spill] sm:$0xff] %v7055_v31  ;;  %s7059_s7 = sld [smem:[#allocation9 + $0x39]]  ;;  %v1964_v27 = vstv %s10592_s17 }
 0x1e7   : > { %10603 = vst [vmem:[#allocation98_spill] sm:$0xff] %v7064_v37  ;;  %s7069_s20 = sld [smem:[#allocation9 + $0x3a]]  ;;  %v2980_v37 = vsel %vm385_vm1, %v2978_v42, %v2977_v9  ;;  %v7107_v10 = vmul.f32 %v1964_v27, %v6789_v34  ;;  %v2144_v9 = vstv %s6632_s19 }
 0x1e8   : > { %v1958_v46 = vstv %s10589_s22  ;;  %10605 = vst [vmem:[#allocation99_spill] sm:$0xff] %v7080_v16  ;;  %s7087_s9 = sld [smem:[#allocation9 + $0x3b]]  ;;  %v7119_v18 = vsel %vm377_vm0, %v2980_v37, 0.0  ;;  %v7137_v37 = vmul.f32 %v1976_v43, %v6670_v3 }
 0x1e9   : > { %v1970_v26 = vstv %s10593_s1  ;;  %10606 = vst [vmem:[#allocation100_spill] sm:$0xff] %v7083_v39  ;;  %s7101_s22 = sld [smem:[#allocation9 + $0x98]]  ;;  %v7104_v2 = vmul.f32 %v1958_v46, %v6789_v34 }
 0x1ea   : > { %10594 = sst [smem:[#allocation44_spill]] %s7035_s23  ;;  %10608 = vst [vmem:[#allocation101_spill] sm:$0xff] %v7090_v50  ;;  %v7110_v41 = vmul.f32 %v1970_v26, %v6789_v34 }
 0x1eb   : > { %10599 = sst [smem:[#allocation45_spill]] %s7049_s27  ;;  %10609 = vst [vmem:[#allocation102_spill] sm:$0xff] %v7093_v49  ;;  %2247 = vrot.lane.b32.xlu0 %v6800_v17, %s10507_s4 }
 0x1ec   : > { %10602 = sst [smem:[#allocation43_spill]] %s7059_s7  ;;  %10610 = vst [vmem:[#allocation103_spill] sm:$0xff] %v7096_v33  ;;  %v2228_v33 = vstv %s6648_s13  ;;  %2157 = vrot.lane.b32.xlu2 %v6793_v38, %s10507_s4  ;;  %2155 = vrot.lane.b32.xlu1 %v6753_v63, %s10507_s4 }
 0x1ed   : > { %10604 = sst [smem:[#allocation41_spill]] %s7069_s20  ;;  %10611 = vst [vmem:[#allocation104_spill] sm:$0xff] %v7099_v55  ;;  %v2138_v55 = vstv %s6628_s26 }
 0x1ee   : > { %10607 = sst [smem:[#allocation47_spill]] %s7087_s9  ;;  %10614 = vst [vmem:[#allocation105_spill] sm:$0xff] %v7104_v2  ;;  %v2132_v2 = vstv %s6616_s30 }
 0x1ef   : > { %10612 = sst [smem:[#allocation48_spill]] %s7101_s22  ;;  %10616 = vst [vmem:[#allocation106_spill] sm:$0xff] %v7107_v10  ;;  %v7126_v10 = vmul.f32 %v1958_v46, %v6670_v3 }
 0x1f0   : > { %s10613_s24 = sld [smem:[#allocation49_spill]]  ;;  %10617 = vst [vmem:[#allocation107_spill] sm:$0xff] %v7110_v41  ;;  %v7129_v41 = vmul.f32 %v1964_v27, %v6670_v3 }
 0x1f1   : > { %s10615_s17 = sld [smem:[#allocation50_spill]]  ;;  %10618 = vst [vmem:[#allocation108_spill] sm:$0xff] %v7113_v13  ;;  %v7134_v13 = vmul.f32 %v1970_v26, %v6670_v3 }
 0x1f2   : > { %s7115_s1 = sld [smem:[#allocation9 + $0x99]]  ;;  %10620 = vst [vmem:[#allocation109_spill] sm:$0xff] %v7123_v28 }
 0x1f3   : > { %10621 = vst [vmem:[#allocation110_spill] sm:$0xff] %v7126_v10  ;;  %s10622_s22 = sld [smem:[#allocation51_spill]]  ;;  %v2150_v10 = vstv %s6639_s10  ;;  %2329 = vrot.lane.b32.xlu0 %v6674_v35, %s10507_s4 }
 0x1f4   : > { %10623 = vst [vmem:[#allocation111_spill] sm:$0xff] %v7129_v41  ;;  %s10624_s9 = sld [smem:[#allocation52_spill]]  ;;  %2245 = vrot.lane.b32.xlu2 %v6809_v30, %s10507_s4  ;;  %2193 = vrot.lane.b32.xlu1 %v6800_v17, %s10518_s12 }
 0x1f5   : > { %s7131_s20 = sld [smem:[#allocation9 + $0x9a]]  ;;  %10626 = vst [vmem:[#allocation112_spill] sm:$0xff] %v7134_v13 }
 0x1f6   : > { %10627 = vst [vmem:[#allocation113_spill] sm:$0xff] %v7137_v37  ;;  %v2042_v42 = vstv %s10613_s24  ;;  %s7147_s7 = sld [smem:[#allocation9 + $0xf8]] }
 0x1f7   : > { %v2048_v46 = vstv %s10615_s17  ;;  %s7149_s27 = sld [smem:[#allocation9 + $0x60]]  ;;  %v7152_v27 = vmul.f32 %v2042_v42, %v6618_v32 }
 0x1f8   : > { %10619 = sst [smem:[#allocation31_spill]] %s7115_s1  ;;  %v7155_v26 = vmul.f32 %v2048_v46, %v6618_v32  ;;  %v7194_v4 = vmul.f32 %v2048_v46, %v6546_v8  ;;  %v7212_v46 = vmul.f32 %v2138_v55, %v6753_v63 }
 0x1f9   : > { %s7141_s1 = sld [smem:[#allocation9 + $0x9b]]  ;;  %10631 = vst [vmem:[#allocation114_spill] sm:$0xff] %v7152_v27  ;;  %v2054_v43 = vstv %s10622_s22  ;;  %v7170_v27 = vmul.f32 %v2132_v2, %v6793_v38 }
 0x1fa   : > { %10632 = vst [vmem:[#allocation115_spill] sm:$0xff] %v7155_v26  ;;  %v2060_v37 = vstv %s10624_s9  ;;  %s7161_s30 = sld [smem:[#allocation9 + $0x61]]  ;;  %v7164_v13 = vmul.f32 %v2054_v43, %v6618_v32  ;;  %v7173_v26 = vmul.f32 %v2138_v55, %v6793_v38  ;;  %v7231_v55 = vmul.f32 %v2228_v33, %v6809_v30 }
 0x1fb   : > { %10625 = sst [smem:[#allocation49_spill]] %s7131_s20  ;;  %v7167_v41 = vmul.f32 %v2060_v37, %v6618_v32  ;;  %10636 = vst [vmem:[#allocation119_spill] sm:$0xff] %v7170_v27  ;;  %v7185_v32 = vmul.f32 %v2150_v10, %v6793_v38  ;;  %v7188_v27 = vmul.f32 %v2042_v42, %v6546_v8  ;;  %v7206_v42 = vmul.f32 %v2132_v2, %v6753_v63 }
 0x1fc   : > { %10629 = sst [smem:[#allocation51_spill]] %s7147_s7  ;;  %10634 = vst [vmem:[#allocation117_spill] sm:$0xff] %v7164_v13  ;;  %v7182_v13 = vmul.f32 %v2144_v9, %v6793_v38  ;;  %v2756_v38 = vstv %s6921_s8  ;;  %2367 = vrot.lane.b32.xlu0 %v6817_v15, %s10518_s12  ;;  %2277 = vrot.lane.b32.xlu2 %v6676_v1, %s10518_s12 }
 0x1fd   : > { %10630 = sst [smem:[#allocation52_spill]] %s7149_s27  ;;  %10635 = vst [vmem:[#allocation118_spill] sm:$0xff] %v7167_v41  ;;  %v2222_v41 = vstv %s6643_s14  ;;  %2275 = vrot.lane.b32.xlu1 %v6674_v35, %s10518_s12 }
 0x1fe   : > { %10637 = vst [vmem:[#allocation120_spill] sm:$0xff] %v7173_v26  ;;  %s7179_s10 = sld [smem:[#allocation9 + $0x62]]  ;;  %v3152_v26 = vrot.slane %v6709_v45, 1 }
 0x1ff   : > { %10628 = sst [smem:[#allocation50_spill]] %s7141_s1  ;;  %10639 = vst [vmem:[#allocation122_spill] sm:$0xff] %v7182_v13  ;;  %v7200_v13 = vmul.f32 %v2054_v43, %v6546_v8  ;;  %v7218_v43 = vmul.f32 %v2150_v10, %v6753_v63 }
 0x200   : > { %10633 = sst [smem:[#allocation116_spill]] %s7161_s30  ;;  %10640 = vst [vmem:[#allocation123_spill] sm:$0xff] %v7185_v32  ;;  %v7203_v32 = vmul.f32 %v2060_v37, %v6546_v8  ;;  %v7225_v2 = vsel %vm1022_vm2, %v3151_v57, %v3152_v26  ;;  %v7228_v37 = vmul.f32 %v2222_v41, %v6809_v30 }
 0x201   : > { %s10641_s19 = sld [smem:[#allocation61_spill]]  ;;  %10642 = vst [vmem:[#allocation124_spill] sm:$0xff] %v7188_v27  ;;  %v2234_v27 = vstv %s6653_s15 }
 0x202   : > { %s7191_s26 = sld [smem:[#allocation9 + $0x63]]  ;;  %10644 = vst [vmem:[#allocation125_spill] sm:$0xff] %v7194_v4  ;;  %v7215_v4 = vmul.f32 %v2144_v9, %v6753_v63  ;;  %v3242_v9 = vrot.slane %v6727_v12, 7  ;;  %v7237_v10 = vmul.f32 %v2234_v27, %v6809_v30  ;;  %v7484_v63 = vpop.permute.xlu2 %1485 }
 0x203   : > { %10645 = vst [vmem:[#allocation126_spill] sm:$0xff] %v7200_v13  ;;  %s10647_s9 = sld [smem:[#allocation62_spill]] }
 0x204   : > { %10638 = sst [smem:[#allocation121_spill]] %s7179_s10  ;;  %10646 = vst [vmem:[#allocation127_spill] sm:$0xff] %v7203_v32  ;;  %2455 = vrot.lane.b32.xlu0 %v6841_v24, %s10518_s12  ;;  %2365 = vrot.lane.b32.xlu2 %v6813_v23, %s10518_s12 }
 0x205   : > { %10648 = vst [vmem:[#allocation128_spill] sm:$0xff] %v7206_v42  ;;  %s10649_s22 = sld [smem:[#allocation63_spill]]  ;;  %2331 = vrot.lane.b32.xlu1 %v6676_v1, %s10507_s4 }
 0x206   : > { %s7209_s24 = sld [smem:[#allocation9 + $0xf9]]  ;;  %10651 = vst [vmem:[#allocation129_spill] sm:$0xff] %v7212_v46 }
 0x207   : > { %10652 = vst [vmem:[#allocation130_spill] sm:$0xff] %v7215_v4  ;;  %s10654_s14 = sld [smem:[#allocation64_spill]]  ;;  %v2240_v8 = vstv %s10641_s19 }
 0x208   : > { %10643 = sst [smem:[#allocation61_spill]] %s7191_s26  ;;  %10653 = vst [vmem:[#allocation131_spill] sm:$0xff] %v7218_v43  ;;  %v3154_v43 = vsel %vm1022_vm2, %v3152_v26, %v3151_v57  ;;  %v7258_v26 = vmul.f32 %v2222_v41, %v6800_v17  ;;  %v7261_v57 = vmul.f32 %v2228_v33, %v6800_v17 }
 0x209   : > { %s10655_s13 = sld [smem:[#allocation65_spill]]  ;;  %10657 = vst [vmem:[#allocation132_spill] sm:$0xff] %v7225_v2  ;;  %v2306_v4 = vstv %s10647_s9  ;;  %v7277_v33 = vsel %vm380_vm3, %v3154_v43, 0.0 }
 0x20a   : > { %s7221_s17 = sld [smem:[#allocation9 + $0xfa]]  ;;  %10658 = vst [vmem:[#allocation133_spill] sm:$0xff] %v7228_v37  ;;  %v7248_v37 = vmul.f32 %v2240_v8, %v6809_v30 }
 0x20b   : > { %10659 = vst [vmem:[#allocation134_spill] sm:$0xff] %v7231_v55  ;;  %s7234_s15 = sld [smem:[#allocation9 + $0xfb]]  ;;  %v2312_v46 = vstv %s10649_s22  ;;  %v3241_v55 = vrot.slane %v6700_v25, 7 }
 0x20c   : > { %10650 = sst [smem:[#allocation62_spill]] %s7209_s24  ;;  %10661 = vst [vmem:[#allocation135_spill] sm:$0xff] %v7237_v10  ;;  %v7264_v10 = vmul.f32 %v2234_v27, %v6800_v17  ;;  %v7282_v27 = vmul.f32 %v2306_v4, %v6674_v35  ;;  %2511 = vrot.lane.b32.xlu0 %v6825_v40, %s10507_s4  ;;  %2421 = vrot.lane.b32.xlu2 %v6817_v15, %s10507_s4 }
 0x20d   : > { %s7243_s19 = sld [smem:[#allocation9 + $0x3c]]  ;;  %10664 = vst [vmem:[#allocation137_spill] sm:$0xff] %v7248_v37  ;;  %v2318_v42 = vstv %s10654_s14  ;;  %v7267_v37 = vmul.f32 %v2240_v8, %v6800_v17  ;;  %v3244_v41 = vsel %vm385_vm1, %v3242_v9, %v3241_v55  ;;  %v7285_v8 = vmul.f32 %v2312_v46, %v6674_v35  ;;  %2419 = vrot.lane.b32.xlu1 %v6813_v23, %s10507_s4 }
 0x20e   : > { %s7255_s24 = sld [smem:[#allocation9 + $0x65]]  ;;  %10668 = vst [vmem:[#allocation138_spill] sm:$0xff] %v7258_v26  ;;  %v7290_v19 = vmul.f32 %v2318_v42, %v6674_v35  ;;  %v7316_v26 = vmul.f32 %v2318_v42, %v6676_v1 }
 0x20f   : > { %v2324_v32 = vstv %s10655_s13  ;;  %s10667_s9 = sld [smem:[#allocation67_spill]]  ;;  %10669 = vst [vmem:[#allocation139_spill] sm:$0xff] %v7261_v57 }
 0x210   : > { %10656 = sst [smem:[#allocation63_spill]] %s7221_s17  ;;  %10670 = vst [vmem:[#allocation140_spill] sm:$0xff] %v7264_v10  ;;  %v7293_v59 = vmul.f32 %v2324_v32, %v6674_v35  ;;  %v7299_v10 = vsel %vm385_vm1, %v3241_v55, %v3242_v9  ;;  %v3416_v55 = vrot.slane %v6727_v12, 1 }
 0x211   : > { %10660 = sst [smem:[#allocation64_spill]] %s7234_s15  ;;  %10672 = vst [vmem:[#allocation141_spill] sm:$0xff] %v7267_v37 }
 0x212   : > { %s7245_s17 = sld [smem:[#allocation9 + $0x64]]  ;;  %10675 = vst [vmem:[#allocation142_spill] sm:$0xff] %v7277_v33 }
 0x213   : > { %10662 = sst [smem:[#allocation65_spill]] %s7243_s19  ;;  %10676 = vst [vmem:[#allocation143_spill] sm:$0xff] %v7282_v27  ;;  %v7302_v27 = vmul.f32 %v2306_v4, %v6676_v1  ;;  %v7322_v4 = vmul.f32 %v2324_v32, %v6676_v1 }
 0x214   : > { %s10665_s15 = sld [smem:[#allocation66_spill]]  ;;  %10677 = vst [vmem:[#allocation144_spill] sm:$0xff] %v7285_v8  ;;  %2593 = vrot.lane.b32.xlu0 %v6686_v20, %s10507_s4  ;;  %2509 = vrot.lane.b32.xlu2 %v6841_v24, %s10507_s4 }
 0x215   : > { %10666 = sst [smem:[#allocation66_spill]] %s7255_s24  ;;  %10679 = vst [vmem:[#allocation145_spill] sm:$0xff] %v7290_v19  ;;  %v2402_v37 = vstv %s10667_s9  ;;  %v7310_v19 = vsel %vm377_vm0, %v3244_v41, 0.0 }
 0x216   : > { %s10671_s22 = sld [smem:[#allocation68_spill]]  ;;  %10680 = vst [vmem:[#allocation146_spill] sm:$0xff] %v7293_v59  ;;  %v7313_v59 = vmul.f32 %v2312_v46, %v6676_v1  ;;  %v7328_v41 = vmul.f32 %v2402_v37, %v6817_v15 }
 0x217   : > { %s10673_s14 = sld [smem:[#allocation69_spill]]  ;;  %10682 = vst [vmem:[#allocation147_spill] sm:$0xff] %v7299_v10 }
 0x218   : > { %10663 = sst [smem:[#allocation136_spill]] %s7245_s17  ;;  %10683 = vst [vmem:[#allocation148_spill] sm:$0xff] %v7302_v27 }
 0x219   : > { %s7273_s13 = sld [smem:[#allocation9 + $0x66]]  ;;  %10685 = vst [vmem:[#allocation149_spill] sm:$0xff] %v7310_v19 }
 0x21a   : > { %s7287_s19 = sld [smem:[#allocation9 + $0x67]]  ;;  %v2396_v43 = vstv %s10665_s15  ;;  %10686 = vst [vmem:[#allocation150_spill] sm:$0xff] %v7313_v59 }
 0x21b   : > { %s10681_s7 = sld [smem:[#allocation70_spill]]  ;;  %10687 = vst [vmem:[#allocation151_spill] sm:$0xff] %v7316_v26  ;;  %v7325_v9 = vmul.f32 %v2396_v43, %v6817_v15  ;;  %v3415_v26 = vrot.slane %v6700_v25, 1 }
 0x21c   : > { %v2408_v57 = vstv %s10671_s22  ;;  %s10684_s1 = sld [smem:[#allocation71_spill]]  ;;  %10691 = vst [vmem:[#allocation152_spill] sm:$0xff] %v7322_v4 }
 0x21d   : > { %v2414_v8 = vstv %s10673_s14  ;;  %s7306_s20 = sld [smem:[#allocation9 + $0x3d]]  ;;  %10692 = vst [vmem:[#allocation153_spill] sm:$0xff] %v7325_v9  ;;  %v7334_v42 = vmul.f32 %v2408_v57, %v6817_v15  ;;  %v7346_v9 = vmul.f32 %v2396_v43, %v6813_v23 }
 0x21e   : > { %s10688_s15 = sld [smem:[#allocation72_spill]]  ;;  %10693 = vst [vmem:[#allocation154_spill] sm:$0xff] %v7328_v41  ;;  %v7337_v27 = vmul.f32 %v2414_v8, %v6817_v15  ;;  %v7349_v41 = vmul.f32 %v2402_v37, %v6813_v23  ;;  %v7361_v59 = vmul.f32 %v2414_v8, %v6813_v23  ;;  %v3418_v37 = vsel %vm1022_vm2, %v3416_v55, %v3415_v26 }
 0x21f   : > { %10674 = sst [smem:[#allocation67_spill]] %s7273_s13  ;;  %10694 = vst [vmem:[#allocation155_spill] sm:$0xff] %v7334_v42  ;;  %v7378_v8 = vsel %vm1022_vm2, %v3415_v26, %v3416_v55  ;;  %v7397_v44 = vsel %vm380_vm3, %v3418_v37, 0.0  ;;  %v2576_v55 = vstv %s6821_s18  ;;  %v2660_v37 = vstv %s6850_s16 }
 0x220   : > { %10678 = sst [smem:[#allocation68_spill]] %s7287_s19  ;;  %10695 = vst [vmem:[#allocation156_spill] sm:$0xff] %v7337_v27  ;;  %v7358_v27 = vmul.f32 %v2408_v57, %v6813_v23 }
 0x221   : > { %s10689_s9 = sld [smem:[#allocation73_spill]]  ;;  %v2486_v46 = vstv %s10681_s7  ;;  %10697 = vst [vmem:[#allocation157_spill] sm:$0xff] %v7346_v9 }
 0x222   : > { %s7319_s23 = sld [smem:[#allocation9 + $0x3e]]  ;;  %v2492_v32 = vstv %s10684_s1  ;;  %10698 = vst [vmem:[#allocation158_spill] sm:$0xff] %v7349_v41  ;;  %v7364_v43 = vmul.f32 %v2486_v46, %v6841_v24  ;;  %v2582_v41 = vstv %s6831_s2 }
 0x223   : > { %s7331_s22 = sld [smem:[#allocation9 + $0x3f]]  ;;  %10700 = vst [vmem:[#allocation159_spill] sm:$0xff] %v7358_v27  ;;  %v7408_v27 = vmul.f32 %v2492_v32, %v6825_v40 }
 0x224   : > { %s7341_s14 = sld [smem:[#allocation9 + $0x9c]]  ;;  %v2498_v42 = vstv %s10688_s15  ;;  %10701 = vst [vmem:[#allocation160_spill] sm:$0xff] %v7361_v59  ;;  %v7405_v59 = vmul.f32 %v2486_v46, %v6825_v40 }
 0x225   : > { %s7355_s7 = sld [smem:[#allocation9 + $0x69]]  ;;  %10702 = vst [vmem:[#allocation161_spill] sm:$0xff] %v7364_v43  ;;  %v7381_v43 = vmul.f32 %v2492_v32, %v6841_v24  ;;  %v7388_v3 = vmul.f32 %v2498_v42, %v6841_v24  ;;  %v7411_v57 = vmul.f32 %v2498_v42, %v6825_v40  ;;  %v7428_v32 = vmul.f32 %v2576_v55, %v6686_v20 }
 0x226   : > { %s10703_s1 = sld [smem:[#allocation53_spill]]  ;;  %10705 = vst [vmem:[#allocation162_spill] sm:$0xff] %v7378_v8  ;;  %v7431_v42 = vmul.f32 %v2582_v41, %v6686_v20 }
 0x227   : > { %v2504_v4 = vstv %s10689_s9  ;;  %s7374_s15 = sld [smem:[#allocation9 + $0x6a]]  ;;  %10706 = vst [vmem:[#allocation163_spill] sm:$0xff] %v7381_v43  ;;  %v2672_v43 = vstv %s6879_s5 }
 0x228   : > { %10690 = sst [smem:[#allocation69_spill]] %s7319_s23  ;;  %10708 = vst [vmem:[#allocation164_spill] sm:$0xff] %v7388_v3  ;;  %v7391_v34 = vmul.f32 %v2504_v4, %v6841_v24  ;;  %v7417_v51 = vmul.f32 %v2504_v4, %v6825_v40  ;;  %v2666_v3 = vstv %s6863_s3 }
 0x229   : > { %s7343_s23 = sld [smem:[#allocation9 + $0x68]]  ;;  %10710 = vst [vmem:[#allocation166_spill] sm:$0xff] %v7397_v44 }
 0x22a   : > { %s7385_s9 = sld [smem:[#allocation9 + $0x6b]]  ;;  %10709 = vst [vmem:[#allocation165_spill] sm:$0xff] %v7391_v34  ;;  %v2588_v34 = vstv %s6837_s11 }
 0x22b   : > { %10699 = sst [smem:[#allocation71_spill]] %s7355_s7  ;;  %10712 = vst [vmem:[#allocation167_spill] sm:$0xff] %v7405_v59  ;;  %v2678_v59 = vstv %s6899_s6  ;;  %v7435_v4 = vmul.f32 %v2588_v34, %v6686_v20 }
 0x22c   : > { %s7393_s30 = sld [smem:[#allocation9 + $0xa0]]  ;;  %v2570_v26 = vstv %s10703_s1  ;;  %10713 = vst [vmem:[#allocation168_spill] sm:$0xff] %v7408_v27 }
 0x22d   : > { %10704 = sst [smem:[#allocation72_spill]] %s7374_s15  ;;  %10714 = vst [vmem:[#allocation169_spill] sm:$0xff] %v7411_v57  ;;  %v7425_v46 = vmul.f32 %v2570_v26, %v6686_v20  ;;  %v7441_v57 = vmul.f32 %v2576_v55, %v6702_v56  ;;  %v7457_v55 = vmul.f32 %v2666_v3, %v6854_v53 }
 0x22e   : > { %s7402_s26 = sld [smem:[#allocation9 + $0xa1]]  ;;  %10716 = vst [vmem:[#allocation171_spill] sm:$0xff] %v7417_v51  ;;  %v7438_v51 = vmul.f32 %v2570_v26, %v6702_v56  ;;  %v7454_v26 = vmul.f32 %v2660_v37, %v6854_v53 }
 0x22f   : > { %10696 = sst [smem:[#allocation70_spill]] %s7343_s23  ;;  %10718 = vst [vmem:[#allocation173_spill] sm:$0xff] %v7425_v46  ;;  %v7444_v46 = vmul.f32 %v2582_v41, %v6702_v56  ;;  %v7460_v41 = vmul.f32 %v2672_v43, %v6854_v53 }
 0x230   : > { %10707 = sst [smem:[#allocation73_spill]] %s7385_s9  ;;  %10719 = vst [vmem:[#allocation174_spill] sm:$0xff] %v7428_v32 }
 0x231   : > { %s7414_s10 = sld [smem:[#allocation9 + $0xa2]]  ;;  %10720 = vst [vmem:[#allocation175_spill] sm:$0xff] %v7431_v42 }
 0x232   : > { %s7422_s2 = sld [smem:[#allocation9 + $0xa3]]  ;;  %10721 = vst [vmem:[#allocation176_spill] sm:$0xff] %v7435_v4  ;;  %v7451_v4 = vmul.f32 %v2588_v34, %v6702_v56  ;;  %v7490_v34 = vmul.f32 %v2666_v3, %v6845_v22  ;;  %v7510_v3 = vmul.f32 %v2756_v38, %v6887_v21 }
 0x233   : > { %10722 = vst [vmem:[#allocation177_spill] sm:$0xff] %v7438_v51  ;;  %s7446_s11 = sld [smem:[#allocation9 + $0x9d]] }
 0x234   : > { %10711 = sst [smem:[#allocation53_spill]] %s7402_s26  ;;  %10723 = vst [vmem:[#allocation178_spill] sm:$0xff] %v7441_v57 }
 0x235   : > { %10724 = vst [vmem:[#allocation179_spill] sm:$0xff] %v7444_v46  ;;  %s7462_s18 = sld [smem:[#allocation9 + $0x9e]]  ;;  %v2762_v46 = vstv %s6933_s25 }
 0x236   : > { %10726 = vst [vmem:[#allocation181_spill] sm:$0xff] %v7451_v4  ;;  %s10731_s16 = sld [smem:[#allocation74_spill]]  ;;  %v2750_v4 = vstv %s6911_s21 }
 0x237   : > { %10715 = sst [smem:[#allocation170_spill]] %s7414_s10  ;;  %10727 = vst [vmem:[#allocation182_spill] sm:$0xff] %v7454_v26  ;;  %v7471_v26 = vmul.f32 %v2678_v59, %v6854_v53  ;;  %v7507_v51 = vmul.f32 %v2750_v4, %v6887_v21 }
 0x238   : > { %10717 = sst [smem:[#allocation172_spill]] %s7422_s2  ;;  %10728 = vst [vmem:[#allocation183_spill] sm:$0xff] %v7457_v55  ;;  %v7474_v55 = vmul.f32 %v2660_v37, %v6845_v22  ;;  %v7493_v37 = vmul.f32 %v2672_v43, %v6845_v22  ;;  %v7513_v43 = vmul.f32 %v2762_v46, %v6887_v21 }
 0x239   : > { %10725 = sst [smem:[#allocation180_spill]] %s7446_s11  ;;  %10729 = vst [vmem:[#allocation184_spill] sm:$0xff] %v7460_v41  ;;  %v7499_v41 = vmul.f32 %v2678_v59, %v6845_v22 }
 0x23a   : > { %10732 = vst [vmem:[#allocation186_spill] sm:$0xff] %v7471_v26  ;;  %s10733_s3 = sld [smem:[#allocation75_spill]] }
 0x23b   : > { %10730 = sst [smem:[#allocation185_spill]] %s7462_s18  ;;  %10734 = vst [vmem:[#allocation187_spill] sm:$0xff] %v7474_v55 }
 0x23c   : > { %s10735_s5 = sld [smem:[#allocation77_spill]]  ;;  %10741 = vst [vmem:[#allocation188_spill] sm:$0xff] %v7490_v34  ;;  %v2768_v26 = vstv %s10731_s16 }
 0x23d   : > { %s7476_s6 = sld [smem:[#allocation9 + $0x9f]]  ;;  %10742 = vst [vmem:[#allocation189_spill] sm:$0xff] %v7493_v37  ;;  %v7519_v59 = vmul.f32 %v2768_v26, %v6887_v21 }
 0x23e   : > { %s10737_s1 = sld [smem:[#allocation46_spill]]  ;;  %10744 = vst [vmem:[#allocation190_spill] sm:$0xff] %v7499_v41  ;;  %v7522_v41 = vmul.f32 %v2750_v4, %v6894_v47 }
 0x23f   : > { %s7482_s18 = sld [smem:[#allocation9 + $0xfc]]  ;;  %10746 = vst [vmem:[#allocation191_spill] sm:$0xff] %v7507_v51  ;;  %v7525_v51 = vmul.f32 %v2756_v38, %v6894_v47  ;;  %v2930_v38 = vstv %s7017_s0 }
 0x240   : > { %s10739_s11 = sld [smem:[#allocation42_spill]]  ;;  %v2834_v55 = vstv %s10733_s3  ;;  %10747 = vst [vmem:[#allocation192_spill] sm:$0xff] %v7510_v3  ;;  %v7528_v3 = vmul.f32 %v2762_v46, %v6894_v47  ;;  %v7589_v30 = vmul.f32 %v2930_v38, %v7077_v60 }
 0x241   : > { %s7487_s24 = sld [smem:[#allocation9 + $0xc0]]  ;;  %10748 = vst [vmem:[#allocation193_spill] sm:$0xff] %v7513_v43  ;;  %v7533_v43 = vmul.f32 %v2768_v26, %v6894_v47  ;;  %v7536_v34 = vmul.f32 %v2834_v55, %v6688_v36  ;;  %v2924_v26 = vstv %s7010_s29 }
 0x242   : > { %s7496_s17 = sld [smem:[#allocation9 + $0xc1]]  ;;  %v2840_v57 = vstv %s10735_s5  ;;  %10750 = vst [vmem:[#allocation195_spill] sm:$0xff] %v7519_v59 }
 0x243   : > { %10736 = sst [smem:[#allocation74_spill]] %s7476_s6  ;;  %10751 = vst [vmem:[#allocation196_spill] sm:$0xff] %v7522_v41  ;;  %v7539_v59 = vmul.f32 %v2840_v57, %v6688_v36 }
 0x244   : > { %v2846_v42 = vstv %s10737_s1  ;;  %s7504_s21 = sld [smem:[#allocation9 + $0xc2]]  ;;  %10752 = vst [vmem:[#allocation197_spill] sm:$0xff] %v7525_v51  ;;  %v7573_v51 = vpop.permute.xlu0 %1537 }
 0x245   : > { %10738 = sst [smem:[#allocation75_spill]] %s7482_s18  ;;  %10753 = vst [vmem:[#allocation198_spill] sm:$0xff] %v7528_v3  ;;  %v7542_v4 = vmul.f32 %v2846_v42, %v6688_v36 }
 0x246   : > { %v2852_v37 = vstv %s10739_s11  ;;  %s7516_s8 = sld [smem:[#allocation9 + $0xc3]]  ;;  %10754 = vst [vmem:[#allocation199_spill] sm:$0xff] %v7533_v43  ;;  %v7603_v43 = vmul.f32 %v2930_v38, %v6987_v11 }
 0x247   : > { %10740 = sst [smem:[#allocation77_spill]] %s7487_s24  ;;  %10756 = vst [vmem:[#allocation200_spill] sm:$0xff] %v7536_v34  ;;  %v7549_v46 = vmul.f32 %v2852_v37, %v6688_v36  ;;  %v2936_v34 = vstv %s7025_s28  ;;  %v7578_v17 = vmul.f32 %v2852_v37, %v6707_v62 }
 0x248   : > { %10743 = sst [smem:[#allocation46_spill]] %s7496_s17  ;;  %10757 = vst [vmem:[#allocation201_spill] sm:$0xff] %v7539_v59  ;;  %v7564_v59 = vmul.f32 %v2840_v57, %v6707_v62  ;;  %v7580_v57 = vpop.permute.xlu2 %1749  ;;  %v7592_v3 = vmul.f32 %v2936_v34, %v7077_v60 }
 0x249   : > { %s7530_s25 = sld [smem:[#allocation9 + $0xa4]]  ;;  %10758 = vst [vmem:[#allocation202_spill] sm:$0xff] %v7542_v4  ;;  %v7561_v4 = vmul.f32 %v2834_v55, %v6707_v62  ;;  %v7586_v55 = vmul.f32 %v2924_v26, %v7077_v60  ;;  %v1752_v9 = vsel %vm381_vm5, %v7580_v57, 0.0 }
 0x24a   : > { %10745 = sst [smem:[#allocation42_spill]] %s7504_s21  ;;  %10759 = vst [vmem:[#allocation203_spill] sm:$0xff] %v7549_v46  ;;  %v7567_v46 = vmul.f32 %v2846_v42, %v6707_v62  ;;  %v7600_v42 = vmul.f32 %v2924_v26, %v6987_v11  ;;  %v7617_v26 = vmul.f32 %v2936_v34, %v6987_v11 }
 0x24b   : > { %s10755_s11 = sld [smem:[#allocation44_spill]]  ;;  %10760 = vst [vmem:[#allocation204_spill] sm:$0xff] %v7561_v4 }
 0x24c   : > { %10749 = sst [smem:[#allocation194_spill]] %s7516_s8  ;;  %10761 = vst [vmem:[#allocation205_spill] sm:$0xff] %v7564_v59 }
 0x24d   : > { %s7546_s16 = sld [smem:[#allocation9 + $0xa5]]  ;;  %10762 = vst [vmem:[#allocation206_spill] sm:$0xff] %v7567_v46 }
 0x24e   : > { %s7558_s3 = sld [smem:[#allocation9 + $0xa6]]  ;;  %10767 = vst [vmem:[#allocation207_spill] sm:$0xff] %v7578_v17 }
 0x24f   : > { %s10763_s28 = sld [smem:[#allocation45_spill]]  ;;  %10770 = vst [vmem:[#allocation208_spill] sm:$0xff] %v7586_v55 }
 0x250   : > { %s10764_s29 = sld [smem:[#allocation43_spill]]  ;;  %10771 = vst [vmem:[#allocation209_spill] sm:$0xff] %v7589_v30 }
 0x251   : > { %v2942_v41 = vstv %s10755_s11  ;;  %s7575_s0 = sld [smem:[#allocation9 + $0xa7]]  ;;  %10772 = vst [vmem:[#allocation210_spill] sm:$0xff] %v7592_v3 }
 0x252   : > { %s10766_s5 = sld [smem:[#allocation41_spill]]  ;;  %v7597_v37 = vmul.f32 %v2942_v41, %v7077_v60  ;;  %10776 = vst [vmem:[#allocation212_spill] sm:$0xff] %v7600_v42  ;;  %v7620_v38 = vmul.f32 %v2942_v41, %v6987_v11 }
 0x253   : > { %s10768_s1 = sld [smem:[#allocation47_spill]]  ;;  %10778 = vst [vmem:[#allocation213_spill] sm:$0xff] %v7603_v43 }
 0x254   : > { %s7583_s11 = sld [smem:[#allocation9 + $0xc4]]  ;;  %10774 = vst [vmem:[#allocation211_spill] sm:$0xff] %v7597_v37 }
 0x255   : > { %s7594_s15 = sld [smem:[#allocation9 + $0xc5]]  ;;  %v3014_v55 = vstv %s10763_s28  ;;  %10783 = vst [vmem:[#allocation214_spill] sm:$0xff] %v7617_v26 }
 0x256   : > { %s10775_s7 = sld [smem:[#allocation48_spill]]  ;;  %v3020_v30 = vstv %s10764_s29  ;;  %10784 = vst [vmem:[#allocation215_spill] sm:$0xff] %v7620_v38  ;;  %v7625_v4 = vmul.f32 %v3014_v55, %v7119_v18  ;;  %v7652_v38 = vmul.f32 %v3014_v55, %v7123_v28 }
 0x257   : > { %10765 = sst [smem:[#allocation44_spill]] %s7575_s0  ;;  %v7635_v59 = vmul.f32 %v3020_v30, %v7119_v18 }
 0x258   : > { %s10777_s9 = sld [smem:[#allocation31_spill]]  ;;  %v3026_v3 = vstv %s10766_s5  ;;  %10785 = vst [vmem:[#allocation216_spill] sm:$0xff] %v7625_v4  ;;  %v7676_v4 = vpop.permute.xlu2 %2013 }
 0x259   : > { %s10779_s23 = sld [smem:[#allocation49_spill]]  ;;  %v3032_v17 = vstv %s10768_s1  ;;  %10786 = vst [vmem:[#allocation217_spill] sm:$0xff] %v7635_v59  ;;  %v7638_v34 = vmul.f32 %v3026_v3, %v7119_v18  ;;  %v7655_v59 = vmul.f32 %v3020_v30, %v7123_v28 }
 0x25a   : > { %10769 = sst [smem:[#allocation45_spill]] %s7583_s11  ;;  %v7641_v41 = vmul.f32 %v3032_v17, %v7119_v18  ;;  %10789 = vst [vmem:[#allocation220_spill] sm:$0xff] %v7652_v38  ;;  %v7665_v35 = vmul.f32 %v3032_v17, %v7123_v28 }
 0x25b   : > { %10773 = sst [smem:[#allocation43_spill]] %s7594_s15  ;;  %10787 = vst [vmem:[#allocation218_spill] sm:$0xff] %v7638_v34  ;;  %v7658_v34 = vmul.f32 %v3026_v3, %v7123_v28 }
 0x25c   : > { %s7607_s19 = sld [smem:[#allocation9 + $0xc6]]  ;;  %v3098_v37 = vstv %s10775_s7  ;;  %10788 = vst [vmem:[#allocation219_spill] sm:$0xff] %v7641_v41  ;;  %v7660_v41 = vpop.permute.xlu0 %1801 }
 0x25d   : > { %s10781_s13 = sld [smem:[#allocation50_spill]]  ;;  %10790 = vst [vmem:[#allocation221_spill] sm:$0xff] %v7655_v59  ;;  %v7668_v55 = vmul.f32 %v3098_v37, %v6698_v61 }
 0x25e   : > { %s7614_s18 = sld [smem:[#allocation9 + $0xc7]]  ;;  %v3104_v43 = vstv %s10777_s9  ;;  %10791 = vst [vmem:[#allocation222_spill] sm:$0xff] %v7658_v34 }
 0x25f   : > { %s7622_s6 = sld [smem:[#allocation9 + $0xa8]]  ;;  %v3110_v42 = vstv %s10779_s23  ;;  %10795 = vst [vmem:[#allocation223_spill] sm:$0xff] %v7665_v35  ;;  %v7671_v30 = vmul.f32 %v3104_v43, %v6698_v61  ;;  %v7687_v38 = vmul.f32 %v3104_v43, %v6709_v45 }
 0x260   : > { %s7632_s28 = sld [smem:[#allocation9 + $0xa9]]  ;;  %10796 = vst [vmem:[#allocation224_spill] sm:$0xff] %v7668_v55  ;;  %v7674_v3 = vmul.f32 %v3110_v42, %v6698_v61  ;;  %v7684_v55 = vmul.f32 %v3098_v37, %v6709_v45 }
 0x261   : > { %s7649_s23 = sld [smem:[#allocation9 + $0xaa]]  ;;  %10797 = vst [vmem:[#allocation225_spill] sm:$0xff] %v7671_v30 }
 0x262   : > { %10780 = sst [smem:[#allocation41_spill]] %s7607_s19  ;;  %10798 = vst [vmem:[#allocation226_spill] sm:$0xff] %v7674_v3  ;;  %v7690_v3 = vmul.f32 %v3110_v42, %v6709_v45  ;;  %v1488_v42 = vsel %vm381_vm5, %v7484_v63, 0.0 }
 0x263   : > { %v3116_v46 = vstv %s10781_s13  ;;  %s10792_s13 = sld [smem:[#allocation51_spill]]  ;;  %10802 = vst [vmem:[#allocation228_spill] sm:$0xff] %v7684_v55  ;;  %v3284_v55 = vstv %s7306_s20 }
 0x264   : > { %10782 = sst [smem:[#allocation47_spill]] %s7614_s18  ;;  %v7681_v17 = vmul.f32 %v3116_v46, %v6698_v61  ;;  %10803 = vst [vmem:[#allocation229_spill] sm:$0xff] %v7687_v38  ;;  %v7696_v35 = vmul.f32 %v3116_v46, %v6709_v45  ;;  %v3296_v46 = vstv %s7331_s22  ;;  %v7750_v26 = vpop.permute.xlu0 %2065 }
 0x265   : > { %s10793_s7 = sld [smem:[#allocation62_spill]]  ;;  %10805 = vst [vmem:[#allocation230_spill] sm:$0xff] %v7690_v3 }
 0x266   : > { %s7662_s9 = sld [smem:[#allocation9 + $0xab]]  ;;  %10801 = vst [vmem:[#allocation227_spill] sm:$0xff] %v7681_v17 }
 0x267   : > { %s10799_s29 = sld [smem:[#allocation63_spill]]  ;;  %10807 = vst [vmem:[#allocation231_spill] sm:$0xff] %v7696_v35 }
 0x268   : > { %s7678_s5 = sld [smem:[#allocation9 + $0xc8]] }
 0x269   : > { %s10804_s1 = sld [smem:[#allocation64_spill]]  ;;  %v3188_v17 = vstv %s10792_s13 }
 0x26a   : > { %s7693_s2 = sld [smem:[#allocation9 + $0xc9]]  ;;  %v7716_v35 = vmul.f32 %v3188_v17, %v7277_v33 }
 0x26b   : > { %v3194_v34 = vstv %s10793_s7  ;;  %s7703_s10 = sld [smem:[#allocation9 + $0xca]] }
 0x26c   : > { %10794 = sst [smem:[#allocation48_spill]] %s7662_s9  ;;  %10812 = vst [vmem:[#allocation232_spill] sm:$0xff] %v7716_v35  ;;  %v7725_v59 = vmul.f32 %v3194_v34, %v7277_v33  ;;  %s10895_s9 = smov 1  }
 0x26d   : > { %s10810_s26 = sld [smem:[#allocation69_spill]]  ;;  %v3200_v43 = vstv %s10799_s29  ;;  %2457 = vrot.lane.b32.xlu1 %v6825_v40, %s10895_s9  ;;  %v2069_v40 = vsel %vm382_vm4, %v7750_v26, 0.0  ;;  %2631 = vrot.lane.b32.xlu0 %v6854_v53, %s10895_s9 }
 0x26e   : > { %10800 = sst [smem:[#allocation31_spill]] %s7678_s5  ;;  %10813 = vst [vmem:[#allocation233_spill] sm:$0xff] %v7725_v59  ;;  %v7728_v30 = vmul.f32 %v3200_v43, %v7277_v33  ;;  %v7748_v59 = vmul.f32 %v3194_v34, %v7225_v2  ;;  %v7753_v63 = vmul.f32 %v3200_v43, %v7225_v2  ;;  %v7766_v34 = vpop.permute.xlu1 %1539  ;;  %v7768_v43 = vpop.permute.xlu2 %1573  ;;  %2541 = vrot.lane.b32.xlu2 %v6702_v56, %s10895_s9 }
 0x26f   : > { %s10808_s5 = sld [smem:[#allocation65_spill]]  ;;  %v3206_v38 = vstv %s10804_s1  ;;  %v1542_v24 = vsel %vm382_vm4, %v7766_v34, 0.0  ;;  %v1577_v34 = vsel %vm381_vm5, %v7768_v43, 0.0  ;;  %v10912_v43 = vstv %s7393_s30 }
 0x270   : > { %10806 = sst [smem:[#allocation49_spill]] %s7693_s2  ;;  %10814 = vst [vmem:[#allocation234_spill] sm:$0xff] %v7728_v30  ;;  %v7742_v35 = vmul.f32 %v3206_v38, %v7277_v33  ;;  %v7745_v30 = vmul.f32 %v3188_v17, %v7225_v2  ;;  %v7756_v1 = vmul.f32 %v3206_v38, %v7225_v2  ;;  %v7762_v17 = vmul.f32 %v3284_v55, %v7310_v19 }
 0x271   : > { %10809 = sst [smem:[#allocation50_spill]] %s7703_s10  ;;  %10818 = vst [vmem:[#allocation237_spill] sm:$0xff] %v7748_v59  ;;  %v10918_v33 = vstv %s7632_s28 }
 0x272   : > { %s7709_s24 = sld [smem:[#allocation9 + $0xcb]]  ;;  %10816 = vst [vmem:[#allocation235_spill] sm:$0xff] %v7742_v35  ;;  %v7774_v35 = vmul.f32 %v3296_v46, %v7310_v19 }
 0x273   : > { %s7713_s2 = sld [smem:[#allocation9 + $0x40]]  ;;  %v3290_v3 = vstv %s10810_s26  ;;  %10817 = vst [vmem:[#allocation236_spill] sm:$0xff] %v7745_v30 }
 0x274   : > { %s7722_s13 = sld [smem:[#allocation9 + $0x41]]  ;;  %10819 = vst [vmem:[#allocation238_spill] sm:$0xff] %v7753_v63  ;;  %v7771_v38 = vmul.f32 %v3290_v3, %v7310_v19 }
 0x275   : > { %v3278_v37 = vstv %s10808_s5  ;;  %s7739_s20 = sld [smem:[#allocation9 + $0x42]]  ;;  %10820 = vst [vmem:[#allocation239_spill] sm:$0xff] %v7756_v1  ;;  %v10834_v1 = vstv %s7149_s27  ;;  %2539 = vrot.lane.b32.xlu1 %v6686_v20, %s10895_s9  ;;  %2719 = vrot.lane.b32.xlu0 %v6887_v21, %s10895_s9 }
 0x276   : > { %s10821_s26 = sld [smem:[#allocation116_spill]]  ;;  %v7759_v32 = vmul.f32 %v3278_v37, %v7310_v19  ;;  %10824 = vst [vmem:[#allocation241_spill] sm:$0xff] %v7762_v17  ;;  %v7780_v17 = vmul.f32 %v3284_v55, %v7299_v10  ;;  %v7786_v63 = vmul.f32 %v10834_v1, %v1488_v42  ;;  %v3362_v55 = vstv %s7341_s14  ;;  %v7870_v13 = vpop.permute.xlu2 %1837  ;;  %2629 = vrot.lane.b32.xlu2 %v6845_v22, %s10895_s9 }
 0x277   : > { %s10823_s22 = sld [smem:[#allocation121_spill]]  ;;  %10827 = vst [vmem:[#allocation242_spill] sm:$0xff] %v7771_v38  ;;  %v7860_v23 = vmul.f32 %v3362_v55, %v6727_v12  ;;  %v10915_v19 = vstv %s7622_s6 }
 0x278   : > { %10811 = sst [smem:[#allocation51_spill]] %s7709_s24  ;;  %10822 = vst [vmem:[#allocation240_spill] sm:$0xff] %v7759_v32  ;;  %v7777_v32 = vmul.f32 %v3278_v37, %v7299_v10  ;;  %v7794_v37 = vmul.f32 %v3296_v46, %v7299_v10  ;;  %v1541_v46 = vsel %vm382_vm4, %v7573_v51, 0.0  ;;  %v7852_v51 = vpop.permute.xlu0 %1455  ;;  %v8016_v45 = vmul.f32 %v10915_v19, %v2069_v40 }
 0x279   : > { %s10825_s7 = sld [smem:[#allocation61_spill]]  ;;  %10828 = vst [vmem:[#allocation243_spill] sm:$0xff] %v7774_v35  ;;  %v7791_v35 = vmul.f32 %v3290_v3, %v7299_v10  ;;  %v7868_v10 = vpop.permute.xlu1 %1803 }
 0x27a   : > { %s7764_s29 = sld [smem:[#allocation9 + $0xfd]]  ;;  %10829 = vst [vmem:[#allocation244_spill] sm:$0xff] %v7777_v32 }
 0x27b   : > { %10815 = sst [smem:[#allocation62_spill]] %s7739_s20  ;;  %10831 = vst [vmem:[#allocation245_spill] sm:$0xff] %v7780_v17 }
 0x27c   : > { %s10830_s5 = sld [smem:[#allocation180_spill]]  ;;  %10836 = vst [vmem:[#allocation246_spill] sm:$0xff] %v7791_v35  ;;  %v10839_v17 = vstv %s10821_s26 }
 0x27d   : > { %s10832_s1 = sld [smem:[#allocation185_spill]]  ;;  %10837 = vst [vmem:[#allocation247_spill] sm:$0xff] %v7794_v37  ;;  %v7799_v32 = vmul.f32 %v10839_v17, %v1488_v42  ;;  %v10840_v38 = vstv %s10823_s22 }
 0x27e   : > { %s7782_s8 = sld [smem:[#allocation9 + $0xfe]]  ;;  %v7803_v1 = vmul.f32 %v10840_v38, %v1488_v42  ;;  %10856 = vst [vmem:[#allocation252_spill] sm:$0xff] %v7860_v23 }
 0x27f   : > { %s7788_s21 = sld [smem:[#allocation9 + $0x43]]  ;;  %v10841_v59 = vstv %s10825_s7  ;;  %10917 = vst [vmem:[#allocation273_spill] sm:$0xff] %v8016_v45  ;;  %v10927_v45 = vstv %s7649_s23 }
 0x280   : > { %10826 = sst [smem:[#allocation63_spill]] %s7764_s29  ;;  %v7807_v30 = vmul.f32 %v10841_v59, %v1488_v42  ;;  %v7831_v59 = vmul.f32 %v3362_v55, %v6700_v25 }
 0x281   : > { %s10838_s17 = sld [smem:[#allocation74_spill]] }
 0x282   : > { %s7810_s27 = sld [smem:[#allocation9 + $0xff]]  ;;  %v3368_v37 = vstv %s10830_s5  ;;  %10846 = vst [vmem:[#allocation248_spill] sm:$0xff] %v7831_v59 }
 0x283   : > { %s10843_s12 = sld [smem:[#allocation75_spill]]  ;;  %v3374_v35 = vstv %s10832_s1  ;;  %v7847_v3 = vmul.f32 %v3368_v37, %v6700_v25  ;;  %v7863_v27 = vmul.f32 %v3368_v37, %v6727_v12 }
 0x284   : > { %10833 = sst [smem:[#allocation64_spill]] %s7782_s8  ;;  %v7850_v57 = vmul.f32 %v3374_v35, %v6700_v25  ;;  %v7866_v2 = vmul.f32 %v3374_v35, %v6727_v12 }
 0x285   : > { %10835 = sst [smem:[#allocation65_spill]] %s7788_s21  ;;  %10849 = vst [vmem:[#allocation249_spill] sm:$0xff] %v7847_v3 }
 0x286   : > { %s7814_s0 = sld [smem:[#allocation9 + $0x44]]  ;;  %10850 = vst [vmem:[#allocation250_spill] sm:$0xff] %v7850_v57  ;;  %v10869_v57 = vstv %s7393_s30 }
 0x287   : > { %s7821_s14 = sld [smem:[#allocation9 + $0x45]]  ;;  %v3380_v38 = vstv %s10838_s17  ;;  %10858 = vst [vmem:[#allocation253_spill] sm:$0xff] %v7863_v27  ;;  %v7888_v3 = vmul.f32 %v10869_v57, %v1541_v46 }
 0x288   : > { %10842 = sst [smem:[#allocation69_spill]] %s7810_s27  ;;  %v7857_v15 = vmul.f32 %v3380_v38, %v6700_v25  ;;  %10860 = vst [vmem:[#allocation254_spill] sm:$0xff] %v7866_v2  ;;  %v7875_v17 = vmul.f32 %v3380_v38, %v6727_v12  ;;  %v10890_v25 = vstv %s7546_s16 }
 0x289   : > { %s7828_s7 = sld [smem:[#allocation9 + $0x46]]  ;;  %v3452_v42 = vstv %s10843_s12 }
 0x28a   : > { %s7844_s17 = sld [smem:[#allocation9 + $0x47]]  ;;  %10854 = vst [vmem:[#allocation251_spill] sm:$0xff] %v7857_v15  ;;  %v7878_v55 = vmul.f32 %v3452_v42, %v7397_v44  ;;  %v10893_v44 = vstv %s7558_s3 }
 0x28b   : > { %s10848_s12 = sld [smem:[#allocation136_spill]]  ;;  %10864 = vst [vmem:[#allocation255_spill] sm:$0xff] %v7875_v17 }
 0x28c   : > { %s10851_s5 = sld [smem:[#allocation53_spill]]  ;;  %10866 = vst [vmem:[#allocation256_spill] sm:$0xff] %v7878_v55 }
 0x28d   : > { %10844 = sst [smem:[#allocation180_spill]] %s7821_s14 }
 0x28e   : > { %s10852_s1 = sld [smem:[#allocation170_spill]] }
 0x28f   : > { %10845 = sst [smem:[#allocation185_spill]] %s7828_s7 }
 0x290   : > { %10847 = sst [smem:[#allocation74_spill]] %s7844_s17 }
 0x291   : > { %s7854_s22 = sld [smem:[#allocation9 + $0x100]]  ;;  %v10867_v35 = vstv %s10848_s12 }
 0x292   : > { %s10855_s26 = sld [smem:[#allocation66_spill]]  ;;  %v7884_v2 = vmul.f32 %v10867_v35, %v1752_v9  ;;  %v10870_v59 = vstv %s10851_s5 }
 0x293   : > { %s10857_s18 = sld [smem:[#allocation67_spill]]  ;;  %v7892_v27 = vmul.f32 %v10870_v59, %v1541_v46 }
 0x294   : > { %s10859_s19 = sld [smem:[#allocation68_spill]]  ;;  %10868 = vst [vmem:[#allocation257_spill] sm:$0xff] %v7884_v2  ;;  %v10871_v23 = vstv %s10852_s1 }
 0x295   : > { %s10861_s15 = sld [smem:[#allocation172_spill]]  ;;  %v7896_v38 = vmul.f32 %v10871_v23, %v1541_v46  ;;  %v1805_v23 = vsel %vm382_vm4, %v7660_v41, 0.0  ;;  %v7934_v41 = vmul.f32 %v3452_v42, %v7378_v8 }
 0x296   : > { %s7872_s11 = sld [smem:[#allocation9 + $0x101]]  ;;  %v7954_v42 = vmul.f32 %v10890_v25, %v1805_v23 }
 0x297   : > { %10853 = sst [smem:[#allocation75_spill]] %s7854_s22  ;;  %10882 = vst [vmem:[#allocation261_spill] sm:$0xff] %v7934_v41 }
 0x298   : > { %v10873_v55 = vstv %s10855_s26  ;;  %s7916_s8 = sld [smem:[#allocation9 + $0x103]]  ;;  %10892 = vst [vmem:[#allocation264_spill] sm:$0xff] %v7954_v42 }
 0x299   : > { %v7902_v37 = vmul.f32 %v10873_v55, %v1752_v9  ;;  %v10875_v15 = vstv %s10857_s18  ;;  %s7930_s18 = sld [smem:[#allocation9 + $0x49]]  ;;  %v7958_v55 = vmul.f32 %v10893_v44, %v1805_v23  ;;  %v1720_v44 = vpop.permute.xlu0 %1719 }
 0x29a   : > { %v7906_v35 = vmul.f32 %v10875_v15, %v1752_v9  ;;  %v10877_v17 = vstv %s10859_s19  ;;  %s7924_s19 = sld [smem:[#allocation9 + $0x48]]  ;;  %v10888_v15 = vstv %s7530_s25 }
 0x29b   : > { %10874 = vst [vmem:[#allocation258_spill] sm:$0xff] %v7902_v37  ;;  %v7910_v57 = vmul.f32 %v10877_v17, %v1752_v9  ;;  %v10879_v59 = vstv %s10861_s15  ;;  %v2016_v9 = vsel %vm381_vm5, %v7676_v4, 0.0  ;;  %s10880_s26 = sld [smem:[#allocation70_spill]]  ;;  %v10885_v4 = vstv %s7764_s29 }
 0x29c   : > { %10862 = sst [smem:[#allocation53_spill]] %s7872_s11  ;;  %10876 = vst [vmem:[#allocation259_spill] sm:$0xff] %v7906_v35  ;;  %v7914_v12 = vmul.f32 %v10879_v59, %v1541_v46  ;;  %v7946_v46 = vmul.f32 %v10885_v4, %v7378_v8  ;;  %v7950_v17 = vmul.f32 %v10888_v15, %v1805_v23 }
 0x29d   : > { %s7898_s11 = sld [smem:[#allocation9 + $0x102]]  ;;  %10878 = vst [vmem:[#allocation260_spill] sm:$0xff] %v7910_v57  ;;  %v10944_v57 = vstv %s7558_s3 }
 0x29e   : > { %s10881_s12 = sld [smem:[#allocation71_spill]]  ;;  %10887 = vst [vmem:[#allocation262_spill] sm:$0xff] %v7946_v46 }
 0x29f   : > { %s10883_s10 = sld [smem:[#allocation72_spill]]  ;;  %10889 = vst [vmem:[#allocation263_spill] sm:$0xff] %v7950_v17 }
 0x2a0   : > { %s7941_s22 = sld [smem:[#allocation9 + $0x4a]]  ;;  %10894 = vst [vmem:[#allocation265_spill] sm:$0xff] %v7958_v55 }
 0x2a1   : > { %s10886_s24 = sld [smem:[#allocation73_spill]]  ;;  %v10897_v15 = vstv %s10880_s26 }
 0x2a2   : > { %s10891_s27 = sld [smem:[#allocation44_spill]]  ;;  %v7969_v4 = vmul.f32 %v10897_v15, %v2016_v9 }
 0x2a3   : > { %10872 = sst [smem:[#allocation170_spill]] %s7898_s11 }
 0x2a4   : > { %s7965_s29 = sld [smem:[#allocation9 + $0x4b]]  ;;  %10898 = vst [vmem:[#allocation267_spill] sm:$0xff] %v7969_v4  ;;  %v10899_v25 = vstv %s10881_s12  ;;  %v2102_v4 = vpop.permute.xlu2 %2101 }
 0x2a5   : > { %v7973_v46 = vmul.f32 %v10899_v25, %v2016_v9  ;;  %s7981_s26 = sld [smem:[#allocation9]]  ;;  %v10902_v15 = vstv %s10883_s10 }
 0x2a6   : > { %10884 = sst [smem:[#allocation172_spill]] %s7941_s22  ;;  %v7985_v59 = vmul.f32 %v10902_v15, %v2016_v9  ;;  %v8020_v15 = vmul.f32 %v10918_v33, %v2069_v40  ;;  %v11014_v28 = vstv %s7941_s22 }
 0x2a7   : > { %10900 = vst [vmem:[#allocation268_spill] sm:$0xff] %v7973_v46  ;;  %v10904_v25 = vstv %s10886_s24  ;;  %s10908_s12 = sld [smem:[#allocation77_spill]]  ;;  %v2068_v46 = vpop.permute.xlu1 %2067 }
 0x2a8   : > { %10903 = vst [vmem:[#allocation270_spill] sm:$0xff] %v7985_v59  ;;  %v7989_v41 = vmul.f32 %v10904_v25, %v2016_v9  ;;  %v10906_v8 = vstv %s10891_s27  ;;  %s10909_s4 = sld [smem:[#allocation46_spill]]  ;;  %v8008_v59 = vmul.f32 %v10912_v43, %v1542_v24  ;;  %v10921_v9 = vstv %s10861_s15 }
 0x2a9   : > { %v7996_v26 = vmul.f32 %v10906_v8, %v1805_v23  ;;  %s7998_s10 = sld [smem:[#allocation9 + $0x1]]  ;;  %v10913_v8 = vstv %s10851_s5  ;;  %10919 = vst [vmem:[#allocation274_spill] sm:$0xff] %v8020_v15  ;;  %v8030_v43 = vmul.f32 %v10921_v9, %v1542_v24 }
 0x2aa   : > { %10896 = sst [smem:[#allocation266_spill]] %s7965_s29  ;;  %10905 = vst [vmem:[#allocation271_spill] sm:$0xff] %v7989_v41  ;;  %v8012_v23 = vmul.f32 %v10913_v8, %v1542_v24  ;;  %v10920_v41 = vstv %s10852_s1 }
 0x2ab   : > { %10901 = sst [smem:[#allocation269_spill]] %s7981_s26  ;;  %10907 = vst [vmem:[#allocation272_spill] sm:$0xff] %v7996_v26  ;;  %v8026_v25 = vmul.f32 %v10920_v41, %v1542_v24  ;;  %v8052_v24 = vmul.f32 %v10927_v45, %v2069_v40  ;;  %v1841_v45 = vsel %vm381_vm5, %v7870_v13, 0.0 }
 0x2ac   : > { %s10910_s26 = sld [smem:[#allocation42_spill]]  ;;  %v1454_v9 = vpop.permute.xlu2 %1453 }
 0x2ad   : > { %s10911_s24 = sld [smem:[#allocation194_spill]]  ;;  %v10922_v49 = vstv %s10908_s12  ;;  %10928 = vst [vmem:[#allocation275_spill] sm:$0xff] %v8052_v24  ;;  %v10939_v24 = vstv %s7530_s25 }
 0x2ae   : > { %s8004_s21 = sld [smem:[#allocation9 + $0x2]]  ;;  %v8034_v8 = vmul.f32 %v10922_v49, %v1577_v34  ;;  %v10924_v50 = vstv %s10909_s4  ;;  %v1458_v49 = vsel %vm382_vm4, %v7852_v51, 0.0 }
 0x2af   : > { %s8022_s14 = sld [smem:[#allocation9 + $0x3]]  ;;  %v8038_v26 = vmul.f32 %v10924_v50, %v1577_v34  ;;  %v1806_v50 = vsel %vm382_vm4, %v7868_v10, 0.0  ;;  %v10942_v10 = vstv %s7546_s16 }
 0x2b0   : > { %s10923_s30 = sld [smem:[#allocation48_spill]]  ;;  %v8093_v20 = vmul.f32 %v10939_v24, %v1806_v50  ;;  %v8101_v35 = vmul.f32 %v10944_v57, %v1806_v50 }
 0x2b1   : > { %s8040_s5 = sld [smem:[#allocation9 + $0x104]] }
 0x2b2   : > { %v10925_v19 = vstv %s10910_s26  ;;  %s8057_s15 = sld [smem:[#allocation9 + $0x105]]  ;;  %10941 = vst [vmem:[#allocation277_spill] sm:$0xff] %v8093_v20 }
 0x2b3   : > { %v8044_v33 = vmul.f32 %v10925_v19, %v1577_v34  ;;  %v10926_v15 = vstv %s10911_s24  ;;  %s8067_s1 = sld [smem:[#allocation9 + $0x106]]  ;;  %10945 = vst [vmem:[#allocation279_spill] sm:$0xff] %v8101_v35 }
 0x2b4   : > { %v8048_v41 = vmul.f32 %v10926_v15, %v1577_v34  ;;  %s10931_s24 = sld [smem:[#allocation44_spill]]  ;;  %v10935_v34 = vstv %s7713_s2  ;;  %v8097_v15 = vmul.f32 %v10942_v10, %v1806_v50 }
 0x2b5   : > { %s10932_s26 = sld [smem:[#allocation45_spill]]  ;;  %v8086_v13 = vmul.f32 %v10935_v34, %v1458_v49  ;;  %v10946_v34 = vstv %s7722_s13 }
 0x2b6   : > { %v10929_v51 = vstv %s10923_s30  ;;  %s10933_s4 = sld [smem:[#allocation43_spill]]  ;;  %10943 = vst [vmem:[#allocation278_spill] sm:$0xff] %v8097_v15  ;;  %v8105_v37 = vmul.f32 %v10946_v34, %v1458_v49 }
 0x2b7   : > { %v8074_v19 = vmul.f32 %v10929_v51, %v2069_v40  ;;  %s10934_s12 = sld [smem:[#allocation41_spill]]  ;;  %v1484_v51 = vpop.permute.xlu1 %1483 }
 0x2b8   : > { %s8082_s11 = sld [smem:[#allocation9 + $0x107]] }
 0x2b9   : > { %10930 = vst [vmem:[#allocation276_spill] sm:$0xff] %v8074_v19  ;;  %s10936_s27 = sld [smem:[#allocation47_spill]]  ;;  %v1984_v19 = vpop.permute.xlu0 %1983 }
 0x2ba   : > { %s10937_s20 = sld [smem:[#allocation62_spill]]  ;;  %v10947_v40 = vstv %s10931_s24 }
 0x2bb   : > { %s10938_s17 = sld [smem:[#allocation65_spill]]  ;;  %v8109_v2 = vmul.f32 %v10947_v40, %v1806_v50  ;;  %v10949_v24 = vstv %s10932_s26  ;;  %v2070_v50 = vsel %vm382_vm4, %v2068_v46, 0.0  ;;  %v2105_v46 = vsel %vm381_vm5, %v2102_v4, 0.0 }
 0x2bc   : > { %s10940_s7 = sld [smem:[#allocation269_spill]]  ;;  %v8113_v20 = vmul.f32 %v10949_v24, %v1841_v45  ;;  %v10951_v10 = vstv %s10933_s4  ;;  %v1722_v24 = vsel %vm382_vm4, %v1720_v44, 0.0  ;;  %v10964_v44 = vstv %s7814_s0  ;;  %s10978_s4 = smov 127  }
 0x2bd   : > { %10948 = vst [vmem:[#allocation280_spill] sm:$0xff] %v8109_v2  ;;  %v8117_v15 = vmul.f32 %v10951_v10, %v1841_v45  ;;  %v10953_v57 = vstv %s10934_s12  ;;  %s10954_s25 = sld [smem:[#allocation180_spill]]  ;;  %v8153_v17 = vmul.f32 %v10964_v44, %v1722_v24  ;;  %v10970_v4 = vstv %s7632_s28  ;;  %2595 = vrot.lane.b32.xlu1 %v6702_v56, %s10978_s4  ;;  %2775 = vrot.lane.b32.xlu0 %v6894_v47, %s10978_s4 }
 0x2be   : > { %10950 = vst [vmem:[#allocation281_spill] sm:$0xff] %v8113_v20  ;;  %v8121_v34 = vmul.f32 %v10953_v57, %v1841_v45  ;;  %s10960_s24 = sld [smem:[#allocation31_spill]]  ;;  %v10962_v20 = vstv %s7622_s6  ;;  %2685 = vrot.lane.b32.xlu2 %v6854_v53, %s10978_s4 }
 0x2bf   : > { %10952 = vst [vmem:[#allocation282_spill] sm:$0xff] %v8117_v15  ;;  %v10956_v35 = vstv %s10936_s27  ;;  %s10961_s16 = sld [smem:[#allocation49_spill]]  ;;  %v8149_v42 = vmul.f32 %v10962_v20, %v2070_v50  ;;  %v10974_v20 = vstv %s10923_s30 }
 0x2c0   : > { %10955 = vst [vmem:[#allocation283_spill] sm:$0xff] %v8121_v34  ;;  %v8125_v55 = vmul.f32 %v10956_v35, %v1841_v45  ;;  %v10958_v40 = vstv %s10937_s20  ;;  %s10965_s3 = sld [smem:[#allocation50_spill]]  ;;  %v8164_v34 = vmul.f32 %v10970_v4, %v2070_v50  ;;  %v8172_v45 = vmul.f32 %v10974_v20, %v2070_v50 }
 0x2c1   : > { %v8131_v2 = vmul.f32 %v10958_v40, %v1458_v49  ;;  %v10959_v10 = vstv %s10938_s17  ;;  %10963 = vst [vmem:[#allocation285_spill] sm:$0xff] %v8149_v42  ;;  %s10968_s27 = sld [smem:[#allocation51_spill]]  ;;  %v10972_v40 = vstv %s7649_s23  ;;  %v1986_v20 = vsel %vm382_vm4, %v1984_v19, 0.0  ;;  %v1400_v57 = vpop.permute.xlu0 %1399 }
 0x2c2   : > { %10957 = vst [vmem:[#allocation284_spill] sm:$0xff] %v8125_v55  ;;  %v8137_v15 = vmul.f32 %v10959_v10, %v1458_v49  ;;  %v8168_v55 = vmul.f32 %v10972_v40, %v2070_v50  ;;  %s10975_s6 = sld [smem:[#allocation185_spill]]  ;;  %v1487_v50 = vsel %vm381_vm5, %v1484_v51, 0.0  ;;  %v1630_v51 = vpop.permute.xlu2 %1629  ;;  %v11012_v31 = vstv %s10938_s17 }
 0x2c3   : > { %10966 = vst [vmem:[#allocation286_spill] sm:$0xff] %v8153_v17  ;;  %v10967_v49 = vstv %s10954_s25  ;;  %s10977_s12 = sld [smem:[#allocation74_spill]]  ;;  %v11005_v17 = vstv %s7713_s2  ;;  %v8255_v11 = vmul.f32 %v11014_v28, %v1986_v20 }
 0x2c4   : > { %v8157_v10 = vmul.f32 %v10967_v49, %v1722_v24  ;;  %10971 = vst [vmem:[#allocation288_spill] sm:$0xff] %v8164_v34  ;;  %v10979_v49 = vstv %s10960_s24  ;;  %s10982_s28 = sld [smem:[#allocation52_spill]]  ;;  %v1403_v34 = vsel %vm381_vm5, %v1400_v57, 0.0 }
 0x2c5   : > { %10973 = vst [vmem:[#allocation289_spill] sm:$0xff] %v8168_v55  ;;  %v8181_v4 = vmul.f32 %v10979_v49, %v2105_v46  ;;  %v10981_v35 = vstv %s10961_s16  ;;  %s10984_s23 = sld [smem:[#allocation116_spill]]  ;;  %v1748_v55 = vpop.permute.xlu1 %1747  ;;  %2683 = vrot.lane.b32.xlu1 %v6845_v22, %s10978_s4  ;;  %2857 = vrot.lane.b32.xlu0 %v6688_v36, %s10978_s4 }
 0x2c6   : > { %10969 = vst [vmem:[#allocation287_spill] sm:$0xff] %v8157_v10  ;;  %v8185_v40 = vmul.f32 %v10981_v35, %v2105_v46  ;;  %v10985_v56 = vstv %s10965_s3  ;;  %s10988_s30 = sld [smem:[#allocation121_spill]]  ;;  %v1457_v35 = vsel %vm382_vm4, %v1454_v9, 0.0  ;;  %v10999_v10 = vstv %s7924_s19  ;;  %2773 = vrot.lane.b32.xlu2 %v6887_v21, %s10978_s4 }
 0x2c7   : > { %10976 = vst [vmem:[#allocation290_spill] sm:$0xff] %v8172_v45  ;;  %v8193_v45 = vmul.f32 %v10985_v56, %v2105_v46  ;;  %v10987_v44 = vstv %s10968_s27  ;;  %s10990_s16 = sld [smem:[#allocation61_spill]]  ;;  %v1461_v61 = vmul.f32 %v11005_v17, %v1457_v35  ;;  %v11043_v21 = vstv %s10954_s25 }
 0x2c8   : > { %10980 = vst [vmem:[#allocation291_spill] sm:$0xff] %v8181_v4  ;;  %v8197_v49 = vmul.f32 %v10987_v44, %v2105_v46  ;;  %v10991_v19 = vstv %s10975_s6  ;;  %v10995_v46 = vstv %s10940_s7  ;;  %s8215_s27 = sld [smem:[#allocation9 + $0x4]] }
 0x2c9   : > { %10983 = vst [vmem:[#allocation292_spill] sm:$0xff] %v8185_v40  ;;  %v8205_v42 = vmul.f32 %v10991_v19, %v1722_v24  ;;  %v10993_v56 = vstv %s10977_s12  ;;  %v1407_v44 = vmul.f32 %v10995_v46, %v1403_v34  ;;  %v8223_v19 = vmul.f32 %v10999_v10, %v1986_v20  ;;  %s8229_s3 = sld [smem:[#allocation9 + $0x5]] }
 0x2ca   : > { %10986 = vst [vmem:[#allocation293_spill] sm:$0xff] %v8193_v45  ;;  %v8209_v45 = vmul.f32 %v10993_v56, %v1722_v24  ;;  %v10997_v9 = vstv %s10982_s28  ;;  %s8239_s28 = sld [smem:[#allocation9 + $0x6]]  ;;  %v11007_v10 = vstv %s8022_s14 }
 0x2cb   : > { %10989 = vst [vmem:[#allocation294_spill] sm:$0xff] %v8197_v49  ;;  %v10996_v49 = vstv %s7998_s10  ;;  %v1491_v4 = vmul.f32 %v10997_v9, %v1487_v50  ;;  %v10998_v39 = vstv %s10984_s23  ;;  %v1751_v9 = vsel %vm381_vm5, %v1748_v55, 0.0  ;;  %s11008_s23 = sld [smem:[#allocation136_spill]] }
 0x2cc   : > { %10992 = vst [vmem:[#allocation295_spill] sm:$0xff] %v8205_v42  ;;  %v1413_v40 = vmul.f32 %v10996_v49, %v1403_v34  ;;  %v1497_v57 = vmul.f32 %v10998_v39, %v1487_v50  ;;  %v11001_v42 = vstv %s7930_s18  ;;  %v11003_v56 = vstv %s10988_s30  ;;  %s11009_s24 = sld [smem:[#allocation66_spill]] }
 0x2cd   : > { %10994 = vst [vmem:[#allocation296_spill] sm:$0xff] %v8209_v45  ;;  %v8227_v24 = vmul.f32 %v11001_v42, %v1986_v20  ;;  %v1503_v49 = vmul.f32 %v11003_v56, %v1487_v50  ;;  %v11004_v46 = vstv %s10990_s16  ;;  %v11006_v39 = vstv %s8004_s21  ;;  %s11013_s2 = sld [smem:[#allocation67_spill]]  ;;  %2721 = vrot.lane.b32.xlu1 %v6894_v47, %s10895_s9  ;;  %2895 = vrot.lane.b32.xlu0 %v7077_v60, %s10895_s9 }
 0x2ce   : > { %11000 = vst [vmem:[#allocation297_spill] sm:$0xff] %v8223_v19  ;;  %v1509_v45 = vmul.f32 %v11004_v46, %v1487_v50  ;;  %v1419_v16 = vmul.f32 %v11006_v39, %v1403_v34  ;;  %v1425_v19 = vmul.f32 %v11007_v10, %v1403_v34  ;;  %v1433_v42 = vadd.f32 %v6857_v52, %v1407_v44  ;;  %s11018_s17 = sld [smem:[#allocation53_spill]] }
 0x2cf   : > { %11002 = vst [vmem:[#allocation298_spill] sm:$0xff] %v8227_v24  ;;  %v1439_v56 = vadd.f32 %v6860_v5, %v1413_v40  ;;  %v11010_v24 = vstv %s7722_s13  ;;  %v11011_v46 = vstv %s10937_s20  ;;  %v1479_v55 = vmul.f32 %v11012_v31, %v1457_v35  ;;  %s11016_s13 = sld [smem:[#allocation68_spill]]  ;;  %2805 = vrot.lane.b32.xlu2 %v6707_v62, %s10895_s9 }
 0x2d0   : > { %v1467_v50 = vmul.f32 %v11010_v24, %v1457_v35  ;;  %v1473_v17 = vmul.f32 %v11011_v46, %v1457_v35  ;;  %11015 = vst [vmem:[#allocation299_spill] sm:$0xff] %v8255_v11  ;;  %v1632_v34 = vsel %vm382_vm4, %v1630_v51, 0.0  ;;  %v1445_v52 = vadd.f32 %v6868_v48, %v1419_v16  ;;  %s11017_s20 = sld [smem:[#allocation75_spill]]  ;;  %v1576_v48 = vpop.permute.xlu0 %1575 }
 0x2d1   : > { %v1451_v5 = vadd.f32 %v6871_v58, %v1425_v19  ;;  %v1463_v31 = vadd.f32 %v1461_v61, %v1433_v42  ;;  %s8267_s16 = sld [smem:[#allocation9 + $0x7]]  ;;  %v11019_v28 = vstv %s11008_s23  ;;  %v11022_v51 = vstv %s7965_s29  ;;  %v2012_v61 = vpop.permute.xlu1 %2011  ;;  %v1718_v19 = vpop.permute.xlu2 %1717 }
 0x2d2   : > { %s11020_s30 = sld [smem:[#allocation170_spill]]  ;;  %v8271_v40 = vmul.f32 %v11019_v28, %v1751_v9  ;;  %v11021_v35 = vstv %s11009_s24  ;;  %v8279_v22 = vmul.f32 %v11022_v51, %v1986_v20  ;;  %v1469_v44 = vadd.f32 %v1467_v50, %v1439_v56 }
 0x2d3   : > { %v8275_v53 = vmul.f32 %v11021_v35, %v1751_v9  ;;  %v11024_v16 = vstv %s11013_s2  ;;  %v1475_v24 = vadd.f32 %v1473_v17, %v1445_v52  ;;  %v1481_v39 = vadd.f32 %v1479_v55, %v1451_v5  ;;  %s11027_s24 = sld [smem:[#allocation70_spill]]  ;;  %v11056_v5 = vld [vmem:[#allocation58_spill] sm:$0xff] }
 0x2d4   : > { %11023 = vst [vmem:[#allocation300_spill] sm:$0xff] %v8279_v22  ;;  %v8283_v58 = vmul.f32 %v11024_v16, %v1751_v9  ;;  %v1493_v10 = vadd.f32 %v1491_v4, %v1463_v31  ;;  %v11028_v56 = vstv %s11018_s17  ;;  %s11029_s23 = sld [smem:[#allocation71_spill]]  ;;  %v1499_v35 = vadd.f32 %v1497_v57, %v1469_v44 }
 0x2d5   : > { %v11025_v42 = vstv %s11016_s13  ;;  %v8295_v50 = vmul.f32 %v11028_v56, %v1632_v34  ;;  %s11030_s2 = sld [smem:[#allocation72_spill]]  ;;  %v11033_v17 = vstv %s7916_s8  ;;  %v2015_v4 = vsel %vm381_vm5, %v2012_v61, 0.0  ;;  %2803 = vrot.lane.b32.xlu1 %v6688_v36, %s10895_s9  ;;  %2983 = vrot.lane.b32.xlu0 %v7119_v18, %s10895_s9 }
 0x2d6   : > { %v8287_v46 = vmul.f32 %v11025_v42, %v1751_v9  ;;  %v11026_v28 = vstv %s11017_s20  ;;  %s11032_s29 = sld [smem:[#allocation77_spill]]  ;;  %v8303_v55 = vmul.f32 %v11033_v17, %v1632_v34  ;;  %v1578_v9 = vsel %vm381_vm5, %v1576_v48, 0.0 }
 0x2d7   : > { %v8291_v20 = vmul.f32 %v11026_v28, %v1632_v34  ;;  %v1721_v52 = vsel %vm382_vm4, %v1718_v19, 0.0  ;;  %v1505_v57 = vadd.f32 %v1503_v49, %v1475_v24  ;;  %v1511_v44 = vadd.f32 %v1509_v45, %v1481_v39  ;;  %s11034_s13 = sld [smem:[#allocation73_spill]] }
 0x2d8   : > { %v11031_v51 = vstv %s11020_s30  ;;  %v1517_v28 = vadd.f32 %v6874_v7, %v1493_v10  ;;  %s8334_s22 = sld [smem:[#allocation9 + $0x108]]  ;;  %v11042_v10 = vstv %s7814_s0  ;;  %v1664_v47 = vpop.permute.xlu0 %1663  ;;  %v11054_v49 = vstv %s8022_s14 }
 0x2d9   : > { %v8299_v16 = vmul.f32 %v11031_v51, %v1632_v34  ;;  %v1523_v34 = vadd.f32 %v6877_v14, %v1499_v35  ;;  %v11035_v56 = vstv %s11027_s24  ;;  %v1529_v7 = vadd.f32 %v6890_v6, %v1505_v57  ;;  %s11040_s24 = sld [smem:[#allocation46_spill]]  ;;  %v1402_v57 = vpop.permute.xlu1 %1401 }
 0x2da   : > { %v8318_v61 = vmul.f32 %v11035_v56, %v2015_v4  ;;  %v11036_v48 = vstv %s11029_s23  ;;  %v1535_v14 = vadd.f32 %v6902_v54, %v1511_v44  ;;  %v1547_v45 = vadd.f32 %v7888_v3, %v1517_v28  ;;  %s11044_s23 = sld [smem:[#allocation42_spill]] }
 0x2db   : > { %v8322_v51 = vmul.f32 %v11036_v48, %v2015_v4  ;;  %v11037_v19 = vstv %s11030_s2  ;;  %v8352_v35 = vmul.f32 %v11042_v10, %v1721_v52  ;;  %v8356_v6 = vmul.f32 %v11043_v21, %v1721_v52  ;;  %s11045_s2 = sld [smem:[#allocation194_spill]] }
 0x2dc   : > { %v8326_v17 = vmul.f32 %v11037_v19, %v2015_v4  ;;  %v11038_v42 = vstv %s11032_s29  ;;  %s8344_s29 = sld [smem:[#allocation9 + $0x109]]  ;;  %v1553_v54 = vadd.f32 %v7892_v27, %v1523_v34  ;;  %v11046_v3 = vstv %s10975_s6 }
 0x2dd   : > { %v8330_v31 = vmul.f32 %v11038_v42, %v1578_v9  ;;  %v11039_v24 = vstv %s11034_s13  ;;  %s8359_s26 = sld [smem:[#allocation9 + $0x10a]]  ;;  %v8363_v42 = vmul.f32 %v11046_v3, %v1721_v52  ;;  %v1559_v44 = vadd.f32 %v7896_v38, %v1529_v7  ;;  %2859 = vrot.lane.b32.xlu1 %v6707_v62, %s10978_s4 }
 0x2de   : > { %v8348_v39 = vmul.f32 %v11039_v24, %v2015_v4  ;;  %v1894_v4 = vpop.permute.xlu2 %1893  ;;  %v1565_v28 = vadd.f32 %v7914_v12, %v1535_v14  ;;  %v1583_v56 = vadd.f32 %v8034_v8, %v1547_v45  ;;  %s8368_s0 = sld [smem:[#allocation9 + $0x10b]]  ;;  %v11047_v27 = vstv %s10977_s12 }
 0x2df   : > { %v8372_v34 = vmul.f32 %v11047_v27, %v1721_v52  ;;  %v1404_v48 = vsel %vm381_vm5, %v1402_v57, 0.0  ;;  %v11048_v19 = vstv %s11040_s24  ;;  %v1589_v10 = vadd.f32 %v8038_v26, %v1553_v54  ;;  %s8522_s14 = sld [smem:[#allocation9 + $0x4d]] }
 0x2e0   : > { %11041 = vst [vmem:[#allocation301_spill] sm:$0xff] %v8348_v39  ;;  %v8378_v24 = vmul.f32 %v11048_v19, %v1578_v9  ;;  %v8383_v38 = vsel %vm382_vm4, %v1894_v4, 0.0  ;;  %v11049_v12 = vstv %s11044_s23  ;;  %v1667_v52 = vsel %vm381_vm5, %v1664_v47, 0.0  ;;  %v11059_v39 = vld [vmem:[#allocation33_spill] sm:$0xff]  ;;  %s11097_s12 = sld [smem:[#allocation41_spill]] }
 0x2e1   : > { %v1594_v7 = vmul.f32 %v11049_v12, %v1578_v9  ;;  %v11050_v8 = vstv %s11045_s2  ;;  %v11051_v45 = vstv %s10940_s7  ;;  %v11052_v3 = vstv %s7998_s10  ;;  %s11082_s10 = sld [smem:[#allocation45_spill]] }
 0x2e2   : > { %v1600_v14 = vmul.f32 %v11050_v8, %v1578_v9  ;;  %v1408_v21 = vmul.f32 %v11051_v45, %v1404_v48  ;;  %v1414_v57 = vmul.f32 %v11052_v3, %v1404_v48  ;;  %v11053_v27 = vstv %s8004_s21  ;;  %v11055_v9 = vld [vmem:[#allocation76_spill] sm:$0xff]  ;;  %v11057_v45 = vld [vmem:[#allocation59_spill] sm:$0xff]  ;;  %v11058_v3 = vld [vmem:[#allocation60_spill] sm:$0xff]  ;;  %s11083_s21 = sld [smem:[#allocation43_spill]] }
 0x2e3   : > { %v1420_v19 = vmul.f32 %v11053_v27, %v1404_v48  ;;  %v1426_v26 = vmul.f32 %v11054_v49, %v1404_v48  ;;  %v1595_v54 = vadd.f32 %v8044_v33, %v1559_v44  ;;  %v1601_v4 = vadd.f32 %v8048_v41, %v1565_v28  ;;  %v11061_v41 = vld [vmem:[#allocation79_spill] sm:$0xff]  ;;  %s8500_s7 = sld [smem:[#allocation9 + $0x4c]] }
 0x2e4   : > { %v1607_v12 = vadd.f32 %v6957_v0, %v1583_v56  ;;  %v1613_v8 = vadd.f32 %v11055_v9, %v1589_v10  ;;  %v1434_v47 = vadd.f32 %v11056_v5, %v1408_v21  ;;  %v1440_v22 = vadd.f32 %v11057_v45, %v1414_v57  ;;  %v11060_v0 = vld [vmem:[#allocation78_spill] sm:$0xff]  ;;  %v1628_v57 = vpop.permute.xlu1 %1627  ;;  %s11098_s25 = sld [smem:[#allocation47_spill]] }
 0x2e5   : > { %v1446_v11 = vadd.f32 %v11058_v3, %v1420_v19  ;;  %v1452_v27 = vadd.f32 %v11059_v39, %v1426_v26  ;;  %v1619_v33 = vadd.f32 %v11060_v0, %v1595_v54  ;;  %v1625_v5 = vadd.f32 %v11061_v41, %v1601_v4  ;;  %v11069_v41 = vld [vmem:[#allocation38_spill] sm:$0xff]  ;;  %v11081_v4 = vld [vmem:[#allocation36_spill] sm:$0xff]  ;;  %s8619_s6 = sld [smem:[#allocation9 + $0x4f]] }
 0x2e6   : > { %v2162_v49 = vstv %s8334_s22  ;;  %v2168_v44 = vstv %s8344_s29  ;;  %v1464_v39 = vadd.f32 %v8086_v13, %v1434_v47  ;;  %v1470_v28 = vadd.f32 %v8105_v37, %v1440_v22  ;;  %v1982_v21 = vpop.permute.xlu2 %1981  ;;  %s11163_s13 = sld [smem:[#allocation49_spill]] }
 0x2e7   : > { %v1476_v56 = vadd.f32 %v8131_v2, %v1446_v11  ;;  %v1482_v48 = vadd.f32 %v8137_v15, %v1452_v27  ;;  %v11062_v10 = vstv %s8040_s5  ;;  %v11063_v19 = vstv %s8215_s27  ;;  %v1840_v15 = vpop.permute.xlu0 %1839  ;;  %v11067_v27 = vld [vmem:[#allocation35_spill] sm:$0xff]  ;;  %s11164_s24 = sld [smem:[#allocation50_spill]] }
 0x2e8   : > { %v8424_v36 = vmul.f32 %v11062_v10, %v8383_v38  ;;  %v1671_v26 = vmul.f32 %v11063_v19, %v1667_v52  ;;  %v2174_v54 = vstv %s8359_s26  ;;  %v1494_v13 = vadd.f32 %v7786_v63, %v1464_v39  ;;  %s11165_s23 = sld [smem:[#allocation51_spill]] }
 0x2e9   : > { %v1500_v37 = vadd.f32 %v7799_v32, %v1470_v28  ;;  %v1506_v11 = vadd.f32 %v7803_v1, %v1476_v56  ;;  %v1512_v2 = vadd.f32 %v7807_v30, %v1482_v48  ;;  %v11064_v22 = vstv %s8057_s15  ;;  %v11068_v30 = vld [vmem:[#allocation32_spill] sm:$0xff]  ;;  %v11070_v28 = vld [vmem:[#allocation37_spill] sm:$0xff]  ;;  %s8804_s2 = sld [smem:[#allocation9 + $0xce]] }
 0x2ea   : > { %v8437_v9 = vmul.f32 %v11064_v22, %v8383_v38  ;;  %v11065_v47 = vstv %s8067_s1  ;;  %v1631_v3 = vsel %vm382_vm4, %v1628_v57, 0.0  ;;  %v11066_v63 = vstv %s8229_s3  ;;  %s8872_s26 = sld [smem:[#allocation9 + $0x10d]] }
 0x2eb   : > { %v8442_v45 = vmul.f32 %v11065_v47, %v8383_v38  ;;  %v1677_v32 = vmul.f32 %v11066_v63, %v1667_v52  ;;  %v1518_v1 = vadd.f32 %v11067_v27, %v1494_v13  ;;  %v1524_v0 = vadd.f32 %v11068_v30, %v1500_v37  ;;  %s8880_s22 = sld [smem:[#allocation9 + $0x10e]] }
 0x2ec   : > { %v1530_v39 = vadd.f32 %v11069_v41, %v1506_v11  ;;  %v1536_v56 = vadd.f32 %v11070_v28, %v1512_v2  ;;  %v8454_v48 = vsel %vm382_vm4, %v1982_v21, 0.0  ;;  %v11071_v10 = vstv %s8239_s28  ;;  %s8892_s29 = sld [smem:[#allocation9 + $0x10f]] }
 0x2ed   : > { %v1683_v19 = vmul.f32 %v11071_v10, %v1667_v52  ;;  %v11072_v57 = vstv %s8267_s16  ;;  %v8462_v47 = vsel %vm381_vm5, %v1840_v15, 0.0  ;;  %v1548_v13 = vadd.f32 %v8008_v59, %v1518_v1  ;;  %v11077_v10 = vld [vmem:[#allocation82_spill] sm:$0xff] }
 0x2ee   : > { %v1689_v22 = vmul.f32 %v11072_v57, %v1667_v52  ;;  %v1554_v37 = vadd.f32 %v8012_v23, %v1524_v0  ;;  %v1560_v11 = vadd.f32 %v8026_v25, %v1530_v39  ;;  %v1566_v2 = vadd.f32 %v8030_v43, %v1536_v56  ;;  %2893 = vrot.lane.b32.xlu2 %v11077_v10, %s10895_s9  ;;  %v11078_v57 = vld [vmem:[#allocation40_spill] sm:$0xff] }
 0x2ef   : > { %v11073_v21 = vstv %s11017_s20  ;;  %v11074_v27 = vstv %s11018_s17  ;;  %v11075_v52 = vstv %s11020_s30  ;;  %v11076_v28 = vstv %s7916_s8  ;;  %s11089_s8 = sld [smem:[#allocation172_spill]] }
 0x2f0   : > { %v1635_v63 = vmul.f32 %v11073_v21, %v1631_v3  ;;  %v1641_v30 = vmul.f32 %v11074_v27, %v1631_v3  ;;  %v1647_v41 = vmul.f32 %v11075_v52, %v1631_v3  ;;  %v1653_v15 = vmul.f32 %v11076_v28, %v1631_v3  ;;  %v11079_v3 = vld [vmem:[#allocation39_spill] sm:$0xff]  ;;  %v11080_v52 = vld [vmem:[#allocation34_spill] sm:$0xff]  ;;  %2947 = vrot.lane.b32.xlu1 %v11077_v10, %s10978_s4  ;;  %s8631_s20 = sld [smem:[#allocation9 + $0xb]] }
 0x2f1   : > { %v1584_v59 = vadd.f32 %v8330_v31, %v1548_v13  ;;  %v1590_v25 = vadd.f32 %v8378_v24, %v1554_v37  ;;  %v1596_v23 = vadd.f32 %v1594_v7, %v1560_v11  ;;  %v1602_v43 = vadd.f32 %v1600_v14, %v1566_v2  ;;  %v2158_v24 = vpop.permute.xlu2 %2157  ;;  %v11086_v2 = vld [vmem:[#allocation81_spill] sm:$0xff]  ;;  %s8648_s17 = sld [smem:[#allocation9 + $0x6c]] }
 0x2f2   : > { %v1637_v1 = vadd.f32 %v1635_v63, %v1607_v12  ;;  %v1643_v0 = vadd.f32 %v1641_v30, %v1613_v8  ;;  %v1649_v39 = vadd.f32 %v1647_v41, %v1619_v33  ;;  %v1655_v56 = vadd.f32 %v1653_v15, %v1625_v5  ;;  %s11161_s30 = sld [smem:[#allocation31_spill]] }
 0x2f3   : > { %v1608_v21 = vadd.f32 %v11078_v57, %v1584_v59  ;;  %v1614_v27 = vadd.f32 %v11079_v3, %v1590_v25  ;;  %v1620_v28 = vadd.f32 %v11080_v52, %v1596_v23  ;;  %v1626_v31 = vadd.f32 %v11081_v4, %v1602_v43  ;;  %v11085_v4 = vld [vmem:[#allocation80_spill] sm:$0xff]  ;;  %v11094_v23 = vld [vmem:[#allocation109_spill] sm:$0xff] }
 0x2f4   : > { %v1673_v7 = vadd.f32 %v1671_v26, %v1637_v1  ;;  %v1679_v14 = vadd.f32 %v1677_v32, %v1643_v0  ;;  %v1685_v62 = vadd.f32 %v1683_v19, %v1649_v39  ;;  %v1691_v12 = vadd.f32 %v1689_v22, %v1655_v56  ;;  %v11087_v26 = vld [vmem:[#allocation83_spill] sm:$0xff]  ;;  %v11088_v32 = vld [vmem:[#allocation84_spill] sm:$0xff]  ;;  %v1666_v22 = vpop.permute.xlu1 %1665  ;;  %3039 = vrot.lane.b32.xlu0 %v11094_v23, %s10978_s4 }
 0x2f5   : > { %v11084_v8 = vstv %s8082_s11  ;;  %v1638_v5 = vadd.f32 %v8291_v20, %v1608_v21  ;;  %v1644_v13 = vadd.f32 %v8295_v50, %v1614_v27  ;;  %v1650_v37 = vadd.f32 %v8299_v16, %v1620_v28 }
 0x2f6   : > { %v8491_v33 = vmul.f32 %v11084_v8, %v8383_v38  ;;  %v1697_v11 = vadd.f32 %v11085_v4, %v1673_v7  ;;  %v1703_v63 = vadd.f32 %v11086_v2, %v1679_v14  ;;  %v1709_v30 = vadd.f32 %v11087_v26, %v1685_v62  ;;  %2949 = vrot.lane.b32.xlu2 %v7077_v60, %s10978_s4  ;;  %v11106_v26 = vld [vmem:[#allocation97_spill] sm:$0xff] }
 0x2f7   : > { %v1715_v19 = vadd.f32 %v11088_v32, %v1691_v12  ;;  %v11090_v38 = vstv %s7924_s19  ;;  %v11091_v20 = vstv %s7930_s18  ;;  %v11092_v16 = vstv %s11082_s10  ;;  %s11095_s19 = sld [smem:[#allocation266_spill]]  ;;  %v11107_v32 = vld [vmem:[#allocation98_spill] sm:$0xff] }
 0x2f8   : > { %v8505_v41 = vmul.f32 %v11090_v38, %v8454_v48  ;;  %v8510_v50 = vmul.f32 %v11091_v20, %v8454_v48  ;;  %v8515_v15 = vmul.f32 %v11092_v16, %v8462_v47  ;;  %v11093_v59 = vstv %s11083_s21  ;;  %s8532_s18 = sld [smem:[#allocation9 + $0x4e]]  ;;  %v11109_v20 = vld [vmem:[#allocation85_spill] sm:$0xff]  ;;  %2985 = vrot.lane.b32.xlu1 %v11094_v23, %s10895_s9  ;;  %v11126_v23 = vld [vmem:[#allocation272_spill] sm:$0xff] }
 0x2f9   : > { %v8520_v25 = vmul.f32 %v11093_v59, %v8462_v47  ;;  %v1727_v43 = vadd.f32 %v8352_v35, %v1697_v11  ;;  %v1733_v1 = vadd.f32 %v8356_v6, %v1703_v63  ;;  %v1739_v0 = vadd.f32 %v8363_v42, %v1709_v30  ;;  %v2246_v11 = vpop.permute.xlu2 %2245  ;;  %v11110_v59 = vld [vmem:[#allocation86_spill] sm:$0xff]  ;;  %s8810_s10 = sld [smem:[#allocation9 + $0xc]] }
 0x2fa   : > { %v1745_v39 = vadd.f32 %v8372_v34, %v1715_v19  ;;  %v11096_v56 = vstv %s11089_s8  ;;  %v8541_v6 = vsel %vm382_vm4, %v2158_v24, 0.0  ;;  %v1656_v42 = vadd.f32 %v8303_v55, %v1626_v31  ;;  %s8816_s21 = sld [smem:[#allocation9 + $0xd]] }
 0x2fb   : > { %v8537_v35 = vmul.f32 %v11096_v56, %v8454_v48  ;;  %v1668_v34 = vsel %vm381_vm5, %v1666_v22, 0.0  ;;  %v1757_v60 = vadd.f32 %v8271_v40, %v1727_v43  ;;  %v1763_v57 = vadd.f32 %v8275_v53, %v1733_v1  ;;  %v11108_v22 = vld [vmem:[#allocation99_spill] sm:$0xff]  ;;  %s8824_s8 = sld [smem:[#allocation9 + $0xe]] }
 0x2fc   : > { %v1769_v21 = vadd.f32 %v8283_v58, %v1739_v0  ;;  %v1775_v3 = vadd.f32 %v8287_v46, %v1745_v39  ;;  %v11099_v27 = vstv %s8215_s27  ;;  %v11100_v28 = vstv %s8229_s3  ;;  %s8590_s27 = sld [smem:[#allocation9 + $0x8]] }
 0x2fd   : > { %v1672_v52 = vmul.f32 %v11099_v27, %v1668_v34  ;;  %v1678_v24 = vmul.f32 %v11100_v28, %v1668_v34  ;;  %v11101_v55 = vstv %s8239_s28  ;;  %v11102_v7 = vstv %s8267_s16  ;;  %s8603_s3 = sld [smem:[#allocation9 + $0x9]]  ;;  %v11116_v27 = vld [vmem:[#allocation295_spill] sm:$0xff]  ;;  %v11117_v28 = vld [vmem:[#allocation296_spill] sm:$0xff] }
 0x2fe   : > { %v1684_v31 = vmul.f32 %v11101_v55, %v1668_v34  ;;  %v1690_v14 = vmul.f32 %v11102_v7, %v1668_v34  ;;  %v11103_v62 = vstv %s11095_s19  ;;  %v8568_v40 = vmul.f32 %v2162_v49, %v8541_v6  ;;  %3037 = vrot.lane.b32.xlu2 %v7119_v18, %s10978_s4  ;;  %v11114_v34 = vld [vmem:[#allocation286_spill] sm:$0xff]  ;;  %v11119_v7 = vld [vmem:[#allocation263_spill] sm:$0xff]  ;;  %v11121_v18 = vld [vmem:[#allocation265_spill] sm:$0xff]  ;;  %s8625_s28 = sld [smem:[#allocation9 + $0xa]] }
 0x2ff   : > { %v8563_v10 = vmul.f32 %v11103_v62, %v8454_v48  ;;  %v8573_v53 = vmul.f32 %v2168_v44, %v8541_v6  ;;  %v11104_v58 = vstv %s11097_s12  ;;  %v1674_v12 = vadd.f32 %v1672_v52, %v1638_v5  ;;  %v11111_v5 = vld [vmem:[#allocation87_spill] sm:$0xff]  ;;  %v11118_v55 = vld [vmem:[#allocation100_spill] sm:$0xff]  ;;  %s8655_s16 = sld [smem:[#allocation9 + $0x6d]] }
 0x300   : > { %v8578_v46 = vmul.f32 %v11104_v58, %v8462_v47  ;;  %v1680_v8 = vadd.f32 %v1678_v24, %v1644_v13  ;;  %v1686_v4 = vadd.f32 %v1684_v31, %v1650_v37  ;;  %v1692_v48 = vadd.f32 %v1690_v14, %v1656_v42  ;;  %v11112_v13 = vld [vmem:[#allocation88_spill] sm:$0xff]  ;;  %v11113_v37 = vld [vmem:[#allocation57_spill] sm:$0xff]  ;;  %s8832_s19 = sld [smem:[#allocation9 + $0xf]] }
 0x301   : > { %v11105_v2 = vstv %s11098_s25  ;;  %v1781_v30 = vadd.f32 %v11106_v26, %v1757_v60  ;;  %v1787_v19 = vadd.f32 %v11107_v32, %v1763_v57  ;;  %v1793_v38 = vadd.f32 %v11108_v22, %v1769_v21  ;;  %3121 = vrot.lane.b32.xlu0 %v11113_v37, %s10978_s4  ;;  %v11115_v57 = vld [vmem:[#allocation287_spill] sm:$0xff]  ;;  %v11120_v62 = vld [vmem:[#allocation264_spill] sm:$0xff]  ;;  %3067 = vrot.lane.b32.xlu1 %v11113_v37, %s10895_s9  ;;  %s8838_s12 = sld [smem:[#allocation9 + $0xcf]] }
 0x302   : > { %v1864_v63 = vmul.f32 %v11105_v2, %v8462_v47  ;;  %v1698_v16 = vadd.f32 %v11109_v20, %v1674_v12  ;;  %v1704_v43 = vadd.f32 %v11110_v59, %v1680_v8  ;;  %v1710_v1 = vadd.f32 %v11111_v5, %v1686_v4  ;;  %v11122_v8 = vld [vmem:[#allocation257_spill] sm:$0xff]  ;;  %v11124_v2 = vld [vmem:[#allocation259_spill] sm:$0xff]  ;;  %v11125_v32 = vld [vmem:[#allocation260_spill] sm:$0xff]  ;;  %v1892_v20 = vpop.permute.xlu1 %1891  ;;  %s8864_s25 = sld [smem:[#allocation9 + $0x10c]] }
 0x303   : > { %v1716_v0 = vadd.f32 %v11112_v13, %v1692_v48  ;;  %v2252_v47 = vstv %s8500_s7  ;;  %v2258_v39 = vstv %s8522_s14  ;;  %v2264_v56 = vstv %s8532_s18  ;;  %v11123_v48 = vld [vmem:[#allocation258_spill] sm:$0xff]  ;;  %s9005_s7 = sld [smem:[#allocation9 + $0x70]] }
 0x304   : > { %v8599_v42 = vsel %vm382_vm4, %v2246_v11, 0.0  ;;  %v1728_v60 = vadd.f32 %v11114_v34, %v1698_v16  ;;  %v1734_v21 = vadd.f32 %v11115_v57, %v1704_v43  ;;  %v1740_v52 = vadd.f32 %v11116_v27, %v1710_v1  ;;  %v11131_v13 = vld [vmem:[#allocation90_spill] sm:$0xff]  ;;  %v11132_v34 = vld [vmem:[#allocation91_spill] sm:$0xff]  ;;  %v11133_v57 = vld [vmem:[#allocation92_spill] sm:$0xff]  ;;  %v1928_v27 = vpop.permute.xlu0 %1927  ;;  %s9013_s14 = sld [smem:[#allocation9 + $0x71]] }
 0x305   : > { %v1746_v24 = vadd.f32 %v11117_v28, %v1716_v0  ;;  %v1799_v31 = vadd.f32 %v11118_v55, %v1775_v3  ;;  %v1811_v14 = vadd.f32 %v11119_v7, %v1781_v30  ;;  %v1817_v58 = vadd.f32 %v11120_v62, %v1787_v19  ;;  %v11127_v3 = vld [vmem:[#allocation281_spill] sm:$0xff]  ;;  %v11128_v30 = vld [vmem:[#allocation282_spill] sm:$0xff]  ;;  %v11129_v19 = vld [vmem:[#allocation283_spill] sm:$0xff]  ;;  %s9025_s18 = sld [smem:[#allocation9 + $0x72]] }
 0x306   : > { %v1823_v12 = vadd.f32 %v11121_v18, %v1793_v38  ;;  %v1758_v4 = vadd.f32 %v11122_v8, %v1728_v60  ;;  %v1764_v11 = vadd.f32 %v11123_v48, %v1734_v21  ;;  %v1770_v26 = vadd.f32 %v11124_v2, %v1740_v52  ;;  %v11130_v38 = vld [vmem:[#allocation89_spill] sm:$0xff]  ;;  %v11134_v52 = vld [vmem:[#allocation284_spill] sm:$0xff] }
 0x307   : > { %v1776_v22 = vadd.f32 %v11125_v32, %v1746_v24  ;;  %v1829_v16 = vadd.f32 %v11126_v23, %v1799_v31  ;;  %v1847_v59 = vadd.f32 %v11127_v3, %v1811_v14  ;;  %v1853_v43 = vadd.f32 %v11128_v30, %v1817_v58  ;;  %v11135_v24 = vld [vmem:[#allocation101_spill] sm:$0xff]  ;;  %v11136_v31 = vld [vmem:[#allocation102_spill] sm:$0xff]  ;;  %v11137_v14 = vld [vmem:[#allocation103_spill] sm:$0xff] }
 0x308   : > { %v1859_v5 = vadd.f32 %v11129_v19, %v1823_v12  ;;  %v1782_v1 = vadd.f32 %v11130_v38, %v1758_v4  ;;  %v1788_v0 = vadd.f32 %v11131_v13, %v1764_v11  ;;  %v1794_v60 = vadd.f32 %v11132_v34, %v1770_v26  ;;  %v11138_v58 = vld [vmem:[#allocation277_spill] sm:$0xff]  ;;  %v11139_v12 = vld [vmem:[#allocation278_spill] sm:$0xff]  ;;  %v11140_v4 = vld [vmem:[#allocation279_spill] sm:$0xff] }
 0x309   : > { %v1800_v21 = vadd.f32 %v11133_v57, %v1776_v22  ;;  %v1865_v28 = vadd.f32 %v11134_v52, %v1829_v16  ;;  %v1871_v55 = vadd.f32 %v11135_v24, %v1847_v59  ;;  %v1877_v7 = vadd.f32 %v11136_v31, %v1853_v43  ;;  %v11141_v11 = vld [vmem:[#allocation280_spill] sm:$0xff]  ;;  %v11142_v26 = vld [vmem:[#allocation142_spill] sm:$0xff]  ;;  %v11143_v32 = vld [vmem:[#allocation104_spill] sm:$0xff] }
 0x30a   : > { %v1883_v62 = vadd.f32 %v11137_v14, %v1859_v5  ;;  %v1812_v18 = vadd.f32 %v11138_v58, %v1782_v1  ;;  %v1818_v8 = vadd.f32 %v11139_v12, %v1788_v0  ;;  %v1824_v48 = vadd.f32 %v11140_v4, %v1794_v60  ;;  %3159 = vrot.lane.b32.xlu0 %v11142_v26, %s10895_s9  ;;  %v11144_v59 = vld [vmem:[#allocation55_spill] sm:$0xff]  ;;  %v11149_v60 = vld [vmem:[#allocation93_spill] sm:$0xff] }
 0x30b   : > { %v1830_v2 = vadd.f32 %v11141_v11, %v1800_v21  ;;  %v1889_v22 = vadd.f32 %v11143_v32, %v1865_v28  ;;  %v1895_v23 = vsel %vm382_vm4, %v1892_v20, 0.0  ;;  %v1934_v16 = vstv %s8590_s27  ;;  %3069 = vrot.lane.b32.xlu2 %v11144_v59, %s10895_s9  ;;  %v11151_v21 = vld [vmem:[#allocation95_spill] sm:$0xff]  ;;  %v11152_v28 = vld [vmem:[#allocation96_spill] sm:$0xff]  ;;  %3123 = vrot.lane.b32.xlu1 %v11144_v59, %s10978_s4  ;;  %s8929_s27 = sld [smem:[#allocation9 + $0x51]] }
 0x30c   : > { %v1940_v3 = vstv %s8603_s3  ;;  %v1848_v30 = vadd.f32 %v8515_v15, %v1812_v18  ;;  %v1854_v43 = vadd.f32 %v8520_v25, %v1818_v8  ;;  %v1860_v19 = vadd.f32 %v8578_v46, %v1824_v48  ;;  %v1930_v48 = vpop.permute.xlu1 %1929  ;;  %s8935_s3 = sld [smem:[#allocation9 + $0x52]] }
 0x30d   : > { %v1866_v5 = vadd.f32 %v1864_v63, %v1830_v2  ;;  %v11145_v20 = vstv %s8040_s5  ;;  %v11146_v1 = vstv %s8057_s15  ;;  %v11147_v0 = vstv %s8067_s1  ;;  %v11150_v63 = vld [vmem:[#allocation94_spill] sm:$0xff]  ;;  %s8704_s5 = sld [smem:[#allocation9 + $0x6f]] }
 0x30e   : > { %v1899_v38 = vmul.f32 %v11145_v20, %v1895_v23  ;;  %v1905_v13 = vmul.f32 %v11146_v1, %v1895_v23  ;;  %v1911_v34 = vmul.f32 %v11147_v0, %v1895_v23  ;;  %v11148_v15 = vstv %s8082_s11  ;;  %s8676_s11 = sld [smem:[#allocation9 + $0x6e]] }
 0x30f   : > { %v1917_v25 = vmul.f32 %v11148_v15, %v1895_v23  ;;  %v1872_v46 = vadd.f32 %v11149_v60, %v1848_v30  ;;  %v1878_v57 = vadd.f32 %v11150_v63, %v1854_v43  ;;  %v1884_v52 = vadd.f32 %v11151_v21, %v1860_v19  ;;  %v2278_v30 = vpop.permute.xlu2 %2277  ;;  %v2104_v43 = vpop.permute.xlu0 %2103  ;;  %v11154_v19 = vld [vmem:[#allocation149_spill] sm:$0xff]  ;;  %s8720_s15 = sld [smem:[#allocation9 + $0xcc]] }
 0x310   : > { %v1890_v24 = vadd.f32 %v11152_v28, %v1866_v5  ;;  %v1901_v37 = vadd.f32 %v1899_v38, %v1871_v55  ;;  %v1907_v31 = vadd.f32 %v1905_v13, %v1877_v7  ;;  %v1913_v14 = vadd.f32 %v1911_v34, %v1883_v62  ;;  %v11157_v63 = vld [vmem:[#allocation106_spill] sm:$0xff]  ;;  %v11158_v28 = vld [vmem:[#allocation107_spill] sm:$0xff]  ;;  %s8728_s1 = sld [smem:[#allocation9 + $0xcd]] }
 0x311   : > { %v1919_v58 = vadd.f32 %v1917_v25, %v1889_v22  ;;  %v2270_v18 = vstv %s8619_s6  ;;  %v1946_v12 = vstv %s8625_s28  ;;  %v1952_v8 = vstv %s8631_s20  ;;  %v11156_v25 = vld [vmem:[#allocation105_spill] sm:$0xff]  ;;  %s8945_s28 = sld [smem:[#allocation9 + $0x53]] }
 0x312   : > { %v1931_v4 = vsel %vm381_vm5, %v1928_v27, 0.0  ;;  %v8685_v62 = vmul.f32 %v2174_v54, %v8541_v6  ;;  %v11153_v32 = vstv %s8368_s0  ;;  %v8695_v22 = vmul.f32 %v2252_v47, %v8599_v42  ;;  %3247 = vrot.lane.b32.xlu0 %v11154_v19, %s10895_s9  ;;  %s8949_s20 = sld [smem:[#allocation9 + $0xac]] }
 0x313   : > { %v1935_v11 = vmul.f32 %v1934_v16, %v1931_v4  ;;  %v1941_v2 = vmul.f32 %v1940_v3, %v1931_v4  ;;  %v1947_v55 = vmul.f32 %v1946_v12, %v1931_v4  ;;  %v1953_v7 = vmul.f32 %v1952_v8, %v1931_v4  ;;  %s9059_s6 = sld [smem:[#allocation9 + $0xd0]] }
 0x314   : > { %v8690_v27 = vmul.f32 %v11153_v32, %v8541_v6  ;;  %v8700_v23 = vmul.f32 %v2258_v39, %v8599_v42  ;;  %v11155_v6 = vld [vmem:[#allocation132_spill] sm:$0xff]  ;;  %v8711_v13 = vmul.f32 %v2264_v56, %v8599_v42  ;;  %v8716_v0 = vmul.f32 %v2270_v18, %v8599_v42 }
 0x315   : > { %v1937_v5 = vadd.f32 %v1935_v11, %v1901_v37  ;;  %v1943_v20 = vadd.f32 %v1941_v2, %v1907_v31  ;;  %v1949_v38 = vadd.f32 %v1947_v55, %v1913_v14  ;;  %v1955_v1 = vadd.f32 %v1953_v7, %v1919_v58  ;;  %3157 = vrot.lane.b32.xlu2 %v11155_v6, %s10895_s9  ;;  %v11159_v31 = vld [vmem:[#allocation108_spill] sm:$0xff] }
 0x316   : > { %v2282_v34 = vstv %s8648_s17  ;;  %v2288_v15 = vstv %s8655_s16  ;;  %v1902_v42 = vadd.f32 %v8424_v36, %v1872_v46  ;;  %v1908_v58 = vadd.f32 %v8437_v9, %v1878_v57  ;;  %3211 = vrot.lane.b32.xlu1 %v11155_v6, %s10978_s4  ;;  %s9061_s17 = sld [smem:[#allocation9 + $0xd1]] }
 0x317   : > { %v1961_v60 = vadd.f32 %v11156_v25, %v1937_v5  ;;  %v1967_v21 = vadd.f32 %v11157_v63, %v1943_v20  ;;  %v1973_v37 = vadd.f32 %v11158_v28, %v1949_v38  ;;  %v1979_v14 = vadd.f32 %v11159_v31, %v1955_v1  ;;  %v2366_v5 = vpop.permute.xlu2 %2365  ;;  %v8777_v20 = vpop.permute.xlu0 %2191  ;;  %v11167_v63 = vld [vmem:[#allocation124_spill] sm:$0xff]  ;;  %s9072_s16 = sld [smem:[#allocation9 + $0xd2]] }
 0x318   : > { %v1914_v4 = vadd.f32 %v8442_v45, %v1884_v52  ;;  %v1920_v59 = vadd.f32 %v8491_v33, %v1890_v24  ;;  %v2294_v32 = vstv %s8676_s11  ;;  %v8741_v36 = vsel %vm381_vm5, %v2278_v30, 0.0  ;;  %v11162_v30 = vld [vmem:[#allocation147_spill] sm:$0xff]  ;;  %s9078_s11 = sld [smem:[#allocation9 + $0xd3]] }
 0x319   : > { %v1991_v11 = vadd.f32 %v8505_v41, %v1961_v60  ;;  %v1997_v2 = vadd.f32 %v8510_v50, %v1967_v21  ;;  %v2003_v55 = vadd.f32 %v8537_v35, %v1973_v37  ;;  %v2009_v7 = vadd.f32 %v8563_v10, %v1979_v14  ;;  %v11160_v35 = vld [vmem:[#allocation301_spill] sm:$0xff]  ;;  %v11170_v14 = vld [vmem:[#allocation112_spill] sm:$0xff] }
 0x31a   : > { %v1932_v9 = vsel %vm381_vm5, %v1930_v48, 0.0  ;;  %v2106_v45 = vsel %vm381_vm5, %v2104_v43, 0.0  ;;  %v8755_v48 = vpop.permute.xlu1 %2155  ;;  %3303 = vrot.lane.b32.xlu0 %v11162_v30, %s10978_s4  ;;  %v11166_v38 = vstv %s11161_s30  ;;  %v2372_v25 = vstv %s8720_s15  ;;  %v11169_v37 = vld [vmem:[#allocation111_spill] sm:$0xff]  ;;  %s8959_s30 = sld [smem:[#allocation9 + $0xad]] }
 0x31b   : > { %v2021_v33 = vadd.f32 %v8318_v61, %v1991_v11  ;;  %v2027_v41 = vadd.f32 %v8322_v51, %v1997_v2  ;;  %v2033_v50 = vadd.f32 %v8326_v17, %v2003_v55  ;;  %v2039_v10 = vadd.f32 %v11160_v35, %v2009_v7  ;;  %v11175_v35 = vld [vmem:[#allocation297_spill] sm:$0xff]  ;;  %s9133_s15 = sld [smem:[#allocation9 + $0x110]] }
 0x31c   : > { %v1936_v46 = vmul.f32 %v1934_v16, %v1932_v9  ;;  %v1942_v57 = vmul.f32 %v1940_v3, %v1932_v9  ;;  %v1948_v52 = vmul.f32 %v1946_v12, %v1932_v9  ;;  %v1954_v24 = vmul.f32 %v1952_v8, %v1932_v9 }
 0x31d   : > { %v2300_v61 = vstv %s8704_s5  ;;  %v8763_v51 = vmul.f32 %v2282_v34, %v8741_v36  ;;  %v8768_v17 = vmul.f32 %v2288_v15, %v8741_v36  ;;  %v8773_v16 = vmul.f32 %v2294_v32, %v8741_v36  ;;  %3213 = vrot.lane.b32.xlu2 %v11142_v26, %s10978_s4  ;;  %v11168_v26 = vld [vmem:[#allocation110_spill] sm:$0xff]  ;;  %s9085_s5 = sld [smem:[#allocation9 + $0x10]] }
 0x31e   : > { %v1938_v3 = vadd.f32 %v1936_v46, %v1902_v42  ;;  %v1944_v12 = vadd.f32 %v1942_v57, %v1908_v58  ;;  %v1950_v8 = vadd.f32 %v1948_v52, %v1914_v4  ;;  %v1956_v43 = vadd.f32 %v1954_v24, %v1920_v59  ;;  %v11171_v58 = vld [vmem:[#allocation113_spill] sm:$0xff]  ;;  %v11176_v46 = vld [vmem:[#allocation298_spill] sm:$0xff]  ;;  %3249 = vrot.lane.b32.xlu1 %v11162_v30, %s10895_s9 }
 0x31f   : > { %v2110_v1 = vmul.f32 %v11166_v38, %v2106_v45  ;;  %v2378_v60 = vstv %s8728_s1  ;;  %v2045_v21 = vadd.f32 %v11167_v63, %v2021_v33  ;;  %v11172_v59 = vstv %s11163_s13  ;;  %v11177_v52 = vld [vmem:[#allocation299_spill] sm:$0xff]  ;;  %v11180_v38 = vld [vmem:[#allocation126_spill] sm:$0xff]  ;;  %s8973_s13 = sld [smem:[#allocation9 + $0xaf]] }
 0x320   : > { %v1962_v28 = vadd.f32 %v11168_v26, %v1938_v3  ;;  %v1968_v31 = vadd.f32 %v11169_v37, %v1944_v12  ;;  %v1974_v42 = vadd.f32 %v11170_v14, %v1950_v8  ;;  %v1980_v4 = vadd.f32 %v11171_v58, %v1956_v43  ;;  %v11178_v3 = vld [vmem:[#allocation300_spill] sm:$0xff]  ;;  %v11179_v8 = vld [vmem:[#allocation125_spill] sm:$0xff]  ;;  %v11181_v26 = vld [vmem:[#allocation127_spill] sm:$0xff]  ;;  %s9141_s1 = sld [smem:[#allocation9 + $0x111]] }
 0x321   : > { %v2116_v11 = vmul.f32 %v11172_v59, %v2106_v45  ;;  %v11173_v2 = vstv %s11164_s24  ;;  %v11174_v7 = vstv %s11165_s23  ;;  %v8798_v9 = vsel %vm381_vm5, %v2366_v5, 0.0  ;;  %v11182_v37 = vld [vmem:[#allocation273_spill] sm:$0xff]  ;;  %v11183_v5 = vld [vmem:[#allocation267_spill] sm:$0xff]  ;;  %v11185_v59 = vld [vmem:[#allocation270_spill] sm:$0xff]  ;;  %s9095_s24 = sld [smem:[#allocation9 + $0x11]] }
 0x322   : > { %v2122_v55 = vmul.f32 %v11173_v2, %v2106_v45  ;;  %v2128_v6 = vmul.f32 %v11174_v7, %v2106_v45  ;;  %v1992_v33 = vadd.f32 %v11175_v35, %v1962_v28  ;;  %v1998_v57 = vadd.f32 %v11176_v46, %v1968_v31  ;;  %v11184_v58 = vld [vmem:[#allocation268_spill] sm:$0xff]  ;;  %v11186_v2 = vld [vmem:[#allocation271_spill] sm:$0xff]  ;;  %s9097_s23 = sld [smem:[#allocation9 + $0x12]] }
 0x323   : > { %v2004_v24 = vadd.f32 %v11177_v52, %v1974_v42  ;;  %v2010_v12 = vadd.f32 %v11178_v3, %v1980_v4  ;;  %v2051_v43 = vadd.f32 %v11179_v8, %v2027_v41  ;;  %v2057_v63 = vadd.f32 %v11180_v38, %v2033_v50  ;;  %v11187_v41 = vld [vmem:[#allocation54_spill] sm:$0xff]  ;;  %v11188_v50 = vld [vmem:[#allocation274_spill] sm:$0xff]  ;;  %v11191_v52 = vld [vmem:[#allocation291_spill] sm:$0xff] }
 0x324   : > { %v2063_v45 = vadd.f32 %v11181_v26, %v2039_v10  ;;  %v2075_v14 = vadd.f32 %v11182_v37, %v2045_v21  ;;  %v2022_v28 = vadd.f32 %v11183_v5, %v1992_v33  ;;  %v2028_v31 = vadd.f32 %v11184_v58, %v1998_v57  ;;  %3385 = vrot.lane.b32.xlu0 %v11187_v41, %s10978_s4  ;;  %v11189_v10 = vld [vmem:[#allocation275_spill] sm:$0xff]  ;;  %v11190_v21 = vld [vmem:[#allocation276_spill] sm:$0xff]  ;;  %v11194_v8 = vld [vmem:[#allocation117_spill] sm:$0xff] }
 0x325   : > { %v2034_v42 = vadd.f32 %v11185_v59, %v2004_v24  ;;  %v2040_v4 = vadd.f32 %v11186_v2, %v2010_v12  ;;  %v2081_v7 = vadd.f32 %v11188_v50, %v2051_v43  ;;  %v2087_v35 = vadd.f32 %v11189_v10, %v2057_v63  ;;  %3301 = vrot.lane.b32.xlu2 %v11154_v19, %s10978_s4  ;;  %v11192_v33 = vld [vmem:[#allocation114_spill] sm:$0xff]  ;;  %v11193_v24 = vld [vmem:[#allocation115_spill] sm:$0xff]  ;;  %v11195_v26 = vld [vmem:[#allocation118_spill] sm:$0xff]  ;;  %v8834_v43 = vpop.permute.xlu1 %2193 }
 0x326   : > { %v2093_v46 = vadd.f32 %v11190_v21, %v2063_v45  ;;  %v2111_v3 = vadd.f32 %v11191_v52, %v2075_v14  ;;  %v2046_v57 = vadd.f32 %v11192_v33, %v2022_v28  ;;  %v2052_v12 = vadd.f32 %v11193_v24, %v2028_v31  ;;  %v11196_v63 = vld [vmem:[#allocation292_spill] sm:$0xff]  ;;  %v11197_v19 = vld [vmem:[#allocation293_spill] sm:$0xff]  ;;  %v11198_v5 = vld [vmem:[#allocation294_spill] sm:$0xff]  ;;  %v8848_v52 = vpop.permute.xlu0 %2247  ;;  %3331 = vrot.lane.b32.xlu1 %v11187_v41, %s10895_s9 }
 0x327   : > { %v2058_v38 = vadd.f32 %v11194_v8, %v2034_v42  ;;  %v2064_v37 = vadd.f32 %v11195_v26, %v2040_v4  ;;  %v2117_v45 = vadd.f32 %v11196_v63, %v2081_v7  ;;  %v2123_v14 = vadd.f32 %v11197_v19, %v2087_v35  ;;  %v11199_v58 = vld [vmem:[#allocation128_spill] sm:$0xff]  ;;  %v11200_v59 = vld [vmem:[#allocation285_spill] sm:$0xff]  ;;  %v11203_v10 = vld [vmem:[#allocation290_spill] sm:$0xff] }
 0x328   : > { %v2129_v28 = vadd.f32 %v11198_v5, %v2093_v46  ;;  %v2135_v31 = vadd.f32 %v11199_v58, %v2111_v3  ;;  %v2076_v42 = vadd.f32 %v11200_v59, %v2046_v57  ;;  %v11201_v2 = vld [vmem:[#allocation288_spill] sm:$0xff]  ;;  %v11202_v50 = vld [vmem:[#allocation289_spill] sm:$0xff]  ;;  %v11205_v33 = vld [vmem:[#allocation130_spill] sm:$0xff]  ;;  %v2159_v3 = vsel %vm382_vm4, %v8755_v48, 0.0  ;;  %v2422_v5 = vpop.permute.xlu2 %2421 }
 0x329   : > { %v2082_v4 = vadd.f32 %v11201_v2, %v2052_v12  ;;  %v2088_v30 = vadd.f32 %v11202_v50, %v2058_v38  ;;  %v2094_v21 = vadd.f32 %v11203_v10, %v2064_v37  ;;  %v11204_v7 = vld [vmem:[#allocation129_spill] sm:$0xff]  ;;  %v2147_v24 = vadd.f32 %v11205_v33, %v2123_v14  ;;  %v11206_v46 = vld [vmem:[#allocation131_spill] sm:$0xff]  ;;  %v11208_v48 = vld [vmem:[#allocation119_spill] sm:$0xff] }
 0x32a   : > { %v2141_v35 = vadd.f32 %v11204_v7, %v2117_v45  ;;  %v2153_v8 = vadd.f32 %v11206_v46, %v2129_v28  ;;  %v2112_v57 = vadd.f32 %v2110_v1, %v2076_v42  ;;  %v2163_v38 = vmul.f32 %v2162_v49, %v2159_v3 }
 0x32b   : > { %v2118_v26 = vadd.f32 %v2116_v11, %v2082_v4  ;;  %v2124_v63 = vadd.f32 %v2122_v55, %v2088_v30  ;;  %v2130_v12 = vadd.f32 %v2128_v6, %v2094_v21  ;;  %v2169_v37 = vmul.f32 %v2168_v44, %v2159_v3  ;;  %v11209_v11 = vld [vmem:[#allocation120_spill] sm:$0xff]  ;;  %v11210_v6 = vld [vmem:[#allocation122_spill] sm:$0xff]  ;;  %v11211_v44 = vld [vmem:[#allocation123_spill] sm:$0xff] }
 0x32c   : > { %v2175_v19 = vmul.f32 %v2174_v54, %v2159_v3  ;;  %v11207_v45 = vstv %s8368_s0  ;;  %v2136_v1 = vadd.f32 %v11208_v48, %v2112_v57  ;;  %v11212_v54 = vld [vmem:[#allocation166_spill] sm:$0xff]  ;;  %v2165_v58 = vadd.f32 %v2163_v38, %v2135_v31  ;;  %v11213_v4 = vld [vmem:[#allocation56_spill] sm:$0xff]  ;;  %s8910_s0 = sld [smem:[#allocation9 + $0x50]] }
 0x32d   : > { %v2181_v14 = vmul.f32 %v11207_v45, %v2159_v3  ;;  %v2142_v55 = vadd.f32 %v11209_v11, %v2118_v26  ;;  %v2148_v49 = vadd.f32 %v11210_v6, %v2124_v63  ;;  %v2154_v28 = vadd.f32 %v11211_v44, %v2130_v12  ;;  %3423 = vrot.lane.b32.xlu0 %v11212_v54, %s10895_s9  ;;  %v11215_v11 = vld [vmem:[#allocation134_spill] sm:$0xff]  ;;  %v11216_v6 = vld [vmem:[#allocation135_spill] sm:$0xff] }
 0x32e   : > { %v2171_v59 = vadd.f32 %v2169_v37, %v2141_v35  ;;  %v2177_v42 = vadd.f32 %v2175_v19, %v2147_v24  ;;  %3333 = vrot.lane.b32.xlu2 %v11213_v4, %s10895_s9  ;;  %v2198_v50 = vstv %s8810_s10  ;;  %v2204_v30 = vstv %s8816_s21  ;;  %v8912_v19 = vpop.permute.xlu0 %2329  ;;  %3387 = vrot.lane.b32.xlu1 %v11213_v4, %s10978_s4  ;;  %s9106_s10 = sld [smem:[#allocation9 + $0x13]] }
 0x32f   : > { %v2183_v2 = vadd.f32 %v2181_v14, %v2153_v8  ;;  %v2210_v10 = vstv %s8824_s8  ;;  %v2216_v21 = vstv %s8832_s19  ;;  %v8885_v7 = vmul.f32 %v2300_v61, %v8741_v36  ;;  %v8896_v36 = vpop.permute.xlu1 %2275  ;;  %s9158_s21 = sld [smem:[#allocation9 + $0x113]] }
 0x330   : > { %v2384_v31 = vstv %s8804_s2  ;;  %v2390_v35 = vstv %s8838_s12  ;;  %v2195_v33 = vsel %vm381_vm5, %v8777_v20, 0.0  ;;  %v8901_v57 = vmul.f32 %v2372_v25, %v8798_v9  ;;  %s9149_s2 = sld [smem:[#allocation9 + $0x112]] }
 0x331   : > { %v2199_v24 = vmul.f32 %v2198_v50, %v2195_v33  ;;  %v2205_v46 = vmul.f32 %v2204_v30, %v2195_v33  ;;  %v2211_v8 = vmul.f32 %v2210_v10, %v2195_v33  ;;  %v2217_v3 = vmul.f32 %v2216_v21, %v2195_v33  ;;  %v2510_v33 = vpop.permute.xlu2 %2509  ;;  %s9184_s8 = sld [smem:[#allocation9 + $0x54]] }
 0x332   : > { %v8906_v20 = vmul.f32 %v2378_v60, %v8798_v9  ;;  %v2166_v26 = vadd.f32 %v8568_v40, %v2136_v1  ;;  %v2172_v41 = vadd.f32 %v8573_v53, %v2142_v55  ;;  %v8917_v45 = vmul.f32 %v2384_v31, %v8798_v9  ;;  %v11214_v53 = vld [vmem:[#allocation133_spill] sm:$0xff]  ;;  %s9196_s19 = sld [smem:[#allocation9 + $0x55]] }
 0x333   : > { %v2201_v63 = vadd.f32 %v2199_v24, %v2165_v58  ;;  %v2207_v12 = vadd.f32 %v2205_v46, %v2171_v59  ;;  %v2213_v38 = vadd.f32 %v2211_v8, %v2177_v42  ;;  %v2219_v37 = vadd.f32 %v2217_v3, %v2183_v2  ;;  %v11217_v58 = vld [vmem:[#allocation137_spill] sm:$0xff]  ;;  %v11218_v24 = vld [vmem:[#allocation162_spill] sm:$0xff]  ;;  %s9207_s12 = sld [smem:[#allocation9 + $0x56]] }
 0x334   : > { %v8922_v14 = vmul.f32 %v2390_v35, %v8798_v9  ;;  %v2426_v48 = vstv %s8864_s25  ;;  %v8927_v40 = vsel %vm382_vm4, %v2422_v5, 0.0  ;;  %v2178_v9 = vadd.f32 %v8685_v62, %v2148_v49  ;;  %s9216_s25 = sld [smem:[#allocation9 + $0x57]] }
 0x335   : > { %v2225_v1 = vadd.f32 %v11214_v53, %v2201_v63  ;;  %v2231_v55 = vadd.f32 %v11215_v11, %v2207_v12  ;;  %v2237_v44 = vadd.f32 %v11216_v6, %v2213_v38  ;;  %v2243_v59 = vadd.f32 %v11217_v58, %v2219_v37  ;;  %v11219_v37 = vld [vmem:[#allocation138_spill] sm:$0xff]  ;;  %v11221_v53 = vld [vmem:[#allocation140_spill] sm:$0xff]  ;;  %v11222_v6 = vld [vmem:[#allocation141_spill] sm:$0xff] }
 0x336   : > { %v2184_v5 = vadd.f32 %v8690_v27, %v2154_v28  ;;  %v2196_v42 = vsel %vm381_vm5, %v8834_v43, 0.0  ;;  %v2250_v2 = vsel %vm382_vm4, %v8848_v52, 0.0  ;;  %3421 = vrot.lane.b32.xlu2 %v11218_v24, %s10895_s9  ;;  %v2432_v43 = vstv %s8872_s26  ;;  %s8963_s9 = sld [smem:[#allocation9 + $0xae]]  ;;  %3475 = vrot.lane.b32.xlu1 %v11218_v24, %s10978_s4 }
 0x337   : > { %v2200_v46 = vmul.f32 %v2198_v50, %v2196_v42  ;;  %v2206_v8 = vmul.f32 %v2204_v30, %v2196_v42  ;;  %v2212_v62 = vmul.f32 %v2210_v10, %v2196_v42  ;;  %v2218_v27 = vmul.f32 %v2216_v21, %v2196_v42  ;;  %v8979_v58 = vpop.permute.xlu1 %2331  ;;  %s9218_s26 = sld [smem:[#allocation9 + $0xb0]] }
 0x338   : > { %v2438_v49 = vstv %s8880_s22  ;;  %v2444_v28 = vstv %s8892_s29  ;;  %v8957_v52 = vmul.f32 %v2426_v48, %v8927_v40  ;;  %v2254_v3 = vmul.f32 %v2252_v47, %v2250_v2  ;;  %s9226_s22 = sld [smem:[#allocation9 + $0xb1]] }
 0x339   : > { %v2202_v50 = vadd.f32 %v2200_v46, %v2166_v26  ;;  %v2208_v30 = vadd.f32 %v2206_v8, %v2172_v41  ;;  %v2214_v10 = vadd.f32 %v2212_v62, %v2178_v9  ;;  %v2220_v21 = vadd.f32 %v2218_v27, %v2184_v5  ;;  %v11220_v26 = vld [vmem:[#allocation139_spill] sm:$0xff]  ;;  %v8989_v8 = vpop.permute.xlu0 %2367  ;;  %s9230_s29 = sld [smem:[#allocation9 + $0xb2]] }
 0x33a   : > { %v2260_v63 = vmul.f32 %v2258_v39, %v2250_v2  ;;  %v2266_v12 = vmul.f32 %v2264_v56, %v2250_v2  ;;  %v2272_v38 = vmul.f32 %v2270_v18, %v2250_v2  ;;  %v8984_v39 = vmul.f32 %v2432_v43, %v8927_v40 }
 0x33b   : > { %v2226_v4 = vadd.f32 %v11219_v37, %v2202_v50  ;;  %v2232_v41 = vadd.f32 %v11220_v26, %v2208_v30  ;;  %v2238_v11 = vadd.f32 %v11221_v53, %v2214_v10  ;;  %v2244_v47 = vadd.f32 %v11222_v6, %v2220_v21  ;;  %v11223_v26 = vld [vmem:[#allocation143_spill] sm:$0xff]  ;;  %v11224_v53 = vld [vmem:[#allocation144_spill] sm:$0xff]  ;;  %v11225_v6 = vld [vmem:[#allocation145_spill] sm:$0xff] }
 0x33c   : > { %v2255_v56 = vadd.f32 %v8695_v22, %v2225_v1  ;;  %v2261_v18 = vadd.f32 %v8700_v23, %v2231_v55  ;;  %v2267_v9 = vadd.f32 %v8711_v13, %v2237_v44  ;;  %v8994_v62 = vmul.f32 %v2438_v49, %v8927_v40 }
 0x33d   : > { %v2256_v5 = vadd.f32 %v2254_v3, %v2226_v4  ;;  %v2262_v42 = vadd.f32 %v2260_v63, %v2232_v41  ;;  %v2268_v2 = vadd.f32 %v2266_v12, %v2238_v11  ;;  %v2274_v46 = vadd.f32 %v2272_v38, %v2244_v47  ;;  %v11226_v47 = vld [vmem:[#allocation146_spill] sm:$0xff] }
 0x33e   : > { %v2516_v27 = vstv %s8910_s0  ;;  %v2522_v22 = vstv %s8929_s27  ;;  %v2528_v1 = vstv %s8935_s3  ;;  %3477 = vrot.lane.b32.xlu2 %v11212_v54, %s10978_s4  ;;  %v2273_v50 = vadd.f32 %v8716_v0, %v2243_v59  ;;  %s9034_s4 = sld [smem:[#allocation9 + $0x73]] }
 0x33f   : > { %v2292_v23 = vadd.f32 %v8768_v17, %v2262_v42  ;;  %v2298_v13 = vadd.f32 %v8773_v16, %v2268_v2  ;;  %v2304_v55 = vadd.f32 %v8885_v7, %v2274_v46  ;;  %v2534_v44 = vstv %s8945_s28  ;;  %v2542_v17 = vpop.permute.xlu2 %2541  ;;  %s9243_s27 = sld [smem:[#allocation9 + $0xb3]] }
 0x340   : > { %v2279_v30 = vsel %vm381_vm5, %v8896_v36, 0.0  ;;  %v2336_v10 = vstv %s8949_s20  ;;  %v2342_v21 = vstv %s8959_s30  ;;  %v2513_v36 = vsel %vm382_vm4, %v2510_v33, 0.0  ;;  %s9268_s0 = sld [smem:[#allocation9 + $0x74]] }
 0x341   : > { %v2283_v16 = vmul.f32 %v2282_v34, %v2279_v30  ;;  %v2289_v7 = vmul.f32 %v2288_v15, %v2279_v30  ;;  %v2295_v3 = vmul.f32 %v2294_v32, %v2279_v30  ;;  %v2301_v0 = vmul.f32 %v2300_v61, %v2279_v30  ;;  %s9276_s3 = sld [smem:[#allocation9 + $0x75]] }
 0x342   : > { %v2348_v59 = vstv %s8963_s9  ;;  %v2354_v63 = vstv %s8973_s13  ;;  %v2333_v12 = vsel %vm382_vm4, %v8912_v19, 0.0  ;;  %v9053_v2 = vmul.f32 %v2522_v22, %v2513_v36  ;;  %s9286_s28 = sld [smem:[#allocation9 + $0x76]] }
 0x343   : > { %v2285_v34 = vadd.f32 %v2283_v16, %v2255_v56  ;;  %v2291_v15 = vadd.f32 %v2289_v7, %v2261_v18  ;;  %v2297_v32 = vadd.f32 %v2295_v3, %v2267_v9  ;;  %v2303_v61 = vadd.f32 %v2301_v0, %v2273_v50  ;;  %v9040_v56 = vpop.permute.xlu1 %2419  ;;  %s9293_s20 = sld [smem:[#allocation9 + $0x77]] }
 0x344   : > { %v2337_v38 = vmul.f32 %v2336_v10, %v2333_v12  ;;  %v2343_v37 = vmul.f32 %v2342_v21, %v2333_v12  ;;  %v2349_v4 = vmul.f32 %v2348_v59, %v2333_v12  ;;  %v2355_v33 = vmul.f32 %v2354_v63, %v2333_v12  ;;  %s9316_s30 = sld [smem:[#allocation9 + $0xd4]] }
 0x345   : > { %v2309_v41 = vadd.f32 %v11223_v26, %v2285_v34  ;;  %v2315_v11 = vadd.f32 %v11224_v53, %v2291_v15  ;;  %v2321_v19 = vadd.f32 %v11225_v6, %v2297_v32  ;;  %v2327_v42 = vadd.f32 %v11226_v47, %v2303_v61  ;;  %s9320_s9 = sld [smem:[#allocation9 + $0xd5]] }
 0x346   : > { %v9045_v18 = vmul.f32 %v2444_v28, %v8927_v40  ;;  %v9049_v9 = vmul.f32 %v2516_v27, %v2513_v36  ;;  %v9057_v46 = vmul.f32 %v2528_v1, %v2513_v36  ;;  %v9063_v40 = vpop.permute.xlu0 %2455  ;;  %v2286_v3 = vadd.f32 %v8763_v51, %v2256_v5  ;;  %v11227_v5 = vld [vmem:[#allocation150_spill] sm:$0xff]  ;;  %s9329_s13 = sld [smem:[#allocation9 + $0xd6]] }
 0x347   : > { %v2339_v50 = vadd.f32 %v2337_v38, %v2309_v41  ;;  %v2345_v30 = vadd.f32 %v2343_v37, %v2315_v11  ;;  %v2351_v16 = vadd.f32 %v2349_v4, %v2321_v19  ;;  %v2357_v7 = vadd.f32 %v2355_v33, %v2327_v42  ;;  %v2630_v33 = vpop.permute.xlu2 %2629 }
 0x348   : > { %v9068_v0 = vmul.f32 %v2534_v44, %v2513_v36  ;;  %v2546_v12 = vstv %s9005_s7  ;;  %v2552_v34 = vstv %s9013_s14  ;;  %v2558_v38 = vstv %s9025_s18  ;;  %s9337_s7 = sld [smem:[#allocation9 + $0xd7]] }
 0x349   : > { %v2381_v15 = vadd.f32 %v8906_v20, %v2345_v30  ;;  %v2387_v32 = vadd.f32 %v8917_v45, %v2351_v16  ;;  %v2393_v61 = vadd.f32 %v8922_v14, %v2357_v7  ;;  %v2375_v37 = vadd.f32 %v8901_v57, %v2339_v50  ;;  %v11228_v20 = vld [vmem:[#allocation151_spill] sm:$0xff]  ;;  %v11229_v14 = vld [vmem:[#allocation152_spill] sm:$0xff]  ;;  %s9344_s14 = sld [smem:[#allocation9 + $0x14]] }
 0x34a   : > { %v2564_v4 = vstv %s9034_s4  ;;  %v2544_v51 = vsel %vm381_vm5, %v2542_v17, 0.0  ;;  %v2316_v36 = vadd.f32 %v11227_v5, %v2292_v23  ;;  %v2322_v45 = vadd.f32 %v11228_v20, %v2298_v13  ;;  %s9354_s18 = sld [smem:[#allocation9 + $0x15]] }
 0x34b   : > { %v2328_v26 = vadd.f32 %v11229_v14, %v2304_v55  ;;  %v2334_v57 = vsel %vm382_vm4, %v8979_v58, 0.0  ;;  %v2370_v17 = vsel %vm381_vm5, %v8989_v8, 0.0  ;;  %v11230_v55 = vld [vmem:[#allocation148_spill] sm:$0xff]  ;;  %v9112_v19 = vmul.f32 %v2546_v12, %v2544_v51  ;;  %v9121_v47 = vpop.permute.xlu1 %2457  ;;  %v11231_v14 = vld [vmem:[#allocation157_spill] sm:$0xff]  ;;  %s9356_s4 = sld [smem:[#allocation9 + $0x16]] }
 0x34c   : > { %v2338_v23 = vmul.f32 %v2336_v10, %v2334_v57  ;;  %v2344_v41 = vmul.f32 %v2342_v21, %v2334_v57  ;;  %v2350_v53 = vmul.f32 %v2348_v59, %v2334_v57  ;;  %v2356_v13 = vmul.f32 %v2354_v63, %v2334_v57 }
 0x34d   : > { %v2310_v11 = vadd.f32 %v11230_v55, %v2286_v3  ;;  %v2380_v58 = vmul.f32 %v2378_v60, %v2370_v17  ;;  %v2386_v6 = vmul.f32 %v2384_v31, %v2370_v17  ;;  %v2392_v8 = vmul.f32 %v2390_v35, %v2370_v17  ;;  %v11235_v55 = vld [vmem:[#allocation160_spill] sm:$0xff] }
 0x34e   : > { %v2346_v10 = vadd.f32 %v2344_v41, %v2316_v36  ;;  %v2352_v21 = vadd.f32 %v2350_v53, %v2322_v45  ;;  %v2358_v59 = vadd.f32 %v2356_v13, %v2328_v26  ;;  %v2374_v63 = vmul.f32 %v2372_v25, %v2370_v17  ;;  %v2512_v36 = vpop.permute.xlu0 %2511  ;;  %v11233_v17 = vld [vmem:[#allocation158_spill] sm:$0xff]  ;;  %v11234_v41 = vld [vmem:[#allocation159_spill] sm:$0xff] }
 0x34f   : > { %v9116_v60 = vmul.f32 %v2552_v34, %v2544_v51  ;;  %v2636_v31 = vstv %s9059_s6  ;;  %v2633_v35 = vsel %vm381_vm5, %v2630_v33, 0.0  ;;  %v2340_v42 = vadd.f32 %v2338_v23, %v2310_v11  ;;  %s9390_s6 = sld [smem:[#allocation9 + $0x114]] }
 0x350   : > { %v2382_v50 = vadd.f32 %v2380_v58, %v2346_v10  ;;  %v2388_v30 = vadd.f32 %v2386_v6, %v2352_v21  ;;  %v2394_v16 = vadd.f32 %v2392_v8, %v2358_v59  ;;  %v9125_v25 = vmul.f32 %v2558_v38, %v2544_v51 }
 0x351   : > { %v9129_v7 = vmul.f32 %v2564_v4, %v2544_v51  ;;  %v2642_v3 = vstv %s9061_s17  ;;  %v2648_v5 = vstv %s9072_s16  ;;  %v2376_v33 = vadd.f32 %v2374_v63, %v2340_v42  ;;  %v11232_v51 = vld [vmem:[#allocation154_spill] sm:$0xff]  ;;  %v11236_v42 = vld [vmem:[#allocation153_spill] sm:$0xff]  ;;  %s9398_s17 = sld [smem:[#allocation9 + $0x115]] }
 0x352   : > { %v2654_v20 = vstv %s9078_s11  ;;  %v9138_v45 = vmul.f32 %v2636_v31, %v2633_v35  ;;  %v2399_v26 = vadd.f32 %v11231_v14, %v2375_v37  ;;  %v2406_v57 = vadd.f32 %v11232_v51, %v2382_v50  ;;  %s9406_s16 = sld [smem:[#allocation9 + $0x116]] }
 0x353   : > { %v2405_v23 = vadd.f32 %v11233_v17, %v2381_v15  ;;  %v2411_v53 = vadd.f32 %v11234_v41, %v2387_v32  ;;  %v2423_v13 = vsel %vm382_vm4, %v9040_v56, 0.0  ;;  %v2417_v11 = vadd.f32 %v11235_v55, %v2393_v61  ;;  %v2686_v15 = vpop.permute.xlu2 %2685  ;;  %v11238_v41 = vld [vmem:[#allocation156_spill] sm:$0xff]  ;;  %v9182_v55 = vpop.permute.xlu1 %2539  ;;  %s9415_s11 = sld [smem:[#allocation9 + $0x117]] }
 0x354   : > { %v2433_v37 = vmul.f32 %v2432_v43, %v2423_v13  ;;  %v2439_v58 = vmul.f32 %v2438_v49, %v2423_v13  ;;  %v2445_v6 = vmul.f32 %v2444_v28, %v2423_v13  ;;  %v2462_v8 = vstv %s9085_s5  ;;  %v11237_v43 = vld [vmem:[#allocation155_spill] sm:$0xff]  ;;  %s9365_s5 = sld [smem:[#allocation9 + $0x17]] }
 0x355   : > { %v2468_v32 = vstv %s9095_s24  ;;  %v2474_v10 = vstv %s9097_s23  ;;  %v2480_v21 = vstv %s9106_s10  ;;  %v2427_v56 = vmul.f32 %v2426_v48, %v2423_v13  ;;  %s9439_s24 = sld [smem:[#allocation9 + $0x58]] }
 0x356   : > { %v2435_v59 = vadd.f32 %v2433_v37, %v2405_v23  ;;  %v2441_v63 = vadd.f32 %v2439_v58, %v2411_v53  ;;  %v2447_v61 = vadd.f32 %v2445_v6, %v2417_v11  ;;  %v2400_v50 = vadd.f32 %v11236_v42, %v2376_v33  ;;  %s9451_s23 = sld [smem:[#allocation9 + $0x59]] }
 0x357   : > { %v2412_v14 = vadd.f32 %v11237_v43, %v2388_v30  ;;  %v9170_v49 = vmul.f32 %v2642_v3, %v2633_v35  ;;  %v2459_v28 = vsel %vm381_vm5, %v9063_v40, 0.0  ;;  %v2418_v53 = vadd.f32 %v11238_v41, %v2394_v16  ;;  %v9198_v43 = vpop.permute.xlu0 %2593  ;;  %s9460_s10 = sld [smem:[#allocation9 + $0x5a]] }
 0x358   : > { %v2463_v51 = vmul.f32 %v2462_v8, %v2459_v28  ;;  %v2469_v17 = vmul.f32 %v2468_v32, %v2459_v28  ;;  %v2475_v48 = vmul.f32 %v2474_v10, %v2459_v28  ;;  %v2481_v23 = vmul.f32 %v2480_v21, %v2459_v28 }
 0x359   : > { %v2690_v33 = vstv %s9133_s15  ;;  %v9179_v30 = vsel %vm382_vm4, %v2686_v15, 0.0  ;;  %v2436_v13 = vadd.f32 %v8984_v39, %v2406_v57  ;;  %v2429_v40 = vadd.f32 %v2427_v56, %v2399_v26  ;;  %s9470_s15 = sld [smem:[#allocation9 + $0x5b]] }
 0x35a   : > { %v2471_v11 = vadd.f32 %v2469_v17, %v2435_v59  ;;  %v2477_v37 = vadd.f32 %v2475_v48, %v2441_v63  ;;  %v2483_v58 = vadd.f32 %v2481_v23, %v2447_v61  ;;  %v9188_v6 = vmul.f32 %v2648_v5, %v2633_v35  ;;  %v11241_v23 = vld [vmem:[#allocation161_spill] sm:$0xff] }
 0x35b   : > { %v9192_v16 = vmul.f32 %v2654_v20, %v2633_v35  ;;  %v2696_v42 = vstv %s9141_s1  ;;  %v2702_v15 = vstv %s9149_s2  ;;  %v2465_v39 = vadd.f32 %v2463_v51, %v2429_v40  ;;  %v2774_v17 = vpop.permute.xlu2 %2773  ;;  %v11243_v40 = vld [vmem:[#allocation168_spill] sm:$0xff]  ;;  %s9472_s1 = sld [smem:[#allocation9 + $0xb4]] }
 0x35c   : > { %v2708_v57 = vstv %s9158_s21  ;;  %v9204_v26 = vmul.f32 %v2690_v33, %v9179_v30  ;;  %v2430_v56 = vadd.f32 %v8957_v52, %v2400_v50  ;;  %v2442_v35 = vadd.f32 %v8994_v62, %v2412_v14  ;;  %v11239_v62 = vld [vmem:[#allocation163_spill] sm:$0xff]  ;;  %v11240_v14 = vld [vmem:[#allocation164_spill] sm:$0xff]  ;;  %s9480_s2 = sld [smem:[#allocation9 + $0xb5]] }
 0x35d   : > { %v2448_v59 = vadd.f32 %v9045_v18, %v2418_v53  ;;  %v2460_v63 = vsel %vm381_vm5, %v9121_v47, 0.0  ;;  %v2514_v61 = vsel %vm382_vm4, %v2512_v36, 0.0  ;;  %v2495_v18 = vadd.f32 %v11239_v62, %v2471_v11  ;;  %s9484_s21 = sld [smem:[#allocation9 + $0xb6]] }
 0x35e   : > { %v2464_v28 = vmul.f32 %v2462_v8, %v2460_v63  ;;  %v2470_v51 = vmul.f32 %v2468_v32, %v2460_v63  ;;  %v2476_v52 = vmul.f32 %v2474_v10, %v2460_v63  ;;  %v2482_v50 = vmul.f32 %v2480_v21, %v2460_v63 }
 0x35f   : > { %v2501_v48 = vadd.f32 %v11240_v14, %v2477_v37  ;;  %v2524_v47 = vmul.f32 %v2522_v22, %v2514_v61  ;;  %v2530_v36 = vmul.f32 %v2528_v1, %v2514_v61  ;;  %v2536_v21 = vmul.f32 %v2534_v44, %v2514_v61  ;;  %v11244_v37 = vld [vmem:[#allocation169_spill] sm:$0xff] }
 0x360   : > { %v2472_v8 = vadd.f32 %v2470_v51, %v2436_v13  ;;  %v2478_v32 = vadd.f32 %v2476_v52, %v2442_v35  ;;  %v2484_v10 = vadd.f32 %v2482_v50, %v2448_v59  ;;  %v2489_v41 = vadd.f32 %v11241_v23, %v2465_v39  ;;  %v11242_v13 = vld [vmem:[#allocation165_spill] sm:$0xff]  ;;  %v11245_v35 = vld [vmem:[#allocation171_spill] sm:$0xff] }
 0x361   : > { %v9236_v53 = vmul.f32 %v2696_v42, %v9179_v30  ;;  %v9241_v22 = vmul.f32 %v2702_v15, %v9179_v30  ;;  %v2466_v1 = vadd.f32 %v2464_v28, %v2430_v56  ;;  %v2507_v44 = vadd.f32 %v11242_v13, %v2483_v58  ;;  %v9254_v56 = vpop.permute.xlu1 %2595 }
 0x362   : > { %v2496_v11 = vadd.f32 %v11243_v40, %v2472_v8  ;;  %v2502_v39 = vadd.f32 %v11244_v37, %v2478_v32  ;;  %v2508_v59 = vadd.f32 %v11245_v35, %v2484_v10  ;;  %v2518_v63 = vmul.f32 %v2516_v27, %v2514_v61  ;;  %v11246_v8 = vld [vmem:[#allocation167_spill] sm:$0xff] }
 0x363   : > { %v2780_v51 = vstv %s9184_s8  ;;  %v2525_v52 = vadd.f32 %v9053_v2, %v2495_v18  ;;  %v2531_v50 = vadd.f32 %v9057_v46, %v2501_v48  ;;  %v2786_v14 = vstv %s9196_s19  ;;  %v9262_v46 = vpop.permute.xlu0 %2631  ;;  %s9497_s19 = sld [smem:[#allocation9 + $0xb7]] }
 0x364   : > { %v2526_v28 = vadd.f32 %v2524_v47, %v2496_v11  ;;  %v2532_v62 = vadd.f32 %v2530_v36, %v2502_v39  ;;  %v2538_v58 = vadd.f32 %v2536_v21, %v2508_v59  ;;  %v2490_v32 = vadd.f32 %v11246_v8, %v2466_v1  ;;  %v11247_v39 = vld [vmem:[#allocation173_spill] sm:$0xff]  ;;  %v11248_v59 = vld [vmem:[#allocation174_spill] sm:$0xff]  ;;  %s9520_s8 = sld [smem:[#allocation9 + $0x78]] }
 0x365   : > { %v2792_v10 = vstv %s9207_s12  ;;  %v2798_v27 = vstv %s9216_s25  ;;  %v2777_v2 = vsel %vm382_vm4, %v2774_v17, 0.0  ;;  %v2519_v47 = vadd.f32 %v9049_v9, %v2489_v41  ;;  %v2806_v41 = vpop.permute.xlu2 %2805  ;;  %s9527_s12 = sld [smem:[#allocation9 + $0x79]] }
 0x366   : > { %v2556_v61 = vadd.f32 %v9116_v60, %v2526_v28  ;;  %v2562_v18 = vadd.f32 %v9125_v25, %v2532_v62  ;;  %v2568_v48 = vadd.f32 %v9129_v7, %v2538_v58  ;;  %v2537_v36 = vadd.f32 %v9068_v0, %v2507_v44  ;;  %v11249_v28 = vld [vmem:[#allocation175_spill] sm:$0xff]  ;;  %v11250_v62 = vld [vmem:[#allocation176_spill] sm:$0xff]  ;;  %s9537_s25 = sld [smem:[#allocation9 + $0x7a]] }
 0x367   : > { %v2543_v17 = vsel %vm381_vm5, %v9182_v55, 0.0  ;;  %v2600_v21 = vstv %s9218_s26  ;;  %v2606_v23 = vstv %s9226_s22  ;;  %v2520_v0 = vadd.f32 %v2518_v63, %v2490_v32  ;;  %s9544_s26 = sld [smem:[#allocation9 + $0x7b]] }
 0x368   : > { %v2547_v60 = vmul.f32 %v2546_v12, %v2543_v17  ;;  %v2553_v25 = vmul.f32 %v2552_v34, %v2543_v17  ;;  %v2559_v7 = vmul.f32 %v2558_v38, %v2543_v17  ;;  %v2565_v9 = vmul.f32 %v2564_v4, %v2543_v17  ;;  %s9567_s22 = sld [smem:[#allocation9 + $0xd8]] }
 0x369   : > { %v2612_v1 = vstv %s9230_s29  ;;  %v2618_v13 = vstv %s9243_s27  ;;  %v2597_v55 = vsel %vm382_vm4, %v9198_v43, 0.0  ;;  %v9310_v8 = vmul.f32 %v2786_v14, %v2777_v2  ;;  %s9569_s29 = sld [smem:[#allocation9 + $0xd9]] }
 0x36a   : > { %v2549_v12 = vadd.f32 %v2547_v60, %v2519_v47  ;;  %v2555_v34 = vadd.f32 %v2553_v25, %v2525_v52  ;;  %v2561_v38 = vadd.f32 %v2559_v7, %v2531_v50  ;;  %v2567_v4 = vadd.f32 %v2565_v9, %v2537_v36  ;;  %v9318_v47 = vpop.permute.xlu1 %2683  ;;  %s9578_s27 = sld [smem:[#allocation9 + $0xda]] }
 0x36b   : > { %v2601_v44 = vmul.f32 %v2600_v21, %v2597_v55  ;;  %v2607_v40 = vmul.f32 %v2606_v23, %v2597_v55  ;;  %v2613_v11 = vmul.f32 %v2612_v1, %v2597_v55  ;;  %v2619_v37 = vmul.f32 %v2618_v13, %v2597_v55 }
 0x36c   : > { %v2573_v35 = vadd.f32 %v11247_v39, %v2549_v12  ;;  %v2579_v63 = vadd.f32 %v11248_v59, %v2555_v34  ;;  %v2585_v43 = vadd.f32 %v11249_v28, %v2561_v38  ;;  %v2591_v58 = vadd.f32 %v11250_v62, %v2567_v4  ;;  %v9331_v12 = vpop.permute.xlu0 %2719 }
 0x36d   : > { %v9302_v52 = vmul.f32 %v2708_v57, %v9179_v30  ;;  %v9306_v50 = vmul.f32 %v2780_v51, %v2777_v2  ;;  %v9314_v32 = vmul.f32 %v2792_v10, %v2777_v2  ;;  %v2550_v25 = vadd.f32 %v9112_v19, %v2520_v0 }
 0x36e   : > { %v2603_v36 = vadd.f32 %v2601_v44, %v2573_v35  ;;  %v2609_v17 = vadd.f32 %v2607_v40, %v2579_v63  ;;  %v2615_v60 = vadd.f32 %v2613_v11, %v2585_v43  ;;  %v2621_v30 = vadd.f32 %v2619_v37, %v2591_v58  ;;  %v11251_v40 = vld [vmem:[#allocation178_spill] sm:$0xff]  ;;  %v11253_v37 = vld [vmem:[#allocation181_spill] sm:$0xff] }
 0x36f   : > { %v9325_v7 = vmul.f32 %v2798_v27, %v2777_v2  ;;  %v2810_v9 = vstv %s9268_s0  ;;  %v2816_v55 = vstv %s9276_s3  ;;  %v2822_v44 = vstv %s9286_s28  ;;  %s9584_s0 = sld [smem:[#allocation9 + $0xdb]] }
 0x370   : > { %v2645_v34 = vadd.f32 %v9170_v49, %v2609_v17  ;;  %v2651_v38 = vadd.f32 %v9188_v6, %v2615_v60  ;;  %v2657_v4 = vadd.f32 %v9192_v16, %v2621_v30  ;;  %v2639_v19 = vadd.f32 %v9138_v45, %v2603_v36  ;;  %v11252_v49 = vld [vmem:[#allocation179_spill] sm:$0xff]  ;;  %s9593_s3 = sld [smem:[#allocation9 + $0x18]] }
 0x371   : > { %v2828_v0 = vstv %s9293_s20  ;;  %v2808_v2 = vsel %vm381_vm5, %v2806_v41, 0.0  ;;  %v2580_v11 = vadd.f32 %v11251_v40, %v2556_v61  ;;  %v2586_v6 = vadd.f32 %v11252_v49, %v2562_v18  ;;  %v2894_v41 = vpop.permute.xlu2 %2893  ;;  %s9602_s28 = sld [smem:[#allocation9 + $0x19]] }
 0x372   : > { %v2592_v16 = vadd.f32 %v11253_v37, %v2568_v48  ;;  %v2598_v39 = vsel %vm382_vm4, %v9254_v56, 0.0  ;;  %v2634_v45 = vsel %vm381_vm5, %v9262_v46, 0.0  ;;  %v11254_v48 = vld [vmem:[#allocation177_spill] sm:$0xff]  ;;  %v9371_v43 = vmul.f32 %v2810_v9, %v2808_v2  ;;  %v2722_v60 = vpop.permute.xlu1 %2721  ;;  %s9604_s20 = sld [smem:[#allocation9 + $0x1a]] }
 0x373   : > { %v2602_v61 = vmul.f32 %v2600_v21, %v2598_v39  ;;  %v2608_v35 = vmul.f32 %v2606_v23, %v2598_v39  ;;  %v2614_v18 = vmul.f32 %v2612_v1, %v2598_v39  ;;  %v2620_v59 = vmul.f32 %v2618_v13, %v2598_v39  ;;  %v11255_v37 = vld [vmem:[#allocation187_spill] sm:$0xff]  ;;  %v11256_v39 = vld [vmem:[#allocation183_spill] sm:$0xff] }
 0x374   : > { %v2574_v63 = vadd.f32 %v11254_v48, %v2550_v25  ;;  %v2644_v56 = vmul.f32 %v2642_v3, %v2634_v45  ;;  %v2650_v28 = vmul.f32 %v2648_v5, %v2634_v45  ;;  %v2656_v46 = vmul.f32 %v2654_v20, %v2634_v45  ;;  %v11259_v48 = vld [vmem:[#allocation190_spill] sm:$0xff] }
 0x375   : > { %v2610_v21 = vadd.f32 %v2608_v35, %v2580_v11  ;;  %v2616_v23 = vadd.f32 %v2614_v18, %v2586_v6  ;;  %v2622_v1 = vadd.f32 %v2620_v59, %v2592_v16  ;;  %v2638_v13 = vmul.f32 %v2636_v31, %v2634_v45  ;;  %v11258_v35 = vld [vmem:[#allocation189_spill] sm:$0xff] }
 0x376   : > { %v9375_v3 = vmul.f32 %v2816_v55, %v2808_v2  ;;  %v2900_v5 = vstv %s9316_s30  ;;  %v2897_v20 = vsel %vm381_vm5, %v2894_v41, 0.0  ;;  %v2604_v62 = vadd.f32 %v2602_v61, %v2574_v63  ;;  %v11257_v41 = vld [vmem:[#allocation188_spill] sm:$0xff]  ;;  %s9638_s30 = sld [smem:[#allocation9 + $0x118]] }
 0x377   : > { %v2646_v58 = vadd.f32 %v2644_v56, %v2610_v21  ;;  %v2652_v36 = vadd.f32 %v2650_v28, %v2616_v23  ;;  %v2658_v17 = vadd.f32 %v2656_v46, %v2622_v1  ;;  %v9382_v30 = vmul.f32 %v2822_v44, %v2808_v2 }
 0x378   : > { %v9386_v31 = vmul.f32 %v2828_v0, %v2808_v2  ;;  %v2906_v25 = vstv %s9320_s9  ;;  %v2912_v40 = vstv %s9329_s13  ;;  %v2640_v11 = vadd.f32 %v2638_v13, %v2604_v62  ;;  %v2776_v2 = vpop.permute.xlu0 %2775  ;;  %v11260_v62 = vld [vmem:[#allocation182_spill] sm:$0xff]  ;;  %s9646_s9 = sld [smem:[#allocation9 + $0x119]] }
 0x379   : > { %v2918_v49 = vstv %s9337_s7  ;;  %v9395_v6 = vmul.f32 %v2900_v5, %v2897_v20  ;;  %v2663_v16 = vadd.f32 %v11255_v37, %v2639_v19  ;;  %v2670_v45 = vadd.f32 %v11256_v39, %v2646_v58  ;;  %v2950_v23 = vpop.permute.xlu2 %2949  ;;  %s9653_s13 = sld [smem:[#allocation9 + $0x11a]] }
 0x37a   : > { %v2669_v61 = vadd.f32 %v11257_v41, %v2645_v34  ;;  %v2675_v18 = vadd.f32 %v11258_v35, %v2651_v38  ;;  %v2687_v59 = vsel %vm382_vm4, %v9318_v47, 0.0  ;;  %v2681_v63 = vadd.f32 %v11259_v48, %v2657_v4  ;;  %v11262_v35 = vld [vmem:[#allocation186_spill] sm:$0xff]  ;;  %s9662_s7 = sld [smem:[#allocation9 + $0x11b]] }
 0x37b   : > { %v2697_v19 = vmul.f32 %v2696_v42, %v2687_v59  ;;  %v2703_v56 = vmul.f32 %v2702_v15, %v2687_v59  ;;  %v2709_v28 = vmul.f32 %v2708_v57, %v2687_v59  ;;  %v2726_v34 = vstv %s9344_s14  ;;  %v11261_v42 = vld [vmem:[#allocation184_spill] sm:$0xff]  ;;  %s9613_s14 = sld [smem:[#allocation9 + $0x1b]] }
 0x37c   : > { %v2732_v46 = vstv %s9354_s18  ;;  %v2738_v38 = vstv %s9356_s4  ;;  %v2744_v21 = vstv %s9365_s5  ;;  %v2691_v47 = vmul.f32 %v2690_v33, %v2687_v59  ;;  %s9686_s18 = sld [smem:[#allocation9 + $0x5c]] }
 0x37d   : > { %v2699_v1 = vadd.f32 %v2697_v19, %v2669_v61  ;;  %v2705_v13 = vadd.f32 %v2703_v56, %v2675_v18  ;;  %v2711_v4 = vadd.f32 %v2709_v28, %v2681_v63  ;;  %v2664_v58 = vadd.f32 %v11260_v62, %v2640_v11  ;;  %v2804_v56 = vpop.permute.xlu1 %2803  ;;  %s9698_s4 = sld [smem:[#allocation9 + $0x5d]] }
 0x37e   : > { %v2676_v37 = vadd.f32 %v11261_v42, %v2652_v36  ;;  %v9427_v15 = vmul.f32 %v2906_v25, %v2897_v20  ;;  %v2723_v57 = vsel %vm381_vm5, %v9331_v12, 0.0  ;;  %v2682_v18 = vadd.f32 %v11262_v35, %v2658_v17  ;;  %s9707_s5 = sld [smem:[#allocation9 + $0x5e]] }
 0x37f   : > { %v2727_v39 = vmul.f32 %v2726_v34, %v2723_v57  ;;  %v2733_v41 = vmul.f32 %v2732_v46, %v2723_v57  ;;  %v2739_v33 = vmul.f32 %v2738_v38, %v2723_v57  ;;  %v2745_v61 = vmul.f32 %v2744_v21, %v2723_v57 }
 0x380   : > { %v2954_v11 = vstv %s9390_s6  ;;  %v9436_v36 = vsel %vm382_vm4, %v2950_v23, 0.0  ;;  %v2700_v59 = vadd.f32 %v9236_v53, %v2670_v45  ;;  %v2693_v48 = vadd.f32 %v2691_v47, %v2663_v16  ;;  %v9462_v45 = vpop.permute.xlu0 %2857  ;;  %s9715_s6 = sld [smem:[#allocation9 + $0x5f]] }
 0x381   : > { %v2735_v12 = vadd.f32 %v2733_v41, %v2699_v1  ;;  %v2741_v63 = vadd.f32 %v2739_v33, %v2705_v13  ;;  %v2747_v19 = vadd.f32 %v2745_v61, %v2711_v4  ;;  %v9443_v28 = vmul.f32 %v2912_v40, %v2897_v20  ;;  %v11265_v61 = vld [vmem:[#allocation191_spill] sm:$0xff] }
 0x382   : > { %v9447_v17 = vmul.f32 %v2918_v49, %v2897_v20  ;;  %v2960_v62 = vstv %s9398_s17  ;;  %v2966_v42 = vstv %s9406_s16  ;;  %v2729_v23 = vadd.f32 %v2727_v39, %v2693_v48  ;;  %v11267_v48 = vld [vmem:[#allocation197_spill] sm:$0xff]  ;;  %s9717_s17 = sld [smem:[#allocation9 + $0xb8]] }
 0x383   : > { %v2972_v57 = vstv %s9415_s11  ;;  %v9457_v53 = vmul.f32 %v2954_v11, %v9436_v36  ;;  %v2694_v16 = vadd.f32 %v9204_v26, %v2664_v58  ;;  %v2706_v20 = vadd.f32 %v9241_v22, %v2676_v37  ;;  %v11263_v22 = vld [vmem:[#allocation192_spill] sm:$0xff]  ;;  %s9725_s16 = sld [smem:[#allocation9 + $0xb9]] }
 0x384   : > { %v2712_v47 = vadd.f32 %v9302_v52, %v2682_v18  ;;  %v2724_v1 = vsel %vm381_vm5, %v2722_v60, 0.0  ;;  %v2778_v13 = vsel %vm382_vm4, %v2776_v2, 0.0  ;;  %v2759_v37 = vadd.f32 %v11263_v22, %v2735_v12  ;;  %v11264_v52 = vld [vmem:[#allocation193_spill] sm:$0xff]  ;;  %v3038_v2 = vpop.permute.xlu2 %3037  ;;  %s9729_s11 = sld [smem:[#allocation9 + $0xba]] }
 0x385   : > { %v2728_v4 = vmul.f32 %v2726_v34, %v2724_v1  ;;  %v2734_v26 = vmul.f32 %v2732_v46, %v2724_v1  ;;  %v2740_v58 = vmul.f32 %v2738_v38, %v2724_v1  ;;  %v2746_v39 = vmul.f32 %v2744_v21, %v2724_v1 }
 0x386   : > { %v2765_v41 = vadd.f32 %v11264_v52, %v2741_v63  ;;  %v2788_v60 = vmul.f32 %v2786_v14, %v2778_v13  ;;  %v2794_v33 = vmul.f32 %v2792_v10, %v2778_v13  ;;  %v2800_v21 = vmul.f32 %v2798_v27, %v2778_v13  ;;  %v11268_v63 = vld [vmem:[#allocation198_spill] sm:$0xff] }
 0x387   : > { %v2736_v34 = vadd.f32 %v2734_v26, %v2700_v59  ;;  %v2742_v46 = vadd.f32 %v2740_v58, %v2706_v20  ;;  %v2748_v38 = vadd.f32 %v2746_v39, %v2712_v47  ;;  %v2753_v35 = vadd.f32 %v11265_v61, %v2729_v23  ;;  %v11266_v59 = vld [vmem:[#allocation195_spill] sm:$0xff] }
 0x388   : > { %v9490_v14 = vmul.f32 %v2960_v62, %v9436_v36  ;;  %v9495_v10 = vmul.f32 %v2966_v42, %v9436_v36  ;;  %v2730_v18 = vadd.f32 %v2728_v4, %v2694_v16  ;;  %v2771_v27 = vadd.f32 %v11266_v59, %v2747_v19  ;;  %v11269_v20 = vld [vmem:[#allocation199_spill] sm:$0xff]  ;;  %v9509_v19 = vpop.permute.xlu1 %2859 }
 0x389   : > { %v2760_v12 = vadd.f32 %v11267_v48, %v2736_v34  ;;  %v2766_v23 = vadd.f32 %v11268_v63, %v2742_v46  ;;  %v2772_v47 = vadd.f32 %v11269_v20, %v2748_v38  ;;  %v2782_v1 = vmul.f32 %v2780_v51, %v2778_v13  ;;  %v11270_v34 = vld [vmem:[#allocation196_spill] sm:$0xff] }
 0x38a   : > { %v3044_v26 = vstv %s9439_s24  ;;  %v2789_v58 = vadd.f32 %v9310_v8, %v2759_v37  ;;  %v2795_v39 = vadd.f32 %v9314_v32, %v2765_v41  ;;  %v3050_v52 = vstv %s9451_s23  ;;  %s9742_s23 = sld [smem:[#allocation9 + $0xbb]] }
 0x38b   : > { %v2790_v16 = vadd.f32 %v2788_v60, %v2760_v12  ;;  %v2796_v4 = vadd.f32 %v2794_v33, %v2766_v23  ;;  %v2802_v22 = vadd.f32 %v2800_v21, %v2772_v47  ;;  %v2754_v46 = vadd.f32 %v11270_v34, %v2730_v18  ;;  %v2896_v60 = vpop.permute.xlu0 %2895  ;;  %v11271_v23 = vld [vmem:[#allocation200_spill] sm:$0xff]  ;;  %v11272_v47 = vld [vmem:[#allocation201_spill] sm:$0xff]  ;;  %s9765_s24 = sld [smem:[#allocation9 + $0x7c]] }
 0x38c   : > { %v3056_v38 = vstv %s9460_s10  ;;  %v3062_v51 = vstv %s9470_s15  ;;  %v3041_v8 = vsel %vm382_vm4, %v3038_v2, 0.0  ;;  %v2783_v41 = vadd.f32 %v9306_v50, %v2753_v35  ;;  %s9772_s10 = sld [smem:[#allocation9 + $0x7d]] }
 0x38d   : > { %v2820_v32 = vadd.f32 %v9375_v3, %v2790_v16  ;;  %v2826_v13 = vadd.f32 %v9382_v30, %v2796_v4  ;;  %v2832_v37 = vadd.f32 %v9386_v31, %v2802_v22  ;;  %v2801_v33 = vadd.f32 %v9325_v7, %v2771_v27  ;;  %v11274_v4 = vld [vmem:[#allocation203_spill] sm:$0xff]  ;;  %s9782_s15 = sld [smem:[#allocation9 + $0x7e]] }
 0x38e   : > { %v2807_v21 = vsel %vm381_vm5, %v2804_v56, 0.0  ;;  %v2864_v61 = vstv %s9472_s1  ;;  %v2870_v2 = vstv %s9480_s2  ;;  %v2784_v35 = vadd.f32 %v2782_v1, %v2754_v46  ;;  %s9788_s1 = sld [smem:[#allocation9 + $0x7f]] }
 0x38f   : > { %v2811_v3 = vmul.f32 %v2810_v9, %v2807_v21  ;;  %v2817_v30 = vmul.f32 %v2816_v55, %v2807_v21  ;;  %v2823_v31 = vmul.f32 %v2822_v44, %v2807_v21  ;;  %v2829_v50 = vmul.f32 %v2828_v0, %v2807_v21  ;;  %v3070_v9 = vpop.permute.xlu2 %3069  ;;  %s9811_s2 = sld [smem:[#allocation9 + $0xdc]] }
 0x390   : > { %v2876_v18 = vstv %s9484_s21  ;;  %v2882_v7 = vstv %s9497_s19  ;;  %v2861_v56 = vsel %vm382_vm4, %v9462_v45, 0.0  ;;  %v11273_v45 = vld [vmem:[#allocation202_spill] sm:$0xff]  ;;  %v9561_v34 = vmul.f32 %v3050_v52, %v3041_v8  ;;  %s9813_s21 = sld [smem:[#allocation9 + $0xdd]] }
 0x391   : > { %v2813_v55 = vadd.f32 %v2811_v3, %v2783_v41  ;;  %v2819_v44 = vadd.f32 %v2817_v30, %v2789_v58  ;;  %v2825_v59 = vadd.f32 %v2823_v31, %v2795_v39  ;;  %v2831_v0 = vadd.f32 %v2829_v50, %v2801_v33  ;;  %s9822_s19 = sld [smem:[#allocation9 + $0xde]] }
 0x392   : > { %v2865_v27 = vmul.f32 %v2864_v61, %v2861_v56  ;;  %v2871_v48 = vmul.f32 %v2870_v2, %v2861_v56  ;;  %v2877_v12 = vmul.f32 %v2876_v18, %v2861_v56  ;;  %v2883_v63 = vmul.f32 %v2882_v7, %v2861_v56 }
 0x393   : > { %v2837_v20 = vadd.f32 %v11271_v23, %v2813_v55  ;;  %v2843_v1 = vadd.f32 %v11272_v47, %v2819_v44  ;;  %v2849_v16 = vadd.f32 %v11273_v45, %v2825_v59  ;;  %v2855_v22 = vadd.f32 %v11274_v4, %v2831_v0 }
 0x394   : > { %v9553_v58 = vmul.f32 %v2972_v57, %v9436_v36  ;;  %v9557_v39 = vmul.f32 %v3044_v26, %v3041_v8  ;;  %v9565_v46 = vmul.f32 %v3056_v38, %v3041_v8  ;;  %v2948_v36 = vpop.permute.xlu1 %2947  ;;  %v2814_v30 = vadd.f32 %v9371_v43, %v2784_v35 }
 0x395   : > { %v2867_v41 = vadd.f32 %v2865_v27, %v2837_v20  ;;  %v2873_v33 = vadd.f32 %v2871_v48, %v2843_v1  ;;  %v2879_v21 = vadd.f32 %v2877_v12, %v2849_v16  ;;  %v2885_v3 = vadd.f32 %v2883_v63, %v2855_v22  ;;  %v9586_v27 = vpop.permute.xlu0 %2983  ;;  %v11275_v48 = vld [vmem:[#allocation205_spill] sm:$0xff] }
 0x396   : > { %v9574_v31 = vmul.f32 %v3062_v51, %v3041_v8  ;;  %v3074_v50 = vstv %s9520_s8  ;;  %v3080_v56 = vstv %s9527_s12  ;;  %v3086_v0 = vstv %s9537_s25  ;;  %s9828_s8 = sld [smem:[#allocation9 + $0xdf]] }
 0x397   : > { %v2909_v55 = vadd.f32 %v9427_v15, %v2873_v33  ;;  %v2915_v44 = vadd.f32 %v9443_v28, %v2879_v21  ;;  %v2921_v59 = vadd.f32 %v9447_v17, %v2885_v3  ;;  %v2903_v43 = vadd.f32 %v9395_v6, %v2867_v41  ;;  %v11276_v15 = vld [vmem:[#allocation206_spill] sm:$0xff]  ;;  %v11277_v17 = vld [vmem:[#allocation207_spill] sm:$0xff]  ;;  %s9835_s12 = sld [smem:[#allocation9 + $0x1c]] }
 0x398   : > { %v3092_v35 = vstv %s9544_s26  ;;  %v3072_v8 = vsel %vm381_vm5, %v3070_v9, 0.0  ;;  %v2844_v12 = vadd.f32 %v11275_v48, %v2820_v32  ;;  %v2850_v28 = vadd.f32 %v11276_v15, %v2826_v13  ;;  %v3158_v13 = vpop.permute.xlu2 %3157  ;;  %s9844_s25 = sld [smem:[#allocation9 + $0x1d]] }
 0x399   : > { %v2856_v63 = vadd.f32 %v11277_v17, %v2832_v37  ;;  %v2862_v23 = vsel %vm382_vm4, %v9509_v19, 0.0  ;;  %v2898_v6 = vsel %vm381_vm5, %v2896_v60, 0.0  ;;  %v11278_v37 = vld [vmem:[#allocation204_spill] sm:$0xff]  ;;  %v9619_v16 = vmul.f32 %v3074_v50, %v3072_v8  ;;  %s9846_s26 = sld [smem:[#allocation9 + $0x1e]] }
 0x39a   : > { %v2866_v9 = vmul.f32 %v2864_v61, %v2862_v23  ;;  %v2872_v32 = vmul.f32 %v2870_v2, %v2862_v23  ;;  %v2878_v20 = vmul.f32 %v2876_v18, %v2862_v23  ;;  %v2884_v47 = vmul.f32 %v2882_v7, %v2862_v23  ;;  %v11279_v17 = vld [vmem:[#allocation212_spill] sm:$0xff] }
 0x39b   : > { %v2838_v1 = vadd.f32 %v11278_v37, %v2814_v30  ;;  %v2908_v19 = vmul.f32 %v2906_v25, %v2898_v6  ;;  %v2914_v60 = vmul.f32 %v2912_v40, %v2898_v6  ;;  %v2920_v45 = vmul.f32 %v2918_v49, %v2898_v6  ;;  %v11283_v37 = vld [vmem:[#allocation215_spill] sm:$0xff] }
 0x39c   : > { %v2874_v61 = vadd.f32 %v2872_v32, %v2844_v12  ;;  %v2880_v2 = vadd.f32 %v2878_v20, %v2850_v28  ;;  %v2886_v18 = vadd.f32 %v2884_v47, %v2856_v63  ;;  %v2902_v7 = vmul.f32 %v2900_v5, %v2898_v6  ;;  %v2986_v48 = vpop.permute.xlu1 %2985  ;;  %v11281_v6 = vld [vmem:[#allocation213_spill] sm:$0xff]  ;;  %v11282_v32 = vld [vmem:[#allocation214_spill] sm:$0xff] }
 0x39d   : > { %v9623_v25 = vmul.f32 %v3080_v56, %v3072_v8  ;;  %v3164_v40 = vstv %s9567_s22  ;;  %v3161_v49 = vsel %vm381_vm5, %v3158_v13, 0.0  ;;  %v2868_v4 = vadd.f32 %v2866_v9, %v2838_v1  ;;  %v3040_v13 = vpop.permute.xlu0 %3039  ;;  %s9888_s22 = sld [smem:[#allocation9 + $0x11c]] }
 0x39e   : > { %v2910_v22 = vadd.f32 %v2908_v19, %v2874_v61  ;;  %v2916_v41 = vadd.f32 %v2914_v60, %v2880_v2  ;;  %v2922_v33 = vadd.f32 %v2920_v45, %v2886_v18  ;;  %v9630_v21 = vmul.f32 %v3086_v0, %v3072_v8 }
 0x39f   : > { %v9634_v5 = vmul.f32 %v3092_v35, %v3072_v8  ;;  %v3170_v3 = vstv %s9569_s29  ;;  %v3176_v30 = vstv %s9578_s27  ;;  %v2904_v12 = vadd.f32 %v2902_v7, %v2868_v4  ;;  %v11280_v8 = vld [vmem:[#allocation209_spill] sm:$0xff]  ;;  %v11284_v4 = vld [vmem:[#allocation208_spill] sm:$0xff]  ;;  %s9920_s29 = sld [smem:[#allocation9 + $0xbc]] }
 0x3a0   : > { %v3182_v15 = vstv %s9584_s0  ;;  %v9643_v28 = vmul.f32 %v3164_v40, %v3161_v49  ;;  %v2927_v63 = vadd.f32 %v11279_v17, %v2903_v43  ;;  %v2934_v23 = vadd.f32 %v11280_v8, %v2910_v22  ;;  %s9922_s27 = sld [smem:[#allocation9 + $0xbd]] }
 0x3a1   : > { %v2933_v9 = vadd.f32 %v11281_v6, %v2909_v55  ;;  %v2939_v20 = vadd.f32 %v11282_v32, %v2915_v44  ;;  %v2951_v47 = vsel %vm382_vm4, %v2948_v36, 0.0  ;;  %v2945_v1 = vadd.f32 %v11283_v37, %v2921_v59  ;;  %v3214_v59 = vpop.permute.xlu2 %3213  ;;  %v11286_v32 = vld [vmem:[#allocation211_spill] sm:$0xff]  ;;  %s9934_s0 = sld [smem:[#allocation9 + $0xbe]] }
 0x3a2   : > { %v2961_v43 = vmul.f32 %v2960_v62, %v2951_v47  ;;  %v2967_v19 = vmul.f32 %v2966_v42, %v2951_v47  ;;  %v2973_v60 = vmul.f32 %v2972_v57, %v2951_v47  ;;  %v2990_v55 = vstv %s9593_s3  ;;  %v11285_v62 = vld [vmem:[#allocation210_spill] sm:$0xff]  ;;  %s9855_s3 = sld [smem:[#allocation9 + $0x1f]] }
 0x3a3   : > { %v2996_v45 = vstv %s9602_s28  ;;  %v3002_v44 = vstv %s9604_s20  ;;  %v3008_v61 = vstv %s9613_s14  ;;  %v2955_v36 = vmul.f32 %v2954_v11, %v2951_v47  ;;  %s9954_s28 = sld [smem:[#allocation9 + $0xbf]] }
 0x3a4   : > { %v2963_v2 = vadd.f32 %v2961_v43, %v2933_v9  ;;  %v2969_v18 = vadd.f32 %v2967_v19, %v2939_v20  ;;  %v2975_v7 = vadd.f32 %v2973_v60, %v2945_v1  ;;  %v2928_v22 = vadd.f32 %v11284_v4, %v2904_v12  ;;  %s9981_s20 = sld [smem:[#allocation9 + $0x11d]] }
 0x3a5   : > { %v2940_v17 = vadd.f32 %v11285_v62, %v2916_v41  ;;  %v9674_v42 = vmul.f32 %v3170_v3, %v3161_v49  ;;  %v2987_v57 = vsel %vm381_vm5, %v9586_v27, 0.0  ;;  %v2946_v20 = vadd.f32 %v11286_v32, %v2922_v33  ;;  %s9988_s14 = sld [smem:[#allocation9 + $0x11e]] }
 0x3a6   : > { %v2991_v8 = vmul.f32 %v2990_v55, %v2987_v57  ;;  %v2997_v11 = vmul.f32 %v2996_v45, %v2987_v57  ;;  %v3003_v6 = vmul.f32 %v3002_v44, %v2987_v57  ;;  %v3009_v9 = vmul.f32 %v3008_v61, %v2987_v57 }
 0x3a7   : > { %v3218_v12 = vstv %s9638_s30  ;;  %v9683_v41 = vsel %vm382_vm4, %v3214_v59, 0.0  ;;  %v2964_v47 = vadd.f32 %v9490_v14, %v2934_v23  ;;  %v2957_v37 = vadd.f32 %v2955_v36, %v2927_v63  ;;  %v3068_v59 = vpop.permute.xlu1 %3067  ;;  %s9994_s30 = sld [smem:[#allocation9 + $0x11f]] }
 0x3a8   : > { %v2999_v1 = vadd.f32 %v2997_v11, %v2963_v2  ;;  %v3005_v27 = vadd.f32 %v3003_v6, %v2969_v18  ;;  %v3011_v43 = vadd.f32 %v3009_v9, %v2975_v7  ;;  %v9690_v19 = vmul.f32 %v3176_v30, %v3161_v49  ;;  %v3122_v18 = vpop.permute.xlu0 %3121 }
 0x3a9   : > { %v9694_v33 = vmul.f32 %v3182_v15, %v3161_v49  ;;  %v3224_v60 = vstv %s9646_s9  ;;  %v3230_v4 = vstv %s9653_s13  ;;  %v2993_v62 = vadd.f32 %v2991_v8, %v2957_v37  ;;  %v11291_v37 = vld [vmem:[#allocation221_spill] sm:$0xff]  ;;  %s11327_s9 = sld [smem:[#allocation64_spill]] }
 0x3aa   : > { %v3236_v57 = vstv %s9662_s7  ;;  %v9704_v14 = vmul.f32 %v3218_v12, %v9683_v41  ;;  %v2958_v63 = vadd.f32 %v9457_v53, %v2928_v22  ;;  %v2970_v49 = vadd.f32 %v9495_v10, %v2940_v17  ;;  %v11287_v10 = vld [vmem:[#allocation217_spill] sm:$0xff]  ;;  %v11288_v17 = vld [vmem:[#allocation218_spill] sm:$0xff]  ;;  %s11328_s13 = sld [smem:[#allocation69_spill]] }
 0x3ab   : > { %v2976_v23 = vadd.f32 %v9553_v58, %v2946_v20  ;;  %v2988_v36 = vsel %vm381_vm5, %v2986_v48, 0.0  ;;  %v3042_v2 = vsel %vm382_vm4, %v3040_v13, 0.0  ;;  %v3023_v58 = vadd.f32 %v11287_v10, %v2999_v1  ;;  %v3302_v20 = vpop.permute.xlu2 %3301  ;;  %s10006_s7 = sld [smem:[#allocation10]] }
 0x3ac   : > { %v2992_v7 = vmul.f32 %v2990_v55, %v2988_v36  ;;  %v2998_v53 = vmul.f32 %v2996_v45, %v2988_v36  ;;  %v3004_v22 = vmul.f32 %v3002_v44, %v2988_v36  ;;  %v3010_v8 = vmul.f32 %v3008_v61, %v2988_v36  ;;  %v11289_v61 = vld [vmem:[#allocation216_spill] sm:$0xff] }
 0x3ad   : > { %v3029_v11 = vadd.f32 %v11288_v17, %v3005_v27  ;;  %v3052_v48 = vmul.f32 %v3050_v52, %v3042_v2  ;;  %v3058_v13 = vmul.f32 %v3056_v38, %v3042_v2  ;;  %v3064_v44 = vmul.f32 %v3062_v51, %v3042_v2  ;;  %v11290_v51 = vld [vmem:[#allocation219_spill] sm:$0xff]  ;;  %v11292_v27 = vld [vmem:[#allocation222_spill] sm:$0xff] }
 0x3ae   : > { %v3000_v6 = vadd.f32 %v2998_v53, %v2964_v47  ;;  %v3006_v55 = vadd.f32 %v3004_v22, %v2970_v49  ;;  %v3012_v45 = vadd.f32 %v3010_v8, %v2976_v23  ;;  %v3017_v9 = vadd.f32 %v11289_v61, %v2993_v62  ;;  %v11293_v49 = vld [vmem:[#allocation223_spill] sm:$0xff] }
 0x3af   : > { %v9735_v32 = vmul.f32 %v3224_v60, %v9683_v41  ;;  %v9740_v52 = vmul.f32 %v3230_v4, %v9683_v41  ;;  %v2994_v38 = vadd.f32 %v2992_v7, %v2958_v63  ;;  %v3035_v47 = vadd.f32 %v11290_v51, %v3011_v43  ;;  %v11294_v43 = vld [vmem:[#allocation220_spill] sm:$0xff] }
 0x3b0   : > { %v3024_v1 = vadd.f32 %v11291_v37, %v3000_v6  ;;  %v3030_v62 = vadd.f32 %v11292_v27, %v3006_v55  ;;  %v3036_v23 = vadd.f32 %v11293_v49, %v3012_v45  ;;  %v3046_v36 = vmul.f32 %v3044_v26, %v3042_v2 }
 0x3b1   : > { %v3308_v53 = vstv %s9686_s18  ;;  %v3053_v22 = vadd.f32 %v9561_v34, %v3023_v58  ;;  %v3059_v63 = vadd.f32 %v9565_v46, %v3029_v11  ;;  %v3314_v17 = vstv %s9698_s4  ;;  %v9759_v34 = vpop.permute.xlu1 %3123  ;;  %s11331_s18 = sld [smem:[#allocation30_spill]] }
 0x3b2   : > { %v3054_v7 = vadd.f32 %v3052_v48, %v3024_v1  ;;  %v3060_v8 = vadd.f32 %v3058_v13, %v3030_v62  ;;  %v3066_v10 = vadd.f32 %v3064_v44, %v3036_v23  ;;  %v3018_v61 = vadd.f32 %v11294_v43, %v2994_v38  ;;  %v11295_v62 = vld [vmem:[#allocation224_spill] sm:$0xff]  ;;  %v11296_v23 = vld [vmem:[#allocation225_spill] sm:$0xff] }
 0x3b3   : > { %v3320_v6 = vstv %s9707_s5  ;;  %v3326_v55 = vstv %s9715_s6  ;;  %v3305_v26 = vsel %vm382_vm4, %v3302_v20, 0.0  ;;  %v3047_v11 = vadd.f32 %v9557_v39, %v3017_v9  ;;  %v3334_v27 = vpop.permute.xlu2 %3333  ;;  %s11335_s5 = sld [smem:[#allocation63_spill]] }
 0x3b4   : > { %v3084_v46 = vadd.f32 %v9623_v25, %v3054_v7  ;;  %v3090_v2 = vadd.f32 %v9630_v21, %v3060_v8  ;;  %v3096_v58 = vadd.f32 %v9634_v5, %v3066_v10  ;;  %v3065_v48 = vadd.f32 %v9574_v31, %v3035_v47  ;;  %v3160_v25 = vpop.permute.xlu0 %3159  ;;  %v11298_v8 = vld [vmem:[#allocation227_spill] sm:$0xff] }
 0x3b5   : > { %v3071_v13 = vsel %vm381_vm5, %v3068_v59, 0.0  ;;  %v3128_v45 = vstv %s9717_s17  ;;  %v3134_v44 = vstv %s9725_s16  ;;  %v3048_v9 = vadd.f32 %v3046_v36, %v3018_v61  ;;  %v11297_v36 = vld [vmem:[#allocation226_spill] sm:$0xff]  ;;  %s4463_s16 = sld [smem:[#allocation10 + $0x1]] }
 0x3b6   : > { %v3075_v21 = vmul.f32 %v3074_v50, %v3071_v13  ;;  %v3081_v38 = vmul.f32 %v3080_v56, %v3071_v13  ;;  %v3087_v5 = vmul.f32 %v3086_v0, %v3071_v13  ;;  %v3093_v39 = vmul.f32 %v3092_v35, %v3071_v13 }
 0x3b7   : > { %v3140_v31 = vstv %s9729_s11  ;;  %v3146_v20 = vstv %s9742_s23  ;;  %v3125_v59 = vsel %vm382_vm4, %v3122_v18, 0.0  ;;  %v9805_v43 = vmul.f32 %v3314_v17, %v3305_v26  ;;  %s4025_s4 = sshll.u32 %s11331_s18, 6  ;;  %s4464_s11 = sld [smem:[#allocation10 + $0x2]] }
 0x3b8   : > { %v3077_v50 = vadd.f32 %v3075_v21, %v3047_v11  ;;  %v3083_v56 = vadd.f32 %v3081_v38, %v3053_v22  ;;  %v3089_v51 = vadd.f32 %v3087_v5, %v3059_v63  ;;  %v3095_v0 = vadd.f32 %v3093_v39, %v3065_v48  ;;  %s10049_s6 = scalar_lea.vmem [#allocation14], %s4025_s4 }
 0x3b9   : > { %v3129_v47 = vmul.f32 %v3128_v45, %v3125_v59  ;;  %v3135_v35 = vmul.f32 %v3134_v44, %v3125_v59  ;;  %v3141_v37 = vmul.f32 %v3140_v31, %v3125_v59  ;;  %v3147_v1 = vmul.f32 %v3146_v20, %v3125_v59  ;;  %v3212_v59 = vpop.permute.xlu1 %3211 }
 0x3ba   : > { %v3101_v49 = vadd.f32 %v11295_v62, %v3077_v50  ;;  %v3107_v18 = vadd.f32 %v11296_v23, %v3083_v56  ;;  %v3113_v7 = vadd.f32 %v11297_v36, %v3089_v51  ;;  %v3119_v10 = vadd.f32 %v11298_v8, %v3095_v0 }
 0x3bb   : > { %v9797_v22 = vmul.f32 %v3236_v57, %v9683_v41  ;;  %v9801_v63 = vmul.f32 %v3308_v53, %v3305_v26  ;;  %v9809_v61 = vmul.f32 %v3320_v6, %v3305_v26  ;;  %v3078_v41 = vadd.f32 %v9619_v16, %v3048_v9  ;;  %v11299_v9 = vld [vmem:[#allocation229_spill] sm:$0xff]  ;;  %v3422_v36 = vpop.permute.xlu2 %3421 }
 0x3bc   : > { %v3131_v11 = vadd.f32 %v3129_v47, %v3101_v49  ;;  %v3137_v48 = vadd.f32 %v3135_v35, %v3107_v18  ;;  %v3143_v13 = vadd.f32 %v3141_v37, %v3113_v7  ;;  %v3149_v21 = vadd.f32 %v3147_v1, %v3119_v10 }
 0x3bd   : > { %v9818_v38 = vmul.f32 %v3326_v55, %v3305_v26  ;;  %v3338_v5 = vstv %s9765_s24  ;;  %v3344_v39 = vstv %s9772_s10  ;;  %v3350_v0 = vstv %s9782_s15 }
 0x3be   : > { %v3173_v50 = vadd.f32 %v9674_v42, %v3137_v48  ;;  %v3179_v56 = vadd.f32 %v9690_v19, %v3143_v13  ;;  %v3185_v51 = vadd.f32 %v9694_v33, %v3149_v21  ;;  %v3167_v47 = vadd.f32 %v9643_v28, %v3131_v11  ;;  %v3248_v42 = vpop.permute.xlu0 %3247  ;;  %v11300_v19 = vld [vmem:[#allocation230_spill] sm:$0xff]  ;;  %v11301_v33 = vld [vmem:[#allocation231_spill] sm:$0xff] }
 0x3bf   : > { %v3356_v16 = vstv %s9788_s1  ;;  %v3336_v26 = vsel %vm381_vm5, %v3334_v27, 0.0  ;;  %v3108_v35 = vadd.f32 %v11299_v9, %v3084_v46  ;;  %v3114_v37 = vadd.f32 %v11300_v19, %v3090_v2 }
 0x3c0   : > { %v3120_v1 = vadd.f32 %v11301_v33, %v3096_v58  ;;  %v3126_v28 = vsel %vm382_vm4, %v9759_v34, 0.0  ;;  %v3162_v62 = vsel %vm381_vm5, %v3160_v25, 0.0  ;;  %v11302_v58 = vld [vmem:[#allocation228_spill] sm:$0xff]  ;;  %v9861_v7 = vmul.f32 %v3338_v5, %v3336_v26 }
 0x3c1   : > { %v3130_v46 = vmul.f32 %v3128_v45, %v3126_v28  ;;  %v3136_v27 = vmul.f32 %v3134_v44, %v3126_v28  ;;  %v3142_v49 = vmul.f32 %v3140_v31, %v3126_v28  ;;  %v3148_v2 = vmul.f32 %v3146_v20, %v3126_v28  ;;  %v11305_v28 = vld [vmem:[#allocation237_spill] sm:$0xff] }
 0x3c2   : > { %v3102_v23 = vadd.f32 %v11302_v58, %v3078_v41  ;;  %v3172_v34 = vmul.f32 %v3170_v3, %v3162_v62  ;;  %v3178_v18 = vmul.f32 %v3176_v30, %v3162_v62  ;;  %v3184_v25 = vmul.f32 %v3182_v15, %v3162_v62 }
 0x3c3   : > { %v3138_v45 = vadd.f32 %v3136_v27, %v3108_v35  ;;  %v3144_v44 = vadd.f32 %v3142_v49, %v3114_v37  ;;  %v3150_v31 = vadd.f32 %v3148_v2, %v3120_v1  ;;  %v3166_v20 = vmul.f32 %v3164_v40, %v3162_v62  ;;  %v11303_v35 = vld [vmem:[#allocation233_spill] sm:$0xff]  ;;  %v11304_v37 = vld [vmem:[#allocation236_spill] sm:$0xff]  ;;  %v3250_v1 = vpop.permute.xlu1 %3249  ;;  %v11307_v49 = vld [vmem:[#allocation239_spill] sm:$0xff] }
 0x3c4   : > { %v9865_v3 = vmul.f32 %v3344_v39, %v3336_v26  ;;  %v9869_v30 = vmul.f32 %v3350_v0, %v3336_v26  ;;  %v9873_v15 = vmul.f32 %v3356_v16, %v3336_v26  ;;  %v3132_v8 = vadd.f32 %v3130_v46, %v3102_v23  ;;  %v11306_v46 = vld [vmem:[#allocation238_spill] sm:$0xff] }
 0x3c5   : > { %v3174_v10 = vadd.f32 %v3172_v34, %v3138_v45  ;;  %v3180_v11 = vadd.f32 %v3178_v18, %v3144_v44  ;;  %v3186_v48 = vadd.f32 %v3184_v25, %v3150_v31  ;;  %v3428_v40 = vstv %s9811_s2  ;;  %s4465_s2 = sld [smem:[#allocation10 + $0x3]] }
 0x3c6   : > { %v3434_v13 = vstv %s9813_s21  ;;  %v3440_v21 = vstv %s9822_s19  ;;  %v3446_v41 = vstv %s9828_s8  ;;  %v3168_v9 = vadd.f32 %v3166_v20, %v3132_v8  ;;  %v3304_v25 = vpop.permute.xlu0 %3303 }
 0x3c7   : > { %v3198_v19 = vadd.f32 %v11303_v35, %v3174_v10  ;;  %v3425_v26 = vsel %vm381_vm5, %v3422_v36, 0.0  ;;  %v3191_v33 = vadd.f32 %v11304_v37, %v3167_v47  ;;  %v3197_v62 = vadd.f32 %v11305_v28, %v3173_v50  ;;  %v11308_v36 = vld [vmem:[#allocation232_spill] sm:$0xff]  ;;  %v3478_v28 = vpop.permute.xlu2 %3477 }
 0x3c8   : > { %v3203_v27 = vadd.f32 %v11306_v46, %v3179_v56  ;;  %v3209_v2 = vadd.f32 %v11307_v49, %v3185_v51  ;;  %v3215_v58 = vsel %vm382_vm4, %v3212_v59, 0.0  ;;  %v3254_v50 = vstv %s9835_s12  ;;  %v11309_v46 = vld [vmem:[#allocation234_spill] sm:$0xff] }
 0x3c9   : > { %v3219_v23 = vmul.f32 %v3218_v12, %v3215_v58  ;;  %v3225_v34 = vmul.f32 %v3224_v60, %v3215_v58  ;;  %v3231_v47 = vmul.f32 %v3230_v4, %v3215_v58  ;;  %v3237_v18 = vmul.f32 %v3236_v57, %v3215_v58 }
 0x3ca   : > { %v3260_v45 = vstv %s9844_s25  ;;  %v3266_v56 = vstv %s9846_s26  ;;  %v3272_v44 = vstv %s9855_s3  ;;  %v9904_v51 = vmul.f32 %v3428_v40, %v3425_v26  ;;  %s11339_s26 = sld [smem:[#allocation25_spill]] }
 0x3cb   : > { %v3227_v59 = vadd.f32 %v3225_v34, %v3197_v62  ;;  %v3233_v31 = vadd.f32 %v3231_v47, %v3203_v27  ;;  %v3239_v20 = vadd.f32 %v3237_v18, %v3209_v2  ;;  %v3192_v12 = vadd.f32 %v11308_v36, %v3168_v9  ;;  %v11310_v27 = vld [vmem:[#allocation235_spill] sm:$0xff]  ;;  %v11312_v18 = vld [vmem:[#allocation241_spill] sm:$0xff] }
 0x3cc   : > { %v9909_v60 = vmul.f32 %v3434_v13, %v3425_v26  ;;  %v3221_v4 = vadd.f32 %v3219_v23, %v3191_v33  ;;  %v3251_v57 = vsel %vm381_vm5, %v3248_v42, 0.0  ;;  %v3204_v62 = vadd.f32 %v11309_v46, %v3180_v11 }
 0x3cd   : > { %v3255_v8 = vmul.f32 %v3254_v50, %v3251_v57  ;;  %v3261_v10 = vmul.f32 %v3260_v45, %v3251_v57  ;;  %v3267_v35 = vmul.f32 %v3266_v56, %v3251_v57  ;;  %v3273_v37 = vmul.f32 %v3272_v44, %v3251_v57 }
 0x3ce   : > { %v3210_v49 = vadd.f32 %v11310_v27, %v3186_v48  ;;  %v9917_v9 = vmul.f32 %v3440_v21, %v3425_v26  ;;  %v3228_v2 = vadd.f32 %v9735_v32, %v3198_v19  ;;  %v9926_v34 = vmul.f32 %v3446_v41, %v3425_v26  ;;  %v11311_v32 = vld [vmem:[#allocation240_spill] sm:$0xff]  ;;  %v3386_v46 = vpop.permute.xlu0 %3385 }
 0x3cf   : > { %v3257_v33 = vadd.f32 %v3255_v8, %v3221_v4  ;;  %v3263_v42 = vadd.f32 %v3261_v10, %v3227_v59  ;;  %v3269_v58 = vadd.f32 %v3267_v35, %v3233_v31  ;;  %v3275_v23 = vadd.f32 %v3273_v37, %v3239_v20  ;;  %v11313_v31 = vld [vmem:[#allocation242_spill] sm:$0xff]  ;;  %v11314_v20 = vld [vmem:[#allocation243_spill] sm:$0xff]  ;;  %v3332_v4 = vpop.permute.xlu1 %3331 }
 0x3d0   : > { %v3482_v47 = vstv %s9888_s22  ;;  %v9931_v11 = vsel %vm382_vm4, %v3478_v28, 0.0  ;;  %v3222_v48 = vadd.f32 %v9704_v14, %v3192_v12  ;;  %v3234_v57 = vadd.f32 %v9740_v52, %v3204_v62  ;;  %s4479_s3 = sshll.u32 %s11339_s26, 6 }
 0x3d1   : > { %v3281_v19 = vadd.f32 %v11311_v32, %v3257_v33  ;;  %v3287_v59 = vadd.f32 %v11312_v18, %v3263_v42  ;;  %v3293_v26 = vadd.f32 %v11313_v31, %v3269_v58  ;;  %v3299_v36 = vadd.f32 %v11314_v20, %v3275_v23  ;;  %v11318_v58 = vld [vmem:[#allocation247_spill] sm:$0xff] }
 0x3d2   : > { %v3240_v8 = vadd.f32 %v9797_v22, %v3210_v49  ;;  %v3252_v14 = vsel %vm381_vm5, %v3250_v1, 0.0  ;;  %v3306_v12 = vsel %vm382_vm4, %v3304_v25, 0.0  ;;  %v11317_v49 = vld [vmem:[#allocation246_spill] sm:$0xff]  ;;  %v3404_v32 = vstv %s9934_s0  ;;  %s11340_s0 = sld [smem:[#allocation308_spill]] }
 0x3d3   : > { %v3256_v10 = vmul.f32 %v3254_v50, %v3252_v14  ;;  %v3262_v35 = vmul.f32 %v3260_v45, %v3252_v14  ;;  %v3268_v37 = vmul.f32 %v3266_v56, %v3252_v14  ;;  %v3274_v28 = vmul.f32 %v3272_v44, %v3252_v14  ;;  %v11316_v56 = vld [vmem:[#allocation245_spill] sm:$0xff] }
 0x3d4   : > { %v3310_v27 = vmul.f32 %v3308_v53, %v3306_v12  ;;  %v3316_v33 = vmul.f32 %v3314_v17, %v3306_v12  ;;  %v3322_v42 = vmul.f32 %v3320_v6, %v3306_v12  ;;  %v3328_v52 = vmul.f32 %v3326_v55, %v3306_v12  ;;  %v11315_v55 = vld [vmem:[#allocation244_spill] sm:$0xff] }
 0x3d5   : > { %v3258_v22 = vadd.f32 %v3256_v10, %v3222_v48  ;;  %v3264_v1 = vadd.f32 %v3262_v35, %v3228_v2  ;;  %v3270_v62 = vadd.f32 %v3268_v37, %v3234_v57  ;;  %v3276_v25 = vadd.f32 %v3274_v28, %v3240_v8 }
 0x3d6   : > { %v3311_v50 = vadd.f32 %v9801_v63, %v3281_v19  ;;  %v3317_v53 = vadd.f32 %v9805_v43, %v3287_v59  ;;  %v3323_v17 = vadd.f32 %v9809_v61, %v3293_v26  ;;  %v3329_v6 = vadd.f32 %v9818_v38, %v3299_v36 }
 0x3d7   : > { %v3282_v45 = vadd.f32 %v11315_v55, %v3258_v22  ;;  %v3288_v44 = vadd.f32 %v11316_v56, %v3264_v1  ;;  %v3294_v2 = vadd.f32 %v11317_v49, %v3270_v62  ;;  %v3300_v23 = vadd.f32 %v11318_v58, %v3276_v25  ;;  %v3388_v14 = vpop.permute.xlu1 %3387  ;;  %v11324_v22 = vld [vmem:[#allocation251_spill] sm:$0xff] }
 0x3d8   : > { %v3335_v63 = vsel %vm381_vm5, %v3332_v4, 0.0  ;;  %v3392_v48 = vstv %s9920_s29  ;;  %v3398_v43 = vstv %s9922_s27 }
 0x3d9   : > { %v3312_v19 = vadd.f32 %v3310_v27, %v3282_v45  ;;  %v3318_v61 = vadd.f32 %v3316_v33, %v3288_v44  ;;  %v3324_v18 = vadd.f32 %v3322_v42, %v3294_v2  ;;  %v3330_v38 = vadd.f32 %v3328_v52, %v3300_v23  ;;  %v11322_v27 = vld [vmem:[#allocation249_spill] sm:$0xff]  ;;  %v11323_v42 = vld [vmem:[#allocation250_spill] sm:$0xff] }
 0x3da   : > { %v3339_v59 = vmul.f32 %v3338_v5, %v3335_v63  ;;  %v3345_v31 = vmul.f32 %v3344_v39, %v3335_v63  ;;  %v3351_v26 = vmul.f32 %v3350_v0, %v3335_v63  ;;  %v3357_v20 = vmul.f32 %v3356_v16, %v3335_v63  ;;  %v11319_v0 = vld [vmem:[#allocation252_spill] sm:$0xff] }
 0x3db   : > { %v3342_v36 = vadd.f32 %v9861_v7, %v3312_v19  ;;  %v3348_v4 = vadd.f32 %v9865_v3, %v3318_v61  ;;  %v3354_v57 = vadd.f32 %v9869_v30, %v3324_v18  ;;  %v3360_v8 = vadd.f32 %v9873_v15, %v3330_v38  ;;  %v11320_v7 = vld [vmem:[#allocation253_spill] sm:$0xff]  ;;  %v3424_v3 = vpop.permute.xlu0 %3423  ;;  %v11321_v30 = vld [vmem:[#allocation248_spill] sm:$0xff] }
 0x3dc   : > { %v3341_v12 = vadd.f32 %v3339_v59, %v3311_v50  ;;  %v3347_v10 = vadd.f32 %v3345_v31, %v3317_v53  ;;  %v3353_v35 = vadd.f32 %v3351_v26, %v3323_v17  ;;  %v3359_v37 = vadd.f32 %v3357_v20, %v3329_v6  ;;  %v11326_v6 = vld [vmem:[#allocation255_spill] sm:$0xff] }
 0x3dd   : > { %v3410_v5 = vstv %s9954_s28  ;;  %v3389_v39 = vsel %vm382_vm4, %v3386_v46, 0.0  ;;  %v3366_v16 = vadd.f32 %v11319_v0, %v3342_v36  ;;  %v3372_v28 = vadd.f32 %v11320_v7, %v3348_v4  ;;  %v11325_v46 = vld [vmem:[#allocation254_spill] sm:$0xff]  ;;  %v11333_v0 = vld [vmem:[#allocation256_spill] sm:$0xff]  ;;  %s3862_s28 = scalar_lea.hbm %s11340_s0, %s4479_s3 }
 0x3de   : > { %v3365_v15 = vadd.f32 %v11321_v30, %v3341_v12  ;;  %v3371_v33 = vadd.f32 %v11322_v27, %v3347_v10  ;;  %v3377_v52 = vadd.f32 %v11323_v42, %v3353_v35  ;;  %v3383_v1 = vadd.f32 %v11324_v22, %v3359_v37  ;;  %v11334_v7 = vld [vmem:[#allocation262_spill] sm:$0xff] }
 0x3df   : > { %v3393_v62 = vmul.f32 %v3392_v48, %v3389_v39  ;;  %v3399_v25 = vmul.f32 %v3398_v43, %v3389_v39  ;;  %v3405_v50 = vmul.f32 %v3404_v32, %v3389_v39  ;;  %v3411_v53 = vmul.f32 %v3410_v5, %v3389_v39  ;;  %v3476_v4 = vpop.permute.xlu1 %3475 }
 0x3e0   : > { %v3378_v17 = vadd.f32 %v11325_v46, %v3354_v57  ;;  %v3384_v55 = vadd.f32 %v11326_v6, %v3360_v8  ;;  %v3390_v45 = vsel %vm382_vm4, %v3388_v14, 0.0  ;;  %v3426_v56 = vsel %vm381_vm5, %v3424_v3, 0.0 }
 0x3e1   : > { %v3395_v44 = vadd.f32 %v3393_v62, %v3365_v15  ;;  %v3401_v49 = vadd.f32 %v3399_v25, %v3371_v33  ;;  %v3407_v2 = vadd.f32 %v3405_v50, %v3377_v52  ;;  %v3413_v58 = vadd.f32 %v3411_v53, %v3383_v1 }
 0x3e2   : > { %v3394_v23 = vmul.f32 %v3392_v48, %v3390_v45  ;;  %v3400_v63 = vmul.f32 %v3398_v43, %v3390_v45  ;;  %v3406_v19 = vmul.f32 %v3404_v32, %v3390_v45  ;;  %v3412_v61 = vmul.f32 %v3410_v5, %v3390_v45 }
 0x3e3   : > { %v3431_v18 = vadd.f32 %v9904_v51, %v3395_v44  ;;  %v3437_v38 = vadd.f32 %v9909_v60, %v3401_v49  ;;  %v3443_v59 = vadd.f32 %v9917_v9, %v3407_v2  ;;  %v3449_v31 = vadd.f32 %v9926_v34, %v3413_v58 }
 0x3e4   : > { %v3396_v26 = vadd.f32 %v3394_v23, %v3366_v16  ;;  %v3402_v48 = vadd.f32 %v3400_v63, %v3372_v28  ;;  %v3408_v43 = vadd.f32 %v3406_v19, %v3378_v17  ;;  %v3414_v32 = vadd.f32 %v3412_v61, %v3384_v55 }
 0x3e5   : > { %v3430_v20 = vmul.f32 %v3428_v40, %v3426_v56  ;;  %v3436_v51 = vmul.f32 %v3434_v13, %v3426_v56  ;;  %v3442_v36 = vmul.f32 %v3440_v21, %v3426_v56  ;;  %v3448_v60 = vmul.f32 %v3446_v41, %v3426_v56  ;;  %v11332_v41 = vld [vmem:[#allocation261_spill] sm:$0xff] }
 0x3e6   : > { %v3488_v9 = vstv %s9981_s20  ;;  %v3494_v34 = vstv %s9988_s14  ;;  %v11329_v57 = vstv %s11327_s9  ;;  %v11330_v14 = vstv %s11328_s13  ;;  %s3863_s14 = sshll.u32 %s10049_s6, 4  ;;  %s3851_s9 = scalar_lea.sflag [#allocation4], %s11331_s18  ;;  %s3864_s14 = int_to_ptr.vmem [resolvable:$true] %s3863_s14 }
 0x3e7   : > { %v3465_v8 = vmul.f32 %v11329_v57, %v11218_v24  ;;  %v3471_v12 = vmul.f32 %v11330_v14, %v11218_v24  ;;  %v3432_v10 = vadd.f32 %v3430_v20, %v3396_v26  ;;  %v3438_v35 = vadd.f32 %v3436_v51, %v3402_v48 }
 0x3e8   : > { %v3444_v40 = vadd.f32 %v3442_v36, %v3408_v43  ;;  %v3450_v13 = vadd.f32 %v3448_v60, %v3414_v32  ;;  %v3500_v37 = vstv %s9994_s30  ;;  %v3484_v21 = vmul.f32 %v3482_v47, %v9931_v11  ;;  %s3865_s30 = sshll.u32 %s3862_s28, 4  ;;  %s3866_s30 = int_to_ptr.hbm [resolvable:$true] %s3865_s30 }
 0x3e9   : > { %v3455_v5 = vadd.f32 %v11332_v41, %v3431_v18  ;;  %v3479_v39 = vsel %vm382_vm4, %v3476_v4, 0.0  ;;  %v3456_v16 = vadd.f32 %v11333_v0, %v3432_v10  ;;  %v3461_v28 = vadd.f32 %v11334_v7, %v3437_v38  ;;  %s4756_s13 = sshra.s32 %s3866_s30, 4  ;;  %s4757_s13 = int_to_ptr.hbm [resolvable:$true] %s4756_s13 }
 0x3ea   : > { %v3467_v24 = vadd.f32 %v3465_v8, %v3443_v59  ;;  %v3473_v3 = vadd.f32 %v3471_v12, %v3449_v31  ;;  %v3483_v30 = vmul.f32 %v3482_v47, %v3479_v39  ;;  %v3489_v15 = vmul.f32 %v3488_v9, %v3479_v39  ;;  %p4763_p2 = scmp.lt.s32.totalorder %s4757_s13, %s11340_s0 }
 0x3eb   : > { %v3495_v27 = vmul.f32 %v3494_v34, %v3479_v39  ;;  %v3501_v33 = vmul.f32 %v3500_v37, %v3479_v39  ;;  %v3486_v42 = vadd.f32 %v3484_v21, %v3456_v16  ;;  %v3506_v52 = vstv %s10006_s7  ;;  %s4758_s7 = scalar_lea.hbm %s4757_s13, 64 }
 0x3ec   : > { %v3485_v22 = vadd.f32 %v3483_v30, %v3455_v5  ;;  %v10037_v29 = vadd.f32 %v3489_v15, %v3461_v28  ;;  %v11336_v17 = vstv %s11335_s5  ;;  %v11337_v55 = vmov %v11329_v57  ;;  %p4759_p1 = scmp.ne.s32.totalorder %s4757_s13, %s4758_s7 }
 0x3ed   : > { %v10039_v1 = vadd.f32 %v3495_v27, %v3467_v24  ;;  %v10041_v62 = vadd.f32 %v3501_v33, %v3473_v3  ;;  %v10043_v25 = vadd.f32 %v3506_v52, %v3486_v42  ;;  %v3460_v6 = vmul.f32 %v11336_v17, %v11212_v54 }
 0x3ee   : > { %v10045_v50 = vadd.f32 %v3506_v52, %v3485_v22  ;;  %v3466_v45 = vmul.f32 %v11337_v55, %v11212_v54  ;;  %v11338_v56 = vmov %v11330_v14  ;;  %v3490_v23 = vmul.f32 %v3488_v9, %v9931_v11  ;;  %p4760_p4 = pnand %p4759_p1, %p4946_p5 }
 0x3ef   : > { %v3524_v47 = vmul.f32 %v10043_v25, %v10043_v25  ;;  %3522 = vst [vmem:[%s10049_s6 + $0x8] sm:$0xff] %v10043_v25  ;;  %v3472_v44 = vmul.f32 %v11338_v56, %v11212_v54  ;;  %v3462_v49 = vadd.f32 %v3460_v6, %v3438_v35  ;;  %v3496_v63 = vmul.f32 %v3494_v34, %v9931_v11 }
 0x3f0   : > { %v3523_v53 = vmul.f32 %v10045_v50, %v10045_v50  ;;  %3521 = vst [vmem:[%s10049_s6] sm:$0xff] %v10045_v50  ;;  %v3468_v2 = vadd.f32 %v3466_v45, %v3444_v40  ;;  %v3502_v19 = vmul.f32 %v3500_v37, %v9931_v11  ;;  %v3510_v39 = vstv %s4463_s16  ;;  %p4761_p8 = pneg %p4760_p4 }
 0x3f1   : > { %v3474_v58 = vadd.f32 %v3472_v44, %v3450_v13  ;;  %v3492_v61 = vadd.f32 %v3490_v23, %v3462_v49  ;;  %v3511_v7 = vadd.f32 %v3510_v39, %v10037_v29  ;;  %v3514_v42 = vstv %s4464_s11 }
 0x3f2   : > { %v3525_v46 = vadd.f32 %v3524_v47, %v3523_v53  ;;  %v3498_v18 = vadd.f32 %v3496_v63, %v3468_v2  ;;  %v10085_v29 = vadd.f32 %v3514_v42, %v10039_v1 }
 0x3f3   : > { %v10069_v38 = vadd.f32 %v3502_v19, %v3474_v58  ;;  %v3512_v28 = vadd.f32 %v3510_v39, %v3492_v61 }
 0x3f4   : > { %3526 = vadd.xlane.f32.xlu0 %v3525_v46 }
 0x467   : > { %v3527_v59 = vpop.xlane.xlu0 %3526 }
 0x468   : > { %v3528_v31 = vrot.slane %v3527_v59, 4 }
 0x46a   : > { %v3529_v26 = vadd.f32 %v3528_v31, %v3527_v59 }
 0x46c   : > { %v3530_v48 = vrot.slane %v3529_v26, 2 }
 0x46e   : > { %v3531_v43 = vadd.f32 %v3530_v48, %v3529_v26 }
 0x470   : > { %v3532_v32 = vrot.slane %v3531_v43, 1 }
 0x472   : > { %v3533_v54 = vadd.f32 %v3532_v32, %v3531_v43 }
 0x474   : > { %4480 = vpush %v3533_v54 }
 0x4a5   : > { %s4481_s17 = spop %4480 }
 0x4a6   : > { %v3535_v20 = vstv %s4481_s17  ;;  %s4762_s17 = scalar_lea.hbm %s11340_s0, 128 }
 0x4a7   : > { %4602 = vrsqrt.f32 %v3535_v20  ;;  %vm3543_vm6 = vcmp.eq.f32.partialorder %v3535_v20, inf  ;;  %v3546_v57 = vand.u32 2147483648, %v3535_v20  ;;  %vm3545_vm7 = vcmp.eq.f32.partialorder %v3535_v20, 0.0  ;;  %p4764_p11 = scmp.lt.s32.totalorder %s4762_s17, %s4758_s7 }
 0x4a9   : > { %p4765_p9 = por %p4764_p11, %p4763_p2 }
 0x4ab   : > { %p4766_p10 = pnand %p4765_p9, %p4761_p8 }
 0x4ad   : > { %v4603_v51 = vpop.eup %4602 }
 0x4ae   : > { %v3537_v36 = vmul.f32 %v4603_v51, %v3535_v20 }
 0x4b0   : > { %v3538_v60 = vmul.f32 %v4603_v51, %v3537_v36 }
 0x4b2   : > { %v3539_v4 = vmul.f32 0.5, %v3538_v60 }
 0x4b4   : > { %v3540_v11 = vsub.f32 1.5, %v3539_v4 }
 0x4b6   : > { %v3541_v9 = vmul.f32 %v4603_v51, %v3540_v11 }
 0x4b8   : > { %v3542_v34 = vmul.f32 %v3541_v9, %v3535_v20 }
 0x4ba   : > { %v3544_v8 = vsel %vm3543_vm6, %v3535_v20, %v3542_v34 }
 0x4bb   : > { %v3547_v14 = vsel %vm3545_vm7, %v3546_v57, %v3544_v8 }
 0x4bc   : > { %v3548_v12 = vadd.f32 1e-08, %v3547_v14 }
 0x4be   : > { %4604 = vrcp.f32 %v3548_v12  ;;  %v3560_v13 = vand.u32 2147483648, %v3548_v12  ;;  %v3558_v21 = vand.u32 2147483647, %v3548_v12  ;;  %vm3554_vm9 = vweird.f32 %v3548_v12 }
 0x4c0   : > { %v3561_v5 = vor.u32 1.1754944e-38, %v3560_v13  ;;  %vm3559_vm11 = vcmp.eq.f32.partialorder %v3558_v21, 8.507059e+37 }
 0x4c4   : > { %v4605_v10 = vpop.eup %4604 }
 0x4c5   : > { %v3550_v35 = vmul.f32 %v4605_v10, %v3548_v12  ;;  %vm3555_vm8 = vweird.f32 %v4605_v10 }
 0x4c6   : > { %vm3556_vm10 = vmor %vm3554_vm9, %vm3555_vm8 }
 0x4c7   : > { %v3551_v40 = vsub.f32 1.0, %v3550_v35 }
 0x4c9   : > { %v3552_v37 = vmul.f32 %v4605_v10, %v3551_v40 }
 0x4cb   : > { %v3553_v41 = vadd.f32 %v4605_v10, %v3552_v37 }
 0x4cd   : > { %v3557_v0 = vsel %vm3556_vm10, %v4605_v10, %v3553_v41 }
 0x4ce   : > { %v3562_v16 = vsel %vm3559_vm11, %v3561_v5, %v3557_v0 }
 0x4cf   : > { %v10073_v24 = vmul.f32 %v3562_v16, %v10045_v50  ;;  %v10076_v3 = vmul.f32 %v3562_v16, %v10043_v25  ;;  %v10087_v25 = vadd.f32 %v3514_v42, %v3498_v18 }
 0x4d1   : > { %v3579_v30 = vmul.f32 %v10073_v24, %v3511_v7  ;;  %v3580_v15 = vmul.f32 %v10076_v3, %v3512_v28  ;;  %v3565_v27 = vmul.f32 %v10073_v24, %v10073_v24  ;;  %v3566_v33 = vmul.f32 %v10076_v3, %v10076_v3 }
 0x4d2   : > { %v3670_v50 = vmul.f32 %v10073_v24, %v10085_v29  ;;  %v3671_v47 = vmul.f32 %v10076_v3, %v10087_v25 }
 0x4d3   : > { %v3581_v52 = vadd.f32 %v3580_v15, %v3579_v30  ;;  %v3567_v22 = vadd.f32 %v3566_v33, %v3565_v27 }
 0x4d4   : > { %v3672_v53 = vadd.f32 %v3671_v47, %v3670_v50 }
 0x4d5   : > { %3582 = vadd.xlane.f32.xlu2 %v3581_v52  ;;  %3568 = vadd.xlane.f32.xlu1 %v3567_v22 }
 0x4dd   : > { %3673 = vadd.xlane.f32.xlu1 %v3672_v53 }
 0x548   : > { %v3583_v46 = vpop.xlane.xlu2 %3582  ;;  %v3569_v17 = vpop.xlane.xlu1 %3568 }
 0x549   : > { %v3584_v6 = vrot.slane %v3583_v46, 4  ;;  %v3570_v55 = vrot.slane %v3569_v17, 4 }
 0x54b   : > { %v3585_v45 = vadd.f32 %v3584_v6, %v3583_v46  ;;  %v3571_v56 = vadd.f32 %v3570_v55, %v3569_v17 }
 0x54d   : > { %v3586_v44 = vrot.slane %v3585_v45, 2  ;;  %v3572_v49 = vrot.slane %v3571_v56, 2 }
 0x54f   : > { %v3573_v1 = vadd.f32 %v3572_v49, %v3571_v56  ;;  %v3587_v2 = vadd.f32 %v3586_v44, %v3585_v45 }
 0x551   : > { %v3574_v58 = vrot.slane %v3573_v1, 1  ;;  %v3588_v23 = vrot.slane %v3587_v2, 1 }
 0x553   : > { %v3575_v63 = vadd.f32 %v3574_v58, %v3573_v1  ;;  %v3589_v19 = vadd.f32 %v3588_v23, %v3587_v2  ;;  %v3674_v23 = vpop.xlane.xlu1 %3673 }
 0x555   : > { %4482 = vpush %v3575_v63  ;;  %v3675_v63 = vrot.slane %v3674_v23, 4 }
 0x556   : > { %4484 = vpush %v3589_v19 }
 0x557   : > { %v3676_v19 = vadd.f32 %v3675_v63, %v3674_v23 }
 0x586   : > { %s4483_s23 = spop %4482 }
 0x587   : > { %v3577_v61 = vstv %s4483_s23  ;;  %s4485_s24 = spop %4484 }
 0x588   : > { %v3578_v18 = vadd.f32 1e-08, %v3577_v61  ;;  %v3591_v36 = vstv %s4485_s24  ;;  %v3677_v61 = vrot.slane %v3676_v19, 2 }
 0x58a   : > { %4606 = vrcp.f32 %v3578_v18  ;;  %v3603_v48 = vand.u32 2147483648, %v3578_v18  ;;  %v3601_v32 = vand.u32 2147483647, %v3578_v18  ;;  %vm3597_vm13 = vweird.f32 %v3578_v18 }
 0x58c   : > { %v3604_v20 = vor.u32 1.1754944e-38, %v3603_v48  ;;  %vm3602_vm15 = vcmp.eq.f32.partialorder %v3601_v32, 8.507059e+37 }
 0x590   : > { %v4607_v59 = vpop.eup %4606 }
 0x591   : > { %v3593_v31 = vmul.f32 %v4607_v59, %v3578_v18  ;;  %vm3598_vm12 = vweird.f32 %v4607_v59 }
 0x592   : > { %vm3599_vm14 = vmor %vm3597_vm13, %vm3598_vm12 }
 0x593   : > { %v3594_v26 = vsub.f32 1.0, %v3593_v31 }
 0x595   : > { %v3595_v43 = vmul.f32 %v4607_v59, %v3594_v26  ;;  %v3678_v26 = vadd.f32 %v3677_v61, %v3676_v19 }
 0x597   : > { %v3596_v54 = vadd.f32 %v4607_v59, %v3595_v43  ;;  %v3679_v32 = vrot.slane %v3678_v26, 1 }
 0x599   : > { %v3600_v51 = vsel %vm3599_vm14, %v4607_v59, %v3596_v54 }
 0x59a   : > { %v10093_v60 = vsel %vm3602_vm15, %v3604_v20, %v3600_v51  ;;  %v3680_v51 = vadd.f32 %v3679_v32, %v3678_v26 }
 0x59b   : > { %v3606_v4 = vmul.f32 %v10093_v60, %v3591_v36 }
 0x59d   : > { %v3607_v11 = vmul.f32 %v3606_v4, %v10073_v24  ;;  %v3608_v9 = vmul.f32 %v3606_v4, %v10076_v3 }
 0x59f   : > { %v3609_v34 = vsub.f32 %v3511_v7, %v3607_v11  ;;  %v3610_v57 = vsub.f32 %v3512_v28, %v3608_v9 }
 0x5a1   : > { %4466 = vst [vmem:[%s10049_s6 + $0x10] sm:$0xff] %v3609_v34  ;;  %v3614_v8 = vmul.f32 %v3609_v34, %v3609_v34  ;;  %v3615_v14 = vmul.f32 %v3610_v57, %v3610_v57 }
 0x5a2   : > { %4467 = vst [vmem:[%s10049_s6 + $0x18] sm:$0xff] %v3610_v57 }
 0x5a3   : > { %v3616_v12 = vadd.f32 %v3615_v14, %v3614_v8 }
 0x5a5   : > { %3617 = vadd.xlane.f32.xlu2 %v3616_v12  ;;  %v3518_v12 = vstv %s4465_s2 }
 0x618   : > { %v3618_v10 = vpop.xlane.xlu2 %3617 }
 0x619   : > { %v3619_v35 = vrot.slane %v3618_v10, 4 }
 0x61b   : > { %v3620_v40 = vadd.f32 %v3619_v35, %v3618_v10  ;;  %v10116_v35 = vadd.f32 %v3518_v12, %v10041_v62 }
 0x61d   : > { %v3621_v13 = vrot.slane %v3620_v40, 2 }
 0x61f   : > { %v3622_v37 = vadd.f32 %v3621_v13, %v3620_v40  ;;  %v10119_v40 = vadd.f32 %v3518_v12, %v10069_v38  ;;  %v3779_v13 = vmul.f32 %v10073_v24, %v10116_v35 }
 0x621   : > { %v3623_v21 = vrot.slane %v3622_v37, 1 }
 0x623   : > { %v3624_v41 = vadd.f32 %v3623_v21, %v3622_v37 }
 0x625   : > { %4486 = vpush %v3624_v41 }
 0x656   : > { %s4487_s10 = spop %4486 }
 0x657   : > { %v3626_v5 = vstv %s4487_s10 }
 0x658   : > { %4608 = vrsqrt.f32 %v3626_v5  ;;  %vm3634_vm0 = vcmp.eq.f32.partialorder %v3626_v5, inf  ;;  %v3637_v27 = vand.u32 2147483648, %v3626_v5  ;;  %vm3636_vm1 = vcmp.eq.f32.partialorder %v3626_v5, 0.0 }
 0x65e   : > { %v4609_v39 = vpop.eup %4608 }
 0x65f   : > { %v3628_v0 = vmul.f32 %v4609_v39, %v3626_v5 }
 0x661   : > { %v3629_v16 = vmul.f32 %v4609_v39, %v3628_v0 }
 0x663   : > { %v3630_v7 = vmul.f32 0.5, %v3629_v16 }
 0x665   : > { %v3631_v28 = vsub.f32 1.5, %v3630_v7 }
 0x667   : > { %v3632_v30 = vmul.f32 %v4609_v39, %v3631_v28 }
 0x669   : > { %v3633_v15 = vmul.f32 %v3632_v30, %v3626_v5 }
 0x66b   : > { %v3635_v33 = vsel %vm3634_vm0, %v3626_v5, %v3633_v15 }
 0x66c   : > { %v3638_v42 = vsel %vm3636_vm1, %v3637_v27, %v3635_v33 }
 0x66d   : > { %v3639_v52 = vadd.f32 1e-08, %v3638_v42 }
 0x66f   : > { %4610 = vrcp.f32 %v3639_v52  ;;  %v3651_v53 = vand.u32 2147483648, %v3639_v52  ;;  %v3649_v17 = vand.u32 2147483647, %v3639_v52  ;;  %vm3645_vm3 = vweird.f32 %v3639_v52 }
 0x671   : > { %v3652_v55 = vor.u32 1.1754944e-38, %v3651_v53  ;;  %vm3650_vm5 = vcmp.eq.f32.partialorder %v3649_v17, 8.507059e+37 }
 0x675   : > { %v4611_v22 = vpop.eup %4610 }
 0x676   : > { %v3641_v50 = vmul.f32 %v4611_v22, %v3639_v52  ;;  %vm3646_vm2 = vweird.f32 %v4611_v22 }
 0x677   : > { %vm3647_vm4 = vmor %vm3645_vm3, %vm3646_vm2 }
 0x678   : > { %v3642_v47 = vsub.f32 1.0, %v3641_v50 }
 0x67a   : > { %v3643_v46 = vmul.f32 %v4611_v22, %v3642_v47 }
 0x67c   : > { %v3644_v6 = vadd.f32 %v4611_v22, %v3643_v46 }
 0x67e   : > { %v3648_v45 = vsel %vm3647_vm4, %v4611_v22, %v3644_v6 }
 0x67f   : > { %v3653_v56 = vsel %vm3650_vm5, %v3652_v55, %v3648_v45 }
 0x680   : > { %v10100_v44 = vmul.f32 %v3653_v56, %v3609_v34  ;;  %v10102_v49 = vmul.f32 %v3653_v56, %v3610_v57 }
 0x682   : > { %v3656_v1 = vmul.f32 %v10100_v44, %v10100_v44  ;;  %v3657_v2 = vmul.f32 %v10102_v49, %v10102_v49 }
 0x684   : > { %v3658_v58 = vadd.f32 %v3657_v2, %v3656_v1 }
 0x686   : > { %3659 = vadd.xlane.f32.xlu0 %v3658_v58 }
 0x6f9   : > { %v3660_v18 = vpop.xlane.xlu0 %3659 }
 0x6fa   : > { %v3661_v59 = vrot.slane %v3660_v18, 4 }
 0x6fc   : > { %v3662_v31 = vadd.f32 %v3661_v59, %v3660_v18 }
 0x6fe   : > { %v3663_v48 = vrot.slane %v3662_v31, 2 }
 0x700   : > { %v3664_v43 = vadd.f32 %v3663_v48, %v3662_v31 }
 0x702   : > { %v3665_v54 = vrot.slane %v3664_v43, 1 }
 0x704   : > { %v3666_v20 = vadd.f32 %v3665_v54, %v3664_v43 }
 0x706   : > { %4488 = vpush %v3666_v20 }
 0x707   : > { %4490 = vpush %v3680_v51 }
 0x737   : > { %s4489_s15 = spop %4488 }
 0x738   : > { %s4491_s1 = spop %4490  ;;  %v3668_v62 = vstv %s4489_s15 }
 0x739   : > { %v3682_v36 = vstv %s4491_s1  ;;  %v3669_v7 = vadd.f32 1e-08, %v3668_v62 }
 0x73a   : > { %v3683_v4 = vmul.f32 %v3682_v36, %v10093_v60 }
 0x73b   : > { %4612 = vrcp.f32 %v3669_v7  ;;  %v3712_v33 = vand.u32 2147483648, %v3669_v7  ;;  %vm3706_vm7 = vweird.f32 %v3669_v7  ;;  %v3710_v42 = vand.u32 2147483647, %v3669_v7 }
 0x73c   : > { %v3684_v11 = vmul.f32 %v3683_v4, %v10073_v24  ;;  %v3685_v9 = vmul.f32 %v3683_v4, %v10076_v3 }
 0x73d   : > { %v3713_v22 = vor.u32 1.1754944e-38, %v3712_v33  ;;  %vm3711_vm9 = vcmp.eq.f32.partialorder %v3710_v42, 8.507059e+37 }
 0x73e   : > { %v3686_v34 = vsub.f32 %v10085_v29, %v3684_v11  ;;  %v3687_v57 = vsub.f32 %v10087_v25, %v3685_v9  ;;  %v3780_v29 = vmul.f32 %v10076_v3, %v10119_v40 }
 0x740   : > { %v3688_v8 = vmul.f32 %v3686_v34, %v10100_v44  ;;  %v3689_v14 = vmul.f32 %v3687_v57, %v10102_v49  ;;  %v3781_v25 = vadd.f32 %v3780_v29, %v3779_v13 }
 0x741   : > { %v4613_v38 = vpop.eup %4612 }
 0x742   : > { %v3690_v10 = vadd.f32 %v3689_v14, %v3688_v8  ;;  %v3702_v28 = vmul.f32 %v4613_v38, %v3669_v7  ;;  %vm3707_vm6 = vweird.f32 %v4613_v38 }
 0x743   : > { %vm3708_vm8 = vmor %vm3706_vm7, %vm3707_vm6 }
 0x744   : > { %3691 = vadd.xlane.f32.xlu2 %v3690_v10  ;;  %v3703_v30 = vsub.f32 1.0, %v3702_v28 }
 0x746   : > { %v3704_v15 = vmul.f32 %v4613_v38, %v3703_v30 }
 0x748   : > { %v3705_v27 = vadd.f32 %v4613_v38, %v3704_v15 }
 0x74a   : > { %v3709_v52 = vsel %vm3708_vm8, %v4613_v38, %v3705_v27 }
 0x74b   : > { %v10125_v47 = vsel %vm3711_vm9, %v3713_v22, %v3709_v52 }
 0x74c   : > { %3782 = vadd.xlane.f32.xlu2 %v3781_v25 }
 0x7b7   : > { %v3692_v37 = vpop.xlane.xlu2 %3691 }
 0x7b8   : > { %v3693_v21 = vrot.slane %v3692_v37, 4 }
 0x7ba   : > { %v3694_v41 = vadd.f32 %v3693_v21, %v3692_v37 }
 0x7bc   : > { %v3695_v5 = vrot.slane %v3694_v41, 2 }
 0x7be   : > { %v3696_v39 = vadd.f32 %v3695_v5, %v3694_v41 }
 0x7c0   : > { %v3697_v0 = vrot.slane %v3696_v39, 1 }
 0x7c2   : > { %v3698_v16 = vadd.f32 %v3697_v0, %v3696_v39  ;;  %v3783_v0 = vpop.xlane.xlu2 %3782 }
 0x7c4   : > { %4492 = vpush %v3698_v16  ;;  %v3784_v16 = vrot.slane %v3783_v0, 4 }
 0x7c6   : > { %v3785_v62 = vadd.f32 %v3784_v16, %v3783_v0 }
 0x7c8   : > { %v3786_v7 = vrot.slane %v3785_v62, 2 }
 0x7ca   : > { %v3787_v15 = vadd.f32 %v3786_v7, %v3785_v62 }
 0x7cc   : > { %v3788_v42 = vrot.slane %v3787_v15, 1 }
 0x7f5   : > { %s4493_s21 = spop %4492 }
 0x7f6   : > { %v3700_v50 = vstv %s4493_s21 }
 0x7f7   : > { %v3715_v53 = vmul.f32 %v10125_v47, %v3700_v50  ;;  %v3789_v50 = vadd.f32 %v3788_v42, %v3787_v15 }
 0x7f9   : > { %v3716_v46 = vmul.f32 %v3715_v53, %v10100_v44  ;;  %v3717_v17 = vmul.f32 %v3715_v53, %v10102_v49 }
 0x7fb   : > { %v3718_v6 = vsub.f32 %v3686_v34, %v3716_v46  ;;  %v3719_v55 = vsub.f32 %v3687_v57, %v3717_v17 }
 0x7fd   : > { %4468 = vst [vmem:[%s10049_s6 + $0x20] sm:$0xff] %v3718_v6  ;;  %v3723_v45 = vmul.f32 %v3718_v6, %v3718_v6  ;;  %v3724_v56 = vmul.f32 %v3719_v55, %v3719_v55 }
 0x7fe   : > { %4469 = vst [vmem:[%s10049_s6 + $0x28] sm:$0xff] %v3719_v55 }
 0x7ff   : > { %v3725_v1 = vadd.f32 %v3724_v56, %v3723_v45 }
 0x801   : > { %3726 = vadd.xlane.f32.xlu0 %v3725_v1 }
 0x874   : > { %v3727_v2 = vpop.xlane.xlu0 %3726 }
 0x875   : > { %v3728_v58 = vrot.slane %v3727_v2, 4 }
 0x877   : > { %v3729_v23 = vadd.f32 %v3728_v58, %v3727_v2 }
 0x879   : > { %v3730_v63 = vrot.slane %v3729_v23, 2 }
 0x87b   : > { %v3731_v19 = vadd.f32 %v3730_v63, %v3729_v23 }
 0x87d   : > { %v3732_v61 = vrot.slane %v3731_v19, 1 }
 0x87f   : > { %v3733_v18 = vadd.f32 %v3732_v61, %v3731_v19 }
 0x881   : > { %4494 = vpush %v3733_v18 }
 0x8b2   : > { %s4495_s19 = spop %4494 }
 0x8b3   : > { %v3735_v59 = vstv %s4495_s19 }
 0x8b4   : > { %4614 = vrsqrt.f32 %v3735_v59  ;;  %vm3743_vm10 = vcmp.eq.f32.partialorder %v3735_v59, inf  ;;  %v3746_v51 = vand.u32 2147483648, %v3735_v59  ;;  %vm3745_vm11 = vcmp.eq.f32.partialorder %v3735_v59, 0.0 }
 0x8ba   : > { %v4615_v31 = vpop.eup %4614 }
 0x8bb   : > { %v3737_v26 = vmul.f32 %v4615_v31, %v3735_v59 }
 0x8bd   : > { %v3738_v48 = vmul.f32 %v4615_v31, %v3737_v26 }
 0x8bf   : > { %v3739_v43 = vmul.f32 0.5, %v3738_v48 }
 0x8c1   : > { %v3740_v32 = vsub.f32 1.5, %v3739_v43 }
 0x8c3   : > { %v3741_v54 = vmul.f32 %v4615_v31, %v3740_v32 }
 0x8c5   : > { %v3742_v20 = vmul.f32 %v3741_v54, %v3735_v59 }
 0x8c7   : > { %v3744_v36 = vsel %vm3743_vm10, %v3735_v59, %v3742_v20 }
 0x8c8   : > { %v3747_v4 = vsel %vm3745_vm11, %v3746_v51, %v3744_v36 }
 0x8c9   : > { %v3748_v11 = vadd.f32 1e-08, %v3747_v4 }
 0x8cb   : > { %4616 = vrcp.f32 %v3748_v11  ;;  %v3760_v8 = vand.u32 2147483648, %v3748_v11  ;;  %v3758_v12 = vand.u32 2147483647, %v3748_v11  ;;  %vm3754_vm13 = vweird.f32 %v3748_v11 }
 0x8cd   : > { %v3761_v13 = vor.u32 1.1754944e-38, %v3760_v8  ;;  %vm3759_vm15 = vcmp.eq.f32.partialorder %v3758_v12, 8.507059e+37 }
 0x8d1   : > { %v4617_v9 = vpop.eup %4616 }
 0x8d2   : > { %v3750_v34 = vmul.f32 %v4617_v9, %v3748_v11  ;;  %vm3755_vm12 = vweird.f32 %v4617_v9 }
 0x8d3   : > { %vm3756_vm14 = vmor %vm3754_vm13, %vm3755_vm12 }
 0x8d4   : > { %v3751_v57 = vsub.f32 1.0, %v3750_v34 }
 0x8d6   : > { %v3752_v14 = vmul.f32 %v4617_v9, %v3751_v57 }
 0x8d8   : > { %v3753_v10 = vadd.f32 %v4617_v9, %v3752_v14 }
 0x8da   : > { %v3757_v29 = vsel %vm3756_vm14, %v4617_v9, %v3753_v10 }
 0x8db   : > { %v3762_v25 = vsel %vm3759_vm15, %v3761_v13, %v3757_v29 }
 0x8dc   : > { %v10132_v37 = vmul.f32 %v3762_v25, %v3718_v6  ;;  %v10134_v21 = vmul.f32 %v3762_v25, %v3719_v55 }
 0x8de   : > { %v3765_v41 = vmul.f32 %v10132_v37, %v10132_v37  ;;  %v3766_v5 = vmul.f32 %v10134_v21, %v10134_v21 }
 0x8e0   : > { %v3767_v39 = vadd.f32 %v3766_v5, %v3765_v41 }
 0x8e2   : > { %3768 = vadd.xlane.f32.xlu1 %v3767_v39 }
 0x955   : > { %v3769_v38 = vpop.xlane.xlu1 %3768 }
 0x956   : > { %v3770_v28 = vrot.slane %v3769_v38, 4 }
 0x958   : > { %v3771_v30 = vadd.f32 %v3770_v28, %v3769_v38 }
 0x95a   : > { %v3772_v27 = vrot.slane %v3771_v30, 2 }
 0x95c   : > { %v3773_v33 = vadd.f32 %v3772_v27, %v3771_v30 }
 0x95e   : > { %v3774_v52 = vrot.slane %v3773_v33, 1 }
 0x960   : > { %v3775_v22 = vadd.f32 %v3774_v52, %v3773_v33 }
 0x962   : > { %4496 = vpush %v3775_v22 }
 0x963   : > { %4498 = vpush %v3789_v50 }
 0x993   : > { %s10140_s8 = spop %4496 }
 0x994   : > { %s4499_s12 = spop %4498 }
 0x995   : > { %v3791_v53 = vstv %s4499_s12 }
 0x996   : > { %v3792_v46 = vmul.f32 %v3791_v53, %v10093_v60 }
 0x998   : > { %v3793_v17 = vmul.f32 %v3792_v46, %v10073_v24  ;;  %v3794_v6 = vmul.f32 %v3792_v46, %v10076_v3 }
 0x99a   : > { %v3795_v55 = vsub.f32 %v10116_v35, %v3793_v17  ;;  %v3796_v45 = vsub.f32 %v10119_v40, %v3794_v6 }
 0x99c   : > { %v3797_v56 = vmul.f32 %v3795_v55, %v10100_v44  ;;  %v3798_v1 = vmul.f32 %v3796_v45, %v10102_v49 }
 0x99e   : > { %v3799_v2 = vadd.f32 %v3798_v1, %v3797_v56 }
 0x9a0   : > { %3800 = vadd.xlane.f32.xlu0 %v3799_v2 }
 0xa13   : > { %v3801_v58 = vpop.xlane.xlu0 %3800 }
 0xa14   : > { %v3802_v23 = vrot.slane %v3801_v58, 4 }
 0xa16   : > { %v3803_v63 = vadd.f32 %v3802_v23, %v3801_v58 }
 0xa18   : > { %v3804_v19 = vrot.slane %v3803_v63, 2 }
 0xa1a   : > { %v3805_v61 = vadd.f32 %v3804_v19, %v3803_v63 }
 0xa1c   : > { %v3806_v60 = vrot.slane %v3805_v61, 1 }
 0xa1e   : > { %v3807_v18 = vadd.f32 %v3806_v60, %v3805_v61 }
 0xa20   : > { %4500 = vpush %v3807_v18 }
 0xa51   : > { %s4501_s25 = spop %4500 }
 0xa52   : > { %v3809_v24 = vstv %s4501_s25 }
 0xa53   : > { %v3810_v3 = vmul.f32 %v3809_v24, %v10125_v47 }
 0xa55   : > { %v3811_v35 = vmul.f32 %v3810_v3, %v10100_v44  ;;  %v3812_v40 = vmul.f32 %v3810_v3, %v10102_v49  ;;  %v3777_v44 = vstv %s10140_s8 }
 0xa56   : > { %v3778_v11 = vadd.f32 1e-08, %v3777_v44 }
 0xa57   : > { %v3813_v59 = vsub.f32 %v3795_v55, %v3811_v35  ;;  %v3814_v31 = vsub.f32 %v3796_v45, %v3812_v40 }
 0xa58   : > { %4618 = vrcp.f32 %v3778_v11  ;;  %v3839_v14 = vand.u32 2147483648, %v3778_v11  ;;  %vm3833_vm1 = vweird.f32 %v3778_v11  ;;  %v3837_v12 = vand.u32 2147483647, %v3778_v11 }
 0xa59   : > { %v3815_v26 = vmul.f32 %v3813_v59, %v10132_v37  ;;  %v3816_v48 = vmul.f32 %v3814_v31, %v10134_v21 }
 0xa5a   : > { %v3840_v13 = vor.u32 1.1754944e-38, %v3839_v14  ;;  %vm3838_vm3 = vcmp.eq.f32.partialorder %v3837_v12, 8.507059e+37 }
 0xa5b   : > { %v3817_v43 = vadd.f32 %v3816_v48, %v3815_v26 }
 0xa5d   : > { %3818 = vadd.xlane.f32.xlu1 %v3817_v43 }
 0xa5e   : > { %v4619_v49 = vpop.eup %4618 }
 0xa5f   : > { %v3829_v9 = vmul.f32 %v4619_v49, %v3778_v11  ;;  %vm3834_vm0 = vweird.f32 %v4619_v49 }
 0xa60   : > { %vm3835_vm2 = vmor %vm3833_vm1, %vm3834_vm0 }
 0xa61   : > { %v3830_v34 = vsub.f32 1.0, %v3829_v9 }
 0xa63   : > { %v3831_v57 = vmul.f32 %v4619_v49, %v3830_v34 }
 0xa65   : > { %v3832_v8 = vadd.f32 %v4619_v49, %v3831_v57 }
 0xa67   : > { %v3836_v10 = vsel %vm3835_vm2, %v4619_v49, %v3832_v8 }
 0xa68   : > { %v3841_v25 = vsel %vm3838_vm3, %v3840_v13, %v3836_v10 }
 0xad0   : > { %v3819_v32 = vpop.xlane.xlu1 %3818 }
 0xad1   : > { %v3820_v54 = vrot.slane %v3819_v32, 4 }
 0xad3   : > { %v3821_v20 = vadd.f32 %v3820_v54, %v3819_v32 }
 0xad5   : > { %v3822_v51 = vrot.slane %v3821_v20, 2 }
 0xad7   : > { %v3823_v36 = vadd.f32 %v3822_v51, %v3821_v20 }
 0xad9   : > { %v3824_v4 = vrot.slane %v3823_v36, 1 }
 0xadb   : > { %v3825_v47 = vadd.f32 %v3824_v4, %v3823_v36 }
 0xadd   : > { %4502 = vpush %v3825_v47 }
 0xb0e   : > { %s4503_s22 = spop %4502 }
 0xb0f   : > { %v3827_v29 = vstv %s4503_s22 }
 0xb10   : > { %v3842_v41 = vmul.f32 %v3841_v25, %v3827_v29 }
 0xb12   : > { %v3843_v5 = vmul.f32 %v3842_v41, %v10132_v37  ;;  %v3844_v39 = vmul.f32 %v3842_v41, %v10134_v21 }
 0xb14   : > { %v3845_v0 = vsub.f32 %v3813_v59, %v3843_v5  ;;  %v3846_v16 = vsub.f32 %v3814_v31, %v3844_v39 }
 0xb16   : > { %4470 = vst [vmem:[%s10049_s6 + $0x30] sm:$0xff] %v3845_v0 }
 0xb17   : > { %4471 = vst [vmem:[%s10049_s6 + $0x38] sm:$0xff] %v3846_v16 }
 0xb18   : > { %4769 = shalt.err (!%p4766_p10)
}
 0xb19   : > { %s4834_s18 = smov 128   ;;  %s4835_s6 = smov 8  }
 0xb1a   : > { %4524 = dma.vmem_to_hbm [thread:$0]  (%p4946_p5), %s3864_s14, 1024, %s3866_s30, %s3851_s9, %s4834_s18, %s4834_s18, %s4835_s6  }
 0xb1b PF: > { %s11342_s23 = sld [smem:[#allocation21_spill]] }
 0xb1c   : > { %s11344_s10 = sld [smem:[#allocation24_spill]] }
 0xb21   : > { %s3880_s15 = sand.u32 1, %s11342_s23  }
 0xb22   : > { %p11345_p12 = scmp.ge.s32.totalorder %s11344_s10, 2  ;;  %s3881_s1 = scalar_lea.sflag [#allocation4], %s3880_s15 }
 0xb24   : > { %p4547_p13 = pnand %p11345_p12, %p4906_p6 }
 0xb26   : > { %p4548_p0 = pneg %p4547_p13 }
 0xb28   : > { %4807 = dma.done.wait (%p4548_p0), %s3881_s1, 1024  }
 0xb29   : > { %4809 = vsyncadd (%p4548_p0), %s3881_s1, 4294966272  ;;  %s11346_s24 = sld [smem:[#allocation27_spill]] }
 0xb2a   : > { %s11347_s21 = sld [smem:[#allocation22_spill]] }
 0xb2b   : > { %s11348_s22 = sld [smem:[#allocation23_spill]] }
 0xb2c   : > { %s11349_s23 = sld [smem:[#allocation28_spill]] }
 0xb2f   : > { %p25_p3 = scmp.ge.s32.totalorder %s11346_s24, 4  }
 0xb31   :  { %27 = sbr.rel (!%p25_p3) target bundleno = 18 (0x12), region = 123 }
 0xb36   :  { %3887 = vsyncpa [#allocation3], 1 }
 0xb37   :  { %3889 = vsyncpa [#allocation3 + $0x1], 1 }
 0xb38   :  { %3890 = vsyncpa [#allocation13], 1 }
 0xb39   :  { %3892 = vsyncpa [#allocation13 + $0x1], 1 }
 0xb3a   :  { %3893 = vsyncpa [#allocation4], 1 }
 0xb3b   :  { %3895 = vsyncpa [#allocation4 + $0x1], 1 }
 0xb3c   :  { %3896 = vsyncpa [#allocation5], 1 }
 0xb3d   :  { %3898 = vsyncpa [#allocation5 + $0x1], 1 }
 0xb3e   :  { %3899 = vsyncpa [#allocation8], 1 }
 0xb3f   :  { %3900 = vsyncpa [#allocation6], 1 }
 0xb40   :  { %3902 = vsyncpa [#allocation6 + $0x1], 1 }

</bundles_post_ra>
